<compile_context>
chip_gen: v7x
topology: tpu7x:2x2x1
jax: 0.10.0
libtpu: 0.0.40
codegen_flags: <defaults>
</compile_context>

<pallas_src>
import functools

import jax
import jax.numpy as jnp
from jax.experimental import pallas as pl
from jax.experimental.pallas import tpu as pltpu


# ---------------------------------------------------------------------------
# Fused BasicBlock kernel (one grid step == one batch element, whole image)
# ---------------------------------------------------------------------------

def basic_block_kernel(*refs, H, W, Cin, Cmid, Cout, downsample):
    if downsample:
        (xp_ref, w1_ref, s1_ref, b1_ref, w2_ref, s2_ref, b2_ref,
         wd_ref, sd_ref, bd_ref,
         out_ref, taps1_ref, taps2_ref, mid_ref) = refs
    else:
        (xp_ref, w1_ref, s1_ref, b1_ref, w2_ref, s2_ref, b2_ref,
         out_ref, taps1_ref, taps2_ref, mid_ref) = refs
        wd_ref = sd_ref = bd_ref = None

    HW = H * W

    # ---- conv1: gather the 9 shifted views of the zero-padded input into one
    #      (HW, 9*Cin) operand held in VMEM scratch (no im2col in HBM).
    for k in range(9):
        dy, dx = divmod(k, 3)
        taps1_ref[:, k * Cin:(k + 1) * Cin] = (
            xp_ref[0, dy:dy + H, dx:dx + W, :].reshape(HW, Cin))

    y1 = jnp.dot(taps1_ref[...], w1_ref[...],
                 preferred_element_type=jnp.float32)          # single deep MXU matmul
    y1 = jnp.maximum(y1 * s1_ref[...] + b1_ref[...], 0.0)     # folded BN1 + ReLU

    # ---- keep conv1 output on-chip: padded (zero halo) VMEM scratch for conv2.
    mid_ref[...] = jnp.zeros_like(mid_ref)
    mid_ref[1:H + 1, 1:W + 1, :] = y1.reshape(H, W, Cmid).astype(mid_ref.dtype)

    # ---- conv2 taps straight from the VMEM-resident conv1 output.
    for k in range(9):
        dy, dx = divmod(k, 3)
        taps2_ref[:, k * Cmid:(k + 1) * Cmid] = (
            mid_ref[dy:dy + H, dx:dx + W, :].reshape(HW, Cmid))

    y2 = jnp.dot(taps2_ref[...], w2_ref[...],
                 preferred_element_type=jnp.float32)
    y2 = y2 * s2_ref[...] + b2_ref[...]                        # folded BN2 (ReLU later)

    # ---- residual: identity (interior of the padded input) or 1x1 conv + BN.
    res = xp_ref[0, 1:H + 1, 1:W + 1, :].reshape(HW, Cin)
    if downsample:
        res = jnp.dot(res, wd_ref[...], preferred_element_type=jnp.float32)
        res = res * sd_ref[...] + bd_ref[...]
    else:
        res = res.astype(jnp.float32)

    # NOTE: cout < 128 keeps this store lane-masked; at realistic channel widths the
    # output slab becomes lane-dense automatically.
    out_ref[0] = jnp.maximum(y2 + res, 0.0).astype(out_ref.dtype)


# ---------------------------------------------------------------------------
# Wrapper
# ---------------------------------------------------------------------------

def basic_block(x_nhwc, p, *, downsample=False):
    """BasicBlock forward. x_nhwc: (N,H,W,Cin) f32. Returns (N,H,W,Cout) f32."""
    n, h, w, cin = x_nhwc.shape
    cmid = p["w1"].shape[-1]
    cout = p["w2"].shape[-1]
    if not downsample:
        assert cin == cout, "identity residual requires Cin == Cout"
    hw = h * w
    hp, wp = h + 2, w + 2

    cdt = jnp.bfloat16  # MXU input dtype; accumulation stays f32 in-kernel.
    xp = jnp.pad(x_nhwc.astype(cdt), ((0, 0), (1, 1), (1, 1), (0, 0)))
    # Weights: HWIO (3,3,Cin,Cout) flattened row-major -> (9*Cin, Cout), tap-major,
    # matching the in-kernel tap concatenation order (k = dy*3 + dx).
    w1 = p["w1"].astype(cdt).reshape(9 * cin, cmid)
    w2 = p["w2"].astype(cdt).reshape(9 * cmid, cout)
    s1 = p["s1"].reshape(1, cmid)
    b1 = p["b1"].reshape(1, cmid)
    s2 = p["s2"].reshape(1, cout)
    b2 = p["b2"].reshape(1, cout)

    args = [xp, w1, s1, b1, w2, s2, b2]
    in_specs = [
        pl.BlockSpec((1, hp, wp, cin), lambda b: (b, 0, 0, 0)),
        pl.BlockSpec((9 * cin, cmid), lambda b: (0, 0)),
        pl.BlockSpec((1, cmid), lambda b: (0, 0)),
        pl.BlockSpec((1, cmid), lambda b: (0, 0)),
        pl.BlockSpec((9 * cmid, cout), lambda b: (0, 0)),
        pl.BlockSpec((1, cout), lambda b: (0, 0)),
        pl.BlockSpec((1, cout), lambda b: (0, 0)),
    ]
    if downsample:
        args += [p["wd"].astype(cdt),
                 p["sd"].reshape(1, cout),
                 p["bd"].reshape(1, cout)]
        in_specs += [
            pl.BlockSpec((cin, cout), lambda b: (0, 0)),
            pl.BlockSpec((1, cout), lambda b: (0, 0)),
            pl.BlockSpec((1, cout), lambda b: (0, 0)),
        ]

    kern = functools.partial(basic_block_kernel, H=h, W=w, Cin=cin, Cmid=cmid,
                             Cout=cout, downsample=downsample)

    out = pl.pallas_call(
        kern,
        out_shape=jax.ShapeDtypeStruct((n, hw, cout), jnp.float32),
        grid=(n,),
        in_specs=in_specs,
        out_specs=pl.BlockSpec((1, hw, cout), lambda b: (b, 0, 0)),
        scratch_shapes=[
            pltpu.VMEM((hw, 9 * cin), cdt),    # conv1 deep-contraction taps
            pltpu.VMEM((hw, 9 * cmid), cdt),   # conv2 deep-contraction taps
            pltpu.VMEM((hp, wp, cmid), cdt),   # padded conv1 output (stays on-chip)
        ],
        compiler_params=pltpu.CompilerParams(
            dimension_semantics=("parallel",)),
    )(*args)
    return out.reshape(n, h, w, cout)


# ---------------------------------------------------------------------------
# Parameters (inference-mode BN folded into scale/bias)
# ---------------------------------------------------------------------------

def _init_conv_bn(key, cin, cout, ksize):
    k1, k2, k3, k4, k5 = jax.random.split(key, 5)
    fan_in = ksize * ksize * cin
    w = jax.random.normal(k1, (ksize, ksize, cin, cout), jnp.float32) / jnp.sqrt(fan_in)
    gamma = 1.0 + 0.1 * jax.random.normal(k2, (cout,), jnp.float32)
    beta = 0.1 * jax.random.normal(k3, (cout,), jnp.float32)
    mean = 0.1 * jax.random.normal(k4, (cout,), jnp.float32)
    var = 1.0 + 0.1 * jnp.abs(jax.random.normal(k5, (cout,), jnp.float32))
    eps = 1e-5
    scale = gamma / jnp.sqrt(var + eps)
    bias = beta - mean * scale
    return w, scale, bias


def init_basic_block(key, cin, cout, downsample=False):
    k1, k2, k3 = jax.random.split(key, 3)
    w1, s1, b1 = _init_conv_bn(k1, cin, cout, 3)
    w2, s2, b2 = _init_conv_bn(k2, cout, cout, 3)
    p = {"w1": w1, "s1": s1, "b1": b1, "w2": w2, "s2": s2, "b2": b2}
    if downsample:
        wd, sd, bd = _init_conv_bn(k3, cin, cout, 1)
        p.update({"wd": wd.reshape(cin, cout), "sd": sd, "bd": bd})
    return p


# ---------------------------------------------------------------------------
# Pure-JAX reference (mirrors kernel dtypes: bf16 operands, f32 accumulation)
# ---------------------------------------------------------------------------

def _conv3x3_bn_ref(x_bf16, w_hwio, scale, bias, relu):
    y = jax.lax.conv_general_dilated(
        x_bf16, w_hwio.astype(x_bf16.dtype), (1, 1), ((1, 1), (1, 1)),
        dimension_numbers=("NHWC", "HWIO", "NHWC"),
        preferred_element_type=jnp.float32)
    y = y * scale + bias
    return jnp.maximum(y, 0.0) if relu else y


def ref_basic_block(x_nhwc, p, *, downsample=False):
    xb = x_nhwc.astype(jnp.bfloat16)
    y1 = _conv3x3_bn_ref(xb, p["w1"], p["s1"], p["b1"], relu=True)
    y2 = _conv3x3_bn_ref(y1.astype(jnp.bfloat16), p["w2"], p["s2"], p["b2"], relu=False)
    if downsample:
        cin, cout = p["wd"].shape
        res = jax.lax.conv_general_dilated(
            xb, p["wd"].astype(jnp.bfloat16).reshape(1, 1, cin, cout), (1, 1), "VALID",
            dimension_numbers=("NHWC", "HWIO", "NHWC"),
            preferred_element_type=jnp.float32)
        res = res * p["sd"] + p["bd"]
    else:
        res = xb.astype(jnp.float32)
    return jnp.maximum(y2 + res, 0.0)


# ---------------------------------------------------------------------------
# Main
# ---------------------------------------------------------------------------

if __name__ == "__main__":
    key = jax.random.PRNGKey(0)
    kx, kp, kx2, kp2 = jax.random.split(key, 4)

    # Identity-residual BasicBlock (module defaults: stride=1, downsample=False).
    N, Cin, Cout, H, W = 2, 32, 32, 16, 16
    x_nchw = jax.random.normal(kx, (N, Cin, H, W), jnp.float32)   # PyTorch NCHW input
    x_nhwc = jnp.transpose(x_nchw, (0, 2, 3, 1))

    params = init_basic_block(kp, Cin, Cout, downsample=False)
    out = basic_block(x_nhwc, params, downsample=False)
    jax.block_until_ready(out)
    assert out.shape == (N, H, W, Cout)
    ref = ref_basic_block(x_nhwc, params, downsample=False)
    err = float(jnp.max(jnp.abs(out - ref)))
    assert err < 3e-2, f"identity-residual mismatch: max_err={err}"

    # Downsample variant (1x1 conv + BN residual, Cin != Cout).
    Cin2, Cout2 = 16, 32
    x2_nhwc = jax.random.normal(kx2, (N, H, W, Cin2), jnp.float32)
    params2 = init_basic_block(kp2, Cin2, Cout2, downsample=True)
    out2 = basic_block(x2_nhwc, params2, downsample=True)
    jax.block_until_ready(out2)
    assert out2.shape == (N, H, W, Cout2)
    ref2 = ref_basic_block(x2_nhwc, params2, downsample=True)
    err2 = float(jnp.max(jnp.abs(out2 - ref2)))
    assert err2 < 3e-2, f"downsample-residual mismatch: max_err={err2}"

    # Back to NCHW to match the PyTorch output convention.
    out_nchw = jnp.transpose(out, (0, 3, 1, 2))
    jax.block_until_ready(out_nchw)
    print("KERNEL_OK")
</pallas_src>

<mosaic_0001>
module attributes {stable_mosaic.version = 11 : i64} {
  func.func @basic_block_kernel(%arg0: i32, %arg1: memref<1x18x18x32xbf16, #tpu.memory_space<vmem>>, %arg2: memref<288x32xbf16, #tpu.memory_space<vmem>>, %arg3: memref<1x32xf32, #tpu.memory_space<vmem>>, %arg4: memref<1x32xf32, #tpu.memory_space<vmem>>, %arg5: memref<288x32xbf16, #tpu.memory_space<vmem>>, %arg6: memref<1x32xf32, #tpu.memory_space<vmem>>, %arg7: memref<1x32xf32, #tpu.memory_space<vmem>>, %arg8: memref<1x256x32xf32, #tpu.memory_space<vmem>>, %arg9: memref<256x288xbf16, #tpu.memory_space<vmem>>, %arg10: memref<256x288xbf16, #tpu.memory_space<vmem>>, %arg11: memref<18x18x32xbf16, #tpu.memory_space<vmem>>) attributes {dimension_semantics = [#tpu.dimension_semantics<parallel>], iteration_bounds = array<i64: 2>, scalar_prefetch = 0 : i64, scratch_operands = 3 : i64, tpu.core_type = #tpu.core_type<tc>, window_params = [{transform_indices = @transform_0, window_bounds = array<i64: 1, 18, 18, 32>}, {pipeline_mode = #tpu.pipeline_mode<synchronous>, transform_indices = @transform_1, window_bounds = array<i64: 288, 32>}, {pipeline_mode = #tpu.pipeline_mode<synchronous>, transform_indices = @transform_2, window_bounds = array<i64: 1, 32>}, {pipeline_mode = #tpu.pipeline_mode<synchronous>, transform_indices = @transform_3, window_bounds = array<i64: 1, 32>}, {pipeline_mode = #tpu.pipeline_mode<synchronous>, transform_indices = @transform_4, window_bounds = array<i64: 288, 32>}, {pipeline_mode = #tpu.pipeline_mode<synchronous>, transform_indices = @transform_5, window_bounds = array<i64: 1, 32>}, {pipeline_mode = #tpu.pipeline_mode<synchronous>, transform_indices = @transform_6, window_bounds = array<i64: 1, 32>}, {transform_indices = @transform_7, window_bounds = array<i64: 1, 256, 32>}]} {
    %c0 = arith.constant 0 : index
    %c0_0 = arith.constant 0 : index
    %c0_1 = arith.constant 0 : index
    %c0_2 = arith.constant 0 : index
    %0 = vector.load %arg1[%c0, %c0_0, %c0_1, %c0_2] : memref<1x18x18x32xbf16, #tpu.memory_space<vmem>>, vector<1x16x16x32xbf16>
    %1 = vector.shape_cast %0 : vector<1x16x16x32xbf16> to vector<16x16x32xbf16>
    %2 = vector.shape_cast %1 : vector<16x16x32xbf16> to vector<256x32xbf16>
    %c0_3 = arith.constant 0 : index
    %c0_4 = arith.constant 0 : index
    %3 = vector.load %arg9[%c0_3, %c0_4] : memref<256x288xbf16, #tpu.memory_space<vmem>>, vector<256x32xbf16>
    tpu.vector_store %arg9[%c0_3, %c0_4], %2 {strides = array<i32>} : memref<256x288xbf16, #tpu.memory_space<vmem>>, vector<256x32xbf16>,
    %c0_5 = arith.constant 0 : index
    %c0_6 = arith.constant 0 : index
    %c1 = arith.constant 1 : index
    %c0_7 = arith.constant 0 : index
    %4 = vector.load %arg1[%c0_5, %c0_6, %c1, %c0_7] : memref<1x18x18x32xbf16, #tpu.memory_space<vmem>>, vector<1x16x16x32xbf16>
    %5 = vector.shape_cast %4 : vector<1x16x16x32xbf16> to vector<16x16x32xbf16>
    %6 = vector.shape_cast %5 : vector<16x16x32xbf16> to vector<256x32xbf16>
    %c0_8 = arith.constant 0 : index
    %c32 = arith.constant 32 : index
    %7 = vector.load %arg9[%c0_8, %c32] : memref<256x288xbf16, #tpu.memory_space<vmem>>, vector<256x32xbf16>
    tpu.vector_store %arg9[%c0_8, %c32], %6 {strides = array<i32>} : memref<256x288xbf16, #tpu.memory_space<vmem>>, vector<256x32xbf16>,
    %c0_9 = arith.constant 0 : index
    %c0_10 = arith.constant 0 : index
    %c2 = arith.constant 2 : index
    %c0_11 = arith.constant 0 : index
    %8 = vector.load %arg1[%c0_9, %c0_10, %c2, %c0_11] : memref<1x18x18x32xbf16, #tpu.memory_space<vmem>>, vector<1x16x16x32xbf16>
    %9 = vector.shape_cast %8 : vector<1x16x16x32xbf16> to vector<16x16x32xbf16>
    %10 = vector.shape_cast %9 : vector<16x16x32xbf16> to vector<256x32xbf16>
    %c0_12 = arith.constant 0 : index
    %c64 = arith.constant 64 : index
    %11 = vector.load %arg9[%c0_12, %c64] : memref<256x288xbf16, #tpu.memory_space<vmem>>, vector<256x32xbf16>
    tpu.vector_store %arg9[%c0_12, %c64], %10 {strides = array<i32>} : memref<256x288xbf16, #tpu.memory_space<vmem>>, vector<256x32xbf16>,
    %c0_13 = arith.constant 0 : index
    %c1_14 = arith.constant 1 : index
    %c0_15 = arith.constant 0 : index
    %c0_16 = arith.constant 0 : index
    %12 = vector.load %arg1[%c0_13, %c1_14, %c0_15, %c0_16] : memref<1x18x18x32xbf16, #tpu.memory_space<vmem>>, vector<1x16x16x32xbf16>
    %13 = vector.shape_cast %12 : vector<1x16x16x32xbf16> to vector<16x16x32xbf16>
    %14 = vector.shape_cast %13 : vector<16x16x32xbf16> to vector<256x32xbf16>
    %c0_17 = arith.constant 0 : index
    %c96 = arith.constant 96 : index
    %15 = vector.load %arg9[%c0_17, %c96] : memref<256x288xbf16, #tpu.memory_space<vmem>>, vector<256x32xbf16>
    tpu.vector_store %arg9[%c0_17, %c96], %14 {strides = array<i32>} : memref<256x288xbf16, #tpu.memory_space<vmem>>, vector<256x32xbf16>,
    %c0_18 = arith.constant 0 : index
    %c1_19 = arith.constant 1 : index
    %c1_20 = arith.constant 1 : index
    %c0_21 = arith.constant 0 : index
    %16 = vector.load %arg1[%c0_18, %c1_19, %c1_20, %c0_21] : memref<1x18x18x32xbf16, #tpu.memory_space<vmem>>, vector<1x16x16x32xbf16>
    %17 = vector.shape_cast %16 : vector<1x16x16x32xbf16> to vector<16x16x32xbf16>
    %18 = vector.shape_cast %17 : vector<16x16x32xbf16> to vector<256x32xbf16>
    %c0_22 = arith.constant 0 : index
    %c128 = arith.constant 128 : index
    %19 = vector.load %arg9[%c0_22, %c128] : memref<256x288xbf16, #tpu.memory_space<vmem>>, vector<256x32xbf16>
    tpu.vector_store %arg9[%c0_22, %c128], %18 {strides = array<i32>} : memref<256x288xbf16, #tpu.memory_space<vmem>>, vector<256x32xbf16>,
    %c0_23 = arith.constant 0 : index
    %c1_24 = arith.constant 1 : index
    %c2_25 = arith.constant 2 : index
    %c0_26 = arith.constant 0 : index
    %20 = vector.load %arg1[%c0_23, %c1_24, %c2_25, %c0_26] : memref<1x18x18x32xbf16, #tpu.memory_space<vmem>>, vector<1x16x16x32xbf16>
    %21 = vector.shape_cast %20 : vector<1x16x16x32xbf16> to vector<16x16x32xbf16>
    %22 = vector.shape_cast %21 : vector<16x16x32xbf16> to vector<256x32xbf16>
    %c0_27 = arith.constant 0 : index
    %c160 = arith.constant 160 : index
    %23 = vector.load %arg9[%c0_27, %c160] : memref<256x288xbf16, #tpu.memory_space<vmem>>, vector<256x32xbf16>
    tpu.vector_store %arg9[%c0_27, %c160], %22 {strides = array<i32>} : memref<256x288xbf16, #tpu.memory_space<vmem>>, vector<256x32xbf16>,
    %c0_28 = arith.constant 0 : index
    %c2_29 = arith.constant 2 : index
    %c0_30 = arith.constant 0 : index
    %c0_31 = arith.constant 0 : index
    %24 = vector.load %arg1[%c0_28, %c2_29, %c0_30, %c0_31] : memref<1x18x18x32xbf16, #tpu.memory_space<vmem>>, vector<1x16x16x32xbf16>
    %25 = vector.shape_cast %24 : vector<1x16x16x32xbf16> to vector<16x16x32xbf16>
    %26 = vector.shape_cast %25 : vector<16x16x32xbf16> to vector<256x32xbf16>
    %c0_32 = arith.constant 0 : index
    %c192 = arith.constant 192 : index
    %27 = vector.load %arg9[%c0_32, %c192] : memref<256x288xbf16, #tpu.memory_space<vmem>>, vector<256x32xbf16>
    tpu.vector_store %arg9[%c0_32, %c192], %26 {strides = array<i32>} : memref<256x288xbf16, #tpu.memory_space<vmem>>, vector<256x32xbf16>,
    %c0_33 = arith.constant 0 : index
    %c2_34 = arith.constant 2 : index
    %c1_35 = arith.constant 1 : index
    %c0_36 = arith.constant 0 : index
    %28 = vector.load %arg1[%c0_33, %c2_34, %c1_35, %c0_36] : memref<1x18x18x32xbf16, #tpu.memory_space<vmem>>, vector<1x16x16x32xbf16>
    %29 = vector.shape_cast %28 : vector<1x16x16x32xbf16> to vector<16x16x32xbf16>
    %30 = vector.shape_cast %29 : vector<16x16x32xbf16> to vector<256x32xbf16>
    %c0_37 = arith.constant 0 : index
    %c224 = arith.constant 224 : index
    %31 = vector.load %arg9[%c0_37, %c224] : memref<256x288xbf16, #tpu.memory_space<vmem>>, vector<256x32xbf16>
    tpu.vector_store %arg9[%c0_37, %c224], %30 {strides = array<i32>} : memref<256x288xbf16, #tpu.memory_space<vmem>>, vector<256x32xbf16>,
    %c0_38 = arith.constant 0 : index
    %c2_39 = arith.constant 2 : index
    %c2_40 = arith.constant 2 : index
    %c0_41 = arith.constant 0 : index
    %32 = vector.load %arg1[%c0_38, %c2_39, %c2_40, %c0_41] : memref<1x18x18x32xbf16, #tpu.memory_space<vmem>>, vector<1x16x16x32xbf16>
    %33 = vector.shape_cast %32 : vector<1x16x16x32xbf16> to vector<16x16x32xbf16>
    %34 = vector.shape_cast %33 : vector<16x16x32xbf16> to vector<256x32xbf16>
    %c0_42 = arith.constant 0 : index
    %c256 = arith.constant 256 : index
    %35 = vector.load %arg9[%c0_42, %c256] : memref<256x288xbf16, #tpu.memory_space<vmem>>, vector<256x32xbf16>
    tpu.vector_store %arg9[%c0_42, %c256], %34 {strides = array<i32>} : memref<256x288xbf16, #tpu.memory_space<vmem>>, vector<256x32xbf16>,
    %c0_43 = arith.constant 0 : index
    %c0_44 = arith.constant 0 : index
    %36 = vector.load %arg9[%c0_43, %c0_44] : memref<256x288xbf16, #tpu.memory_space<vmem>>, vector<256x288xbf16>
    %c0_45 = arith.constant 0 : index
    %c0_46 = arith.constant 0 : index
    %37 = vector.load %arg2[%c0_45, %c0_46] : memref<288x32xbf16, #tpu.memory_space<vmem>>, vector<288x32xbf16>
    %cst = arith.constant dense<0.000000e+00> : vector<256x32xf32>
    %38 = tpu.matmul %36, %37, %cst {dimension_numbers = #tpu.dot_dimension_numbers<[1], [0], [0], [1], [0, 0, 1, 1], [], []>} : vector<256x288xbf16>, vector<288x32xbf16>, vector<256x32xf32> -> vector<256x32xf32>
    %c0_47 = arith.constant 0 : index
    %c0_48 = arith.constant 0 : index
    %39 = vector.load %arg3[%c0_47, %c0_48] : memref<1x32xf32, #tpu.memory_space<vmem>>, vector<1x32xf32>
    %40 = vector.broadcast %39 : vector<1x32xf32> to vector<256x32xf32>
    %41 = arith.mulf %38, %40 : vector<256x32xf32>
    %c0_49 = arith.constant 0 : index
    %c0_50 = arith.constant 0 : index
    %42 = vector.load %arg4[%c0_49, %c0_50] : memref<1x32xf32, #tpu.memory_space<vmem>>, vector<1x32xf32>
    %43 = vector.broadcast %42 : vector<1x32xf32> to vector<256x32xf32>
    %44 = arith.addf %41, %43 : vector<256x32xf32>
    %cst_51 = arith.constant 0.000000e+00 : f32
    %45 = vector.broadcast %cst_51 : f32 to vector<256x32xf32>
    %46 = arith.maximumf %44, %45 : vector<256x32xf32>
    %cst_52 = arith.constant 0.000000e+00 : bf16
    %47 = vector.broadcast %cst_52 : bf16 to vector<18x18x32xbf16>
    %c0_53 = arith.constant 0 : index
    %c0_54 = arith.constant 0 : index
    %c0_55 = arith.constant 0 : index
    %48 = vector.load %arg11[%c0_53, %c0_54, %c0_55] : memref<18x18x32xbf16, #tpu.memory_space<vmem>>, vector<18x18x32xbf16>
    tpu.vector_store %arg11[%c0_53, %c0_54, %c0_55], %47 {strides = array<i32>} : memref<18x18x32xbf16, #tpu.memory_space<vmem>>, vector<18x18x32xbf16>,
    %49 = vector.shape_cast %46 : vector<256x32xf32> to vector<16x16x32xf32>
    %50 = arith.truncf %49 : vector<16x16x32xf32> to vector<16x16x32xbf16>
    %c1_56 = arith.constant 1 : index
    %c1_57 = arith.constant 1 : index
    %c0_58 = arith.constant 0 : index
    %51 = vector.load %arg11[%c1_56, %c1_57, %c0_58] : memref<18x18x32xbf16, #tpu.memory_space<vmem>>, vector<16x16x32xbf16>
    tpu.vector_store %arg11[%c1_56, %c1_57, %c0_58], %50 {strides = array<i32>} : memref<18x18x32xbf16, #tpu.memory_space<vmem>>, vector<16x16x32xbf16>,
    %c0_59 = arith.constant 0 : index
    %c0_60 = arith.constant 0 : index
    %c0_61 = arith.constant 0 : index
    %52 = vector.load %arg11[%c0_59, %c0_60, %c0_61] : memref<18x18x32xbf16, #tpu.memory_space<vmem>>, vector<16x16x32xbf16>
    %53 = vector.shape_cast %52 : vector<16x16x32xbf16> to vector<256x32xbf16>
    %c0_62 = arith.constant 0 : index
    %c0_63 = arith.constant 0 : index
    %54 = vector.load %arg10[%c0_62, %c0_63] : memref<256x288xbf16, #tpu.memory_space<vmem>>, vector<256x32xbf16>
    tpu.vector_store %arg10[%c0_62, %c0_63], %53 {strides = array<i32>} : memref<256x288xbf16, #tpu.memory_space<vmem>>, vector<256x32xbf16>,
    %c0_64 = arith.constant 0 : index
    %c1_65 = arith.constant 1 : index
    %c0_66 = arith.constant 0 : index
    %55 = vector.load %arg11[%c0_64, %c1_65, %c0_66] : memref<18x18x32xbf16, #tpu.memory_space<vmem>>, vector<16x16x32xbf16>
    %56 = vector.shape_cast %55 : vector<16x16x32xbf16> to vector<256x32xbf16>
    %c0_67 = arith.constant 0 : index
    %c32_68 = arith.constant 32 : index
    %57 = vector.load %arg10[%c0_67, %c32_68] : memref<256x288xbf16, #tpu.memory_space<vmem>>, vector<256x32xbf16>
    tpu.vector_store %arg10[%c0_67, %c32_68], %56 {strides = array<i32>} : memref<256x288xbf16, #tpu.memory_space<vmem>>, vector<256x32xbf16>,
    %c0_69 = arith.constant 0 : index
    %c2_70 = arith.constant 2 : index
    %c0_71 = arith.constant 0 : index
    %58 = vector.load %arg11[%c0_69, %c2_70, %c0_71] : memref<18x18x32xbf16, #tpu.memory_space<vmem>>, vector<16x16x32xbf16>
    %59 = vector.shape_cast %58 : vector<16x16x32xbf16> to vector<256x32xbf16>
    %c0_72 = arith.constant 0 : index
    %c64_73 = arith.constant 64 : index
    %60 = vector.load %arg10[%c0_72, %c64_73] : memref<256x288xbf16, #tpu.memory_space<vmem>>, vector<256x32xbf16>
    tpu.vector_store %arg10[%c0_72, %c64_73], %59 {strides = array<i32>} : memref<256x288xbf16, #tpu.memory_space<vmem>>, vector<256x32xbf16>,
    %c1_74 = arith.constant 1 : index
    %c0_75 = arith.constant 0 : index
    %c0_76 = arith.constant 0 : index
    %61 = vector.load %arg11[%c1_74, %c0_75, %c0_76] : memref<18x18x32xbf16, #tpu.memory_space<vmem>>, vector<16x16x32xbf16>
    %62 = vector.shape_cast %61 : vector<16x16x32xbf16> to vector<256x32xbf16>
    %c0_77 = arith.constant 0 : index
    %c96_78 = arith.constant 96 : index
    %63 = vector.load %arg10[%c0_77, %c96_78] : memref<256x288xbf16, #tpu.memory_space<vmem>>, vector<256x32xbf16>
    tpu.vector_store %arg10[%c0_77, %c96_78], %62 {strides = array<i32>} : memref<256x288xbf16, #tpu.memory_space<vmem>>, vector<256x32xbf16>,
    %c1_79 = arith.constant 1 : index
    %c1_80 = arith.constant 1 : index
    %c0_81 = arith.constant 0 : index
    %64 = vector.load %arg11[%c1_79, %c1_80, %c0_81] : memref<18x18x32xbf16, #tpu.memory_space<vmem>>, vector<16x16x32xbf16>
    %65 = vector.shape_cast %64 : vector<16x16x32xbf16> to vector<256x32xbf16>
    %c0_82 = arith.constant 0 : index
    %c128_83 = arith.constant 128 : index
    %66 = vector.load %arg10[%c0_82, %c128_83] : memref<256x288xbf16, #tpu.memory_space<vmem>>, vector<256x32xbf16>
    tpu.vector_store %arg10[%c0_82, %c128_83], %65 {strides = array<i32>} : memref<256x288xbf16, #tpu.memory_space<vmem>>, vector<256x32xbf16>,
    %c1_84 = arith.constant 1 : index
    %c2_85 = arith.constant 2 : index
    %c0_86 = arith.constant 0 : index
    %67 = vector.load %arg11[%c1_84, %c2_85, %c0_86] : memref<18x18x32xbf16, #tpu.memory_space<vmem>>, vector<16x16x32xbf16>
    %68 = vector.shape_cast %67 : vector<16x16x32xbf16> to vector<256x32xbf16>
    %c0_87 = arith.constant 0 : index
    %c160_88 = arith.constant 160 : index
    %69 = vector.load %arg10[%c0_87, %c160_88] : memref<256x288xbf16, #tpu.memory_space<vmem>>, vector<256x32xbf16>
    tpu.vector_store %arg10[%c0_87, %c160_88], %68 {strides = array<i32>} : memref<256x288xbf16, #tpu.memory_space<vmem>>, vector<256x32xbf16>,
    %c2_89 = arith.constant 2 : index
    %c0_90 = arith.constant 0 : index
    %c0_91 = arith.constant 0 : index
    %70 = vector.load %arg11[%c2_89, %c0_90, %c0_91] : memref<18x18x32xbf16, #tpu.memory_space<vmem>>, vector<16x16x32xbf16>
    %71 = vector.shape_cast %70 : vector<16x16x32xbf16> to vector<256x32xbf16>
    %c0_92 = arith.constant 0 : index
    %c192_93 = arith.constant 192 : index
    %72 = vector.load %arg10[%c0_92, %c192_93] : memref<256x288xbf16, #tpu.memory_space<vmem>>, vector<256x32xbf16>
    tpu.vector_store %arg10[%c0_92, %c192_93], %71 {strides = array<i32>} : memref<256x288xbf16, #tpu.memory_space<vmem>>, vector<256x32xbf16>,
    %c2_94 = arith.constant 2 : index
    %c1_95 = arith.constant 1 : index
    %c0_96 = arith.constant 0 : index
    %73 = vector.load %arg11[%c2_94, %c1_95, %c0_96] : memref<18x18x32xbf16, #tpu.memory_space<vmem>>, vector<16x16x32xbf16>
    %74 = vector.shape_cast %73 : vector<16x16x32xbf16> to vector<256x32xbf16>
    %c0_97 = arith.constant 0 : index
    %c224_98 = arith.constant 224 : index
    %75 = vector.load %arg10[%c0_97, %c224_98] : memref<256x288xbf16, #tpu.memory_space<vmem>>, vector<256x32xbf16>
    tpu.vector_store %arg10[%c0_97, %c224_98], %74 {strides = array<i32>} : memref<256x288xbf16, #tpu.memory_space<vmem>>, vector<256x32xbf16>,
    %c2_99 = arith.constant 2 : index
    %c2_100 = arith.constant 2 : index
    %c0_101 = arith.constant 0 : index
    %76 = vector.load %arg11[%c2_99, %c2_100, %c0_101] : memref<18x18x32xbf16, #tpu.memory_space<vmem>>, vector<16x16x32xbf16>
    %77 = vector.shape_cast %76 : vector<16x16x32xbf16> to vector<256x32xbf16>
    %c0_102 = arith.constant 0 : index
    %c256_103 = arith.constant 256 : index
    %78 = vector.load %arg10[%c0_102, %c256_103] : memref<256x288xbf16, #tpu.memory_space<vmem>>, vector<256x32xbf16>
    tpu.vector_store %arg10[%c0_102, %c256_103], %77 {strides = array<i32>} : memref<256x288xbf16, #tpu.memory_space<vmem>>, vector<256x32xbf16>,
    %c0_104 = arith.constant 0 : index
    %c0_105 = arith.constant 0 : index
    %79 = vector.load %arg10[%c0_104, %c0_105] : memref<256x288xbf16, #tpu.memory_space<vmem>>, vector<256x288xbf16>
    %c0_106 = arith.constant 0 : index
    %c0_107 = arith.constant 0 : index
    %80 = vector.load %arg5[%c0_106, %c0_107] : memref<288x32xbf16, #tpu.memory_space<vmem>>, vector<288x32xbf16>
    %cst_108 = arith.constant dense<0.000000e+00> : vector<256x32xf32>
    %81 = tpu.matmul %79, %80, %cst_108 {dimension_numbers = #tpu.dot_dimension_numbers<[1], [0], [0], [1], [0, 0, 1, 1], [], []>} : vector<256x288xbf16>, vector<288x32xbf16>, vector<256x32xf32> -> vector<256x32xf32>
    %c0_109 = arith.constant 0 : index
    %c0_110 = arith.constant 0 : index
    %82 = vector.load %arg6[%c0_109, %c0_110] : memref<1x32xf32, #tpu.memory_space<vmem>>, vector<1x32xf32>
    %83 = vector.broadcast %82 : vector<1x32xf32> to vector<256x32xf32>
    %84 = arith.mulf %81, %83 : vector<256x32xf32>
    %c0_111 = arith.constant 0 : index
    %c0_112 = arith.constant 0 : index
    %85 = vector.load %arg7[%c0_111, %c0_112] : memref<1x32xf32, #tpu.memory_space<vmem>>, vector<1x32xf32>
    %86 = vector.broadcast %85 : vector<1x32xf32> to vector<256x32xf32>
    %87 = arith.addf %84, %86 : vector<256x32xf32>
    %c0_113 = arith.constant 0 : index
    %c1_114 = arith.constant 1 : index
    %c1_115 = arith.constant 1 : index
    %c0_116 = arith.constant 0 : index
    %88 = vector.load %arg1[%c0_113, %c1_114, %c1_115, %c0_116] : memref<1x18x18x32xbf16, #tpu.memory_space<vmem>>, vector<1x16x16x32xbf16>
    %89 = vector.shape_cast %88 : vector<1x16x16x32xbf16> to vector<16x16x32xbf16>
    %90 = vector.shape_cast %89 : vector<16x16x32xbf16> to vector<256x32xbf16>
    %91 = arith.extf %90 : vector<256x32xbf16> to vector<256x32xf32>
    %92 = arith.addf %87, %91 : vector<256x32xf32>
    %cst_117 = arith.constant 0.000000e+00 : f32
    %93 = vector.broadcast %cst_117 : f32 to vector<256x32xf32>
    %94 = arith.maximumf %92, %93 : vector<256x32xf32>
    %c0_118 = arith.constant 0 : index
    %c0_119 = arith.constant 0 : index
    %c0_120 = arith.constant 0 : index
    %95 = vector.load %arg8[%c0_118, %c0_119, %c0_120] : memref<1x256x32xf32, #tpu.memory_space<vmem>>, vector<1x256x32xf32>
    %96 = vector.shape_cast %95 : vector<1x256x32xf32> to vector<256x32xf32>
    %97 = vector.shape_cast %94 : vector<256x32xf32> to vector<1x256x32xf32>
    tpu.vector_store %arg8[%c0_118, %c0_119, %c0_120], %97 {strides = array<i32>} : memref<1x256x32xf32, #tpu.memory_space<vmem>>, vector<1x256x32xf32>,
    return
  }
  func.func @transform_0(%arg0: i32) -> (i32, i32, i32, i32) {
    %c0_i32 = arith.constant 0 : i32
    %c0_i32_0 = arith.constant 0 : i32
    %c0_i32_1 = arith.constant 0 : i32
    %c0_i32_2 = arith.constant 0 : i32
    return %arg0, %c0_i32, %c0_i32_0, %c0_i32_1 : i32, i32, i32, i32
  }
  func.func @transform_1(%arg0: i32) -> (i32, i32) {
    %c0_i32 = arith.constant 0 : i32
    %c0_i32_0 = arith.constant 0 : i32
    %c0_i32_1 = arith.constant 0 : i32
    return %c0_i32, %c0_i32_0 : i32, i32
  }
  func.func @transform_2(%arg0: i32) -> (i32, i32) {
    %c0_i32 = arith.constant 0 : i32
    %c0_i32_0 = arith.constant 0 : i32
    %c0_i32_1 = arith.constant 0 : i32
    return %c0_i32, %c0_i32_0 : i32, i32
  }
  func.func @transform_3(%arg0: i32) -> (i32, i32) {
    %c0_i32 = arith.constant 0 : i32
    %c0_i32_0 = arith.constant 0 : i32
    %c0_i32_1 = arith.constant 0 : i32
    return %c0_i32, %c0_i32_0 : i32, i32
  }
  func.func @transform_4(%arg0: i32) -> (i32, i32) {
    %c0_i32 = arith.constant 0 : i32
    %c0_i32_0 = arith.constant 0 : i32
    %c0_i32_1 = arith.constant 0 : i32
    return %c0_i32, %c0_i32_0 : i32, i32
  }
  func.func @transform_5(%arg0: i32) -> (i32, i32) {
    %c0_i32 = arith.constant 0 : i32
    %c0_i32_0 = arith.constant 0 : i32
    %c0_i32_1 = arith.constant 0 : i32
    return %c0_i32, %c0_i32_0 : i32, i32
  }
  func.func @transform_6(%arg0: i32) -> (i32, i32) {
    %c0_i32 = arith.constant 0 : i32
    %c0_i32_0 = arith.constant 0 : i32
    %c0_i32_1 = arith.constant 0 : i32
    return %c0_i32, %c0_i32_0 : i32, i32
  }
  func.func @transform_7(%arg0: i32) -> (i32, i32, i32) {
    %c0_i32 = arith.constant 0 : i32
    %c0_i32_0 = arith.constant 0 : i32
    %c0_i32_1 = arith.constant 0 : i32
    return %arg0, %c0_i32, %c0_i32_0 : i32, i32, i32
  }
}

</mosaic_0001>

<bundles_post_ra>
// kernel: tpu_custom_call.1
= control target key start
LH: loop header
LB: loop body
LE: loop exit
PB: predicated region body
PF: predicated region fallthrough
CT: control target
= control target key end

     0   :  { %s10271_s24 = smov 0   ;;  %s13201_s0 = inlined_call_operand.vmem [shape: bf16[2,18,18,32], index: 0, kind: input, shape index: {}]   ;;  %s13202_s1 = inlined_call_operand.vmem [shape: bf16[288,32], index: 1, kind: input, shape index: {}]   ;;  %s13203_s2 = inlined_call_operand.vmem [shape: f32[1,32], index: 2, kind: input, shape index: {}]   ;;  %s13204_s3 = inlined_call_operand.vmem [shape: f32[1,32], index: 3, kind: input, shape index: {}]   ;;  %s13205_s4 = inlined_call_operand.vmem [shape: bf16[288,32], index: 4, kind: input, shape index: {}]   ;;  %s13206_s5 = inlined_call_operand.vmem [shape: f32[1,32], index: 5, kind: input, shape index: {}]   ;;  %s13207_s6 = inlined_call_operand.vmem [shape: f32[1,32], index: 6, kind: input, shape index: {}]   ;;  %s13208_s7 = inlined_call_operand.vmem [shape: f32[2,256,32], index: 7, kind: output, shape index: {}]  }
   0x1 LB: > { %s8893_s25 = sadd.s32 4294967295, %s10225_s24   ;;  %p8897_p0 = scmp.ge.s32.totalorder %s10225_s24, 1  ;;  %s10225_s24 = sphi %s10271_s24, %s17_s24  }
   0x2   : > { %p237_p1 = scmp.lt.s32.totalorder %s10225_s24, 3 }
   0x4   : > { %p238_p2 = pnand %p8897_p0, %p237_p1 }
   0x5   : > { %p269_p3 = scmp.lt.s32.totalorder (!%p238_p2), %s8893_s25, 1  ;;  %vm1069_vm0 = vcmask (!%p238_p2), 1042432   ;;  %vm1070_vm1 = vcmask (!%p238_p2), 1046532   ;;  %v10095_v0 = vld [vmem:[%s13202_s1 + $0x40] sm:$0xff] (!%p238_p2)   ;;  %v10097_v3 = vld [vmem:[%s13202_s1 + $0x48] sm:$0xff] (!%p238_p2)   ;;  %s10227_s13 = smov (!%p238_p2), 64  }
   0x6   : > { %241 = sbr.rel (%p238_p2) target bundleno = 1121 (0x461), region = 48  ;;  %v10096_v1 = vld [vmem:[%s13202_s1] sm:$0xff] (!%p238_p2)   ;;  %vm10288_vm2 = vmor (!%p238_p2), %vm1069_vm0, %vm1070_vm1  ;;  %9728 = vmatprep.subr.bf16.mxu0 (!%p238_p2), %v10095_v0  ;;  %s10228_s14 = smov (!%p238_p2), 96   ;;  %vm473_vm3 = vsmask.f32 (!%p238_p2), 3328  ;;  %vm408_vm6 = vcmask (!%p238_p2), 261120  }
   0x7   : > { %9729 = vmatpush3.bf16.msra.mxu0 (!%p238_p2), %v10096_v1  ;;  %vm474_vm4 = vsmask.f32 (!%p238_p2), 7440  ;;  %s10229_s15 = smov (!%p238_p2), 32   ;;  %vm956_vm7 = vcmask (!%p238_p2), 523520   ;;  %vm1280_vm8 = vcmask (!%p238_p2), 785920   ;;  %vm1458_vm9 = vcmask (!%p238_p2), 1048320  }
   0x8   : > { %9730 = vmatprep.subr.bf16.mxu0 (!%p238_p2), %v10097_v3  ;;  %vm10348_vm5 = vmor (!%p238_p2), %vm473_vm3, %vm474_vm4  ;;  %vm3988_vm10 = vcmask (!%p238_p2), 257024   ;;  %vm3991_vm11 = vcmask (!%p238_p2), 253952   ;;  %vm4465_vm12 = vsmask.f32 (!%p238_p2), 7938  ;;  %vm4140_vm13 = vsmask.f32 (!%p238_p2), 256 }
   0x9   : > { %vm4141_vm14 = vsmask.f32 (!%p238_p2), 4368  ;;  %vm11575_vm15 = vmand (!%p238_p2), %vm3988_vm10, %vm4465_vm12 }
   0xa   : > { %vm11581_vm0 = vmand (!%p238_p2), %vm3991_vm11, %vm4140_vm13 }
   0xb   : > { %vm11587_vm1 = vmor (!%p238_p2), %vm4140_vm13, %vm4141_vm14 }
   0xd   : > { %s13220_s25 = smov (!%p269_p3, %s8893_s25), 1 }
   0xe   : > { %s10064_s30 = smul.u32 216, %s13220_s25  ;;  %s9695_s18 = sshll.u32 %s13220_s25, 8 }
   0xf   : > { %s12908_s21 = scalar_lea.vmem %s13208_s7, %s9695_s18 }
  0x10   : > { %s10298_s12 = scalar_lea.vmem %s13201_s0, %s10064_s30 }
  0x11   : > { %v10077_v4 = vld [vmem:[%s10298_s12 + $0x18] sm:$0xff]   ;;  %v10078_v5 = vld [vmem:[%s10298_s12 + $0x24] sm:$0xff]   ;;  %v10079_v6 = vld [vmem:[%s10298_s12 + $0xc] sm:$0xff]  }
  0x12   : > { %2420 = vrot.lane.b32.xlu1 %v10077_v4, %s10227_s13  ;;  %2422 = vrot.lane.b32.xlu0 %v10078_v5, %s10227_s13  ;;  %v9077_v7 = vld [vmem:[%s10298_s12 + $0xc] sm:$0xe]  ;;  %v9078_v8 = vld [vmem:[%s10298_s12 + $0x10] sm:$0xf] }
  0x13   : > { %v9079_v9 = vld [vmem:[%s10298_s12 + $0x14] sm:$0x1]  ;;  %v9125_v10 = vrot.slane %v9077_v7, 9  ;;  %v2085_v11 = vrot.slane %v9078_v8, 5  ;;  %v973_v13 = vld [vmem:[%s10298_s12] sm:$0xe] }
  0x14   : > { %v2088_v12 = vrot.slane %v9079_v9, 5  ;;  %v974_v14 = vld [vmem:[%s10298_s12 + $0x4] sm:$0xf]  ;;  %v975_v15 = vld [vmem:[%s10298_s12 + $0x8] sm:$0x1]  ;;  %v8933_v16 = vrot.slane %v973_v13, 9 }
  0x15   : > { %v2086_v17 = vsel %vm10288_vm2, %v9125_v10, %v2085_v11  ;;  %v2087_v18 = vrot.slane %v2085_v11, 4  ;;  %v1074_v19 = vrot.slane %v974_v14, 5  ;;  %v1077_v20 = vrot.slane %v975_v15, 5  ;;  %v9080_v21 = vld [vmem:[%s10298_s12 + $0x18] sm:$0xe] }
  0x16   : > { %1410 = vrot.lane.b32.xlu1 %v10079_v6, %s10228_s14  ;;  %v9081_v22 = vld [vmem:[%s10298_s12 + $0x1c] sm:$0xf]  ;;  %v9082_v23 = vld [vmem:[%s10298_s12 + $0x20] sm:$0x1]  ;;  %v9126_v24 = vrot.slane %v9080_v21, 9 }
  0x17   : > { %v2089_v25 = vsel %vm10288_vm2, %v2087_v18, %v2088_v12  ;;  %v1075_v26 = vsel %vm10288_vm2, %v8933_v16, %v1074_v19  ;;  %v1076_v27 = vrot.slane %v1074_v19, 4  ;;  %v2092_v28 = vrot.slane %v9081_v22, 5  ;;  %v976_v29 = vld [vmem:[%s10298_s12 + $0xc] sm:$0xe]  ;;  %v977_v30 = vld [vmem:[%s10298_s12 + $0x10] sm:$0xf] }
  0x18   : > { %v9141_v31 = vcombine.low %v2086_v17, %v2089_v25  ;;  %v2095_v32 = vrot.slane %v9082_v23, 5  ;;  %v978_v33 = vld [vmem:[%s10298_s12 + $0x14] sm:$0x1]  ;;  %v8934_v34 = vrot.slane %v976_v29, 9  ;;  %v1081_v35 = vrot.slane %v977_v30, 5 }
  0x19   : > { %v1078_v36 = vsel %vm10288_vm2, %v1076_v27, %v1077_v20  ;;  %v2093_v37 = vsel %vm10288_vm2, %v9126_v24, %v2092_v28  ;;  %v2094_v38 = vrot.slane %v2092_v28, 4  ;;  %v1084_v39 = vrot.slane %v978_v33, 5  ;;  %v425_v40 = vld [vmem:[%s10298_s12] sm:$0xf]  ;;  %v426_v41 = vld [vmem:[%s10298_s12 + $0x4] sm:$0xf] }
  0x1a   : > { %2243 = vrot.lane.b32.xlu0 %v9141_v31, %s10229_s15  ;;  %v8949_v42 = vcombine.low %v1075_v26, %v1078_v36  ;;  %v1082_v43 = vsel %vm10288_vm2, %v8934_v34, %v1081_v35  ;;  %v1083_v44 = vrot.slane %v1081_v35, 4  ;;  %v427_v45 = vld [vmem:[%s10298_s12 + $0x8] sm:$0x1]  ;;  %v477_v46 = vshrl.u32 %v425_v40, 16  ;;  %v428_v47 = vld [vmem:[%s10298_s12 + $0xc] sm:$0xf] }
  0x1b   : > { %v2096_v48 = vsel %vm10288_vm2, %v2094_v38, %v2095_v32  ;;  %v480_v49 = vshll.u32 %v425_v40, 16  ;;  %v486_v50 = vshll.u32 %v426_v41, 16  ;;  %v490_v51 = vshrl.u32 %v426_v41, 16  ;;  %v429_v52 = vld [vmem:[%s10298_s12 + $0x10] sm:$0xf] }
  0x1c   : > { %1232 = vrot.lane.b32.xlu1 %v8949_v42, %s10227_s13  ;;  %v9142_v53 = vcombine.low %v2093_v37, %v2096_v48  ;;  %v1085_v54 = vsel %vm10288_vm2, %v1083_v44, %v1084_v39  ;;  %v479_v55 = vrot.slane %v477_v46, 4  ;;  %v496_v56 = vshll.u32 %v427_v45, 16  ;;  %v430_v57 = vld [vmem:[%s10298_s12 + $0x14] sm:$0x1]  ;;  %v9205_v62 = vld [vmem:[%s10298_s12 + $0x18] sm:$0xf] }
  0x1d   : > { %v8950_v58 = vcombine.low %v1082_v43, %v1085_v54  ;;  %v482_v59 = vrot.slane %v480_v49, 5  ;;  %v488_v60 = vrot.slane %v486_v50, 5  ;;  %v492_v61 = vrot.slane %v490_v51, 4  ;;  %v9206_v8 = vld [vmem:[%s10298_s12 + $0x1c] sm:$0xf] }
  0x1e   : > { %2245 = vrot.lane.b32.xlu0 %v9142_v53, %s10229_s15  ;;  %v498_v63 = vrot.slane %v496_v56, 5  ;;  %v501_v0 = vshrl.u32 %v428_v47, 16  ;;  %v504_v1 = vshll.u32 %v428_v47, 16  ;;  %v510_v3 = vshll.u32 %v429_v52, 16  ;;  %v9207_v13 = vld [vmem:[%s10298_s12 + $0x20] sm:$0x1] }
  0x1f   : > { %v483_v4 = vor.u32 %v482_v59, %v479_v55  ;;  %v493_v5 = vor.u32 %v492_v61, %v488_v60  ;;  %v514_v6 = vshrl.u32 %v429_v52, 16  ;;  %v520_v7 = vshll.u32 %v430_v57, 16  ;;  %v9208_v15 = vld [vmem:[%s10298_s12 + $0x24] sm:$0xf]  ;;  %v9209_v28 = vld [vmem:[%s10298_s12 + $0x28] sm:$0xf] }
  0x20   : > { %1234 = vrot.lane.b32.xlu1 %v8950_v58, %s10227_s13  ;;  %v503_v10 = vrot.slane %v501_v0, 4  ;;  %v506_v11 = vrot.slane %v504_v1, 5  ;;  %v512_v12 = vrot.slane %v510_v3, 5  ;;  %v2533_v14 = vshrl.u32 %v9205_v62, 16  ;;  %v9210_v33 = vld [vmem:[%s10298_s12 + $0x2c] sm:$0x1] }
  0x21   : > { %v484_v16 = vrot.slane %v483_v4, 4  ;;  %v494_v17 = vrot.slane %v493_v5, 4  ;;  %v516_v18 = vrot.slane %v514_v6, 4  ;;  %v522_v19 = vrot.slane %v520_v7, 5  ;;  %v9083_v38 = vld [vmem:[%s10298_s12 + $0x24] sm:$0xe] }
  0x22   : > { %v507_v20 = vor.u32 %v506_v11, %v503_v10  ;;  %v2535_v21 = vrot.slane %v2533_v14, 4  ;;  %v2536_v22 = vshll.u32 %v9205_v62, 16  ;;  %v2542_v23 = vshll.u32 %v9206_v8, 16  ;;  %v9084_v43 = vld [vmem:[%s10298_s12 + $0x28] sm:$0xf]  ;;  %v10080_v57 = vld [vmem:[%s10298_s12 + $0x18] sm:$0xff]  }
  0x23   : > { %v489_v24 = vsel %vm10348_vm5, %v484_v16, %v488_v60  ;;  %v499_v25 = vsel %vm10348_vm5, %v494_v17, %v498_v63  ;;  %v517_v26 = vor.u32 %v516_v18, %v512_v12  ;;  %v2546_v27 = vshrl.u32 %v9206_v8, 16  ;;  %v9085_v44 = vld [vmem:[%s10298_s12 + $0x2c] sm:$0x1]  ;;  %v431_v53 = vld [vmem:[%s10298_s12 + $0x18] sm:$0xf] }
  0x24   : > { %v8917_v29 = vcombine.low %v489_v24, %v499_v25  ;;  %v508_v30 = vrot.slane %v507_v20, 4  ;;  %v2538_v31 = vrot.slane %v2536_v22, 5  ;;  %v2544_v32 = vrot.slane %v2542_v23, 5  ;;  %v432_v63 = vld [vmem:[%s10298_s12 + $0x1c] sm:$0xf] }
  0x25   : > { %v518_v34 = vrot.slane %v517_v26, 4  ;;  %v2548_v35 = vrot.slane %v2546_v27, 4  ;;  %v2552_v36 = vshll.u32 %v9207_v13, 16  ;;  %v2557_v37 = vshrl.u32 %v9208_v15, 16  ;;  %v433_v0 = vld [vmem:[%s10298_s12 + $0x20] sm:$0x1] }
  0x26   : > { %908 = vrot.lane.b32.xlu0 %v8917_v29, %s10229_s15  ;;  %v513_v39 = vsel %vm10348_vm5, %v508_v30, %v512_v12  ;;  %v2539_v40 = vor.u32 %v2538_v31, %v2535_v21  ;;  %v2560_v41 = vshll.u32 %v9208_v15, 16  ;;  %v2566_v42 = vshll.u32 %v9209_v28, 16  ;;  %v979_v6 = vld [vmem:[%s10298_s12 + $0x18] sm:$0xe]  ;;  %v980_v12 = vld [vmem:[%s10298_s12 + $0x1c] sm:$0xf] }
  0x27   : > { %v523_v45 = vsel %vm10348_vm5, %v518_v34, %v522_v19  ;;  %v2549_v46 = vor.u32 %v2548_v35, %v2544_v32  ;;  %v2554_v47 = vrot.slane %v2552_v36, 5  ;;  %v2559_v48 = vrot.slane %v2557_v37, 4  ;;  %v981_v21 = vld [vmem:[%s10298_s12 + $0x20] sm:$0x1]  ;;  %v9211_v22 = vld [vmem:[%s10298_s12 + $0x30] sm:$0xf] }
  0x28   : > { %v8918_v49 = vcombine.low %v513_v39, %v523_v45  ;;  %v2540_v50 = vrot.slane %v2539_v40, 4  ;;  %v2562_v51 = vrot.slane %v2560_v41, 5  ;;  %v2568_v52 = vrot.slane %v2566_v42, 5  ;;  %v9212_v31 = vld [vmem:[%s10298_s12 + $0x34] sm:$0xf] }
  0x29   : > { %v2550_v54 = vrot.slane %v2549_v46, 4  ;;  %v2570_v55 = vshrl.u32 %v9209_v28, 16  ;;  %v2576_v56 = vshll.u32 %v9210_v33, 16  ;;  %v9127_v58 = vrot.slane %v9083_v38, 9  ;;  %v9213_v35 = vld [vmem:[%s10298_s12 + $0x38] sm:$0x1] }
  0x2a   : > { %910 = vrot.lane.b32.xlu1 %v8918_v49, %s10229_s15  ;;  %v2545_v59 = vsel %vm10348_vm5, %v2540_v50, %v2544_v32  ;;  %v2563_v60 = vor.u32 %v2562_v51, %v2559_v48  ;;  %v2099_v61 = vrot.slane %v9084_v43, 5  ;;  %v2102_v62 = vrot.slane %v9085_v44, 5  ;;  %v9086_v37 = vld [vmem:[%s10298_s12 + $0x30] sm:$0xe]  ;;  %v9087_v46 = vld [vmem:[%s10298_s12 + $0x34] sm:$0xf] }
  0x2b   : > { %v2555_v1 = vsel %vm10348_vm5, %v2550_v54, %v2554_v47  ;;  %v2572_v3 = vrot.slane %v2570_v55, 4  ;;  %v2578_v4 = vrot.slane %v2576_v56, 5  ;;  %v525_v5 = vshrl.u32 %v431_v53, 16  ;;  %v9088_v51 = vld [vmem:[%s10298_s12 + $0x38] sm:$0x1] }
  0x2c   : > { %v9253_v7 = vcombine.low %v2545_v59, %v2555_v1  ;;  %v2564_v8 = vrot.slane %v2563_v60, 4  ;;  %v2100_v10 = vsel %vm10288_vm2, %v9127_v58, %v2099_v61  ;;  %v2101_v11 = vrot.slane %v2099_v61, 4  ;;  %v434_v56 = vld [vmem:[%s10298_s12 + $0x24] sm:$0xf]  ;;  %v10081_v59 = vld [vmem:[%s10298_s12 + $0x30] sm:$0xff]  }
  0x2d   : > { %v2573_v13 = vor.u32 %v2572_v3, %v2568_v52  ;;  %v527_v14 = vrot.slane %v525_v5, 4  ;;  %v528_v15 = vshll.u32 %v431_v53, 16  ;;  %v534_v16 = vshll.u32 %v432_v63, 16  ;;  %v436_v5 = vld [vmem:[%s10298_s12 + $0x2c] sm:$0x1] }
  0x2e   : > { %2964 = vrot.lane.b32.xlu0 %v9253_v7, %s10228_s14  ;;  %v2569_v17 = vsel %vm10348_vm5, %v2564_v8, %v2568_v52  ;;  %1412 = vrot.lane.b32.xlu1 %v10080_v57, %s10228_s14  ;;  %v2103_v18 = vsel %vm10288_vm2, %v2101_v11, %v2102_v62  ;;  %v538_v19 = vshrl.u32 %v432_v63, 16  ;;  %v544_v20 = vshll.u32 %v433_v0, 16  ;;  %v435_v57 = vld [vmem:[%s10298_s12 + $0x28] sm:$0xf]  ;;  %v10100_v11 = vld [vmem:[%s13202_s1 + $0x50] sm:$0xff]  }
  0x2f   : > { %v2574_v23 = vrot.slane %v2573_v13, 4  ;;  %v9143_v24 = vcombine.low %v2100_v10, %v2103_v18  ;;  %v530_v25 = vrot.slane %v528_v15, 5  ;;  %v536_v26 = vrot.slane %v534_v16, 5  ;;  %v10099_v63 = vld [vmem:[%s13202_s1 + $0x8] sm:$0xff]   ;;  %v982_v16 = vld [vmem:[%s10298_s12 + $0x24] sm:$0xe] }
  0x30   : > { %v540_v27 = vrot.slane %v538_v19, 4  ;;  %v546_v28 = vrot.slane %v544_v20, 5  ;;  %v8935_v29 = vrot.slane %v979_v6, 9  ;;  %v1088_v30 = vrot.slane %v980_v12, 5  ;;  %9731 = vmatpush3.bf16.msra.mxu0 %v10099_v63 }
  0x31   : > { %v2579_v32 = vsel %vm10348_vm5, %v2574_v23, %v2578_v4  ;;  %v531_v33 = vor.u32 %v530_v25, %v527_v14  ;;  %v1091_v34 = vrot.slane %v981_v21, 5  ;;  %v2581_v36 = vshrl.u32 %v9211_v22, 16  ;;  %9732 = vmatprep.subr.bf16.mxu0 %v10100_v11  ;;  %v10083_v11 = vld [vmem:[%s10298_s12 + $0x3c] sm:$0xff]  }
  0x32   : > { %v9254_v38 = vcombine.low %v2569_v17, %v2579_v32  ;;  %v541_v39 = vor.u32 %v540_v27, %v536_v26  ;;  %v10396_v40 = vsel %vm10288_vm2, %v8935_v29, %v1088_v30  ;;  %v1090_v41 = vrot.slane %v1088_v30, 4  ;;  %v10101_v17 = vld [vmem:[%s13202_s1 + $0x10] sm:$0xff]   ;;  %v984_v27 = vld [vmem:[%s10298_s12 + $0x2c] sm:$0x1]  ;;  %v10082_v30 = vld [vmem:[%s10298_s12 + $0x24] sm:$0xff]  }
  0x33   : > { %v532_v42 = vrot.slane %v531_v33, 4  ;;  %v2583_v43 = vrot.slane %v2581_v36, 4  ;;  %v2584_v44 = vshll.u32 %v9211_v22, 16  ;;  %v2590_v45 = vshll.u32 %v9212_v31, 16  ;;  %v983_v22 = vld [vmem:[%s10298_s12 + $0x28] sm:$0xf] }
  0x34   : > { %2966 = vrot.lane.b32.xlu0 %v9254_v38, %s10228_s14  ;;  %v542_v47 = vrot.slane %v541_v39, 4  ;;  %v1092_v48 = vsel %vm10288_vm2, %v1090_v41, %v1091_v34  ;;  %v2594_v49 = vshrl.u32 %v9212_v31, 16  ;;  %v2600_v50 = vshll.u32 %v9213_v35, 16  ;;  %v9215_v34 = vld [vmem:[%s10298_s12 + $0x40] sm:$0xf]  ;;  %9733 = vmatpush3.bf16.msra.mxu0 %v10101_v17 }
  0x35   : > { %v537_v52 = vsel %vm10348_vm5, %v532_v42, %v536_v26  ;;  %v8951_v53 = vcombine.low %v10396_v40, %v1092_v48  ;;  %v2586_v54 = vrot.slane %v2584_v44, 5  ;;  %v2592_v55 = vrot.slane %v2590_v45, 5  ;;  %v9216_v35 = vld [vmem:[%s10298_s12 + $0x44] sm:$0x1]  ;;  %v9089_v44 = vld [vmem:[%s10298_s12 + $0x3c] sm:$0xe] }
  0x36   : > { %v547_v58 = vsel %vm10348_vm5, %v542_v47, %v546_v28  ;;  %v2596_v60 = vrot.slane %v2594_v49, 4  ;;  %v2602_v61 = vrot.slane %v2600_v50, 5  ;;  %v9128_v62 = vrot.slane %v9086_v37, 9  ;;  %v9214_v28 = vld [vmem:[%s10298_s12 + $0x3c] sm:$0xf] }
  0x37   : > { %v8919_v0 = vcombine.low %v537_v52, %v547_v58  ;;  %v2587_v1 = vor.u32 %v2586_v54, %v2583_v43  ;;  %v2106_v3 = vrot.slane %v9087_v46, 5  ;;  %v2109_v4 = vrot.slane %v9088_v51, 5  ;;  %v9090_v49 = vld [vmem:[%s10298_s12 + $0x40] sm:$0xf]  ;;  %v10103_v50 = vld [vmem:[%s13202_s1 + $0x58] sm:$0xff]  }
  0x38   : > { %2247 = vrot.lane.b32.xlu0 %v9143_v24, %s10229_s15  ;;  %v2597_v6 = vor.u32 %v2596_v60, %v2592_v55  ;;  %v549_v7 = vshrl.u32 %v434_v56, 16  ;;  %v552_v8 = vshll.u32 %v434_v56, 16  ;;  %v558_v10 = vshll.u32 %v435_v57, 16  ;;  %v10104_v56 = vld [vmem:[%s13202_s1 + $0x18] sm:$0xff]   ;;  %9734 = vmatprep.subr.bf16.mxu0 %v10103_v50  ;;  %v9092_v50 = vld [vmem:[%s10298_s12 + $0x48] sm:$0xe] }
  0x39   : > { %912 = vrot.lane.b32.xlu1 %v8919_v0, %s10229_s15  ;;  %v2588_v12 = vrot.slane %v2587_v1, 4  ;;  %v10422_v13 = vsel %vm10288_vm2, %v9128_v62, %v2106_v3  ;;  %v2108_v14 = vrot.slane %v2106_v3, 4  ;;  %v562_v15 = vshrl.u32 %v435_v57, 16  ;;  %v438_v62 = vld [vmem:[%s10298_s12 + $0x34] sm:$0xf]  ;;  %9735 = vmatpush3.bf16.msra.mxu0 %v10104_v56 }
  0x3a   : > { %v2598_v18 = vrot.slane %v2597_v6, 4  ;;  %v551_v19 = vrot.slane %v549_v7, 4  ;;  %v554_v20 = vrot.slane %v552_v8, 5  ;;  %v560_v21 = vrot.slane %v558_v10, 5 }
  0x3b   : > { %v2593_v23 = vsel %vm10348_vm5, %v2588_v12, %v2592_v55  ;;  %v2110_v24 = vsel %vm10288_vm2, %v2108_v14, %v2109_v4  ;;  %v564_v25 = vrot.slane %v562_v15, 4  ;;  %v568_v26 = vshll.u32 %v436_v5, 16  ;;  %v9091_v55 = vld [vmem:[%s10298_s12 + $0x44] sm:$0x1]  ;;  %v439_v4 = vld [vmem:[%s10298_s12 + $0x38] sm:$0x1] }
  0x3c   : > { %2424 = vrot.lane.b32.xlu0 %v10081_v59, %s10227_s13  ;;  %v2603_v29 = vsel %vm10348_vm5, %v2598_v18, %v2602_v61  ;;  %v9144_v31 = vcombine.low %v10422_v13, %v2110_v24  ;;  %v555_v32 = vor.u32 %v554_v20, %v551_v19  ;;  %v8936_v33 = vrot.slane %v982_v16, 9  ;;  %v437_v61 = vld [vmem:[%s10298_s12 + $0x30] sm:$0xf]  ;;  %v10105_v5 = vld [vmem:[%s13202_s1 + $0x60] sm:$0xff]  }
  0x3d   : > { %1236 = vrot.lane.b32.xlu1 %v8951_v53, %s10227_s13  ;;  %v9255_v36 = vcombine.low %v2593_v23, %v2603_v29  ;;  %v565_v37 = vor.u32 %v564_v25, %v560_v21  ;;  %v570_v38 = vrot.slane %v568_v26, 5  ;;  %v1095_v39 = vrot.slane %v983_v22, 5  ;;  %v985_v16 = vld [vmem:[%s10298_s12 + $0x30] sm:$0xe]  ;;  %9736 = vmatprep.subr.bf16.mxu0 %v10105_v5  ;;  %v10107_v22 = vld [vmem:[%s13202_s1 + $0x20] sm:$0xff]   ;;  %v10085_v5 = vld [vmem:[%s10298_s12 + $0x48] sm:$0xff]  }
  0x3e   : > { %v556_v40 = vrot.slane %v555_v32, 4  ;;  %v1098_v41 = vrot.slane %v984_v27, 5  ;;  %v2605_v42 = vshrl.u32 %v9214_v28, 16  ;;  %v2608_v43 = vshll.u32 %v9214_v28, 16  ;;  %v987_v27 = vld [vmem:[%s10298_s12 + $0x38] sm:$0x1]  ;;  %9737 = vmatpush3.bf16.msra.mxu0 %v10107_v22 }
  0x3f   : > { %v566_v45 = vrot.slane %v565_v37, 4  ;;  %v10446_v46 = vsel %vm10288_vm2, %v8936_v33, %v1095_v39  ;;  %v1097_v47 = vrot.slane %v1095_v39, 4  ;;  %v2614_v48 = vshll.u32 %v9215_v34, 16  ;;  %v10084_v28 = vld [vmem:[%s10298_s12 + $0x30] sm:$0xff]   ;;  %v9217_v33 = vld [vmem:[%s10298_s12 + $0x48] sm:$0xf] }
  0x40   : > { %2968 = vrot.lane.b32.xlu0 %v9255_v36, %s10228_s14  ;;  %v561_v51 = vsel %vm10348_vm5, %v556_v40, %v560_v21  ;;  %v2607_v52 = vrot.slane %v2605_v42, 4  ;;  %v2610_v53 = vrot.slane %v2608_v43, 5  ;;  %v2618_v54 = vshrl.u32 %v9215_v34, 16  ;;  %v986_v21 = vld [vmem:[%s10298_s12 + $0x34] sm:$0xf]  ;;  %v10109_v34 = vld [vmem:[%s13202_s1 + $0x68] sm:$0xff]  }
  0x41   : > { %1414 = vrot.lane.b32.xlu1 %v10082_v30, %s10228_s14  ;;  %v571_v57 = vsel %vm10348_vm5, %v566_v45, %v570_v38  ;;  %v1099_v58 = vsel %vm10288_vm2, %v1097_v47, %v1098_v41  ;;  %v2616_v59 = vrot.slane %v2614_v48, 5  ;;  %v2624_v60 = vshll.u32 %v9216_v35, 16  ;;  %v9218_v39 = vld [vmem:[%s10298_s12 + $0x4c] sm:$0xf]  ;;  %v9219_v40 = vld [vmem:[%s10298_s12 + $0x50] sm:$0x1]  ;;  %9738 = vmatprep.subr.bf16.mxu0 %v10109_v34 }
  0x42   : > { %v8920_v63 = vcombine.low %v561_v51, %v571_v57  ;;  %v8952_v0 = vcombine.low %v10446_v46, %v1099_v58  ;;  %v2611_v1 = vor.u32 %v2610_v53, %v2607_v52  ;;  %v2620_v3 = vrot.slane %v2618_v54, 4  ;;  %v10110_v41 = vld [vmem:[%s13202_s1 + $0x28] sm:$0xff]  }
  0x43   : > { %v2626_v6 = vrot.slane %v2624_v60, 5  ;;  %v9129_v7 = vrot.slane %v9089_v44, 9  ;;  %v2113_v8 = vrot.slane %v9090_v49, 5  ;;  %v2116_v10 = vrot.slane %v9091_v55, 5  ;;  %v9093_v55 = vld [vmem:[%s10298_s12 + $0x4c] sm:$0xf]  ;;  %9739 = vmatpush3.bf16.msra.mxu0 %v10110_v41 }
  0x44   : > { %2249 = vrot.lane.b32.xlu0 %v9144_v31, %s10229_s15  ;;  %v2612_v12 = vrot.slane %v2611_v1, 4  ;;  %v2621_v13 = vor.u32 %v2620_v3, %v2616_v59  ;;  %v573_v14 = vshrl.u32 %v437_v61, 16  ;;  %v576_v15 = vshll.u32 %v437_v61, 16  ;;  %v9094_v60 = vld [vmem:[%s10298_s12 + $0x50] sm:$0x1]  ;;  %v10086_v41 = vld [vmem:[%s10298_s12 + $0x3c] sm:$0xff]  }
  0x45   : > { %914 = vrot.lane.b32.xlu1 %v8920_v63, %s10229_s15  ;;  %v10477_v17 = vsel %vm10288_vm2, %v9129_v7, %v2113_v8  ;;  %v2115_v18 = vrot.slane %v2113_v8, 4  ;;  %v582_v19 = vshll.u32 %v438_v62, 16  ;;  %v586_v20 = vshrl.u32 %v438_v62, 16  ;;  %v440_v1 = vld [vmem:[%s10298_s12 + $0x3c] sm:$0xf] }
  0x46   : > { %v2617_v23 = vsel %vm10348_vm5, %v2612_v12, %v2616_v59  ;;  %v2622_v24 = vrot.slane %v2621_v13, 4  ;;  %v575_v25 = vrot.slane %v573_v14, 4  ;;  %v578_v26 = vrot.slane %v576_v15, 5  ;;  %v441_v3 = vld [vmem:[%s10298_s12 + $0x40] sm:$0xf] }
  0x47   : > { %v2117_v29 = vsel %vm10288_vm2, %v2115_v18, %v2116_v10  ;;  %v584_v30 = vrot.slane %v582_v19, 5  ;;  %v588_v31 = vrot.slane %v586_v20, 4  ;;  %v592_v32 = vshll.u32 %v439_v4, 16  ;;  %v442_v10 = vld [vmem:[%s10298_s12 + $0x44] sm:$0x1] }
  0x48   : > { %2426 = vrot.lane.b32.xlu0 %v10083_v11, %s10227_s13  ;;  %v2627_v35 = vsel %vm10348_vm5, %v2622_v24, %v2626_v6  ;;  %v9145_v36 = vcombine.low %v10477_v17, %v2117_v29  ;;  %v579_v37 = vor.u32 %v578_v26, %v575_v25  ;;  %v8937_v38 = vrot.slane %v985_v16, 9  ;;  %v10113_v11 = vld [vmem:[%s13202_s1 + $0x80] sm:$0xff]   ;;  %v988_v20 = vld [vmem:[%s10298_s12 + $0x3c] sm:$0xe] }
  0x49   : > { %1238 = vrot.lane.b32.xlu1 %v8952_v0, %s10227_s13  ;;  %v9256_v42 = vcombine.low %v2617_v23, %v2627_v35  ;;  %v589_v43 = vor.u32 %v588_v31, %v584_v30  ;;  %v594_v44 = vrot.slane %v592_v32, 5  ;;  %v1102_v45 = vrot.slane %v986_v21, 5  ;;  %9988 = vmatprep.subr.bf16.mxu1 %v10113_v11  ;;  %v10114_v21 = vld [vmem:[%s13202_s1 + $0x70] sm:$0xff]   ;;  %v989_v26 = vld [vmem:[%s10298_s12 + $0x40] sm:$0xf] }
  0x4a   : > { %v580_v46 = vrot.slane %v579_v37, 4  ;;  %v1105_v47 = vrot.slane %v987_v27, 5  ;;  %v2629_v48 = vshrl.u32 %v9217_v33, 16  ;;  %v2632_v49 = vshll.u32 %v9217_v33, 16  ;;  %9989 = vmatpush3.bf16.msra.mxu1 %v10113_v11  ;;  %v10115_v27 = vld [vmem:[%s13202_s1 + $0x30] sm:$0xff]   ;;  %9740 = vmatprep.subr.bf16.mxu0 %v10114_v21  ;;  %v10116_v33 = vld [vmem:[%s13202_s1 + $0x88] sm:$0xff]  }
  0x4b   : > { %v590_v51 = vrot.slane %v589_v43, 4  ;;  %v10506_v52 = vsel %vm10288_vm2, %v8937_v38, %v1102_v45  ;;  %v1104_v53 = vrot.slane %v1102_v45, 4  ;;  %v2638_v54 = vshll.u32 %v9218_v39, 16  ;;  %v990_v32 = vld [vmem:[%s10298_s12 + $0x44] sm:$0x1]  ;;  %9741 = vmatpush3.bf16.msra.mxu0 %v10115_v27  ;;  %9990 = vmatprep.subr.bf16.mxu1 %v10116_v33 }
  0x4c   : > { %2970 = vrot.lane.b32.xlu0 %v9256_v42, %s10228_s14  ;;  %v585_v56 = vsel %vm10348_vm5, %v580_v46, %v584_v30  ;;  %v2631_v57 = vrot.slane %v2629_v48, 4  ;;  %v2634_v58 = vrot.slane %v2632_v49, 5  ;;  %v2642_v59 = vshrl.u32 %v9218_v39, 16  ;;  %v9220_v38 = vld [vmem:[%s10298_s12 + $0x54] sm:$0xf]  ;;  %v10117_v39 = vld [vmem:[%s13202_s1 + $0x78] sm:$0xff]  }
  0x4d   : > { %1416 = vrot.lane.b32.xlu1 %v10084_v28, %s10228_s14  ;;  %v595_v61 = vsel %vm10348_vm5, %v590_v51, %v594_v44  ;;  %v1106_v62 = vsel %vm10288_vm2, %v1104_v53, %v1105_v47  ;;  %v2640_v63 = vrot.slane %v2638_v54, 5  ;;  %v2648_v0 = vshll.u32 %v9219_v40, 16  ;;  %v9221_v45 = vld [vmem:[%s10298_s12 + $0x58] sm:$0xf]  ;;  %v9222_v46 = vld [vmem:[%s10298_s12 + $0x5c] sm:$0x1]  ;;  %9742 = vmatprep.subr.bf16.mxu0 %v10117_v39 }
  0x4e   : > { %v8921_v4 = vcombine.low %v585_v56, %v595_v61  ;;  %v8953_v6 = vcombine.low %v10506_v52, %v1106_v62  ;;  %v2635_v7 = vor.u32 %v2634_v58, %v2631_v57  ;;  %v2644_v8 = vrot.slane %v2642_v59, 4  ;;  %9991 = vmatpush3.bf16.msra.mxu1 %v10116_v33  ;;  %v10119_v61 = vld [vmem:[%s13202_s1 + $0x38] sm:$0xff]  }
  0x4f   : > { %v2650_v12 = vrot.slane %v2648_v0, 5  ;;  %v9130_v13 = vrot.slane %v9092_v50, 9  ;;  %v2120_v14 = vrot.slane %v9093_v55, 5  ;;  %v2123_v15 = vrot.slane %v9094_v60, 5  ;;  %v9095_v55 = vld [vmem:[%s10298_s12 + $0x54] sm:$0xe]  ;;  %9743 = vmatpush3.bf16.msra.mxu0 %v10119_v61 }
  0x50   : > { %2251 = vrot.lane.b32.xlu0 %v9145_v36, %s10229_s15  ;;  %v2636_v16 = vrot.slane %v2635_v7, 4  ;;  %v2645_v17 = vor.u32 %v2644_v8, %v2640_v63  ;;  %v597_v18 = vshrl.u32 %v440_v1, 16  ;;  %v600_v19 = vshll.u32 %v440_v1, 16  ;;  %v9096_v60 = vld [vmem:[%s10298_s12 + $0x58] sm:$0xf] }
  0x51   : > { %916 = vrot.lane.b32.xlu1 %v8921_v4, %s10229_s15  ;;  %v10534_v22 = vsel %vm10288_vm2, %v9130_v13, %v2120_v14  ;;  %v2122_v23 = vrot.slane %v2120_v14, 4  ;;  %v606_v24 = vshll.u32 %v441_v3, 16  ;;  %v610_v25 = vshrl.u32 %v441_v3, 16  ;;  %v9097_v3 = vld [vmem:[%s10298_s12 + $0x5c] sm:$0x1] }
  0x52   : > { %v2641_v28 = vsel %vm10348_vm5, %v2636_v16, %v2640_v63  ;;  %v2646_v29 = vrot.slane %v2645_v17, 4  ;;  %v599_v30 = vrot.slane %v597_v18, 4  ;;  %v602_v31 = vrot.slane %v600_v19, 5  ;;  %v443_v8 = vld [vmem:[%s10298_s12 + $0x48] sm:$0xf] }
  0x53   : > { %v2124_v34 = vsel %vm10288_vm2, %v2122_v23, %v2123_v15  ;;  %v608_v35 = vrot.slane %v606_v24, 5  ;;  %v612_v36 = vrot.slane %v610_v25, 4  ;;  %v616_v37 = vshll.u32 %v442_v10, 16  ;;  %v444_v10 = vld [vmem:[%s10298_s12 + $0x4c] sm:$0xf] }
  0x54   : > { %2428 = vrot.lane.b32.xlu0 %v10085_v5, %s10227_s13  ;;  %v2651_v40 = vsel %vm10348_vm5, %v2646_v29, %v2650_v12  ;;  %v9146_v42 = vcombine.low %v10534_v22, %v2124_v34  ;;  %v603_v43 = vor.u32 %v602_v31, %v599_v30  ;;  %v8938_v44 = vrot.slane %v988_v20, 9  ;;  %v445_v15 = vld [vmem:[%s10298_s12 + $0x50] sm:$0x1]  ;;  %v10087_v20 = vld [vmem:[%s10298_s12 + $0x54] sm:$0xff]   ;;  %v991_v25 = vld [vmem:[%s10298_s12 + $0x48] sm:$0xe] }
  0x55   : > { %1240 = vrot.lane.b32.xlu1 %v8953_v6, %s10227_s13  ;;  %v9257_v47 = vcombine.low %v2641_v28, %v2651_v40  ;;  %v613_v48 = vor.u32 %v612_v36, %v608_v35  ;;  %v618_v49 = vrot.slane %v616_v37, 5  ;;  %v1109_v50 = vrot.slane %v989_v26, 5  ;;  %v992_v30 = vld [vmem:[%s10298_s12 + $0x4c] sm:$0xf]  ;;  %v9223_v40 = vld [vmem:[%s10298_s12 + $0x60] sm:$0xf] }
  0x56   : > { %v604_v51 = vrot.slane %v603_v43, 4  ;;  %v1112_v52 = vrot.slane %v990_v32, 5  ;;  %v2653_v53 = vshrl.u32 %v9220_v38, 16  ;;  %v2656_v54 = vshll.u32 %v9220_v38, 16  ;;  %v9099_v61 = vld [vmem:[%s10298_s12 + $0x64] sm:$0xf] }
  0x57   : > { %v614_v56 = vrot.slane %v613_v48, 4  ;;  %v1110_v57 = vsel %vm10288_vm2, %v8938_v44, %v1109_v50  ;;  %v1111_v58 = vrot.slane %v1109_v50, 4  ;;  %v2662_v59 = vshll.u32 %v9221_v45, 16 }
  0x58   : > { %2972 = vrot.lane.b32.xlu0 %v9257_v47, %s10228_s14  ;;  %v609_v62 = vsel %vm10348_vm5, %v604_v51, %v608_v35  ;;  %v2655_v63 = vrot.slane %v2653_v53, 4  ;;  %v2658_v0 = vrot.slane %v2656_v54, 5  ;;  %v2666_v1 = vshrl.u32 %v9221_v45, 16  ;;  %v993_v35 = vld [vmem:[%s10298_s12 + $0x50] sm:$0x1] }
  0x59   : > { %1418 = vrot.lane.b32.xlu1 %v10086_v41, %s10228_s14  ;;  %v619_v4 = vsel %vm10348_vm5, %v614_v56, %v618_v49  ;;  %v1113_v5 = vsel %vm10288_vm2, %v1111_v58, %v1112_v52  ;;  %v2664_v6 = vrot.slane %v2662_v59, 5  ;;  %v2672_v7 = vshll.u32 %v9222_v46, 16  ;;  %v9224_v46 = vld [vmem:[%s10298_s12 + $0x64] sm:$0xf]  ;;  %v9225_v47 = vld [vmem:[%s10298_s12 + $0x68] sm:$0x1] }
  0x5a   : > { %v8922_v11 = vcombine.low %v609_v62, %v619_v4  ;;  %v8954_v12 = vcombine.low %v1110_v57, %v1113_v5  ;;  %v2659_v13 = vor.u32 %v2658_v0, %v2655_v63  ;;  %v2668_v14 = vrot.slane %v2666_v1, 4  ;;  %v9098_v56 = vld [vmem:[%s10298_s12 + $0x60] sm:$0xe] }
  0x5b   : > { %v2674_v16 = vrot.slane %v2672_v7, 5  ;;  %v9131_v17 = vrot.slane %v9095_v55, 9  ;;  %v2127_v18 = vrot.slane %v9096_v60, 5  ;;  %v2130_v19 = vrot.slane %v9097_v3, 5  ;;  %v9100_v3 = vld [vmem:[%s10298_s12 + $0x68] sm:$0x1] }
  0x5c   : > { %2253 = vrot.lane.b32.xlu0 %v9146_v42, %s10229_s15  ;;  %v2660_v21 = vrot.slane %v2659_v13, 4  ;;  %v2669_v22 = vor.u32 %v2668_v14, %v2664_v6  ;;  %v621_v23 = vshrl.u32 %v443_v8, 16  ;;  %v624_v24 = vshll.u32 %v443_v8, 16  ;;  %v10088_v42 = vld [vmem:[%s10298_s12 + $0x48] sm:$0xff]   ;;  %v446_v8 = vld [vmem:[%s10298_s12 + $0x54] sm:$0xf] }
  0x5d   : > { %918 = vrot.lane.b32.xlu1 %v8922_v11, %s10229_s15  ;;  %v2128_v26 = vsel %vm10288_vm2, %v9131_v17, %v2127_v18  ;;  %v2129_v27 = vrot.slane %v2127_v18, 4  ;;  %v630_v28 = vshll.u32 %v444_v10, 16  ;;  %v634_v29 = vshrl.u32 %v444_v10, 16  ;;  %v447_v10 = vld [vmem:[%s10298_s12 + $0x58] sm:$0xf] }
  0x5e   : > { %v2665_v31 = vsel %vm10348_vm5, %v2660_v21, %v2664_v6  ;;  %v2670_v32 = vrot.slane %v2669_v22, 4  ;;  %v623_v33 = vrot.slane %v621_v23, 4  ;;  %v626_v34 = vrot.slane %v624_v24, 5 }
  0x5f   : > { %v2131_v36 = vsel %vm10288_vm2, %v2129_v27, %v2130_v19  ;;  %v632_v37 = vrot.slane %v630_v28, 5  ;;  %v636_v38 = vrot.slane %v634_v29, 4  ;;  %v640_v39 = vshll.u32 %v445_v15, 16  ;;  %v448_v15 = vld [vmem:[%s10298_s12 + $0x5c] sm:$0x1] }
  0x60   : > { %2430 = vrot.lane.b32.xlu0 %v10087_v20, %s10227_s13  ;;  %v2675_v41 = vsel %vm10348_vm5, %v2670_v32, %v2674_v16  ;;  %v9147_v43 = vcombine.low %v2128_v26, %v2131_v36  ;;  %v627_v44 = vor.u32 %v626_v34, %v623_v33  ;;  %v8939_v45 = vrot.slane %v991_v25, 9  ;;  %v10089_v20 = vld [vmem:[%s10298_s12 + $0x60] sm:$0xff]   ;;  %v994_v25 = vld [vmem:[%s10298_s12 + $0x54] sm:$0xe] }
  0x61   : > { %1242 = vrot.lane.b32.xlu1 %v8954_v12, %s10227_s13  ;;  %v9258_v48 = vcombine.low %v2665_v31, %v2675_v41  ;;  %v637_v49 = vor.u32 %v636_v38, %v632_v37  ;;  %v642_v50 = vrot.slane %v640_v39, 5  ;;  %v1116_v51 = vrot.slane %v992_v30, 5  ;;  %v995_v30 = vld [vmem:[%s10298_s12 + $0x58] sm:$0xf] }
  0x62   : > { %v628_v52 = vrot.slane %v627_v44, 4  ;;  %v1119_v53 = vrot.slane %v993_v35, 5  ;;  %v2677_v54 = vshrl.u32 %v9223_v40, 16  ;;  %v2680_v55 = vshll.u32 %v9223_v40, 16  ;;  %v996_v35 = vld [vmem:[%s10298_s12 + $0x5c] sm:$0x1] }
  0x63   : > { %v638_v57 = vrot.slane %v637_v49, 4  ;;  %v1117_v58 = vsel %vm10288_vm2, %v8939_v45, %v1116_v51  ;;  %v1118_v59 = vrot.slane %v1116_v51, 4  ;;  %v2686_v60 = vshll.u32 %v9224_v46, 16  ;;  %v9226_v40 = vld [vmem:[%s10298_s12 + $0x6c] sm:$0xf] }
  0x64   : > { %2974 = vrot.lane.b32.xlu0 %v9258_v48, %s10228_s14  ;;  %v633_v62 = vsel %vm10348_vm5, %v628_v52, %v632_v37  ;;  %v2679_v63 = vrot.slane %v2677_v54, 4  ;;  %v2682_v0 = vrot.slane %v2680_v55, 5  ;;  %v2690_v1 = vshrl.u32 %v9224_v46, 16  ;;  %v9227_v46 = vld [vmem:[%s10298_s12 + $0x70] sm:$0xf] }
  0x65   : > { %1420 = vrot.lane.b32.xlu1 %v10088_v42, %s10228_s14  ;;  %v643_v4 = vsel %vm10348_vm5, %v638_v57, %v642_v50  ;;  %v1120_v5 = vsel %vm10288_vm2, %v1118_v59, %v1119_v53  ;;  %v2688_v6 = vrot.slane %v2686_v60, 5  ;;  %v2696_v7 = vshll.u32 %v9225_v47, 16  ;;  %v10090_v42 = vld [vmem:[%s10298_s12 + $0x54] sm:$0xff]  }
  0x66   : > { %v8923_v11 = vcombine.low %v633_v62, %v643_v4  ;;  %v8955_v12 = vcombine.low %v1117_v58, %v1120_v5  ;;  %v2683_v13 = vor.u32 %v2682_v0, %v2679_v63  ;;  %v2692_v14 = vrot.slane %v2690_v1, 4  ;;  %v9228_v47 = vld [vmem:[%s10298_s12 + $0x74] sm:$0x1] }
  0x67   : > { %v2698_v16 = vrot.slane %v2696_v7, 5  ;;  %v9132_v17 = vrot.slane %v9098_v56, 9  ;;  %v2134_v18 = vrot.slane %v9099_v61, 5  ;;  %v2137_v19 = vrot.slane %v9100_v3, 5  ;;  %v9101_v56 = vld [vmem:[%s10298_s12 + $0x6c] sm:$0xe] }
  0x68   : > { %2255 = vrot.lane.b32.xlu0 %v9147_v43, %s10229_s15  ;;  %v2684_v21 = vrot.slane %v2683_v13, 4  ;;  %v2693_v22 = vor.u32 %v2692_v14, %v2688_v6  ;;  %v645_v23 = vshrl.u32 %v446_v8, 16  ;;  %v648_v24 = vshll.u32 %v446_v8, 16  ;;  %v9102_v61 = vld [vmem:[%s10298_s12 + $0x70] sm:$0xf] }
  0x69   : > { %920 = vrot.lane.b32.xlu1 %v8923_v11, %s10229_s15  ;;  %v2135_v26 = vsel %vm10288_vm2, %v9132_v17, %v2134_v18  ;;  %v2136_v27 = vrot.slane %v2134_v18, 4  ;;  %v654_v28 = vshll.u32 %v447_v10, 16  ;;  %v658_v29 = vshrl.u32 %v447_v10, 16  ;;  %v9103_v3 = vld [vmem:[%s10298_s12 + $0x74] sm:$0x1] }
  0x6a   : > { %v2689_v31 = vsel %vm10348_vm5, %v2684_v21, %v2688_v6  ;;  %v2694_v32 = vrot.slane %v2693_v22, 4  ;;  %v647_v33 = vrot.slane %v645_v23, 4  ;;  %v650_v34 = vrot.slane %v648_v24, 5  ;;  %v449_v8 = vld [vmem:[%s10298_s12 + $0x60] sm:$0xf] }
  0x6b   : > { %v2138_v36 = vsel %vm10288_vm2, %v2136_v27, %v2137_v19  ;;  %v656_v37 = vrot.slane %v654_v28, 5  ;;  %v660_v38 = vrot.slane %v658_v29, 4  ;;  %v664_v39 = vshll.u32 %v448_v15, 16  ;;  %v450_v10 = vld [vmem:[%s10298_s12 + $0x64] sm:$0xf] }
  0x6c   : > { %2432 = vrot.lane.b32.xlu0 %v10089_v20, %s10227_s13  ;;  %v2699_v41 = vsel %vm10348_vm5, %v2694_v32, %v2698_v16  ;;  %v9148_v43 = vcombine.low %v2135_v26, %v2138_v36  ;;  %v651_v44 = vor.u32 %v650_v34, %v647_v33  ;;  %v8940_v45 = vrot.slane %v994_v25, 9  ;;  %v451_v15 = vld [vmem:[%s10298_s12 + $0x68] sm:$0x1]  ;;  %v10091_v20 = vld [vmem:[%s10298_s12 + $0x6c] sm:$0xff]   ;;  %v997_v25 = vld [vmem:[%s10298_s12 + $0x60] sm:$0xe] }
  0x6d   : > { %1244 = vrot.lane.b32.xlu1 %v8955_v12, %s10227_s13  ;;  %v9259_v48 = vcombine.low %v2689_v31, %v2699_v41  ;;  %v661_v49 = vor.u32 %v660_v38, %v656_v37  ;;  %v666_v50 = vrot.slane %v664_v39, 5  ;;  %v1123_v51 = vrot.slane %v995_v30, 5  ;;  %v998_v30 = vld [vmem:[%s10298_s12 + $0x64] sm:$0xf] }
  0x6e   : > { %v652_v52 = vrot.slane %v651_v44, 4  ;;  %v1126_v53 = vrot.slane %v996_v35, 5  ;;  %v2701_v54 = vshrl.u32 %v9226_v40, 16  ;;  %v2704_v55 = vshll.u32 %v9226_v40, 16  ;;  %v999_v35 = vld [vmem:[%s10298_s12 + $0x68] sm:$0x1] }
  0x6f   : > { %v662_v57 = vrot.slane %v661_v49, 4  ;;  %v1124_v58 = vsel %vm10288_vm2, %v8940_v45, %v1123_v51  ;;  %v1125_v59 = vrot.slane %v1123_v51, 4  ;;  %v2710_v60 = vshll.u32 %v9227_v46, 16  ;;  %v9229_v40 = vld [vmem:[%s10298_s12 + $0x78] sm:$0xf] }
  0x70   : > { %2976 = vrot.lane.b32.xlu0 %v9259_v48, %s10228_s14  ;;  %v657_v62 = vsel %vm10348_vm5, %v652_v52, %v656_v37  ;;  %v2703_v63 = vrot.slane %v2701_v54, 4  ;;  %v2706_v0 = vrot.slane %v2704_v55, 5  ;;  %v2714_v1 = vshrl.u32 %v9227_v46, 16  ;;  %v9230_v46 = vld [vmem:[%s10298_s12 + $0x7c] sm:$0xf] }
  0x71   : > { %1422 = vrot.lane.b32.xlu1 %v10090_v42, %s10228_s14  ;;  %v667_v4 = vsel %vm10348_vm5, %v662_v57, %v666_v50  ;;  %v1127_v5 = vsel %vm10288_vm2, %v1125_v59, %v1126_v53  ;;  %v2712_v6 = vrot.slane %v2710_v60, 5  ;;  %v2720_v7 = vshll.u32 %v9228_v47, 16  ;;  %v10092_v42 = vld [vmem:[%s10298_s12 + $0x60] sm:$0xff]  }
  0x72   : > { %v8924_v11 = vcombine.low %v657_v62, %v667_v4  ;;  %v8956_v12 = vcombine.low %v1124_v58, %v1127_v5  ;;  %v2707_v13 = vor.u32 %v2706_v0, %v2703_v63  ;;  %v2716_v14 = vrot.slane %v2714_v1, 4  ;;  %v9231_v47 = vld [vmem:[%s10298_s12 + $0x80] sm:$0x1] }
  0x73   : > { %v2722_v16 = vrot.slane %v2720_v7, 5  ;;  %v9133_v17 = vrot.slane %v9101_v56, 9  ;;  %v2141_v18 = vrot.slane %v9102_v61, 5  ;;  %v2144_v19 = vrot.slane %v9103_v3, 5  ;;  %v9104_v56 = vld [vmem:[%s10298_s12 + $0x78] sm:$0xe] }
  0x74   : > { %2257 = vrot.lane.b32.xlu0 %v9148_v43, %s10229_s15  ;;  %v2708_v21 = vrot.slane %v2707_v13, 4  ;;  %v2717_v22 = vor.u32 %v2716_v14, %v2712_v6  ;;  %v669_v23 = vshrl.u32 %v449_v8, 16  ;;  %v672_v24 = vshll.u32 %v449_v8, 16  ;;  %v9105_v61 = vld [vmem:[%s10298_s12 + $0x7c] sm:$0xf] }
  0x75   : > { %922 = vrot.lane.b32.xlu1 %v8924_v11, %s10229_s15  ;;  %v2142_v26 = vsel %vm10288_vm2, %v9133_v17, %v2141_v18  ;;  %v2143_v27 = vrot.slane %v2141_v18, 4  ;;  %v678_v28 = vshll.u32 %v450_v10, 16  ;;  %v682_v29 = vshrl.u32 %v450_v10, 16  ;;  %v9106_v3 = vld [vmem:[%s10298_s12 + $0x80] sm:$0x1] }
  0x76   : > { %v2713_v31 = vsel %vm10348_vm5, %v2708_v21, %v2712_v6  ;;  %v2718_v32 = vrot.slane %v2717_v22, 4  ;;  %v671_v33 = vrot.slane %v669_v23, 4  ;;  %v674_v34 = vrot.slane %v672_v24, 5  ;;  %v452_v8 = vld [vmem:[%s10298_s12 + $0x6c] sm:$0xf]  ;;  %v10093_v21 = vld [vmem:[%s10298_s12 + $0x78] sm:$0xff]  }
  0x77   : > { %v2145_v36 = vsel %vm10288_vm2, %v2143_v27, %v2144_v19  ;;  %v680_v37 = vrot.slane %v678_v28, 5  ;;  %v684_v38 = vrot.slane %v682_v29, 4  ;;  %v688_v39 = vshll.u32 %v451_v15, 16  ;;  %v453_v10 = vld [vmem:[%s10298_s12 + $0x70] sm:$0xf] }
  0x78   : > { %2434 = vrot.lane.b32.xlu0 %v10091_v20, %s10227_s13  ;;  %v2723_v41 = vsel %vm10348_vm5, %v2718_v32, %v2722_v16  ;;  %v9149_v43 = vcombine.low %v2142_v26, %v2145_v36  ;;  %v675_v44 = vor.u32 %v674_v34, %v671_v33  ;;  %v8941_v45 = vrot.slane %v997_v25, 9  ;;  %v454_v15 = vld [vmem:[%s10298_s12 + $0x74] sm:$0x1]  ;;  %v1000_v20 = vld [vmem:[%s10298_s12 + $0x6c] sm:$0xe] }
  0x79   : > { %1246 = vrot.lane.b32.xlu1 %v8956_v12, %s10227_s13  ;;  %v9260_v48 = vcombine.low %v2713_v31, %v2723_v41  ;;  %v685_v49 = vor.u32 %v684_v38, %v680_v37  ;;  %v690_v50 = vrot.slane %v688_v39, 5  ;;  %v1130_v51 = vrot.slane %v998_v30, 5  ;;  %v1001_v26 = vld [vmem:[%s10298_s12 + $0x70] sm:$0xf]  ;;  %v1002_v31 = vld [vmem:[%s10298_s12 + $0x74] sm:$0x1] }
  0x7a   : > { %v676_v52 = vrot.slane %v675_v44, 4  ;;  %v1133_v53 = vrot.slane %v999_v35, 5  ;;  %v2725_v54 = vshrl.u32 %v9229_v40, 16  ;;  %v2728_v55 = vshll.u32 %v9229_v40, 16  ;;  %v9232_v36 = vld [vmem:[%s10298_s12 + $0x84] sm:$0xf] }
  0x7b   : > { %v686_v57 = vrot.slane %v685_v49, 4  ;;  %v1131_v58 = vsel %vm10288_vm2, %v8941_v45, %v1130_v51  ;;  %v1132_v59 = vrot.slane %v1130_v51, 4  ;;  %v2734_v60 = vshll.u32 %v9230_v46, 16  ;;  %v9233_v41 = vld [vmem:[%s10298_s12 + $0x88] sm:$0xf] }
  0x7c   : > { %2978 = vrot.lane.b32.xlu0 %v9260_v48, %s10228_s14  ;;  %v681_v62 = vsel %vm10348_vm5, %v676_v52, %v680_v37  ;;  %v2727_v63 = vrot.slane %v2725_v54, 4  ;;  %v2730_v0 = vrot.slane %v2728_v55, 5  ;;  %v2738_v1 = vshrl.u32 %v9230_v46, 16  ;;  %v10094_v48 = vld [vmem:[%s10298_s12 + $0x6c] sm:$0xff]  }
  0x7d   : > { %1424 = vrot.lane.b32.xlu1 %v10092_v42, %s10228_s14  ;;  %v691_v4 = vsel %vm10348_vm5, %v686_v57, %v690_v50  ;;  %v1134_v5 = vsel %vm10288_vm2, %v1132_v59, %v1133_v53  ;;  %v2736_v6 = vrot.slane %v2734_v60, 5  ;;  %v2744_v7 = vshll.u32 %v9231_v47, 16  ;;  %v9234_v52 = vld [vmem:[%s10298_s12 + $0x8c] sm:$0x1]  ;;  %v10108_v59 = vld [vmem:[%s10298_s12] sm:$0xff]  }
  0x7e   : > { %v8925_v11 = vcombine.low %v681_v62, %v691_v4  ;;  %v8957_v12 = vcombine.low %v1131_v58, %v1134_v5  ;;  %v2731_v13 = vor.u32 %v2730_v0, %v2727_v63  ;;  %v2740_v14 = vrot.slane %v2738_v1, 4  ;;  %v9013_v58 = vld [vmem:[%s10298_s12 + $0xc] sm:$0xf]  ;;  %v10123_v62 = vld [vmem:[%s10298_s12 + $0x24] sm:$0xff]   ;;  %v10126_v63 = vld [vmem:[%s10298_s12 + $0x30] sm:$0xff]   ;;  %409 = vst.msk [vmem:[#allocation2] sm:$0xff] %vm408_vm6, %v10108_v59 }
  0x7f   : > { %v2746_v16 = vrot.slane %v2744_v7, 5  ;;  %v9134_v17 = vrot.slane %v9104_v56, 9  ;;  %v2148_v18 = vrot.slane %v9105_v61, 5  ;;  %v2151_v19 = vrot.slane %v9106_v3, 5  ;;  %v10112_v60 = vld [vmem:[%s10298_s12 + $0xc] sm:$0xff]   ;;  %v10120_v61 = vld [vmem:[%s10298_s12 + $0x18] sm:$0xff]  }
  0x80   : > { %2259 = vrot.lane.b32.xlu0 %v9149_v43, %s10229_s15  ;;  %v2732_v22 = vrot.slane %v2731_v13, 4  ;;  %v2741_v23 = vor.u32 %v2740_v14, %v2736_v6  ;;  %v693_v24 = vshrl.u32 %v452_v8, 16  ;;  %v696_v25 = vshll.u32 %v452_v8, 16  ;;  %v10129_v5 = vld [vmem:[%s10298_s12 + $0x3c] sm:$0xff]   ;;  %410 = vst.msk [vmem:[#allocation2 + $0x18] sm:$0xff] %vm408_vm6, %v10112_v60  ;;  %411 = vst.msk [vmem:[#allocation2 + $0x30] sm:$0xff] %vm408_vm6, %v10120_v61 }
  0x81   : > { %924 = vrot.lane.b32.xlu1 %v8925_v11, %s10229_s15  ;;  %v10694_v27 = vsel %vm10288_vm2, %v9134_v17, %v2148_v18  ;;  %v2150_v28 = vrot.slane %v2148_v18, 4  ;;  %v702_v29 = vshll.u32 %v453_v10, 16  ;;  %v706_v30 = vshrl.u32 %v453_v10, 16  ;;  %v10132_v11 = vld [vmem:[%s10298_s12 + $0x48] sm:$0xff]   ;;  %v9015_v17 = vld [vmem:[%s10298_s12 + $0x14] sm:$0x1] }
  0x82   : > { %v2737_v32 = vsel %vm10348_vm5, %v2732_v22, %v2736_v6  ;;  %v2742_v33 = vrot.slane %v2741_v23, 4  ;;  %v695_v34 = vrot.slane %v693_v24, 4  ;;  %v698_v35 = vrot.slane %v696_v25, 5  ;;  %v9107_v22 = vld [vmem:[%s10298_s12 + $0x84] sm:$0xe]  ;;  %412 = vst.msk [vmem:[#allocation2 + $0x48] sm:$0xff] %vm408_vm6, %v10123_v62 }
  0x83   : > { %v2152_v37 = vsel %vm10288_vm2, %v2150_v28, %v2151_v19  ;;  %v704_v38 = vrot.slane %v702_v29, 5  ;;  %v708_v39 = vrot.slane %v706_v30, 4  ;;  %v712_v40 = vshll.u32 %v454_v15, 16  ;;  %v9108_v23 = vld [vmem:[%s10298_s12 + $0x88] sm:$0xf]  ;;  %413 = vst.msk [vmem:[#allocation2 + $0x60] sm:$0xff] %vm408_vm6, %v10126_v63 }
  0x84   : > { %2436 = vrot.lane.b32.xlu0 %v10093_v21, %s10227_s13  ;;  %v2747_v42 = vsel %vm10348_vm5, %v2742_v33, %v2746_v16  ;;  %v9150_v43 = vcombine.low %v10694_v27, %v2152_v37  ;;  %v699_v44 = vor.u32 %v698_v35, %v695_v34  ;;  %v10707_v45 = vpop.permute.xlu1 %2420  ;;  %v8942_v46 = vrot.slane %v1000_v20, 9  ;;  %v10712_v55 = vpop.permute.xlu0 %2422  ;;  %v9014_v16 = vld [vmem:[%s10298_s12 + $0x10] sm:$0xf]  ;;  %v9109_v27 = vld [vmem:[%s10298_s12 + $0x8c] sm:$0x1]  ;;  %v10098_v28 = vld [vmem:[%s10298_s12 + $0x84] sm:$0xff]  }
  0x85   : > { %1248 = vrot.lane.b32.xlu1 %v8957_v12, %s10227_s13  ;;  %v9261_v47 = vcombine.low %v2737_v32, %v2747_v42  ;;  %v709_v49 = vor.u32 %v708_v39, %v704_v38  ;;  %v714_v50 = vrot.slane %v712_v40, 5  ;;  %v1137_v51 = vrot.slane %v1001_v26, 5  ;;  %v455_v34 = vld [vmem:[%s10298_s12 + $0x78] sm:$0xf]  ;;  %414 = vst.msk [vmem:[#allocation2 + $0x78] sm:$0xff] %vm408_vm6, %v10129_v5  ;;  %415 = vst.msk [vmem:[#allocation2 + $0x90] sm:$0xff] %vm408_vm6, %v10132_v11 }
  0x86   : > { %v700_v53 = vrot.slane %v699_v44, 4  ;;  %v1140_v54 = vrot.slane %v1002_v31, 5  ;;  %v2749_v56 = vshrl.u32 %v9232_v36, 16  ;;  %v2752_v57 = vshll.u32 %v9232_v36, 16  ;;  %v456_v39 = vld [vmem:[%s10298_s12 + $0x7c] sm:$0xf] }
  0x87   : > { %v710_v0 = vrot.slane %v709_v49, 4  ;;  %v10722_v1 = vsel %vm10288_vm2, %v8942_v46, %v1137_v51  ;;  %v1139_v3 = vrot.slane %v1137_v51, 4  ;;  %v2758_v4 = vshll.u32 %v9233_v41, 16  ;;  %v457_v44 = vld [vmem:[%s10298_s12 + $0x80] sm:$0x1]  ;;  %v10102_v46 = vld [vmem:[%s10298_s12 + $0x78] sm:$0xff]  }
  0x88   : > { %2980 = vrot.lane.b32.xlu0 %v9261_v47, %s10228_s14  ;;  %v705_v6 = vsel %vm10348_vm5, %v700_v53, %v704_v38  ;;  %v2751_v7 = vrot.slane %v2749_v56, 4  ;;  %v2754_v8 = vrot.slane %v2752_v57, 5  ;;  %v2762_v10 = vshrl.u32 %v9233_v41, 16  ;;  %v10736_v21 = vpop.permute.xlu1 %1410  ;;  %v9016_v57 = vld [vmem:[%s10298_s12 + $0x18] sm:$0xf] }
  0x89   : > { %1426 = vrot.lane.b32.xlu1 %v10094_v48, %s10228_s14  ;;  %v715_v12 = vsel %vm10348_vm5, %v710_v0, %v714_v50  ;;  %v1141_v13 = vsel %vm10288_vm2, %v1139_v3, %v1140_v54  ;;  %v2760_v14 = vrot.slane %v2758_v4, 5  ;;  %v2768_v15 = vshll.u32 %v9234_v52, 16  ;;  %v9017_v62 = vld [vmem:[%s10298_s12 + $0x1c] sm:$0xf]  ;;  %v10134_v63 = vld [vmem:[%s10298_s12 + $0x54] sm:$0xff]  }
  0x8a   : > { %v8926_v18 = vcombine.low %v705_v6, %v715_v12  ;;  %v2755_v19 = vor.u32 %v2754_v8, %v2751_v7  ;;  %v2764_v20 = vrot.slane %v2762_v10, 4  ;;  %v8958_v24 = vcombine.low %v10722_v1, %v1141_v13  ;;  %v9018_v6 = vld [vmem:[%s10298_s12 + $0x20] sm:$0x1]  ;;  %v1003_v12 = vld [vmem:[%s10298_s12 + $0x78] sm:$0xe]  ;;  %416 = vst.msk [vmem:[#allocation2 + $0xa8] sm:$0xff] %vm408_vm6, %v10134_v63 }
  0x8b   : > { %v2770_v25 = vrot.slane %v2768_v15, 5  ;;  %v1524_v26 = vshrl.u32 %v9013_v58, 16  ;;  %v1527_v32 = vshll.u32 %v9013_v58, 16  ;;  %v1533_v33 = vshll.u32 %v9014_v16, 16 }
  0x8c   : > { %2261 = vrot.lane.b32.xlu0 %v9150_v43, %s10229_s15  ;;  %v2756_v29 = vrot.slane %v2755_v19, 4  ;;  %v2765_v30 = vor.u32 %v2764_v20, %v2760_v14  ;;  %v10744_v31 = vpop.permute.xlu0 %2243  ;;  %v1537_v36 = vshrl.u32 %v9014_v16, 16  ;;  %v1543_v37 = vshll.u32 %v9015_v17, 16  ;;  %v1004_v17 = vld [vmem:[%s10298_s12 + $0x7c] sm:$0xf] }
  0x8d   : > { %926 = vrot.lane.b32.xlu1 %v8926_v18, %s10229_s15  ;;  %v1526_v35 = vrot.slane %v1524_v26, 4  ;;  %v9135_v38 = vrot.slane %v9107_v22, 9  ;;  %v1529_v42 = vrot.slane %v1527_v32, 5  ;;  %v1535_v43 = vrot.slane %v1533_v33, 5  ;;  %v1005_v33 = vld [vmem:[%s10298_s12 + $0x80] sm:$0x1] }
  0x8e   : > { %v2761_v40 = vsel %vm10348_vm5, %v2756_v29, %v2760_v14  ;;  %v2766_v41 = vrot.slane %v2765_v30, 4  ;;  %v1539_v47 = vrot.slane %v1537_v36, 4  ;;  %v1545_v48 = vrot.slane %v1543_v37, 5  ;;  %v10763_v53 = vpop.permute.xlu1 %1232 }
  0x8f   : > { %v2155_v49 = vrot.slane %v9108_v23, 5  ;;  %v2158_v50 = vrot.slane %v9109_v27, 5  ;;  %v1530_v52 = vor.u32 %v1529_v42, %v1526_v35  ;;  %v717_v54 = vshrl.u32 %v455_v34, 16 }
  0x90   : > { %2438 = vrot.lane.b32.xlu0 %v10098_v28, %s10227_s13  ;;  %v2771_v51 = vsel %vm10348_vm5, %v2766_v41, %v2770_v25  ;;  %v720_v56 = vshll.u32 %v455_v34, 16  ;;  %v1540_v59 = vor.u32 %v1539_v47, %v1535_v43  ;;  %v726_v4 = vshll.u32 %v456_v39, 16  ;;  %v10771_v5 = vpop.permute.xlu0 %2245  ;;  %v10135_v34 = vld [vmem:[%s10298_s12 + $0x60] sm:$0xff]   ;;  %v9235_v41 = vld [vmem:[%s10298_s12 + $0x90] sm:$0xf] }
  0x91   : > { %1250 = vrot.lane.b32.xlu1 %v8958_v24, %s10227_s13  ;;  %v9262_v58 = vcombine.low %v2761_v40, %v2771_v51  ;;  %v2156_v60 = vsel %vm10288_vm2, %v9135_v38, %v2155_v49  ;;  %v2157_v61 = vrot.slane %v2155_v49, 4  ;;  %v1531_v0 = vrot.slane %v1530_v52, 4  ;;  %v10106_v38 = vld [vmem:[%s10298_s12 + $0x90] sm:$0xff]   ;;  %417 = vst.msk [vmem:[#allocation2 + $0xc0] sm:$0xff] %vm408_vm6, %v10135_v34 }
  0x92   : > { %v719_v1 = vrot.slane %v717_v54, 4  ;;  %v722_v3 = vrot.slane %v720_v56, 5  ;;  %v1541_v7 = vrot.slane %v1540_v59, 4  ;;  %v730_v10 = vshrl.u32 %v456_v39, 16  ;;  %v1235_v27 = vpop.permute.xlu1 %1234  ;;  %v9236_v47 = vld [vmem:[%s10298_s12 + $0x94] sm:$0xf] }
  0x93   : > { %v2159_v8 = vsel %vm10288_vm2, %v2157_v61, %v2158_v50  ;;  %v736_v11 = vshll.u32 %v457_v44, 16  ;;  %v1536_v13 = vsel %vm10348_vm5, %v1531_v0, %v1535_v43  ;;  %v728_v16 = vrot.slane %v726_v4, 5  ;;  %v9237_v50 = vld [vmem:[%s10298_s12 + $0x98] sm:$0x1]  ;;  %v10136_v51 = vld [vmem:[%s10298_s12 + $0x6c] sm:$0xff]  }
  0x94   : > { %2982 = vrot.lane.b32.xlu0 %v9262_v58, %s10228_s14  ;;  %v9151_v14 = vcombine.low %v2156_v60, %v2159_v8  ;;  %v723_v15 = vor.u32 %v722_v3, %v719_v1  ;;  %v1546_v18 = vsel %vm10348_vm5, %v1541_v7, %v1545_v48  ;;  %v732_v19 = vrot.slane %v730_v10, 4  ;;  %418 = vst.msk [vmem:[#allocation2 + $0xd8] sm:$0xff] %vm408_vm6, %v10136_v51 }
  0x95   : > { %1428 = vrot.lane.b32.xlu1 %v10102_v46, %s10228_s14  ;;  %v738_v20 = vrot.slane %v736_v11, 5  ;;  %v1548_v22 = vshrl.u32 %v9016_v57, 16  ;;  %v9061_v23 = vcombine.low %v1536_v13, %v1546_v18  ;;  %v1551_v25 = vshll.u32 %v9016_v57, 16  ;;  %v9110_v13 = vld [vmem:[%s10298_s12 + $0x90] sm:$0xe] }
  0x96   : > { %v724_v24 = vrot.slane %v723_v15, 4  ;;  %v1557_v26 = vshll.u32 %v9017_v62, 16  ;;  %v733_v28 = vor.u32 %v732_v19, %v728_v16  ;;  %v1561_v30 = vshrl.u32 %v9017_v62, 16  ;;  %v9112_v18 = vld [vmem:[%s10298_s12 + $0x98] sm:$0x1] }
  0x97   : > { %v1550_v29 = vrot.slane %v1548_v22, 4  ;;  %v1567_v32 = vshll.u32 %v9018_v6, 16  ;;  %1971 = vst.msk [vmem:[#allocation2 + $0x8] sm:$0xff] %vm408_vm6, %v9061_v23  ;;  %v1553_v36 = vrot.slane %v1551_v25, 5  ;;  %v8943_v39 = vrot.slane %v1003_v12, 9  ;;  %v10111_v22 = vld [vmem:[%s10298_s12 + $0x84] sm:$0xff]  }
  0x98   : > { %2263 = vrot.lane.b32.xlu0 %v9151_v14, %s10229_s15  ;;  %v729_v35 = vsel %vm10348_vm5, %v724_v24, %v728_v16  ;;  %v1559_v37 = vrot.slane %v1557_v26, 5  ;;  %v909_v40 = vpop.permute.xlu0 %908  ;;  %2291 = vst.msk [vmem:[#allocation2 + $0x8] sm:$0xff] %vm956_vm7, %v10744_v31  ;;  %v734_v42 = vrot.slane %v733_v28, 4  ;;  %v1563_v43 = vrot.slane %v1561_v30, 4  ;;  %v458_v26 = vld [vmem:[%s10298_s12 + $0x84] sm:$0xf] }
  0x99   : > { %v1569_v44 = vrot.slane %v1567_v32, 5  ;;  %v1144_v46 = vrot.slane %v1004_v17, 5  ;;  %957 = vst.msk [vmem:[#allocation2] sm:$0xff] %vm956_vm7, %v909_v40  ;;  %v1554_v48 = vor.u32 %v1553_v36, %v1550_v29  ;;  %v1147_v49 = vrot.slane %v1005_v33, 5  ;;  %v9111_v17 = vld [vmem:[%s10298_s12 + $0x94] sm:$0xf] }
  0x9a   : > { %v739_v52 = vsel %vm10348_vm5, %v734_v42, %v738_v20  ;;  %v1564_v54 = vor.u32 %v1563_v43, %v1559_v37  ;;  %1281 = vst.msk [vmem:[#allocation2] sm:$0xff] %vm1280_vm8, %v10763_v53  ;;  %2468 = vst.msk [vmem:[#allocation2 + $0x8] sm:$0xff] %vm1280_vm8, %v10707_v45  ;;  %v2773_v59 = vshrl.u32 %v9235_v41, 16  ;;  %v2776_v60 = vshll.u32 %v9235_v41, 16  ;;  %v459_v30 = vld [vmem:[%s10298_s12 + $0x88] sm:$0xf] }
  0x9b   : > { %v1145_v31 = vsel %vm10288_vm2, %v8943_v39, %v1144_v46  ;;  %v1146_v56 = vrot.slane %v1144_v46, 4  ;;  %v8927_v57 = vcombine.low %v729_v35, %v739_v52  ;;  %v1555_v58 = vrot.slane %v1554_v48, 4  ;;  %1459 = vst.msk [vmem:[#allocation2] sm:$0xff] %vm1458_vm9, %v10736_v21  ;;  %v460_v32 = vld [vmem:[%s10298_s12 + $0x8c] sm:$0x1] }
  0x9c   : > { %2440 = vrot.lane.b32.xlu0 %v10106_v38, %s10227_s13  ;;  %v911_v61 = vpop.permute.xlu1 %910  ;;  %v1565_v62 = vrot.slane %v1564_v54, 4  ;;  %v2782_v53 = vshll.u32 %v9236_v47, 16  ;;  %v2786_v0 = vshrl.u32 %v9236_v47, 16  ;;  %v2775_v1 = vrot.slane %v2773_v59, 4  ;;  %v1006_v52 = vld [vmem:[%s10298_s12 + $0x84] sm:$0xe] }
  0x9d   : > { %v1148_v63 = vsel %vm10288_vm2, %v1146_v56, %v1147_v49  ;;  %958 = vst.msk [vmem:[#allocation2 + $0x18] sm:$0xff] %vm956_vm7, %v911_v61  ;;  %928 = vrot.lane.b32.xlu1 %v8927_v57, %s10229_s15  ;;  %v1560_v45 = vsel %vm10348_vm5, %v1555_v58, %v1559_v37  ;;  %v2778_v3 = vrot.slane %v2776_v60, 5  ;;  %v2792_v8 = vshll.u32 %v9237_v50, 16  ;;  %v10137_v37 = vld [vmem:[%s10298_s12 + $0x78] sm:$0xff]   ;;  %v1008_v56 = vld [vmem:[%s10298_s12 + $0x8c] sm:$0x1] }
  0x9e   : > { %v8959_v21 = vcombine.low %v1145_v31, %v1148_v63  ;;  %1282 = vst.msk [vmem:[#allocation2 + $0x18] sm:$0xff] %vm1280_vm8, %v1235_v27  ;;  %v1570_v4 = vsel %vm10348_vm5, %v1565_v62, %v1569_v44  ;;  %v2784_v6 = vrot.slane %v2782_v53, 5  ;;  %v2788_v7 = vrot.slane %v2786_v0, 4  ;;  %v10118_v54 = vld [vmem:[%s10298_s12 + $0x9c] sm:$0xff]   ;;  %v1007_v31 = vld [vmem:[%s10298_s12 + $0x88] sm:$0xf] }
  0x9f   : > { %v9062_v10 = vcombine.low %v1560_v45, %v1570_v4  ;;  %v2779_v11 = vor.u32 %v2778_v3, %v2775_v1  ;;  %v2794_v16 = vrot.slane %v2792_v8, 5  ;;  %v9136_v19 = vrot.slane %v9110_v13, 9  ;;  %419 = vst.msk [vmem:[#allocation2 + $0xf0] sm:$0xff] %vm408_vm6, %v10137_v37  ;;  %v9269_v63 = vld [vmem:[%s10298_s12 + $0x18] sm:$0xe]  ;;  %v10138_v1 = vld [vmem:[%s10298_s12 + $0x84] sm:$0xff]  }
  0xa0   : > { %v2965_v12 = vpop.permute.xlu0 %2964  ;;  %v1413_v14 = vpop.permute.xlu1 %1412  ;;  %v2789_v15 = vor.u32 %v2788_v7, %v2784_v6  ;;  %v2162_v23 = vrot.slane %v9111_v17, 5  ;;  %v2165_v24 = vrot.slane %v9112_v18, 5  ;;  %v741_v33 = vshrl.u32 %v458_v26, 16  ;;  %v9270_v0 = vld [vmem:[%s10298_s12 + $0x1c] sm:$0xf]  ;;  %420 = vst.msk [vmem:[#allocation2 + $0x108] sm:$0xff] %vm408_vm6, %v10138_v1 }
  0xa1   : > { %3012 = vst.msk [vmem:[#allocation2 + $0x8] sm:$0xff] %vm1458_vm9, %v2965_v12  ;;  %1460 = vst.msk [vmem:[#allocation2 + $0x18] sm:$0xff] %vm1458_vm9, %v1413_v14  ;;  %1252 = vrot.lane.b32.xlu1 %v8959_v21, %s10227_s13  ;;  %v2780_v20 = vrot.slane %v2779_v11, 4  ;;  %v744_v35 = vshll.u32 %v458_v26, 16  ;;  %v754_v36 = vshrl.u32 %v459_v30, 16  ;;  %v760_v40 = vshll.u32 %v460_v32, 16 }
  0xa2   : > { %1972 = vst.msk [vmem:[#allocation2 + $0x20] sm:$0xff] %vm408_vm6, %v9062_v10  ;;  %v2790_v25 = vrot.slane %v2789_v15, 4  ;;  %v2163_v28 = vsel %vm10288_vm2, %v9136_v19, %v2162_v23  ;;  %v2164_v29 = vrot.slane %v2162_v23, 4  ;;  %v743_v39 = vrot.slane %v741_v33, 4  ;;  %v3316_v46 = vld [vmem:[#allocation2] sm:$0xff] }
  0xa3   : > { %2292 = vst.msk [vmem:[#allocation2 + $0x20] sm:$0xff] %vm956_vm7, %v10771_v5  ;;  %v2785_v27 = vsel %vm10348_vm5, %v2780_v20, %v2784_v6  ;;  %v750_v5 = vshll.u32 %v459_v30, 16  ;;  %v746_v42 = vrot.slane %v744_v35, 5  ;;  %v756_v44 = vrot.slane %v754_v36, 4  ;;  %v9271_v45 = vld [vmem:[%s10298_s12 + $0x20] sm:$0x1] }
  0xa4   : > { %2469 = vst.msk [vmem:[#allocation2 + $0x20] sm:$0xff] %vm1280_vm8, %v10712_v55  ;;  %v2795_v34 = vsel %vm10348_vm5, %v2790_v25, %v2794_v16  ;;  %v2166_v55 = vsel %vm10288_vm2, %v2164_v29, %v2165_v24  ;;  %v762_v48 = vrot.slane %v760_v40, 5  ;;  %v8944_v57 = vrot.slane %v1006_v52, 9  ;;  %v9019_v8 = vld [vmem:[%s10298_s12 + $0x24] sm:$0xf] }
  0xa5   : > { %v9263_v38 = vcombine.low %v2785_v27, %v2795_v34  ;;  %1430 = vrot.lane.b32.xlu1 %v10111_v22, %s10228_s14  ;;  %v752_v43 = vrot.slane %v750_v5, 5  ;;  %v9152_v47 = vcombine.low %v2163_v28, %v2166_v55  ;;  %v747_v50 = vor.u32 %v746_v42, %v743_v39  ;;  %v9020_v10 = vld [vmem:[%s10298_s12 + $0x28] sm:$0xf]  ;;  %v9021_v14 = vld [vmem:[%s10298_s12 + $0x2c] sm:$0x1] }
  0xa6   : > { %v2967_v41 = vpop.permute.xlu0 %2966  ;;  %v1151_v61 = vrot.slane %v1007_v31, 5  ;;  %v1154_v62 = vrot.slane %v1008_v56, 5  ;;  %v9317_v21 = vrot.slane %v9269_v63, 9  ;;  %v3126_v12 = vrot.slane %v9270_v0, 5  ;;  %v9272_v23 = vld [vmem:[%s10298_s12 + $0x24] sm:$0xe] }
  0xa7   : > { %3013 = vst.msk [vmem:[#allocation2 + $0x20] sm:$0xff] %vm1458_vm9, %v2967_v41  ;;  %2984 = vrot.lane.b32.xlu0 %v9263_v38, %s10228_s14  ;;  %v757_v51 = vor.u32 %v756_v44, %v752_v43  ;;  %v748_v59 = vrot.slane %v747_v50, 4  ;;  %v3129_v13 = vrot.slane %v9271_v45, 5  ;;  %v1572_v15 = vshrl.u32 %v9019_v8, 16  ;;  %v9273_v30 = vld [vmem:[%s10298_s12 + $0x28] sm:$0xf] }
  0xa8   : > { %v3317_v49 = vld [vmem:[#allocation2 + $0x8] sm:$0xff]  ;;  %v1152_v6 = vsel %vm10288_vm2, %v8944_v57, %v1151_v61  ;;  %v1153_v7 = vrot.slane %v1151_v61, 4  ;;  %v1575_v19 = vshll.u32 %v9019_v8, 16  ;;  %v1581_v20 = vshll.u32 %v9020_v10, 16  ;;  %v3319_v25 = vld [vmem:[#allocation2 + $0x18] sm:$0xff] }
  0xa9   : > { %3588 = vmatprep.mubr.bf16.mxu0 %v3317_v49  ;;  %v758_v60 = vrot.slane %v757_v51, 4  ;;  %v753_v3 = vsel %vm10348_vm5, %v748_v59, %v752_v43  ;;  %v1585_v22 = vshrl.u32 %v9020_v10, 16  ;;  %v3127_v27 = vsel %vm10288_vm2, %v9317_v21, %v3126_v12  ;;  %v9274_v32 = vld [vmem:[%s10298_s12 + $0x2c] sm:$0x1]  ;;  %v9238_v44 = vld [vmem:[%s10298_s12 + $0x9c] sm:$0xf] }
  0xaa   : > { %v10853_v58 = vpop.permute.xlu0 %2247  ;;  %3589 = vmatmul.mubr.bf16.vlgmr.msra.gmra.mrb[0].mxu0 %v3316_v46  ;;  %v1155_v18 = vsel %vm10288_vm2, %v1153_v7, %v1154_v62  ;;  %v3128_v28 = vrot.slane %v3126_v12, 4  ;;  %v1574_v29 = vrot.slane %v1572_v15, 4  ;;  %v1577_v33 = vrot.slane %v1575_v19, 5  ;;  %v9239_v46 = vld [vmem:[%s10298_s12 + $0xa0] sm:$0xf] }
  0xab   : > { %v913_v53 = vpop.permute.xlu1 %912  ;;  %2265 = vrot.lane.b32.xlu0 %v9152_v47, %s10229_s15  ;;  %v763_v4 = vsel %vm10348_vm5, %v758_v60, %v762_v48  ;;  %v8960_v26 = vcombine.low %v1152_v6, %v1155_v18  ;;  %v1583_v34 = vrot.slane %v1581_v20, 5  ;;  %v1587_v35 = vrot.slane %v1585_v22, 4  ;;  %v9240_v50 = vld [vmem:[%s10298_s12 + $0xa4] sm:$0x1]  ;;  %v462_v18 = vld [vmem:[%s10298_s12 + $0x94] sm:$0xf] }
  0xac   : > { %959 = vst.msk [vmem:[#allocation2 + $0x30] sm:$0xff] %vm956_vm7, %v913_v53  ;;  %v8928_v11 = vcombine.low %v753_v3, %v763_v4  ;;  %v1591_v5 = vshll.u32 %v9021_v14, 16  ;;  %v3130_v36 = vsel %vm10288_vm2, %v3128_v28, %v3129_v13  ;;  %v9318_v37 = vrot.slane %v9272_v23, 9  ;;  %v9113_v3 = vld [vmem:[%s10298_s12 + $0x9c] sm:$0xe] }
  0xad   : > { %v3133_v38 = vrot.slane %v9273_v30, 5  ;;  %v3136_v55 = vrot.slane %v9274_v32, 5  ;;  %v9333_v40 = vcombine.low %v3127_v27, %v3130_v36  ;;  %v1578_v41 = vor.u32 %v1577_v33, %v1574_v29  ;;  %v9114_v4 = vld [vmem:[%s10298_s12 + $0xa0] sm:$0xf]  ;;  %v9115_v12 = vld [vmem:[%s10298_s12 + $0xa4] sm:$0x1] }
  0xae   : > { %v10870_v16 = vpop.permute.xlu0 %2424  ;;  %v3320_v17 = vld [vmem:[#allocation2 + $0x20] sm:$0xff]  ;;  %930 = vrot.lane.b32.xlu1 %v8928_v11, %s10229_s15  ;;  %v1588_v42 = vor.u32 %v1587_v35, %v1583_v34  ;;  %v1593_v43 = vrot.slane %v1591_v5, 5  ;;  %v2797_v51 = vshrl.u32 %v9238_v44, 16  ;;  %v2800_v52 = vshll.u32 %v9238_v44, 16  ;;  %v461_v13 = vld [vmem:[%s10298_s12 + $0x90] sm:$0xf] }
  0xaf   : > { %v1237_v24 = vpop.permute.xlu1 %1236  ;;  %3596 = vmatprep.mubr.bf16.mxu0 %v3320_v17  ;;  %2442 = vrot.lane.b32.xlu0 %v10118_v54, %s10227_s13  ;;  %v3134_v48 = vsel %vm10288_vm2, %v9318_v37, %v3133_v38  ;;  %v3135_v49 = vrot.slane %v3133_v38, 4  ;;  %v10121_v54 = vld [vmem:[%s10298_s12 + $0x90] sm:$0xff]   ;;  %3300 = vst.msk [vmem:[#allocation2 + $0x10] sm:$0xff] %vm408_vm6, %v9333_v40  ;;  %v1579_v31 = vrot.slane %v1578_v41, 4  ;;  %v2806_v57 = vshll.u32 %v9239_v46, 16 }
  0xb0   : > { %1283 = vst.msk [vmem:[#allocation2 + $0x30] sm:$0xff] %vm1280_vm8, %v1237_v24  ;;  %v1589_v56 = vrot.slane %v1588_v42, 4  ;;  %v2810_v59 = vshrl.u32 %v9239_v46, 16  ;;  %v2799_v61 = vrot.slane %v2797_v51, 4  ;;  %v2802_v62 = vrot.slane %v2800_v52, 5  ;;  %v10139_v27 = vld [vmem:[%s10298_s12 + $0x90] sm:$0xff]  }
  0xb1   : > { %v3137_v60 = vsel %vm10288_vm2, %v3135_v49, %v3136_v55  ;;  %v2816_v63 = vshll.u32 %v9240_v50, 16  ;;  %v1584_v0 = vsel %vm10348_vm5, %v1579_v31, %v1583_v34  ;;  %v2808_v1 = vrot.slane %v2806_v57, 5  ;;  %v463_v23 = vld [vmem:[%s10298_s12 + $0x98] sm:$0x1]  ;;  %421 = vst.msk [vmem:[#allocation2 + $0x120] sm:$0xff] %vm408_vm6, %v10139_v27 }
  0xb2   : > { %v10885_v39 = vpop.permute.xlu0 %2968  ;;  %3597 = vmatmul.mubr.bf16.gmra.mrb[4].mxu0 %v3319_v25  ;;  %1254 = vrot.lane.b32.xlu1 %v8960_v26, %s10227_s13  ;;  %v1594_v45 = vsel %vm10348_vm5, %v1589_v56, %v1593_v43  ;;  %v9334_v21 = vcombine.low %v3134_v48, %v3137_v60  ;;  %v2803_v8 = vor.u32 %v2802_v62, %v2799_v61  ;;  %v2812_v10 = vrot.slane %v2810_v59, 4  ;;  %v1010_v40 = vld [vmem:[%s10298_s12 + $0x94] sm:$0xf]  ;;  %v1011_v44 = vld [vmem:[%s10298_s12 + $0x98] sm:$0x1] }
  0xb3   : > { %v1415_v47 = vpop.permute.xlu1 %1414  ;;  %v9063_v7 = vcombine.low %v1584_v0, %v1594_v45  ;;  %v2818_v11 = vrot.slane %v2816_v63, 5  ;;  %v9137_v14 = vrot.slane %v9113_v3, 9  ;;  %v2169_v15 = vrot.slane %v9114_v4, 5  ;;  %v9024_v31 = vld [vmem:[%s10298_s12 + $0x38] sm:$0x1] }
  0xb4   : > { %1461 = vst.msk [vmem:[#allocation2 + $0x30] sm:$0xff] %vm1458_vm9, %v1415_v47  ;;  %v2172_v17 = vrot.slane %v9115_v12, 5  ;;  %v765_v19 = vshrl.u32 %v461_v13, 16  ;;  %v2804_v20 = vrot.slane %v2803_v8, 4  ;;  %v2813_v22 = vor.u32 %v2812_v10, %v2808_v1  ;;  %v9022_v47 = vld [vmem:[%s10298_s12 + $0x30] sm:$0xf] }
  0xb5   : > { %3301 = vst.msk [vmem:[#allocation2 + $0x28] sm:$0xff] %vm408_vm6, %v9334_v21  ;;  %1973 = vst.msk [vmem:[#allocation2 + $0x38] sm:$0xff] %vm408_vm6, %v9063_v7  ;;  %v768_v24 = vshll.u32 %v461_v13, 16  ;;  %v774_v25 = vshll.u32 %v462_v18, 16  ;;  %v10921_v28 = vsel %vm10288_vm2, %v9137_v14, %v2169_v15  ;;  %v2171_v29 = vrot.slane %v2169_v15, 4  ;;  %v10122_v10 = vld [vmem:[%s10298_s12 + $0xa8] sm:$0xff]  }
  0xb6   : > { %v10898_v53 = vpop.permute.xlu0 %2249  ;;  %1432 = vrot.lane.b32.xlu1 %v10121_v54, %s10228_s14  ;;  %2293 = vst.msk [vmem:[#allocation2 + $0x38] sm:$0xff] %vm956_vm7, %v10853_v58  ;;  %v767_v30 = vrot.slane %v765_v19, 4  ;;  %v778_v32 = vshrl.u32 %v462_v18, 16  ;;  %v3318_v34 = vld [vmem:[#allocation2 + $0x10] sm:$0xff]  ;;  %v2809_v35 = vsel %vm10348_vm5, %v2804_v20, %v2808_v1  ;;  %v2814_v5 = vrot.slane %v2813_v22, 4 }
  0xb7   : > { %v915_v6 = vpop.permute.xlu1 %914  ;;  %2470 = vst.msk [vmem:[#allocation2 + $0x38] sm:$0xff] %vm1280_vm8, %v10870_v16  ;;  %v770_v58 = vrot.slane %v768_v24, 5  ;;  %v776_v36 = vrot.slane %v774_v25, 5  ;;  %9992 = vmatprep.mubr.msk.bf16.mxu1 %vm408_vm6, %v3318_v34  ;;  %v2173_v37 = vsel %vm10288_vm2, %v2171_v29, %v2172_v17  ;;  %v784_v55 = vshll.u32 %v463_v23, 16  ;;  %v1009_v16 = vld [vmem:[%s10298_s12 + $0x90] sm:$0xe] }
  0xb8   : > { %960 = vst.msk [vmem:[#allocation2 + $0x48] sm:$0xff] %vm956_vm7, %v915_v6  ;;  %v780_v38 = vrot.slane %v778_v32, 4  ;;  %v2819_v41 = vsel %vm10348_vm5, %v2814_v5, %v2818_v11  ;;  %v9153_v42 = vcombine.low %v10921_v28, %v2173_v37  ;;  %v8945_v46 = vrot.slane %v1009_v16, 9  ;;  %v9023_v54 = vld [vmem:[%s10298_s12 + $0x34] sm:$0xf] }
  0xb9   : > { %3014 = vst.msk [vmem:[#allocation2 + $0x38] sm:$0xff] %vm1458_vm9, %v10885_v39  ;;  %v771_v43 = vor.u32 %v770_v58, %v767_v30  ;;  %v9264_v49 = vcombine.low %v2809_v35, %v2819_v41  ;;  %v786_v51 = vrot.slane %v784_v55, 5  ;;  %v1158_v52 = vrot.slane %v1010_v40, 5  ;;  %v9241_v14 = vld [vmem:[%s10298_s12 + $0xa8] sm:$0xf] }
  0xba   : > { %v10914_v26 = vpop.permute.xlu0 %2426  ;;  %v781_v50 = vor.u32 %v780_v38, %v776_v36  ;;  %v1161_v59 = vrot.slane %v1011_v44, 5  ;;  %v1596_v60 = vshrl.u32 %v9022_v47, 16  ;;  %v1599_v61 = vshll.u32 %v9022_v47, 16  ;;  %v9242_v15 = vld [vmem:[%s10298_s12 + $0xac] sm:$0xf]  ;;  %v10124_v44 = vld [vmem:[%s10298_s12 + $0x9c] sm:$0xff]  }
  0xbb   : > { %v1239_v33 = vpop.permute.xlu1 %1238  ;;  %v772_v57 = vrot.slane %v771_v43, 4  ;;  %2986 = vrot.lane.b32.xlu0 %v9264_v49, %s10228_s14  ;;  %v1159_v63 = vsel %vm10288_vm2, %v8945_v46, %v1158_v52  ;;  %v1160_v0 = vrot.slane %v1158_v52, 4  ;;  %v1605_v45 = vshll.u32 %v9023_v54, 16  ;;  %v3322_v6 = vld [vmem:[#allocation2 + $0x30] sm:$0xff]  ;;  %v9277_v46 = vld [vmem:[%s10298_s12 + $0x38] sm:$0x1] }
  0xbc   : > { %1284 = vst.msk [vmem:[#allocation2 + $0x48] sm:$0xff] %vm1280_vm8, %v1239_v33  ;;  %v3321_v56 = vld [vmem:[#allocation2 + $0x28] sm:$0xff]  ;;  %v782_v62 = vrot.slane %v781_v50, 4  ;;  %v1598_v1 = vrot.slane %v1596_v60, 4  ;;  %v1601_v3 = vrot.slane %v1599_v61, 5  ;;  %v1609_v4 = vshrl.u32 %v9023_v54, 16 }
  0xbd   : > { %9993 = vmatmul.mubr.msk.bf16.vlgmr.msra.gmra.mrb[0].mxu1 %vm408_vm6, %v3321_v56  ;;  %v777_v21 = vsel %vm10348_vm5, %v772_v57, %v776_v36  ;;  %v1162_v11 = vsel %vm10288_vm2, %v1160_v0, %v1161_v59  ;;  %v1607_v12 = vrot.slane %v1605_v45, 5  ;;  %v1615_v13 = vshll.u32 %v9024_v31, 16  ;;  %v9243_v23 = vld [vmem:[%s10298_s12 + $0xb0] sm:$0x1]  ;;  %v9275_v35 = vld [vmem:[%s10298_s12 + $0x30] sm:$0xe] }
  0xbe   : > { %v10941_v48 = vpop.permute.xlu0 %2970  ;;  %v787_v8 = vsel %vm10348_vm5, %v782_v62, %v786_v51  ;;  %v8961_v19 = vcombine.low %v1159_v63, %v1162_v11  ;;  %v1602_v20 = vor.u32 %v1601_v3, %v1598_v1  ;;  %v1611_v22 = vrot.slane %v1609_v4, 4  ;;  %v9276_v38 = vld [vmem:[%s10298_s12 + $0x34] sm:$0xf]  ;;  %v9278_v51 = vld [vmem:[%s10298_s12 + $0x3c] sm:$0xe] }
  0xbf   : > { %v1417_v39 = vpop.permute.xlu1 %1416  ;;  %v8929_v18 = vcombine.low %v777_v21, %v787_v8  ;;  %2267 = vrot.lane.b32.xlu0 %v9153_v42, %s10229_s15  ;;  %v1617_v25 = vrot.slane %v1615_v13, 5  ;;  %v2821_v27 = vshrl.u32 %v9241_v14, 16  ;;  %v2824_v28 = vshll.u32 %v9241_v14, 16  ;;  %v9279_v52 = vld [vmem:[%s10298_s12 + $0x40] sm:$0xf] }
  0xc0   : > { %1462 = vst.msk [vmem:[#allocation2 + $0x48] sm:$0xff] %vm1458_vm9, %v1417_v39  ;;  %v3323_v24 = vld [vmem:[#allocation2 + $0x38] sm:$0xff]  ;;  %v2830_v29 = vshll.u32 %v9242_v15, 16  ;;  %v1603_v30 = vrot.slane %v1602_v20, 4  ;;  %v1612_v32 = vor.u32 %v1611_v22, %v1607_v12  ;;  %v2834_v33 = vshrl.u32 %v9242_v15, 16 }
  0xc1   : > { %3604 = vmatprep.mubr.bf16.mxu0 %v3323_v24  ;;  %932 = vrot.lane.b32.xlu1 %v8929_v18, %s10229_s15  ;;  %v2840_v34 = vshll.u32 %v9243_v23, 16  ;;  %v2823_v58 = vrot.slane %v2821_v27, 4  ;;  %v2826_v36 = vrot.slane %v2824_v28, 5  ;;  %v9319_v55 = vrot.slane %v9275_v35, 9  ;;  %v9280_v39 = vld [vmem:[%s10298_s12 + $0x44] sm:$0x1] }
  0xc2   : > { %v10952_v7 = vpop.permute.xlu0 %2251  ;;  %3605 = vmatmul.mubr.bf16.gmra.mrb[8].mxu0 %v3322_v6  ;;  %v2832_v37 = vrot.slane %v2830_v29, 5  ;;  %v1608_v40 = vsel %vm10348_vm5, %v1603_v30, %v1607_v12  ;;  %v1613_v41 = vrot.slane %v1612_v32, 4  ;;  %v2836_v42 = vrot.slane %v2834_v33, 4  ;;  %v9116_v59 = vld [vmem:[%s10298_s12 + $0xa8] sm:$0xe]  ;;  %v10140_v24 = vld [vmem:[%s10298_s12 + $0x9c] sm:$0xff]  }
  0xc3   : > { %v917_v17 = vpop.permute.xlu1 %916  ;;  %v2842_v43 = vrot.slane %v2840_v34, 5  ;;  %2444 = vrot.lane.b32.xlu0 %v10122_v10, %s10227_s13  ;;  %v2827_v47 = vor.u32 %v2826_v36, %v2823_v58  ;;  %v3140_v49 = vrot.slane %v9276_v38, 5  ;;  %v3143_v50 = vrot.slane %v9277_v46, 5  ;;  %v9117_v45 = vld [vmem:[%s10298_s12 + $0xac] sm:$0xf]  ;;  %422 = vst.msk [vmem:[#allocation2 + $0x138] sm:$0xff] %vm408_vm6, %v10140_v24 }
  0xc4   : > { %961 = vst.msk [vmem:[#allocation2 + $0x60] sm:$0xff] %vm956_vm7, %v917_v17  ;;  %v1618_v54 = vsel %vm10348_vm5, %v1613_v41, %v1617_v25  ;;  %v2837_v31 = vor.u32 %v2836_v42, %v2832_v37  ;;  %v9320_v56 = vrot.slane %v9278_v51, 9  ;;  %v3147_v57 = vrot.slane %v9279_v52, 5  ;;  %v9118_v21 = vld [vmem:[%s10298_s12 + $0xb0] sm:$0x1] }
  0xc5   : > { %1256 = vrot.lane.b32.xlu1 %v8961_v19, %s10227_s13  ;;  %v9064_v61 = vcombine.low %v1608_v40, %v1618_v54  ;;  %v2828_v62 = vrot.slane %v2827_v47, 4  ;;  %v3141_v63 = vsel %vm10288_vm2, %v9319_v55, %v3140_v49  ;;  %v3142_v0 = vrot.slane %v3140_v49, 4  ;;  %v464_v10 = vld [vmem:[%s10298_s12 + $0x9c] sm:$0xf]  ;;  %v465_v15 = vld [vmem:[%s10298_s12 + $0xa0] sm:$0xf] }
  0xc6   : > { %v10966_v5 = vpop.permute.xlu0 %2428  ;;  %v2838_v3 = vrot.slane %v2837_v31, 4  ;;  %v3148_v4 = vsel %vm10288_vm2, %v9320_v56, %v3147_v57  ;;  %v3149_v6 = vrot.slane %v3147_v57, 4  ;;  %v3150_v8 = vrot.slane %v9280_v39, 5  ;;  %v466_v17 = vld [vmem:[%s10298_s12 + $0xa4] sm:$0x1] }
  0xc7   : > { %v1241_v16 = vpop.permute.xlu1 %1240  ;;  %1974 = vst.msk [vmem:[#allocation2 + $0x50] sm:$0xff] %vm408_vm6, %v9064_v61  ;;  %v2833_v11 = vsel %vm10348_vm5, %v2828_v62, %v2832_v37  ;;  %v3144_v12 = vsel %vm10288_vm2, %v3142_v0, %v3143_v50  ;;  %v9138_v13 = vrot.slane %v9116_v59, 9  ;;  %v2176_v14 = vrot.slane %v9117_v45, 5  ;;  %v1012_v29 = vld [vmem:[%s10298_s12 + $0x9c] sm:$0xe]  ;;  %v10125_v59 = vld [vmem:[%s10298_s12 + $0xb4] sm:$0xff]  }
  0xc8   : > { %1285 = vst.msk [vmem:[#allocation2 + $0x60] sm:$0xff] %vm1280_vm8, %v1241_v16  ;;  %v2843_v18 = vsel %vm10348_vm5, %v2838_v3, %v2842_v43  ;;  %v9335_v19 = vcombine.low %v3141_v63, %v3144_v12  ;;  %v3151_v20 = vsel %vm10288_vm2, %v3149_v6, %v3150_v8  ;;  %v2179_v22 = vrot.slane %v9118_v21, 5  ;;  %v1013_v30 = vld [vmem:[%s10298_s12 + $0xa0] sm:$0xf]  ;;  %v9025_v16 = vld [vmem:[%s10298_s12 + $0x3c] sm:$0xf] }
  0xc9   : > { %2294 = vst.msk [vmem:[#allocation2 + $0x50] sm:$0xff] %vm956_vm7, %v10898_v53  ;;  %1434 = vrot.lane.b32.xlu1 %v10124_v44, %s10228_s14  ;;  %v9265_v25 = vcombine.low %v2833_v11, %v2843_v18  ;;  %v9336_v27 = vcombine.low %v3148_v4, %v3151_v20  ;;  %v2177_v53 = vsel %vm10288_vm2, %v9138_v13, %v2176_v14  ;;  %v2178_v28 = vrot.slane %v2176_v14, 4  ;;  %v9026_v43 = vld [vmem:[%s10298_s12 + $0x40] sm:$0xf]  ;;  %v9027_v51 = vld [vmem:[%s10298_s12 + $0x44] sm:$0x1] }
  0xca   : > { %v10982_v60 = vpop.permute.xlu0 %2972  ;;  %2471 = vst.msk [vmem:[#allocation2 + $0x50] sm:$0xff] %vm1280_vm8, %v10914_v26  ;;  %v789_v33 = vshrl.u32 %v464_v10, 16  ;;  %v792_v34 = vshll.u32 %v464_v10, 16  ;;  %v798_v35 = vshll.u32 %v465_v15, 16  ;;  %v802_v58 = vshrl.u32 %v465_v15, 16  ;;  %v3325_v4 = vld [vmem:[#allocation2 + $0x48] sm:$0xff] }
  0xcb   : > { %v1419_v1 = vpop.permute.xlu1 %1418  ;;  %3302 = vst.msk [vmem:[#allocation2 + $0x40] sm:$0xff] %vm408_vm6, %v9335_v19  ;;  %v1014_v26 = vld [vmem:[%s10298_s12 + $0xa4] sm:$0x1]  ;;  %2988 = vrot.lane.b32.xlu0 %v9265_v25, %s10228_s14  ;;  %3303 = vst.msk [vmem:[#allocation2 + $0x58] sm:$0xff] %vm408_vm6, %v9336_v27  ;;  %v2180_v36 = vsel %vm10288_vm2, %v2178_v28, %v2179_v22  ;;  %v808_v37 = vshll.u32 %v466_v17, 16  ;;  %v8946_v38 = vrot.slane %v1012_v29, 9 }
  0xcc   : > { %1463 = vst.msk [vmem:[#allocation2 + $0x60] sm:$0xff] %vm1458_vm9, %v1419_v1  ;;  %3015 = vst.msk [vmem:[#allocation2 + $0x50] sm:$0xff] %vm1458_vm9, %v10941_v48  ;;  %v1165_v55 = vrot.slane %v1013_v30, 5  ;;  %v9154_v40 = vcombine.low %v2177_v53, %v2180_v36  ;;  %v791_v41 = vrot.slane %v789_v33, 4  ;;  %v794_v48 = vrot.slane %v792_v34, 5 }
  0xcd   : > { %v800_v42 = vrot.slane %v798_v35, 5  ;;  %v804_v46 = vrot.slane %v802_v58, 4  ;;  %v810_v47 = vrot.slane %v808_v37, 5  ;;  %v1168_v31 = vrot.slane %v1014_v26, 5  ;;  %v9244_v3 = vld [vmem:[%s10298_s12 + $0xb4] sm:$0xf] }
  0xce   : > { %v11006_v23 = vpop.permute.xlu0 %2253  ;;  %v11031_v49 = vsel %vm10288_vm2, %v8946_v38, %v1165_v55  ;;  %v1167_v50 = vrot.slane %v1165_v55, 4  ;;  %v795_v54 = vor.u32 %v794_v48, %v791_v41  ;;  %v1620_v39 = vshrl.u32 %v9025_v16, 16  ;;  %v9245_v14 = vld [vmem:[%s10298_s12 + $0xb8] sm:$0xf]  ;;  %v9246_v22 = vld [vmem:[%s10298_s12 + $0xbc] sm:$0x1] }
  0xcf   : > { %v919_v32 = vpop.permute.xlu1 %918  ;;  %v1623_v56 = vshll.u32 %v9025_v16, 16  ;;  %2269 = vrot.lane.b32.xlu0 %v9154_v40, %s10229_s15  ;;  %v805_v57 = vor.u32 %v804_v46, %v800_v42  ;;  %v1629_v61 = vshll.u32 %v9026_v43, 16  ;;  %v1633_v62 = vshrl.u32 %v9026_v43, 16  ;;  %v9119_v35 = vld [vmem:[%s10298_s12 + $0xb4] sm:$0xe] }
  0xd0   : > { %962 = vst.msk [vmem:[#allocation2 + $0x78] sm:$0xff] %vm956_vm7, %v919_v32  ;;  %v1639_v63 = vshll.u32 %v9027_v51, 16  ;;  %v796_v0 = vrot.slane %v795_v54, 4  ;;  %v11039_v45 = vsel %vm10288_vm2, %v1167_v50, %v1168_v31  ;;  %v1622_v21 = vrot.slane %v1620_v39, 4  ;;  %v9120_v55 = vld [vmem:[%s10298_s12 + $0xb8] sm:$0xf] }
  0xd1   : > { %v1625_v1 = vrot.slane %v1623_v56, 5  ;;  %v806_v10 = vrot.slane %v805_v57, 4  ;;  %v8962_v11 = vcombine.low %v11031_v49, %v11039_v45  ;;  %v1631_v12 = vrot.slane %v1629_v61, 5  ;;  %v9121_v48 = vld [vmem:[%s10298_s12 + $0xbc] sm:$0x1]  ;;  %v10141_v61 = vld [vmem:[%s10298_s12 + $0xa8] sm:$0xff]  }
  0xd2   : > { %v11027_v44 = vpop.permute.xlu0 %2430  ;;  %v3324_v8 = vld [vmem:[#allocation2 + $0x40] sm:$0xff]  ;;  %v1635_v13 = vrot.slane %v1633_v62, 4  ;;  %v3327_v17 = vld [vmem:[#allocation2 + $0x58] sm:$0xff]  ;;  %v801_v18 = vsel %vm10348_vm5, %v796_v0, %v800_v42  ;;  %v1641_v20 = vrot.slane %v1639_v63, 5  ;;  %v2845_v24 = vshrl.u32 %v9244_v3, 16  ;;  %423 = vst.msk [vmem:[#allocation2 + $0x150] sm:$0xff] %vm408_vm6, %v10141_v61 }
  0xd3   : > { %v1243_v52 = vpop.permute.xlu1 %1242  ;;  %9996 = vmatprep.mubr.msk.bf16.mxu1 %vm408_vm6, %v3324_v8  ;;  %v1626_v19 = vor.u32 %v1625_v1, %v1622_v21  ;;  %v3326_v25 = vld [vmem:[#allocation2 + $0x50] sm:$0xff]  ;;  %v811_v27 = vsel %vm10348_vm5, %v806_v10, %v810_v47  ;;  %2446 = vrot.lane.b32.xlu0 %v10125_v59, %s10227_s13  ;;  %v2848_v28 = vshll.u32 %v9244_v3, 16  ;;  %v2854_v29 = vshll.u32 %v9245_v14, 16  ;;  %v467_v51 = vld [vmem:[%s10298_s12 + $0xa8] sm:$0xf] }
  0xd4   : > { %1286 = vst.msk [vmem:[#allocation2 + $0x78] sm:$0xff] %vm1280_vm8, %v1243_v52  ;;  %9997 = vmatmul.mubr.msk.bf16.gmra.mrb[4].mxu1 %vm408_vm6, %v3327_v17  ;;  %v1636_v53 = vor.u32 %v1635_v13, %v1631_v12  ;;  %v8930_v30 = vcombine.low %v801_v18, %v811_v27  ;;  %v2847_v33 = vrot.slane %v2845_v24, 4  ;;  %v2858_v34 = vshrl.u32 %v9245_v14, 16  ;;  %3612 = vmatprep.mubr.bf16.mxu0 %v3326_v25  ;;  %v468_v52 = vld [vmem:[%s10298_s12 + $0xac] sm:$0xf] }
  0xd5   : > { %v1627_v32 = vrot.slane %v1626_v19, 4  ;;  %v2850_v36 = vrot.slane %v2848_v28, 5  ;;  %v2856_v37 = vrot.slane %v2854_v29, 5  ;;  %v2864_v38 = vshll.u32 %v9246_v22, 16  ;;  %3613 = vmatmul.mubr.bf16.gmra.mrb[12].mxu0 %v3325_v4  ;;  %v469_v57 = vld [vmem:[%s10298_s12 + $0xb0] sm:$0x1] }
  0xd6   : > { %v11042_v6 = vpop.permute.xlu0 %2974  ;;  %v1637_v26 = vrot.slane %v1636_v53, 4  ;;  %934 = vrot.lane.b32.xlu1 %v8930_v30, %s10229_s15  ;;  %v2860_v41 = vrot.slane %v2858_v34, 4  ;;  %v9139_v42 = vrot.slane %v9119_v35, 9  ;;  %v2183_v43 = vrot.slane %v9120_v55, 5  ;;  %v10127_v3 = vld [vmem:[%s10298_s12 + $0xa8] sm:$0xff]  }
  0xd7   : > { %v1421_v15 = vpop.permute.xlu1 %1420  ;;  %v1632_v40 = vsel %vm10348_vm5, %v1627_v32, %v1631_v12  ;;  %v2851_v47 = vor.u32 %v2850_v36, %v2847_v33  ;;  %v2866_v49 = vrot.slane %v2864_v38, 5  ;;  %v2186_v50 = vrot.slane %v9121_v48, 5  ;;  %v1015_v12 = vld [vmem:[%s10298_s12 + $0xa8] sm:$0xe]  ;;  %v1016_v17 = vld [vmem:[%s10298_s12 + $0xac] sm:$0xf] }
  0xd8   : > { %1464 = vst.msk [vmem:[#allocation2 + $0x78] sm:$0xff] %vm1458_vm9, %v1421_v15  ;;  %v1642_v46 = vsel %vm10348_vm5, %v1637_v26, %v1641_v20  ;;  %v2861_v31 = vor.u32 %v2860_v41, %v2856_v37  ;;  %v11071_v39 = vsel %vm10288_vm2, %v9139_v42, %v2183_v43  ;;  %v2185_v56 = vrot.slane %v2183_v43, 4  ;;  %v1017_v18 = vld [vmem:[%s10298_s12 + $0xb0] sm:$0x1]  ;;  %v9028_v24 = vld [vmem:[%s10298_s12 + $0x48] sm:$0xf] }
  0xd9   : > { %v9065_v54 = vcombine.low %v1632_v40, %v1642_v46  ;;  %v2852_v62 = vrot.slane %v2851_v47, 4  ;;  %v813_v63 = vshrl.u32 %v467_v51, 16  ;;  %v816_v0 = vshll.u32 %v467_v51, 16  ;;  %v9029_v30 = vld [vmem:[%s10298_s12 + $0x4c] sm:$0xf] }
  0xda   : > { %v11057_v58 = vpop.permute.xlu0 %2255  ;;  %v822_v45 = vshll.u32 %v468_v52, 16  ;;  %1258 = vrot.lane.b32.xlu1 %v8962_v11, %s10227_s13  ;;  %v2862_v1 = vrot.slane %v2861_v31, 4  ;;  %v2187_v4 = vsel %vm10288_vm2, %v2185_v56, %v2186_v50  ;;  %v826_v8 = vshrl.u32 %v468_v52, 16  ;;  %v9030_v32 = vld [vmem:[%s10298_s12 + $0x50] sm:$0x1]  ;;  %v10128_v31 = vld [vmem:[%s10298_s12 + $0xc0] sm:$0xff]  }
  0xdb   : > { %v921_v16 = vpop.permute.xlu1 %920  ;;  %1975 = vst.msk [vmem:[#allocation2 + $0x68] sm:$0xff] %vm408_vm6, %v9065_v54  ;;  %v832_v10 = vshll.u32 %v469_v57, 16  ;;  %v2857_v11 = vsel %vm10348_vm5, %v2852_v62, %v2856_v37  ;;  %v9155_v13 = vcombine.low %v11071_v39, %v2187_v4  ;;  %v815_v14 = vrot.slane %v813_v63, 4  ;;  %v9247_v48 = vld [vmem:[%s10298_s12 + $0xc0] sm:$0xf] }
  0xdc   : > { %963 = vst.msk [vmem:[#allocation2 + $0x90] sm:$0xff] %vm956_vm7, %v921_v16  ;;  %2295 = vst.msk [vmem:[#allocation2 + $0x68] sm:$0xff] %vm956_vm7, %v10952_v7  ;;  %v818_v15 = vrot.slane %v816_v0, 5  ;;  %v2867_v19 = vsel %vm10348_vm5, %v2862_v1, %v2866_v49  ;;  %v824_v20 = vrot.slane %v822_v45, 5  ;;  %v828_v22 = vrot.slane %v826_v8, 4 }
  0xdd   : > { %2472 = vst.msk [vmem:[#allocation2 + $0x68] sm:$0xff] %vm1280_vm8, %v10966_v5  ;;  %v834_v7 = vrot.slane %v832_v10, 5  ;;  %v9266_v27 = vcombine.low %v2857_v11, %v2867_v19  ;;  %v8947_v28 = vrot.slane %v1015_v12, 9  ;;  %v1172_v29 = vrot.slane %v1016_v17, 5  ;;  %v9248_v50 = vld [vmem:[%s10298_s12 + $0xc4] sm:$0xf] }
  0xde   : > { %v11074_v59 = vpop.permute.xlu0 %2432  ;;  %v819_v53 = vor.u32 %v818_v15, %v815_v14  ;;  %3016 = vst.msk [vmem:[#allocation2 + $0x68] sm:$0xff] %vm1458_vm9, %v10982_v60  ;;  %1436 = vrot.lane.b32.xlu1 %v10127_v3, %s10228_s14  ;;  %v829_v5 = vor.u32 %v828_v22, %v824_v20  ;;  %v1175_v34 = vrot.slane %v1017_v18, 5  ;;  %v1644_v35 = vshrl.u32 %v9028_v24, 16  ;;  %v9249_v51 = vld [vmem:[%s10298_s12 + $0xc8] sm:$0x1] }
  0xdf   : > { %v1245_v21 = vpop.permute.xlu1 %1244  ;;  %v1647_v26 = vshll.u32 %v9028_v24, 16  ;;  %2990 = vrot.lane.b32.xlu0 %v9266_v27, %s10228_s14  ;;  %v11108_v60 = vsel %vm10288_vm2, %v8947_v28, %v1172_v29  ;;  %v1174_v37 = vrot.slane %v1172_v29, 4  ;;  %v1653_v38 = vshll.u32 %v9029_v30, 16  ;;  %v9281_v45 = vld [vmem:[%s10298_s12 + $0x48] sm:$0xe]  ;;  %v10130_v29 = vld [vmem:[%s10298_s12 + $0xb4] sm:$0xff]  }
  0xe0   : > { %1287 = vst.msk [vmem:[#allocation2 + $0x90] sm:$0xff] %vm1280_vm8, %v1245_v21  ;;  %v820_v36 = vrot.slane %v819_v53, 4  ;;  %v830_v55 = vrot.slane %v829_v5, 4  ;;  %v1646_v16 = vrot.slane %v1644_v35, 4  ;;  %v1657_v41 = vshrl.u32 %v9029_v30, 16  ;;  %v3328_v21 = vld [vmem:[#allocation2 + $0x60] sm:$0xff] }
  0xe1   : > { %v1649_v40 = vrot.slane %v1647_v26, 5  ;;  %v1176_v46 = vsel %vm10288_vm2, %v1174_v37, %v1175_v34  ;;  %v1655_v47 = vrot.slane %v1653_v38, 5  ;;  %v1663_v49 = vshll.u32 %v9030_v32, 16  ;;  %v9282_v10 = vld [vmem:[%s10298_s12 + $0x4c] sm:$0xf] }
  0xe2   : > { %v11097_v25 = vpop.permute.xlu0 %2976  ;;  %v825_v43 = vsel %vm10348_vm5, %v820_v36, %v824_v20  ;;  %v835_v54 = vsel %vm10348_vm5, %v830_v55, %v834_v7  ;;  %v8963_v39 = vcombine.low %v11108_v60, %v1176_v46  ;;  %v1659_v57 = vrot.slane %v1657_v41, 4  ;;  %v9283_v17 = vld [vmem:[%s10298_s12 + $0x50] sm:$0x1]  ;;  %v9284_v27 = vld [vmem:[%s10298_s12 + $0x54] sm:$0xe] }
  0xe3   : > { %v1423_v33 = vpop.permute.xlu1 %1422  ;;  %v1650_v56 = vor.u32 %v1649_v40, %v1646_v16  ;;  %2271 = vrot.lane.b32.xlu0 %v9155_v13, %s10229_s15  ;;  %v8931_v61 = vcombine.low %v825_v43, %v835_v54  ;;  %v1665_v62 = vrot.slane %v1663_v49, 5  ;;  %v2869_v63 = vshrl.u32 %v9247_v48, 16  ;;  %v9286_v35 = vld [vmem:[%s10298_s12 + $0x5c] sm:$0x1]  ;;  %v9122_v60 = vld [vmem:[%s10298_s12 + $0xc0] sm:$0xe] }
  0xe4   : > { %1465 = vst.msk [vmem:[#allocation2 + $0x90] sm:$0xff] %vm1458_vm9, %v1423_v33  ;;  %v2872_v0 = vshll.u32 %v9247_v48, 16  ;;  %v1660_v3 = vor.u32 %v1659_v57, %v1655_v47  ;;  %v2878_v4 = vshll.u32 %v9248_v50, 16  ;;  %v2882_v8 = vshrl.u32 %v9248_v50, 16  ;;  %v9285_v33 = vld [vmem:[%s10298_s12 + $0x58] sm:$0xf] }
  0xe5   : > { %v1651_v1 = vrot.slane %v1650_v56, 4  ;;  %v3329_v12 = vld [vmem:[#allocation2 + $0x68] sm:$0xff]  ;;  %936 = vrot.lane.b32.xlu1 %v8931_v61, %s10229_s15  ;;  %v2871_v14 = vrot.slane %v2869_v63, 4  ;;  %v2888_v15 = vshll.u32 %v9249_v51, 16  ;;  %v9321_v18 = vrot.slane %v9281_v45, 9 }
  0xe6   : > { %v11111_v42 = vpop.permute.xlu0 %2257  ;;  %v2874_v13 = vrot.slane %v2872_v0, 5  ;;  %3620 = vmatprep.mubr.bf16.mxu0 %v3329_v12  ;;  %v1661_v22 = vrot.slane %v1660_v3, 4  ;;  %v2880_v7 = vrot.slane %v2878_v4, 5  ;;  %v2884_v24 = vrot.slane %v2882_v8, 4  ;;  %v9123_v41 = vld [vmem:[%s10298_s12 + $0xc4] sm:$0xf] }
  0xe7   : > { %v923_v52 = vpop.permute.xlu1 %922  ;;  %v1656_v20 = vsel %vm10348_vm5, %v1651_v1, %v1655_v47  ;;  %3621 = vmatmul.mubr.bf16.gmra.mrb[16].mxu0 %v3328_v21  ;;  %2448 = vrot.lane.b32.xlu0 %v10128_v31, %s10227_s13  ;;  %v2890_v28 = vrot.slane %v2888_v15, 5  ;;  %v3154_v30 = vrot.slane %v9282_v10, 5  ;;  %v3157_v32 = vrot.slane %v9283_v17, 5  ;;  %v9124_v48 = vld [vmem:[%s10298_s12 + $0xc8] sm:$0x1]  ;;  %v10142_v21 = vld [vmem:[%s10298_s12 + $0xb4] sm:$0xff]  }
  0xe8   : > { %964 = vst.msk [vmem:[#allocation2 + $0xa8] sm:$0xff] %vm956_vm7, %v923_v52  ;;  %v2875_v53 = vor.u32 %v2874_v13, %v2871_v14  ;;  %v1666_v5 = vsel %vm10348_vm5, %v1661_v22, %v1665_v62  ;;  %v2885_v34 = vor.u32 %v2884_v24, %v2880_v7  ;;  %v9322_v26 = vrot.slane %v9284_v27, 9  ;;  %v470_v51 = vld [vmem:[%s10298_s12 + $0xb4] sm:$0xf]  ;;  %v471_v56 = vld [vmem:[%s10298_s12 + $0xb8] sm:$0xf] }
  0xe9   : > { %v3161_v36 = vrot.slane %v9285_v33, 5  ;;  %1260 = vrot.lane.b32.xlu1 %v8963_v39, %s10227_s13  ;;  %v9066_v38 = vcombine.low %v1656_v20, %v1666_v5  ;;  %v3155_v16 = vsel %vm10288_vm2, %v9321_v18, %v3154_v30  ;;  %v3156_v40 = vrot.slane %v3154_v30, 4  ;;  %v472_v57 = vld [vmem:[%s10298_s12 + $0xbc] sm:$0x1]  ;;  %v1018_v8 = vld [vmem:[%s10298_s12 + $0xb4] sm:$0xe] }
  0xea   : > { %v11127_v11 = vpop.permute.xlu0 %2434  ;;  %v2876_v55 = vrot.slane %v2875_v53, 4  ;;  %v2886_v46 = vrot.slane %v2885_v34, 4  ;;  %v3164_v50 = vrot.slane %v9286_v35, 5  ;;  %v9140_v31 = vrot.slane %v9122_v60, 9  ;;  %v1019_v10 = vld [vmem:[%s10298_s12 + $0xb8] sm:$0xf] }
  0xeb   : > { %v1247_v19 = vpop.permute.xlu1 %1246  ;;  %v3162_v47 = vsel %vm10288_vm2, %v9322_v26, %v3161_v36  ;;  %v3163_v49 = vrot.slane %v3161_v36, 4  ;;  %1976 = vst.msk [vmem:[#allocation2 + $0x80] sm:$0xff] %vm408_vm6, %v9066_v38  ;;  %v3158_v54 = vsel %vm10288_vm2, %v3156_v40, %v3157_v32  ;;  %v2190_v39 = vrot.slane %v9123_v41, 5  ;;  %424 = vst.msk [vmem:[#allocation2 + $0x168] sm:$0xff] %vm408_vm6, %v10142_v21  ;;  %v9033_v34 = vld [vmem:[%s10298_s12 + $0x5c] sm:$0x1] }
  0xec   : > { %1288 = vst.msk [vmem:[#allocation2 + $0xa8] sm:$0xff] %vm1280_vm8, %v1247_v19  ;;  %v2881_v52 = vsel %vm10348_vm5, %v2876_v55, %v2880_v7  ;;  %v2891_v61 = vsel %vm10348_vm5, %v2886_v46, %v2890_v28  ;;  %v9337_v62 = vcombine.low %v3155_v16, %v3158_v54  ;;  %v2193_v0 = vrot.slane %v9124_v48, 5  ;;  %v9031_v7 = vld [vmem:[%s10298_s12 + $0x54] sm:$0xf]  ;;  %v9032_v28 = vld [vmem:[%s10298_s12 + $0x58] sm:$0xf] }
  0xed   : > { %2296 = vst.msk [vmem:[#allocation2 + $0x80] sm:$0xff] %vm956_vm7, %v11006_v23  ;;  %v3165_v63 = vsel %vm10288_vm2, %v3163_v49, %v3164_v50  ;;  %v9267_v1 = vcombine.low %v2881_v52, %v2891_v61  ;;  %1438 = vrot.lane.b32.xlu1 %v10130_v29, %s10228_s14  ;;  %v2191_v23 = vsel %vm10288_vm2, %v9140_v31, %v2190_v39  ;;  %v2192_v4 = vrot.slane %v2190_v39, 4  ;;  %v10131_v16 = vld [vmem:[%s10298_s12 + $0xcc] sm:$0xff]  }
  0xee   : > { %v11142_v37 = vpop.permute.xlu0 %2978  ;;  %2473 = vst.msk [vmem:[#allocation2 + $0x80] sm:$0xff] %vm1280_vm8, %v11027_v44  ;;  %v9338_v3 = vcombine.low %v3162_v47, %v3165_v63  ;;  %v837_v14 = vshrl.u32 %v470_v51, 16  ;;  %v840_v13 = vshll.u32 %v470_v51, 16  ;;  %v846_v15 = vshll.u32 %v471_v56, 16  ;;  %v1020_v44 = vld [vmem:[%s10298_s12 + $0xbc] sm:$0x1] }
  0xef   : > { %v1425_v43 = vpop.permute.xlu1 %1424  ;;  %3304 = vst.msk [vmem:[#allocation2 + $0x70] sm:$0xff] %vm408_vm6, %v9337_v62  ;;  %v850_v17 = vshrl.u32 %v471_v56, 16  ;;  %2992 = vrot.lane.b32.xlu0 %v9267_v1, %s10228_s14  ;;  %v2194_v18 = vsel %vm10288_vm2, %v2192_v4, %v2193_v0  ;;  %v856_v19 = vshll.u32 %v472_v57, 16  ;;  %v8948_v20 = vrot.slane %v1018_v8, 9  ;;  %v9250_v50 = vld [vmem:[%s10298_s12 + $0xcc] sm:$0xf] }
  0xf0   : > { %1466 = vst.msk [vmem:[#allocation2 + $0xa8] sm:$0xff] %vm1458_vm9, %v1425_v43  ;;  %3017 = vst.msk [vmem:[#allocation2 + $0x80] sm:$0xff] %vm1458_vm9, %v11042_v6  ;;  %v1179_v22 = vrot.slane %v1019_v10, 5  ;;  %v9156_v24 = vcombine.low %v2191_v23, %v2194_v18  ;;  %v839_v27 = vrot.slane %v837_v14, 4  ;;  %v842_v6 = vrot.slane %v840_v13, 5  ;;  %v3331_v51 = vld [vmem:[#allocation2 + $0x78] sm:$0xff] }
  0xf1   : > { %3305 = vst.msk [vmem:[#allocation2 + $0x88] sm:$0xff] %vm408_vm6, %v9338_v3  ;;  %v848_v53 = vrot.slane %v846_v15, 5  ;;  %v852_v30 = vrot.slane %v850_v17, 4  ;;  %v858_v32 = vrot.slane %v856_v19, 5  ;;  %v1182_v36 = vrot.slane %v1020_v44, 5 }
  0xf2   : > { %v11166_v45 = vpop.permute.xlu0 %2259  ;;  %v11192_v33 = vsel %vm10288_vm2, %v8948_v20, %v1179_v22  ;;  %v1181_v5 = vrot.slane %v1179_v22, 4  ;;  %v843_v26 = vor.u32 %v842_v6, %v839_v27  ;;  %v1668_v60 = vshrl.u32 %v9031_v7, 16  ;;  %v9251_v61 = vld [vmem:[%s10298_s12 + $0xd0] sm:$0xf]  ;;  %v9252_v3 = vld [vmem:[%s10298_s12 + $0xd4] sm:$0x1] }
  0xf3   : > { %v925_v12 = vpop.permute.xlu1 %924  ;;  %v1671_v38 = vshll.u32 %v9031_v7, 16  ;;  %2273 = vrot.lane.b32.xlu0 %v9156_v24, %s10229_s15  ;;  %v853_v55 = vor.u32 %v852_v30, %v848_v53  ;;  %v1677_v40 = vshll.u32 %v9032_v28, 16  ;;  %v1681_v41 = vshrl.u32 %v9032_v28, 16  ;;  %v9034_v18 = vld [vmem:[%s10298_s12 + $0x60] sm:$0xf] }
  0xf4   : > { %965 = vst.msk [vmem:[#allocation2 + $0xc0] sm:$0xff] %vm956_vm7, %v925_v12  ;;  %v1687_v48 = vshll.u32 %v9033_v34, 16  ;;  %v844_v43 = vrot.slane %v843_v26, 4  ;;  %v11200_v46 = vsel %vm10288_vm2, %v1181_v5, %v1182_v36  ;;  %v1670_v47 = vrot.slane %v1668_v60, 4  ;;  %v9035_v27 = vld [vmem:[%s10298_s12 + $0x64] sm:$0xf] }
  0xf5   : > { %v1673_v49 = vrot.slane %v1671_v38, 5  ;;  %v854_v31 = vrot.slane %v853_v55, 4  ;;  %v8964_v39 = vcombine.low %v11192_v33, %v11200_v46  ;;  %v1679_v56 = vrot.slane %v1677_v40, 5  ;;  %v9036_v30 = vld [vmem:[%s10298_s12 + $0x68] sm:$0x1] }
  0xf6   : > { %v11188_v29 = vpop.permute.xlu0 %2436  ;;  %v3330_v54 = vld [vmem:[#allocation2 + $0x70] sm:$0xff]  ;;  %v1683_v57 = vrot.slane %v1681_v41, 4  ;;  %v849_v0 = vsel %vm10348_vm5, %v844_v43, %v848_v53  ;;  %v1689_v1 = vrot.slane %v1687_v48, 5  ;;  %v2893_v23 = vshrl.u32 %v9250_v50, 16  ;;  %v9288_v40 = vld [vmem:[%s10298_s12 + $0x64] sm:$0xf] }
  0xf7   : > { %v1249_v35 = vpop.permute.xlu1 %1248  ;;  %10000 = vmatprep.mubr.msk.bf16.mxu1 %vm408_vm6, %v3330_v54  ;;  %v1674_v21 = vor.u32 %v1673_v49, %v1670_v47  ;;  %v3332_v4 = vld [vmem:[#allocation2 + $0x80] sm:$0xff]  ;;  %v859_v8 = vsel %vm10348_vm5, %v854_v31, %v858_v32  ;;  %2450 = vrot.lane.b32.xlu0 %v10131_v16, %s10227_s13  ;;  %v2896_v12 = vshll.u32 %v9250_v50, 16  ;;  %v2902_v14 = vshll.u32 %v9251_v61, 16  ;;  %v9289_v49 = vld [vmem:[%s10298_s12 + $0x68] sm:$0x1] }
  0xf8   : > { %1289 = vst.msk [vmem:[#allocation2 + $0xc0] sm:$0xff] %vm1280_vm8, %v1249_v35  ;;  %v3333_v63 = vld [vmem:[#allocation2 + $0x88] sm:$0xff]  ;;  %v1684_v10 = vor.u32 %v1683_v57, %v1679_v56  ;;  %v8932_v13 = vcombine.low %v849_v0, %v859_v8  ;;  %v2895_v17 = vrot.slane %v2893_v23, 4  ;;  %v2906_v44 = vshrl.u32 %v9251_v61, 16  ;;  %3628 = vmatprep.mubr.bf16.mxu0 %v3332_v4  ;;  %v9287_v16 = vld [vmem:[%s10298_s12 + $0x60] sm:$0xe] }
  0xf9   : > { %10001 = vmatmul.mubr.msk.bf16.gmra.mrb[8].mxu1 %vm408_vm6, %v3333_v63  ;;  %v1675_v15 = vrot.slane %v1674_v21, 4  ;;  %v2898_v22 = vrot.slane %v2896_v12, 5  ;;  %v2904_v7 = vrot.slane %v2902_v14, 5  ;;  %v2912_v24 = vshll.u32 %v9252_v3, 16  ;;  %3629 = vmatmul.mubr.bf16.gmra.mrb[20].mxu0 %v3331_v51  ;;  %v10133_v54 = vld [vmem:[%s10298_s12 + $0xc0] sm:$0xff]  }
  0xfa   : > { %v11203_v52 = vpop.permute.xlu0 %2980  ;;  %v1685_v20 = vrot.slane %v1684_v10, 4  ;;  %938 = vrot.lane.b32.xlu1 %v8932_v13, %s10229_s15  ;;  %v2908_v28 = vrot.slane %v2906_v44, 4  ;;  %v1692_v32 = vshrl.u32 %v9034_v18, 16  ;;  %v1695_v33 = vshll.u32 %v9034_v18, 16  ;;  %v9290_v61 = vld [vmem:[%s10298_s12 + $0x6c] sm:$0xe] }
  0xfb   : > { %v1427_v62 = vpop.permute.xlu1 %1426  ;;  %v1680_v53 = vsel %vm10348_vm5, %v1675_v15, %v1679_v56  ;;  %v2899_v34 = vor.u32 %v2898_v22, %v2895_v17  ;;  %v2914_v35 = vrot.slane %v2912_v24, 5  ;;  %v1701_v26 = vshll.u32 %v9035_v27, 16  ;;  %v9291_v21 = vld [vmem:[%s10298_s12 + $0x70] sm:$0xf]  ;;  %v9292_v4 = vld [vmem:[%s10298_s12 + $0x74] sm:$0x1] }
  0xfc   : > { %1467 = vst.msk [vmem:[#allocation2 + $0xc0] sm:$0xff] %vm1458_vm9, %v1427_v62  ;;  %v1690_v5 = vsel %vm10348_vm5, %v1685_v20, %v1689_v1  ;;  %v2909_v60 = vor.u32 %v2908_v28, %v2904_v7  ;;  %v1694_v38 = vrot.slane %v1692_v32, 4  ;;  %v1697_v55 = vrot.slane %v1695_v33, 5  ;;  %v9037_v8 = vld [vmem:[%s10298_s12 + $0x6c] sm:$0xf] }
  0xfd   : > { %v9067_v36 = vcombine.low %v1680_v53, %v1690_v5  ;;  %v2900_v48 = vrot.slane %v2899_v34, 4  ;;  %v1703_v43 = vrot.slane %v1701_v26, 5  ;;  %v1705_v46 = vshrl.u32 %v9035_v27, 16  ;;  %v9038_v15 = vld [vmem:[%s10298_s12 + $0x70] sm:$0xf] }
  0xfe   : > { %v11218_v19 = vpop.permute.xlu0 %2261  ;;  %v1711_v47 = vshll.u32 %v9036_v30, 16  ;;  %1262 = vrot.lane.b32.xlu1 %v8964_v39, %s10227_s13  ;;  %v2910_v51 = vrot.slane %v2909_v60, 4  ;;  %v1698_v31 = vor.u32 %v1697_v55, %v1694_v38  ;;  %v9323_v56 = vrot.slane %v9287_v16, 9  ;;  %v9039_v17 = vld [vmem:[%s10298_s12 + $0x74] sm:$0x1] }
  0xff   : > { %v927_v6 = vpop.permute.xlu1 %926  ;;  %1977 = vst.msk [vmem:[#allocation2 + $0x98] sm:$0xff] %vm408_vm6, %v9067_v36  ;;  %v3168_v57 = vrot.slane %v9288_v40, 5  ;;  %v2905_v62 = vsel %vm10348_vm5, %v2900_v48, %v2904_v7  ;;  %v1707_v63 = vrot.slane %v1705_v46, 4  ;;  %v3171_v0 = vrot.slane %v9289_v49, 5  ;;  %v9040_v53 = vld [vmem:[%s10298_s12 + $0x78] sm:$0xf] }
 0x100   : > { %966 = vst.msk [vmem:[#allocation2 + $0xd8] sm:$0xff] %vm956_vm7, %v927_v6  ;;  %2297 = vst.msk [vmem:[#allocation2 + $0x98] sm:$0xff] %vm956_vm7, %v11057_v58  ;;  %v1713_v39 = vrot.slane %v1711_v47, 5  ;;  %v2915_v1 = vsel %vm10348_vm5, %v2910_v51, %v2914_v35  ;;  %v1699_v3 = vrot.slane %v1698_v31, 4  ;;  %v9324_v14 = vrot.slane %v9290_v61, 9  ;;  %v3334_v26 = vld [vmem:[#allocation2 + $0x90] sm:$0xff] }
 0x101   : > { %2474 = vst.msk [vmem:[#allocation2 + $0x98] sm:$0xff] %vm1280_vm8, %v11074_v59  ;;  %v3169_v23 = vsel %vm10288_vm2, %v9323_v56, %v3168_v57  ;;  %v3170_v58 = vrot.slane %v3168_v57, 4  ;;  %v9268_v10 = vcombine.low %v2905_v62, %v2915_v1  ;;  %v1708_v12 = vor.u32 %v1707_v63, %v1703_v43  ;;  %v9041_v28 = vld [vmem:[%s10298_s12 + $0x7c] sm:$0xf]  ;;  %v9042_v34 = vld [vmem:[%s10298_s12 + $0x80] sm:$0x1] }
 0x102   : > { %v11230_v41 = vpop.permute.xlu0 %2438  ;;  %3018 = vst.msk [vmem:[#allocation2 + $0x98] sm:$0xff] %vm1458_vm9, %v11097_v25  ;;  %v3175_v13 = vrot.slane %v9291_v21, 5  ;;  %1440 = vrot.lane.b32.xlu1 %v10133_v54, %s10228_s14  ;;  %v1704_v59 = vsel %vm10348_vm5, %v1699_v3, %v1703_v43  ;;  %v3178_v20 = vrot.slane %v9292_v4, 5  ;;  %v1716_v22 = vshrl.u32 %v9037_v8, 16  ;;  %v9293_v43 = vld [vmem:[%s10298_s12 + $0x78] sm:$0xe] }
 0x103   : > { %v1251_v50 = vpop.permute.xlu1 %1250  ;;  %v3172_v18 = vsel %vm10288_vm2, %v3170_v58, %v3171_v0  ;;  %2994 = vrot.lane.b32.xlu0 %v9268_v10, %s10228_s14  ;;  %v1709_v7 = vrot.slane %v1708_v12, 4  ;;  %v1719_v32 = vshll.u32 %v9037_v8, 16  ;;  %v1725_v33 = vshll.u32 %v9038_v15, 16  ;;  %v9294_v46 = vld [vmem:[%s10298_s12 + $0x7c] sm:$0xf] }
 0x104   : > { %1290 = vst.msk [vmem:[#allocation2 + $0xd8] sm:$0xff] %vm1280_vm8, %v1251_v50  ;;  %v9339_v24 = vcombine.low %v3169_v23, %v3172_v18  ;;  %v3176_v27 = vsel %vm10288_vm2, %v9324_v14, %v3175_v13  ;;  %v3177_v6 = vrot.slane %v3175_v13, 4  ;;  %v1718_v30 = vrot.slane %v1716_v22, 4  ;;  %v9295_v54 = vld [vmem:[%s10298_s12 + $0x80] sm:$0x1] }
 0x105   : > { %v1729_v5 = vshrl.u32 %v9038_v15, 16  ;;  %v1714_v35 = vsel %vm10348_vm5, %v1709_v7, %v1713_v39  ;;  %v1735_v60 = vshll.u32 %v9039_v17, 16  ;;  %v1740_v38 = vshrl.u32 %v9040_v53, 16  ;;  %v9296_v63 = vld [vmem:[%s10298_s12 + $0x84] sm:$0xe] }
 0x106   : > { %v11260_v25 = vpop.permute.xlu0 %2982  ;;  %3306 = vst.msk [vmem:[#allocation2 + $0xa0] sm:$0xff] %vm408_vm6, %v9339_v24  ;;  %v3179_v36 = vsel %vm10288_vm2, %v3177_v6, %v3178_v20  ;;  %v9068_v55 = vcombine.low %v1704_v59, %v1714_v35  ;;  %v1721_v40 = vrot.slane %v1719_v32, 5  ;;  %v1727_v48 = vrot.slane %v1725_v33, 5  ;;  %v9297_v23 = vld [vmem:[%s10298_s12 + $0x88] sm:$0xf] }
 0x107   : > { %v1429_v44 = vpop.permute.xlu1 %1428  ;;  %v9340_v16 = vcombine.low %v3176_v27, %v3179_v36  ;;  %v1731_v47 = vrot.slane %v1729_v5, 4  ;;  %v1737_v49 = vrot.slane %v1735_v60, 5  ;;  %v1742_v50 = vrot.slane %v1740_v38, 4  ;;  %v9298_v12 = vld [vmem:[%s10298_s12 + $0x8c] sm:$0x1] }
 0x108   : > { %1468 = vst.msk [vmem:[#allocation2 + $0xd8] sm:$0xff] %vm1458_vm9, %v1429_v44  ;;  %v1743_v51 = vshll.u32 %v9040_v53, 16  ;;  %v1722_v56 = vor.u32 %v1721_v40, %v1718_v30  ;;  %v1749_v57 = vshll.u32 %v9041_v28, 16  ;;  %v1753_v61 = vshrl.u32 %v9041_v28, 16  ;;  %v9043_v44 = vld [vmem:[%s10298_s12 + $0x84] sm:$0xf] }
 0x109   : > { %1978 = vst.msk [vmem:[#allocation2 + $0xb0] sm:$0xff] %vm408_vm6, %v9068_v55  ;;  %v3335_v31 = vld [vmem:[#allocation2 + $0x98] sm:$0xff]  ;;  %3307 = vst.msk [vmem:[#allocation2 + $0xb8] sm:$0xff] %vm408_vm6, %v9340_v16  ;;  %v1759_v62 = vshll.u32 %v9042_v34, 16  ;;  %v1732_v0 = vor.u32 %v1731_v47, %v1727_v48  ;;  %v9325_v1 = vrot.slane %v9293_v43, 9  ;;  %v3182_v3 = vrot.slane %v9294_v46, 5 }
 0x10a   : > { %v11280_v39 = vpop.permute.xlu0 %2263  ;;  %2298 = vst.msk [vmem:[#allocation2 + $0xb0] sm:$0xff] %vm956_vm7, %v11111_v42  ;;  %3636 = vmatprep.mubr.bf16.mxu0 %v3335_v31  ;;  %v1745_v21 = vrot.slane %v1743_v51, 5  ;;  %v1723_v58 = vrot.slane %v1722_v56, 4  ;;  %v1751_v4 = vrot.slane %v1749_v57, 5  ;;  %v1755_v8 = vrot.slane %v1753_v61, 4 }
 0x10b   : > { %2475 = vst.msk [vmem:[#allocation2 + $0xb0] sm:$0xff] %vm1280_vm8, %v11127_v11  ;;  %3637 = vmatmul.mubr.bf16.gmra.mrb[24].mxu0 %v3334_v26  ;;  %v1761_v10 = vrot.slane %v1759_v62, 5  ;;  %v1733_v42 = vrot.slane %v1732_v0, 4  ;;  %v3183_v15 = vsel %vm10288_vm2, %v9325_v1, %v3182_v3  ;;  %v3184_v17 = vrot.slane %v3182_v3, 4  ;;  %v9044_v59 = vld [vmem:[%s10298_s12 + $0x88] sm:$0xf] }
 0x10c   : > { %3019 = vst.msk [vmem:[#allocation2 + $0xb0] sm:$0xff] %vm1458_vm9, %v11142_v37  ;;  %v1746_v13 = vor.u32 %v1745_v21, %v1742_v50  ;;  %v1728_v18 = vsel %vm10348_vm5, %v1723_v58, %v1727_v48  ;;  %v1756_v20 = vor.u32 %v1755_v8, %v1751_v4  ;;  %v3185_v22 = vrot.slane %v9295_v54, 5  ;;  %v9045_v24 = vld [vmem:[%s10298_s12 + $0x8c] sm:$0x1]  ;;  %v9046_v35 = vld [vmem:[%s10298_s12 + $0x90] sm:$0xf] }
 0x10d   : > { %v3336_v11 = vld [vmem:[#allocation2 + $0xa0] sm:$0xff]  ;;  %v9326_v7 = vrot.slane %v9296_v63, 9  ;;  %v1738_v37 = vsel %vm10348_vm5, %v1733_v42, %v1737_v49  ;;  %v3189_v6 = vrot.slane %v9297_v23, 5  ;;  %v3192_v53 = vrot.slane %v9298_v12, 5  ;;  %v9047_v16 = vld [vmem:[%s10298_s12 + $0x94] sm:$0xf] }
 0x10e   : > { %10004 = vmatprep.mubr.msk.bf16.mxu1 %vm408_vm6, %v3336_v11  ;;  %v1747_v27 = vrot.slane %v1746_v13, 4  ;;  %v9069_v28 = vcombine.low %v1728_v18, %v1738_v37  ;;  %v1757_v30 = vrot.slane %v1756_v20, 4  ;;  %v3186_v32 = vsel %vm10288_vm2, %v3184_v17, %v3185_v22  ;;  %v11303_v5 = vpop.permute.xlu0 %2440  ;;  %v9048_v40 = vld [vmem:[%s10298_s12 + $0x98] sm:$0x1]  ;;  %v3337_v48 = vld [vmem:[#allocation2 + $0xa8] sm:$0xff] }
 0x10f   : > { %v929_v14 = vpop.permute.xlu1 %928  ;;  %v1764_v33 = vshrl.u32 %v9043_v44, 16  ;;  %v9341_v60 = vcombine.low %v3183_v15, %v3186_v32  ;;  %v3190_v38 = vsel %vm10288_vm2, %v9326_v7, %v3189_v6  ;;  %v3191_v55 = vrot.slane %v3189_v6, 4  ;;  %v9299_v56 = vld [vmem:[%s10298_s12 + $0x90] sm:$0xe]  ;;  %v9301_v58 = vld [vmem:[%s10298_s12 + $0x98] sm:$0x1] }
 0x110   : > { %967 = vst.msk [vmem:[#allocation2 + $0xf0] sm:$0xff] %vm956_vm7, %v929_v14  ;;  %v3339_v26 = vld [vmem:[#allocation2 + $0xb8] sm:$0xff]  ;;  %v1752_v36 = vsel %vm10348_vm5, %v1747_v27, %v1751_v4  ;;  %v1762_v43 = vsel %vm10348_vm5, %v1757_v30, %v1761_v10  ;;  %v1767_v47 = vshll.u32 %v9043_v44, 16  ;;  %v1773_v49 = vshll.u32 %v9044_v59, 16  ;;  %v9303_v44 = vld [vmem:[%s10298_s12 + $0xa0] sm:$0xf] }
 0x111   : > { %10005 = vmatmul.mubr.msk.bf16.gmra.mrb[12].mxu1 %vm408_vm6, %v3339_v26  ;;  %1979 = vst.msk [vmem:[#allocation2 + $0xc8] sm:$0xff] %vm408_vm6, %v9069_v28  ;;  %v1766_v46 = vrot.slane %v1764_v33, 4  ;;  %v9070_v50 = vcombine.low %v1752_v36, %v1762_v43  ;;  %3308 = vst.msk [vmem:[#allocation2 + $0xd0] sm:$0xff] %vm408_vm6, %v9341_v60  ;;  %v3193_v51 = vsel %vm10288_vm2, %v3191_v55, %v3192_v53  ;;  %v1777_v54 = vshrl.u32 %v9044_v59, 16  ;;  %v9302_v14 = vld [vmem:[%s10298_s12 + $0x9c] sm:$0xe] }
 0x112   : > { %2299 = vst.msk [vmem:[#allocation2 + $0xc8] sm:$0xff] %vm956_vm7, %v11166_v45  ;;  %v1783_v31 = vshll.u32 %v9045_v24, 16  ;;  %v9342_v61 = vcombine.low %v3190_v38, %v3193_v51  ;;  %v1769_v62 = vrot.slane %v1767_v47, 5  ;;  %v1775_v63 = vrot.slane %v1773_v49, 5  ;;  %v9300_v45 = vld [vmem:[%s10298_s12 + $0x94] sm:$0xf] }
 0x113   : > { %v1253_v34 = vpop.permute.xlu1 %1252  ;;  %2476 = vst.msk [vmem:[#allocation2 + $0xc8] sm:$0xff] %vm1280_vm8, %v11188_v29  ;;  %v3338_v57 = vld [vmem:[#allocation2 + $0xb0] sm:$0xff]  ;;  %v1788_v21 = vshrl.u32 %v9046_v35, 16  ;;  %v1779_v1 = vrot.slane %v1777_v54, 4  ;;  %v1791_v29 = vshll.u32 %v9046_v35, 16  ;;  %v1797_v23 = vshll.u32 %v9047_v16, 16 }
 0x114   : > { %1291 = vst.msk [vmem:[#allocation2 + $0xf0] sm:$0xff] %vm1280_vm8, %v1253_v34  ;;  %3644 = vmatprep.mubr.bf16.mxu0 %v3338_v57  ;;  %v1785_v3 = vrot.slane %v1783_v31, 5  ;;  %v1770_v4 = vor.u32 %v1769_v62, %v1766_v46  ;;  %v1801_v10 = vshrl.u32 %v9047_v16, 16  ;;  %v1807_v12 = vshll.u32 %v9048_v40, 16  ;;  %v9304_v20 = vld [vmem:[%s10298_s12 + $0xa4] sm:$0x1] }
 0x115   : > { %3020 = vst.msk [vmem:[#allocation2 + $0xc8] sm:$0xff] %vm1458_vm9, %v11203_v52  ;;  %3645 = vmatmul.mubr.bf16.gmra.mrb[28].mxu0 %v3337_v48  ;;  %v1790_v52 = vrot.slane %v1788_v21, 4  ;;  %v1780_v42 = vor.u32 %v1779_v1, %v1775_v63  ;;  %v1793_v13 = vrot.slane %v1791_v29, 5  ;;  %v1799_v15 = vrot.slane %v1797_v23, 5  ;;  %v9049_v37 = vld [vmem:[%s10298_s12 + $0x9c] sm:$0xf] }
 0x116   : > { %1980 = vst.msk [vmem:[#allocation2 + $0xe0] sm:$0xff] %vm408_vm6, %v9070_v50  ;;  %3309 = vst.msk [vmem:[#allocation2 + $0xe8] sm:$0xff] %vm408_vm6, %v9342_v61  ;;  %v9327_v17 = vrot.slane %v9299_v56, 9  ;;  %v1803_v59 = vrot.slane %v1801_v10, 4  ;;  %v1809_v11 = vrot.slane %v1807_v12, 5  ;;  %v3196_v18 = vrot.slane %v9300_v45, 5 }
 0x117   : > { %v1431_v0 = vpop.permute.xlu1 %1430  ;;  %2300 = vst.msk [vmem:[#allocation2 + $0xe0] sm:$0xff] %vm956_vm7, %v11218_v19  ;;  %v1771_v19 = vrot.slane %v1770_v4, 4  ;;  %v1781_v22 = vrot.slane %v1780_v42, 4  ;;  %v1794_v7 = vor.u32 %v1793_v13, %v1790_v52  ;;  %v3199_v24 = vrot.slane %v9301_v58, 5  ;;  %v9050_v30 = vld [vmem:[%s10298_s12 + $0xa0] sm:$0xf] }
 0x118   : > { %1469 = vst.msk [vmem:[#allocation2 + $0xf0] sm:$0xff] %vm1458_vm9, %v1431_v0  ;;  %v3342_v27 = vld [vmem:[#allocation2 + $0xd0] sm:$0xff]  ;;  %v1804_v53 = vor.u32 %v1803_v59, %v1799_v15  ;;  %v3198_v28 = vrot.slane %v3196_v18, 4  ;;  %v9051_v32 = vld [vmem:[%s10298_s12 + $0xa4] sm:$0x1]  ;;  %v3203_v26 = vrot.slane %v9303_v44, 5 }
 0x119   : > { %v11334_v8 = vpop.permute.xlu0 %2984  ;;  %2477 = vst.msk [vmem:[#allocation2 + $0xe0] sm:$0xff] %vm1280_vm8, %v11230_v41  ;;  %v9328_v41 = vrot.slane %v9302_v14, 9  ;;  %v1776_v6 = vsel %vm10348_vm5, %v1771_v19, %v1775_v63  ;;  %10008 = vmatprep.mubr.msk.bf16.mxu1 %vm408_vm6, %v3342_v27  ;;  %v3340_v33 = vld [vmem:[#allocation2 + $0xc0] sm:$0xff]  ;;  %v1786_v34 = vsel %vm10348_vm5, %v1781_v22, %v1785_v3  ;;  %v1795_v35 = vrot.slane %v1794_v7, 4  ;;  %v9052_v51 = vld [vmem:[%s10298_s12 + $0xa8] sm:$0xf] }
 0x11a   : > { %3021 = vst.msk [vmem:[#allocation2 + $0xe0] sm:$0xff] %vm1458_vm9, %v11260_v25  ;;  %v3197_v25 = vsel %vm10288_vm2, %v9327_v17, %v3196_v18  ;;  %v3206_v36 = vrot.slane %v9304_v20, 5  ;;  %v9071_v38 = vcombine.low %v1776_v6, %v1786_v34  ;;  %v1805_v55 = vrot.slane %v1804_v53, 4  ;;  %v9053_v54 = vld [vmem:[%s10298_s12 + $0xac] sm:$0xf]  ;;  %v3343_v19 = vld [vmem:[#allocation2 + $0xd8] sm:$0xff] }
 0x11b   : > { %v3200_v40 = vsel %vm10288_vm2, %v3198_v28, %v3199_v24  ;;  %v1812_v48 = vshrl.u32 %v9049_v37, 16  ;;  %v1800_v46 = vsel %vm10348_vm5, %v1795_v35, %v1799_v15  ;;  %v3204_v49 = vsel %vm10288_vm2, %v9328_v41, %v3203_v26  ;;  %v9054_v63 = vld [vmem:[%s10298_s12 + $0xb0] sm:$0x1]  ;;  %v9305_v14 = vld [vmem:[%s10298_s12 + $0xa8] sm:$0xe] }
 0x11c   : > { %v3341_v60 = vld [vmem:[#allocation2 + $0xc8] sm:$0xff]  ;;  %v9343_v47 = vcombine.low %v3197_v25, %v3200_v40  ;;  %v3205_v50 = vrot.slane %v3203_v26, 4  ;;  %1981 = vst.msk [vmem:[#allocation2 + $0xf8] sm:$0xff] %vm408_vm6, %v9071_v38  ;;  %v1810_v31 = vsel %vm10348_vm5, %v1805_v55, %v1809_v11  ;;  %v1815_v61 = vshll.u32 %v9049_v37, 16  ;;  %v9307_v20 = vld [vmem:[%s10298_s12 + $0xb0] sm:$0x1] }
 0x11d   : > { %v2266_v16 = vpop.permute.xlu0 %2265  ;;  %3652 = vmatprep.mubr.bf16.mxu0 %v3341_v60  ;;  %v3345_v43 = vld [vmem:[#allocation2 + $0xe8] sm:$0xff]  ;;  %v1814_v57 = vrot.slane %v1812_v48, 4  ;;  %v1821_v62 = vshll.u32 %v9050_v30, 16  ;;  %2301 = vst.msk [vmem:[#allocation2 + $0xf8] sm:$0xff] %vm956_vm7, %v11280_v39  ;;  %v9072_v21 = vcombine.low %v1800_v46, %v1810_v31  ;;  %v1825_v1 = vshrl.u32 %v9050_v30, 16 }
 0x11e   : > { %3653 = vmatmul.mubr.bf16.gmra.mrb[32].mxu0 %v3340_v33  ;;  %10009 = vmatmul.mubr.msk.bf16.gmra.mrb[16].mxu1 %vm408_vm6, %v3345_v43  ;;  %3310 = vst.msk [vmem:[#allocation2 + $0x100] sm:$0xff] %vm408_vm6, %v9343_v47  ;;  %v3207_v45 = vsel %vm10288_vm2, %v3205_v50, %v3206_v36  ;;  %v1831_v3 = vshll.u32 %v9051_v32, 16  ;;  %v1817_v23 = vrot.slane %v1815_v61, 5  ;;  %v1836_v39 = vshrl.u32 %v9052_v51, 16  ;;  %v9308_v27 = vld [vmem:[%s10298_s12 + $0xb4] sm:$0xe] }
 0x11f   : > { %2478 = vst.msk [vmem:[#allocation2 + $0xf8] sm:$0xff] %vm1280_vm8, %v11303_v5  ;;  %v9344_v29 = vcombine.low %v3204_v49, %v3207_v45  ;;  %v1823_v58 = vrot.slane %v1821_v62, 5  ;;  %v1827_v4 = vrot.slane %v1825_v1, 4  ;;  %v1839_v10 = vshll.u32 %v9052_v51, 16  ;;  %v9309_v28 = vld [vmem:[%s10298_s12 + $0xb8] sm:$0xf] }
 0x120   : > { %v931_v56 = vpop.permute.xlu1 %930  ;;  %3022 = vst.msk [vmem:[#allocation2 + $0xf8] sm:$0xff] %vm1458_vm9, %v11334_v8  ;;  %v1833_v52 = vrot.slane %v1831_v3, 5  ;;  %v1845_v12 = vshll.u32 %v9053_v54, 16  ;;  %v1818_v13 = vor.u32 %v1817_v23, %v1814_v57  ;;  %v1838_v15 = vrot.slane %v1836_v39, 4  ;;  %v9306_v8 = vld [vmem:[%s10298_s12 + $0xac] sm:$0xf] }
 0x121   : > { %v3344_v0 = vld [vmem:[#allocation2 + $0xe0] sm:$0xff]  ;;  %968 = vst.msk [vmem:[#allocation2 + $0x108] sm:$0xff] %vm956_vm7, %v931_v56  ;;  %v2443_v5 = vpop.permute.xlu0 %2442  ;;  %v1849_v17 = vshrl.u32 %v9053_v54, 16  ;;  %v1855_v44 = vshll.u32 %v9054_v63, 16  ;;  %v1828_v59 = vor.u32 %v1827_v4, %v1823_v58  ;;  %v1841_v11 = vrot.slane %v1839_v10, 5  ;;  %v3346_v63 = vld [vmem:[#allocation2 + $0xf0] sm:$0xff] }
 0x122   : > { %3660 = vmatprep.mubr.bf16.mxu0 %v3344_v0  ;;  %1982 = vst.msk [vmem:[#allocation2 + $0x110] sm:$0xff] %vm408_vm6, %v9072_v21  ;;  %3311 = vst.msk [vmem:[#allocation2 + $0x118] sm:$0xff] %vm408_vm6, %v9344_v29  ;;  %v1847_v18 = vrot.slane %v1845_v12, 5  ;;  %v9329_v22 = vrot.slane %v9305_v14, 9  ;;  %v1819_v7 = vrot.slane %v1818_v13, 4  ;;  %v3210_v37 = vrot.slane %v9306_v8, 5 }
 0x123   : > { %2302 = vst.msk [vmem:[#allocation2 + $0x110] sm:$0xff] %vm956_vm7, %v2266_v16  ;;  %v1851_v24 = vrot.slane %v1849_v17, 4  ;;  %v1857_v41 = vrot.slane %v1855_v44, 5  ;;  %v1829_v6 = vrot.slane %v1828_v59, 4  ;;  %v1842_v53 = vor.u32 %v1841_v11, %v1838_v15  ;;  %v9310_v30 = vld [vmem:[%s10298_s12 + $0xbc] sm:$0x1] }
 0x124   : > { %v1255_v42 = vpop.permute.xlu1 %1254  ;;  %2479 = vst.msk [vmem:[#allocation2 + $0x110] sm:$0xff] %vm1280_vm8, %v2443_v5  ;;  %v3213_v25 = vrot.slane %v9307_v20, 5  ;;  %v1824_v34 = vsel %vm10348_vm5, %v1819_v7, %v1823_v58  ;;  %v3211_v26 = vsel %vm10288_vm2, %v9329_v22, %v3210_v37  ;;  %v3212_v36 = vrot.slane %v3210_v37, 4  ;;  %v9055_v60 = vld [vmem:[%s10298_s12 + $0xb4] sm:$0xf] }
 0x125   : > { %1292 = vst.msk [vmem:[#allocation2 + $0x108] sm:$0xff] %vm1280_vm8, %v1255_v42  ;;  %v3348_v32 = vld [vmem:[#allocation2 + $0x100] sm:$0xff]  ;;  %v1852_v35 = vor.u32 %v1851_v24, %v1847_v18  ;;  %v9056_v38 = vld [vmem:[%s10298_s12 + $0xb8] sm:$0xf]  ;;  %v1834_v55 = vsel %vm10348_vm5, %v1829_v6, %v1833_v52  ;;  %v1843_v16 = vrot.slane %v1842_v53, 4  ;;  %v9330_v40 = vrot.slane %v9308_v27, 9 }
 0x126   : > { %3661 = vmatmul.mubr.bf16.gmra.mrb[36].mxu0 %v3343_v19  ;;  %10012 = vmatprep.mubr.msk.bf16.mxu1 %vm408_vm6, %v3348_v32  ;;  %v3217_v48 = vrot.slane %v9309_v28, 5  ;;  %v9057_v43 = vld [vmem:[%s10298_s12 + $0xbc] sm:$0x1]  ;;  %v9073_v47 = vcombine.low %v1824_v34, %v1834_v55  ;;  %v3214_v50 = vsel %vm10288_vm2, %v3212_v36, %v3213_v25  ;;  %v3220_v51 = vrot.slane %v9310_v30, 5  ;;  %v9058_v62 = vld [vmem:[%s10298_s12 + $0xc0] sm:$0xf] }
 0x127   : > { %v3347_v46 = vld [vmem:[#allocation2 + $0xf8] sm:$0xff]  ;;  %v1853_v49 = vrot.slane %v1852_v35, 4  ;;  %v1848_v31 = vsel %vm10348_vm5, %v1843_v16, %v1847_v18  ;;  %v9345_v56 = vcombine.low %v3211_v26, %v3214_v50  ;;  %v1860_v21 = vshrl.u32 %v9055_v60, 16  ;;  %v9059_v3 = vld [vmem:[%s10298_s12 + $0xc4] sm:$0xf] }
 0x128   : > { %v1433_v33 = vpop.permute.xlu1 %1432  ;;  %3668 = vmatprep.mubr.bf16.mxu0 %v3347_v46  ;;  %v3218_v57 = vsel %vm10288_vm2, %v9330_v40, %v3217_v48  ;;  %v3219_v61 = vrot.slane %v3217_v48, 4  ;;  %1983 = vst.msk [vmem:[#allocation2 + $0x128] sm:$0xff] %vm408_vm6, %v9073_v47  ;;  %v1863_v45 = vshll.u32 %v9055_v60, 16  ;;  %v1869_v1 = vshll.u32 %v9056_v38, 16  ;;  %v9060_v4 = vld [vmem:[%s10298_s12 + $0xc8] sm:$0x1] }
 0x129   : > { %1470 = vst.msk [vmem:[#allocation2 + $0x108] sm:$0xff] %vm1458_vm9, %v1433_v33  ;;  %v3351_v54 = vld [vmem:[#allocation2 + $0x118] sm:$0xff]  ;;  %v1858_v0 = vsel %vm10348_vm5, %v1853_v49, %v1857_v41  ;;  %v1873_v58 = vshrl.u32 %v9056_v38, 16  ;;  %v1879_v39 = vshll.u32 %v9057_v43, 16  ;;  %v1862_v10 = vrot.slane %v1860_v21, 4 }
 0x12a   : > { %10013 = vmatmul.mubr.msk.bf16.gmra.mrb[20].mxu1 %vm408_vm6, %v3351_v54  ;;  %v9074_v29 = vcombine.low %v1848_v31, %v1858_v0  ;;  %3312 = vst.msk [vmem:[#allocation2 + $0x130] sm:$0xff] %vm408_vm6, %v9345_v56  ;;  %v3221_v23 = vsel %vm10288_vm2, %v3219_v61, %v3220_v51  ;;  %v1865_v12 = vrot.slane %v1863_v45, 5  ;;  %v1871_v14 = vrot.slane %v1869_v1, 5  ;;  %v9311_v17 = vld [vmem:[%s10298_s12 + $0xc0] sm:$0xe] }
 0x12b   : > { %v9346_v52 = vcombine.low %v3218_v57, %v3221_v23  ;;  %v1875_v5 = vrot.slane %v1873_v58, 4  ;;  %v1881_v42 = vrot.slane %v1879_v39, 5  ;;  %v1884_v13 = vshrl.u32 %v9058_v62, 16  ;;  %v9312_v11 = vld [vmem:[%s10298_s12 + $0xc4] sm:$0xf] }
 0x12c   : > { %1984 = vst.msk [vmem:[#allocation2 + $0x140] sm:$0xff] %vm408_vm6, %v9074_v29  ;;  %v1887_v15 = vshll.u32 %v9058_v62, 16  ;;  %v1866_v44 = vor.u32 %v1865_v12, %v1862_v10  ;;  %v1893_v8 = vshll.u32 %v9059_v3, 16  ;;  %v1897_v19 = vshrl.u32 %v9059_v3, 16  ;;  %v9313_v24 = vld [vmem:[%s10298_s12 + $0xc8] sm:$0x1] }
 0x12d   : > { %3313 = vst.msk [vmem:[#allocation2 + $0x148] sm:$0xff] %vm408_vm6, %v9346_v52  ;;  %v1903_v59 = vshll.u32 %v9060_v4, 16  ;;  %v2987_v18 = vpop.permute.xlu0 %2986  ;;  %v1876_v20 = vor.u32 %v1875_v5, %v1871_v14  ;;  %v1886_v22 = vrot.slane %v1884_v13, 4  ;;  %v9331_v41 = vrot.slane %v9311_v17, 9  ;;  %v9314_v25 = vld [vmem:[%s10298_s12 + $0xcc] sm:$0xe] }
 0x12e   : > { %3669 = vmatmul.mubr.bf16.gmra.mrb[40].mxu0 %v3346_v63  ;;  %v1889_v7 = vrot.slane %v1887_v15, 5  ;;  %3023 = vst.msk [vmem:[#allocation2 + $0x110] sm:$0xff] %vm1458_vm9, %v2987_v18  ;;  %v1867_v37 = vrot.slane %v1866_v44, 4  ;;  %v1895_v27 = vrot.slane %v1893_v8, 5  ;;  %v1899_v6 = vrot.slane %v1897_v19, 4 }
 0x12f   : > { %v1905_v53 = vrot.slane %v1903_v59, 5  ;;  %v1877_v28 = vrot.slane %v1876_v20, 4  ;;  %v3224_v32 = vrot.slane %v9312_v11, 5  ;;  %v3227_v33 = vrot.slane %v9313_v24, 5  ;;  %v9315_v34 = vld [vmem:[%s10298_s12 + $0xd0] sm:$0xf] }
 0x130   : > { %v1890_v30 = vor.u32 %v1889_v7, %v1886_v22  ;;  %v1872_v26 = vsel %vm10348_vm5, %v1867_v37, %v1871_v14  ;;  %v1900_v36 = vor.u32 %v1899_v6, %v1895_v27  ;;  %v9316_v60 = vld [vmem:[%s10298_s12 + $0xd4] sm:$0x1]  ;;  %v9332_v38 = vrot.slane %v9314_v25, 9  ;;  %v11442_v62 = vld [vmem:[#allocation2 + $0x108] sm:$0xff] }
 0x131   : > { %v3354_v35 = vld [vmem:[#allocation2 + $0x130] sm:$0xff]  ;;  %v3231_v55 = vrot.slane %v9315_v34, 5  ;;  %v2268_v16 = vpop.permute.xlu0 %2267  ;;  %v1882_v40 = vsel %vm10348_vm5, %v1877_v28, %v1881_v42  ;;  %v11430_v43 = vsel %vm10288_vm2, %v9331_v41, %v3224_v32  ;;  %v3226_v46 = vrot.slane %v3224_v32, 4 }
 0x132   : > { %10016 = vmatprep.mubr.msk.bf16.mxu1 %vm408_vm6, %v3354_v35  ;;  %v1891_v48 = vrot.slane %v1890_v30, 4  ;;  %2303 = vst.msk [vmem:[#allocation2 + $0x128] sm:$0xff] %vm956_vm7, %v2268_v16  ;;  %v9075_v49 = vcombine.low %v1872_v26, %v1882_v40  ;;  %v1901_v50 = vrot.slane %v1900_v36, 4  ;;  %v3234_v61 = vrot.slane %v9316_v60, 5 }
 0x133   : > { %v933_v47 = vpop.permute.xlu1 %932  ;;  %v11435_v51 = vsel %vm10288_vm2, %v9332_v38, %v3231_v55  ;;  %v3233_v54 = vrot.slane %v3231_v55, 4  ;;  %v3228_v57 = vsel %vm10288_vm2, %v3226_v46, %v3227_v33  ;;  %v10230_v29 = vmov 0  }
 0x134   : > { %969 = vst.msk [vmem:[#allocation2 + $0x120] sm:$0xff] %vm956_vm7, %v933_v47  ;;  %v3357_v31 = vld [vmem:[#allocation2 + $0x148] sm:$0xff]  ;;  %v1896_v56 = vsel %vm10348_vm5, %v1891_v48, %v1895_v27  ;;  %v1906_v63 = vsel %vm10348_vm5, %v1901_v50, %v1905_v53  ;;  %v9347_v0 = vcombine.low %v11430_v43, %v3228_v57 }
 0x135   : > { %10017 = vmatmul.mubr.msk.bf16.gmra.mrb[24].mxu1 %vm408_vm6, %v3357_v31  ;;  %1985 = vst.msk [vmem:[#allocation2 + $0x158] sm:$0xff] %vm408_vm6, %v9075_v49  ;;  %v2445_v21 = vpop.permute.xlu0 %2444  ;;  %v3350_v45 = vld [vmem:[#allocation2 + $0x110] sm:$0xff]  ;;  %v11449_v1 = vcombine.low %v1896_v56, %v1906_v63  ;;  %v11453_v3 = vsel %vm10288_vm2, %v3233_v54, %v3234_v61  ;;  %v10147_v54 = vld [vmem:[%s13205_s4 + $0x80] sm:$0xff]   ;;  %v10149_v56 = vld [vmem:[%s13205_s4 + $0x88] sm:$0xff]  }
 0x136   : > { %3993 = vst.msk [vmem:[#allocation4 + $0xc] sm:$0xf] %vm3988_vm10, %v10230_v29  ;;  %3989 = vst.msk [vmem:[#allocation4] sm:$0xf] %vm3988_vm10, %v10230_v29  ;;  %3676 = vmatprep.mubr.bf16.mxu0 %v3350_v45  ;;  %v9348_v58 = vcombine.low %v11435_v51, %v11453_v3  ;;  %10024 = vmatprep.subr.bf16.mxu0 %v10147_v54 }
 0x137   : > { %3990 = vst.msk [vmem:[#allocation4 + $0x4] sm:$0xf] %vm3988_vm10, %v10230_v29  ;;  %3994 = vst.msk [vmem:[#allocation4 + $0x10] sm:$0xf] %vm3988_vm10, %v10230_v29  ;;  %v1257_v23 = vpop.permute.xlu1 %1256  ;;  %3677 = vmatmul.mubr.bf16.gmra.mrb[44].mxu0 %v11442_v62 }
 0x138   : > { %3996 = vst.msk [vmem:[#allocation4 + $0x18] sm:$0xf] %vm3988_vm10, %v10230_v29  ;;  %3997 = vst.msk [vmem:[#allocation4 + $0x1c] sm:$0xf] %vm3988_vm10, %v10230_v29  ;;  %10025 = vmatpush3.bf16.msra.mxu0 %v10147_v54 }
 0x139   : > { %3999 = vst.msk [vmem:[#allocation4 + $0x24] sm:$0xf] %vm3988_vm10, %v10230_v29  ;;  %4000 = vst.msk [vmem:[#allocation4 + $0x28] sm:$0xf] %vm3988_vm10, %v10230_v29  ;;  %10026 = vmatprep.subr.bf16.mxu0 %v10149_v56 }
 0x13a   : > { %4002 = vst.msk [vmem:[#allocation4 + $0x30] sm:$0xf] %vm3988_vm10, %v10230_v29  ;;  %4003 = vst.msk [vmem:[#allocation4 + $0x34] sm:$0xf] %vm3988_vm10, %v10230_v29 }
 0x13b   : > { %4005 = vst.msk [vmem:[#allocation4 + $0x3c] sm:$0xf] %vm3988_vm10, %v10230_v29  ;;  %4006 = vst.msk [vmem:[#allocation4 + $0x40] sm:$0xf] %vm3988_vm10, %v10230_v29  ;;  %v1435_v39 = vpop.permute.xlu1 %1434 }
 0x13c   : > { %4008 = vst.msk [vmem:[#allocation4 + $0x48] sm:$0xf] %vm3988_vm10, %v10230_v29  ;;  %4009 = vst.msk [vmem:[#allocation4 + $0x4c] sm:$0xf] %vm3988_vm10, %v10230_v29  ;;  %10027 = vmatpush3.bf16.msra.mxu0 %v10149_v56 }
 0x13d   : > { %4011 = vst.msk [vmem:[#allocation4 + $0x54] sm:$0xf] %vm3988_vm10, %v10230_v29  ;;  %4012 = vst.msk [vmem:[#allocation4 + $0x58] sm:$0xf] %vm3988_vm10, %v10230_v29  ;;  %v2989_v4 = vpop.permute.xlu0 %2988  ;;  %v4725_v10 = vld [vmem:[#allocation4] sm:$0xf] }
 0x13e   : > { %4014 = vst.msk [vmem:[#allocation4 + $0x60] sm:$0xf] %vm3988_vm10, %v10230_v29  ;;  %4015 = vst.msk [vmem:[#allocation4 + $0x64] sm:$0xf] %vm3988_vm10, %v10230_v29  ;;  %v4726_v12 = vld [vmem:[#allocation4 + $0x4] sm:$0xf] }
 0x13f   : > { %4017 = vst.msk [vmem:[#allocation4 + $0x6c] sm:$0xf] %vm3988_vm10, %v10230_v29  ;;  %4018 = vst.msk [vmem:[#allocation4 + $0x70] sm:$0xf] %vm3988_vm10, %v10230_v29  ;;  %v4774_v42 = vshrl.u32 %v4725_v10, 16  ;;  %v4777_v13 = vshll.u32 %v4725_v10, 16 }
 0x140   : > { %4020 = vst.msk [vmem:[#allocation4 + $0x78] sm:$0xf] %vm3988_vm10, %v10230_v29  ;;  %4021 = vst.msk [vmem:[#allocation4 + $0x7c] sm:$0xf] %vm3988_vm10, %v10230_v29  ;;  %v4783_v15 = vshll.u32 %v4726_v12, 16  ;;  %v4787_v17 = vshrl.u32 %v4726_v12, 16 }
 0x141   : > { %4023 = vst.msk [vmem:[#allocation4 + $0x84] sm:$0xf] %vm3988_vm10, %v10230_v29  ;;  %4024 = vst.msk [vmem:[#allocation4 + $0x88] sm:$0xf] %vm3988_vm10, %v10230_v29  ;;  %v5269_v8 = vld [vmem:[#allocation4] sm:$0xe]  ;;  %v2270_v59 = vpop.permute.xlu0 %2269 }
 0x142   : > { %4026 = vst.msk [vmem:[#allocation4 + $0x90] sm:$0xf] %vm3988_vm10, %v10230_v29  ;;  %4027 = vst.msk [vmem:[#allocation4 + $0x94] sm:$0xf] %vm3988_vm10, %v10230_v29  ;;  %v5270_v19 = vld [vmem:[#allocation4 + $0x4] sm:$0xf] }
 0x143   : > { %4029 = vst.msk [vmem:[#allocation4 + $0x9c] sm:$0xf] %vm3988_vm10, %v10230_v29  ;;  %4030 = vst.msk [vmem:[#allocation4 + $0xa0] sm:$0xf] %vm3988_vm10, %v10230_v29  ;;  %v4776_v11 = vrot.slane %v4774_v42, 4  ;;  %v4779_v18 = vrot.slane %v4777_v13, 5 }
 0x144   : > { %4032 = vst.msk [vmem:[#allocation4 + $0xa8] sm:$0xf] %vm3988_vm10, %v10230_v29  ;;  %4033 = vst.msk [vmem:[#allocation4 + $0xac] sm:$0xf] %vm3988_vm10, %v10230_v29  ;;  %v4785_v20 = vrot.slane %v4783_v15, 5  ;;  %v4789_v7 = vrot.slane %v4787_v17, 4 }
 0x145   : > { %4035 = vst.msk [vmem:[#allocation4 + $0xb4] sm:$0xf] %vm3988_vm10, %v10230_v29  ;;  %4036 = vst.msk [vmem:[#allocation4 + $0xb8] sm:$0xf] %vm3988_vm10, %v10230_v29  ;;  %v5367_v24 = vrot.slane %v5270_v19, 5  ;;  %v4780_v37 = vor.u32 %v4779_v18, %v4776_v11  ;;  %v9449_v6 = vrot.slane %v5269_v8, 9  ;;  %v2447_v30 = vpop.permute.xlu0 %2446 }
 0x146   : > { %4038 = vst.msk [vmem:[#allocation4 + $0xc0] sm:$0xf] %vm3988_vm10, %v10230_v29  ;;  %4039 = vst.msk [vmem:[#allocation4 + $0xc4] sm:$0xf] %vm3988_vm10, %v10230_v29  ;;  %v4790_v53 = vor.u32 %v4789_v7, %v4785_v20 }
 0x147   : > { %4041 = vst.msk [vmem:[#allocation4 + $0xcc] sm:$0xf] %vm3988_vm10, %v10230_v29  ;;  %4042 = vst.msk [vmem:[#allocation4 + $0xd0] sm:$0xf] %vm3988_vm10, %v10230_v29  ;;  %v5369_v25 = vrot.slane %v5367_v24, 4  ;;  %v4781_v33 = vrot.slane %v4780_v37, 4  ;;  %v5368_v60 = vsel %vm10288_vm2, %v9449_v6, %v5367_v24 }
 0x148   : > { %2480 = vst.msk [vmem:[#allocation2 + $0x128] sm:$0xff] %vm1280_vm8, %v2445_v21  ;;  %1293 = vst.msk [vmem:[#allocation2 + $0x120] sm:$0xff] %vm1280_vm8, %v1257_v23  ;;  %v4791_v34 = vrot.slane %v4790_v53, 4  ;;  %v935_v26 = vpop.permute.xlu1 %934 }
 0x149   : > { %3314 = vst.msk [vmem:[#allocation2 + $0x160] sm:$0xff] %vm408_vm6, %v9347_v0  ;;  %1986 = vst.msk [vmem:[#allocation2 + $0x170] sm:$0xff] %vm408_vm6, %v11449_v1  ;;  %v4786_v35 = vsel %vm10348_vm5, %v4781_v33, %v4785_v20 }
 0x14a   : > { %3995 = vst.msk [vmem:[#allocation4 + $0x14] sm:$0x1] %vm3991_vm11, %v10230_v29  ;;  %3992 = vst.msk [vmem:[#allocation4 + $0x8] sm:$0x1] %vm3991_vm11, %v10230_v29 }
 0x14b   : > { %3998 = vst.msk [vmem:[#allocation4 + $0x20] sm:$0x1] %vm3991_vm11, %v10230_v29  ;;  %4001 = vst.msk [vmem:[#allocation4 + $0x2c] sm:$0x1] %vm3991_vm11, %v10230_v29 }
 0x14c   : > { %4004 = vst.msk [vmem:[#allocation4 + $0x38] sm:$0x1] %vm3991_vm11, %v10230_v29  ;;  %4007 = vst.msk [vmem:[#allocation4 + $0x44] sm:$0x1] %vm3991_vm11, %v10230_v29  ;;  %v1259_v40 = vpop.permute.xlu1 %1258 }
 0x14d   : > { %4010 = vst.msk [vmem:[#allocation4 + $0x50] sm:$0x1] %vm3991_vm11, %v10230_v29  ;;  %4013 = vst.msk [vmem:[#allocation4 + $0x5c] sm:$0x1] %vm3991_vm11, %v10230_v29 }
 0x14e   : > { %4016 = vst.msk [vmem:[#allocation4 + $0x68] sm:$0x1] %vm3991_vm11, %v10230_v29  ;;  %4019 = vst.msk [vmem:[#allocation4 + $0x74] sm:$0x1] %vm3991_vm11, %v10230_v29 }
 0x14f   : > { %4022 = vst.msk [vmem:[#allocation4 + $0x80] sm:$0x1] %vm3991_vm11, %v10230_v29  ;;  %4025 = vst.msk [vmem:[#allocation4 + $0x8c] sm:$0x1] %vm3991_vm11, %v10230_v29 }
 0x150   : > { %4028 = vst.msk [vmem:[#allocation4 + $0x98] sm:$0x1] %vm3991_vm11, %v10230_v29  ;;  %4031 = vst.msk [vmem:[#allocation4 + $0xa4] sm:$0x1] %vm3991_vm11, %v10230_v29  ;;  %v3360_v52 = vld [vmem:[#allocation2 + $0x160] sm:$0xff]  ;;  %v1437_v48 = vpop.permute.xlu1 %1436 }
 0x151   : > { %4034 = vst.msk [vmem:[#allocation4 + $0xb0] sm:$0x1] %vm3991_vm11, %v10230_v29  ;;  %4037 = vst.msk [vmem:[#allocation4 + $0xbc] sm:$0x1] %vm3991_vm11, %v10230_v29  ;;  %10020 = vmatprep.mubr.msk.bf16.mxu1 %vm408_vm6, %v3360_v52  ;;  %v4727_v5 = vld [vmem:[#allocation4 + $0x8] sm:$0x1]  ;;  %v2991_v43 = vpop.permute.xlu0 %2990 }
 0x152   : > { %4040 = vst.msk [vmem:[#allocation4 + $0xc8] sm:$0x1] %vm3991_vm11, %v10230_v29  ;;  %4043 = vst.msk [vmem:[#allocation4 + $0xd4] sm:$0x1] %vm3991_vm11, %v10230_v29  ;;  %v4793_v44 = vshll.u32 %v4727_v5, 16 }
 0x153   : > { %3315 = vst.msk [vmem:[#allocation2 + $0x178] sm:$0xff] %vm408_vm6, %v9348_v58  ;;  %v5271_v22 = vld [vmem:[#allocation4 + $0x8] sm:$0x1] }
 0x154   : > { %1471 = vst.msk [vmem:[#allocation2 + $0x120] sm:$0xff] %vm1458_vm9, %v1435_v39  ;;  %3024 = vst.msk [vmem:[#allocation2 + $0x128] sm:$0xff] %vm1458_vm9, %v2989_v4  ;;  %v4795_v27 = vrot.slane %v4793_v44, 5  ;;  %v5370_v28 = vrot.slane %v5271_v22, 5  ;;  %v11564_v22 = vld [vmem:[%s13204_s3] ss:$0 sm:$0xff] }
 0x155   : > { %2304 = vst.msk [vmem:[#allocation2 + $0x140] sm:$0xff] %vm956_vm7, %v2270_v59  ;;  %970 = vst.msk [vmem:[#allocation2 + $0x138] sm:$0xff] %vm956_vm7, %v935_v26  ;;  %v2272_v46 = vpop.permute.xlu0 %2271  ;;  %v11559_v59 = vld [vmem:[%s13203_s2] ss:$0 sm:$0xff] }
 0x156   : > { %2481 = vst.msk [vmem:[#allocation2 + $0x140] sm:$0xff] %vm1280_vm8, %v2447_v30  ;;  %v4796_v36 = vsel %vm10348_vm5, %v4791_v34, %v4795_v27  ;;  %v5371_v38 = vsel %vm10288_vm2, %v5369_v25, %v5370_v28  ;;  %1294 = vst.msk [vmem:[#allocation2 + $0x138] sm:$0xff] %vm1280_vm8, %v1259_v40 }
 0x157   : > { %v9433_v55 = vcombine.low %v4786_v35, %v4796_v36  ;;  %v9465_v16 = vcombine.low %v5368_v60, %v5371_v38  ;;  %1472 = vst.msk [vmem:[#allocation2 + $0x138] sm:$0xff] %vm1458_vm9, %v1437_v48  ;;  %3025 = vst.msk [vmem:[#allocation2 + $0x140] sm:$0xff] %vm1458_vm9, %v2991_v43  ;;  %v937_v47 = vpop.permute.xlu1 %936 }
 0x158   : > { %2305 = vst.msk [vmem:[#allocation2 + $0x158] sm:$0xff] %vm956_vm7, %v2272_v46  ;;  %971 = vst.msk [vmem:[#allocation2 + $0x150] sm:$0xff] %vm956_vm7, %v937_v47 }
 0x159   : > { %5205 = vrot.lane.b32.xlu1 %v9433_v55, %s10229_s15  ;;  %v2449_v50 = vpop.permute.xlu0 %2448 }
 0x15a   : > { %v3363_v14 = vld [vmem:[#allocation2 + $0x178] sm:$0xff]  ;;  %2482 = vst.msk [vmem:[#allocation2 + $0x158] sm:$0xff] %vm1280_vm8, %v2449_v50 }
 0x15b   : > { %10021 = vmatmul.mubr.msk.bf16.gmra.mrb[28].mxu1 %vm408_vm6, %v3363_v14  ;;  %v3352_v41 = vld [vmem:[#allocation2 + $0x120] sm:$0xff]  ;;  %v3353_v32 = vld [vmem:[#allocation2 + $0x128] sm:$0xff]  ;;  %v1261_v31 = vpop.permute.xlu1 %1260 }
 0x15c   : > { %3684 = vmatprep.mubr.bf16.mxu0 %v3353_v32  ;;  %1295 = vst.msk [vmem:[#allocation2 + $0x150] sm:$0xff] %vm1280_vm8, %v1261_v31 }
 0x15d   : > { %3685 = vmatmul.mubr.bf16.gmra.mrb[48].mxu0 %v3352_v41  ;;  %5525 = vrot.lane.b32.xlu1 %v9465_v16, %s10227_s13 }
 0x15e   : > { %v3355_v49 = vld [vmem:[#allocation2 + $0x138] sm:$0xff]  ;;  %v3356_v51 = vld [vmem:[#allocation2 + $0x140] sm:$0xff] }
 0x15f   : > { %3692 = vmatprep.mubr.bf16.mxu0 %v3356_v51  ;;  %v1439_v57 = vpop.permute.xlu1 %1438 }
 0x160   : > { %1473 = vst.msk [vmem:[#allocation2 + $0x150] sm:$0xff] %vm1458_vm9, %v1439_v57 }
 0x161   : > { %v2993_v61 = vpop.permute.xlu0 %2992 }
 0x162   : > { %3026 = vst.msk [vmem:[#allocation2 + $0x158] sm:$0xff] %vm1458_vm9, %v2993_v61 }
 0x165   : > { %3693 = vmatmul.mubr.bf16.gmra.mrb[52].mxu0 %v3355_v49  ;;  %v2274_v62 = vpop.permute.xlu0 %2273 }
 0x166   : > { %2306 = vst.msk [vmem:[#allocation2 + $0x170] sm:$0xff] %vm956_vm7, %v2274_v62  ;;  %v4476_v62 = vld [vmem:[#allocation4 + $0x18] sm:$0xf] }
 0x167   : > { %v3358_v63 = vld [vmem:[#allocation2 + $0x150] sm:$0xff] }
 0x169   : > { %v2451_v0 = vpop.permute.xlu0 %2450  ;;  %v3359_v21 = vld [vmem:[#allocation2 + $0x158] sm:$0xff] }
 0x16a   : > { %2483 = vst.msk [vmem:[#allocation2 + $0x170] sm:$0xff] %vm1280_vm8, %v2451_v0  ;;  %3700 = vmatprep.mubr.bf16.mxu0 %v3359_v21  ;;  %v4467_v0 = vld [vmem:[#allocation4 + $0xc] sm:$0xf] }
 0x16c   : > { %v939_v45 = vpop.permute.xlu1 %938 }
 0x16d   : > { %3701 = vmatmul.mubr.bf16.gmra.mrb[56].mxu0 %v3358_v63  ;;  %972 = vst.msk [vmem:[#allocation2 + $0x168] sm:$0xff] %vm956_vm7, %v939_v45 }
 0x170   : > { %v1263_v1 = vpop.permute.xlu1 %1262 }
 0x171   : > { %1296 = vst.msk [vmem:[#allocation2 + $0x168] sm:$0xff] %vm1280_vm8, %v1263_v1 }
 0x174   : > { %v1441_v3 = vpop.permute.xlu1 %1440 }
 0x175   : > { %v2995_v29 = vpop.permute.xlu0 %2994  ;;  %1474 = vst.msk [vmem:[#allocation2 + $0x168] sm:$0xff] %vm1458_vm9, %v1441_v3 }
 0x176   : > { %3027 = vst.msk [vmem:[#allocation2 + $0x170] sm:$0xff] %vm1458_vm9, %v2995_v29 }
 0x17c   : > { %v3361_v12 = vld [vmem:[#allocation2 + $0x168] sm:$0xff] }
 0x17d   : > { %v9744_v23 = vpop.f32.mrb[0].mxu0  ;;  %v3362_v14 = vld [vmem:[#allocation2 + $0x170] sm:$0xff] }
 0x17e   : > { %v9745_v58 = vpop.f32.mrb[1].mxu0  ;;  %3708 = vmatprep.mubr.bf16.mxu0 %v3362_v14 }
 0x17f   : > { %v9746_v39 = vadd.f32 %v9745_v58, %v9744_v23  ;;  %v9747_v4 = vpop.f32.mrb[2].mxu0  ;;  %3709 = vmatmul.mubr.bf16.gmra.mrb[60].mxu0 %v3361_v12 }
 0x180   : > { %v9748_v52 = vpop.f32.mrb[3].mxu0 }
 0x181   : > { %v9749_v10 = vadd.f32 %v9748_v52, %v9747_v4  ;;  %v4473_v52 = vld [vmem:[#allocation4 + $0x14] sm:$0x1] }
 0x185   : > { %v9750_v5 = vpop.f32.mrb[4].mxu0 }
 0x186   : > { %v9751_v42 = vpop.f32.mrb[5].mxu0 }
 0x187   : > { %v9752_v13 = vadd.f32 %v9751_v42, %v9750_v5  ;;  %v9753_v15 = vpop.f32.mrb[6].mxu0 }
 0x188   : > { %v9754_v17 = vpop.f32.mrb[7].mxu0 }
 0x189   : > { %v9755_v44 = vadd.f32 %v9754_v17, %v9753_v15 }
 0x190   : > { %v9994_v8 = vpop.f32.mrb[0].mxu1 }
 0x191   : > { %v3751_v19 = vpop.f32.mrb[1].mxu1  ;;  %v3760_v11 = vadd.f32 %v9994_v8, %v9752_v13 }
 0x192   : > { %v3752_v18 = vadd.f32 %v9746_v39, %v3751_v19  ;;  %v9995_v20 = vpop.f32.mrb[2].mxu1  ;;  %v4480_v39 = vld [vmem:[#allocation4 + $0x20] sm:$0x1] }
 0x193   : > { %v3754_v7 = vpop.f32.mrb[3].mxu1  ;;  %v3887_v24 = vmul.f32 %v11559_v59, %v3760_v11  ;;  %v3763_v41 = vadd.f32 %v9995_v20, %v9755_v44 }
 0x194   : > { %v3885_v37 = vmul.f32 %v11559_v59, %v3752_v18  ;;  %v3755_v27 = vadd.f32 %v9749_v10, %v3754_v7 }
 0x195   : > { %v3926_v6 = vadd.f32 %v11564_v22, %v3887_v24  ;;  %v3888_v53 = vmul.f32 %v11559_v59, %v3763_v41  ;;  %v9756_v25 = vpop.f32.mrb[8].mxu0 }
 0x196   : > { %v3924_v28 = vadd.f32 %v11564_v22, %v3885_v37  ;;  %v3886_v30 = vmul.f32 %v11559_v59, %v3755_v27  ;;  %v9757_v32 = vpop.f32.mrb[9].mxu0 }
 0x197   : > { %v3958_v33 = vmax.f32 %v3926_v6, 0.0  ;;  %v3927_v34 = vadd.f32 %v11564_v22, %v3888_v53  ;;  %v9758_v35 = vadd.f32 %v9757_v32, %v9756_v25  ;;  %v9759_v26 = vpop.f32.mrb[10].mxu0 }
 0x198   : > { %v3956_v36 = vmax.f32 %v3924_v28, 0.0  ;;  %v3925_v60 = vadd.f32 %v11564_v22, %v3886_v30  ;;  %v9760_v38 = vpop.f32.mrb[11].mxu0 }
 0x199   : > { %v9698_v55 = vpack.c.bf16 %v3958_v33, %v3958_v33  ;;  %v3959_v16 = vmax.f32 %v3927_v34, 0.0  ;;  %v9761_v40 = vadd.f32 %v9760_v38, %v9759_v26 }
 0x19a   : > { %v9696_v48 = vpack.c.bf16 %v3956_v36, %v3956_v36  ;;  %v3957_v43 = vmax.f32 %v3925_v60, 0.0 }
 0x19b   : > { %v4161_v46 = vshrl.u32 %v9698_v55, 16  ;;  %v9699_v47 = vpack.c.bf16 %v3959_v16, %v3959_v16  ;;  %v4164_v54 = vshll.u32 %v9698_v55, 16 }
 0x19c   : > { %v4144_v49 = vshrl.u32 %v9696_v48, 16  ;;  %v9697_v50 = vpack.c.bf16 %v3957_v43, %v3957_v43  ;;  %v4147_v57 = vshll.u32 %v9696_v48, 16 }
 0x19d   : > { %v4163_v51 = vrot.slane %v4161_v46, 7  ;;  %v4169_v31 = vshrl.u32 %v9699_v47, 16  ;;  %v4172_v1 = vshll.u32 %v9699_v47, 16 }
 0x19e   : > { %v4146_v56 = vrot.slane %v4144_v49, 7  ;;  %v4152_v61 = vshrl.u32 %v9697_v50, 16  ;;  %v4155_v23 = vshll.u32 %v9697_v50, 16 }
 0x19f   : > { %v4166_v21 = vor.u32 %v4164_v54, %v4163_v51  ;;  %v4171_v45 = vrot.slane %v4169_v31, 7  ;;  %v4167_v10 = vrot.slane %v4163_v51, 4 }
 0x1a0   : > { %v4149_v3 = vor.u32 %v4147_v57, %v4146_v56  ;;  %v4154_v29 = vrot.slane %v4152_v61, 7  ;;  %v4150_v42 = vrot.slane %v4146_v56, 4 }
 0x1a1   : > { %v4477_v12 = vsel %vm11575_vm15, %v4166_v21, %v4476_v62  ;;  %v4174_v14 = vor.u32 %v4172_v1, %v4171_v45  ;;  %v4176_v5 = vrot.slane %v4171_v45, 4 }
 0x1a2   : > { %v4468_v13 = vsel %vm11575_vm15, %v4149_v3, %v4467_v0  ;;  %v4157_v15 = vor.u32 %v4155_v23, %v4154_v29  ;;  %v4159_v17 = vrot.slane %v4154_v29, 4  ;;  %4478 = vst [vmem:[#allocation4 + $0x18] sm:$0xf] %v4477_v12 }
 0x1a3   : > { %4469 = vst [vmem:[#allocation4 + $0xc] sm:$0xf] %v4468_v13  ;;  %v4175_v44 = vsel %vm11587_vm1, %v4167_v10, %v4174_v14  ;;  %v4481_v8 = vsel %vm11581_vm0, %v4176_v5, %v4480_v39 }
 0x1a4   : > { %v4158_v19 = vsel %vm11587_vm1, %v4150_v42, %v4157_v15  ;;  %v4474_v11 = vsel %vm11581_vm0, %v4159_v17, %v4473_v52  ;;  %4479 = vst.msk [vmem:[#allocation4 + $0x1c] sm:$0xf] %vm3988_vm10, %v4175_v44  ;;  %4482 = vst [vmem:[#allocation4 + $0x20] sm:$0x1] %v4481_v8 }
 0x1a5   : > { %4470 = vst.msk [vmem:[#allocation4 + $0x10] sm:$0xf] %vm3988_vm10, %v4158_v19  ;;  %4475 = vst [vmem:[#allocation4 + $0x14] sm:$0x1] %v4474_v11 }
 0x1a7   : > { %v9998_v18 = vpop.f32.mrb[4].mxu1 }
 0x1a8   : > { %v3767_v20 = vpop.f32.mrb[5].mxu1  ;;  %v9762_v41 = vpop.f32.mrb[12].mxu0 }
 0x1a9   : > { %v3768_v7 = vadd.f32 %v9758_v35, %v3767_v20  ;;  %v9999_v24 = vpop.f32.mrb[6].mxu1  ;;  %v9763_v6 = vpop.f32.mrb[13].mxu0  ;;  %v6280_v51 = vld [vmem:[#allocation4 + $0x18] sm:$0xe] }
 0x1aa   : > { %v6277_v37 = vld [vmem:[#allocation4 + $0xc] sm:$0xe]  ;;  %v3770_v27 = vpop.f32.mrb[7].mxu1  ;;  %v9764_v32 = vadd.f32 %v9763_v6, %v9762_v41  ;;  %v9765_v33 = vpop.f32.mrb[14].mxu0  ;;  %v9514_v45 = vrot.slane %v6280_v51, 9 }
 0x1ab   : > { %v9513_v53 = vrot.slane %v6277_v37, 9  ;;  %v5272_v25 = vld [vmem:[#allocation4 + $0xc] sm:$0xe]  ;;  %v3889_v28 = vmul.f32 %v11559_v59, %v3768_v7  ;;  %v3771_v30 = vadd.f32 %v9761_v40, %v3770_v27  ;;  %v9766_v36 = vpop.f32.mrb[15].mxu0  ;;  %v6281_v61 = vld [vmem:[#allocation4 + $0x1c] sm:$0xf] }
 0x1ac   : > { %v10143_v34 = vld [vmem:[#allocation4 + $0xc] sm:$0xff]   ;;  %v6279_v60 = vld [vmem:[#allocation4 + $0x14] sm:$0x1]  ;;  %v3776_v48 = vadd.f32 %v9998_v18, %v9764_v32  ;;  %v9767_v43 = vadd.f32 %v9766_v36, %v9765_v33  ;;  %v9450_v50 = vrot.slane %v5272_v25, 9  ;;  %v6282_v12 = vld [vmem:[#allocation4 + $0x20] sm:$0x1] }
 0x1ad   : > { %v6278_v26 = vld [vmem:[#allocation4 + $0x10] sm:$0xf]  ;;  %v3928_v35 = vadd.f32 %v11564_v22, %v3889_v28  ;;  %v3890_v16 = vmul.f32 %v11559_v59, %v3771_v30  ;;  %5701 = vrot.lane.b32.xlu1 %v10143_v34, %s10228_s14  ;;  %v5274_v46 = vld [vmem:[#allocation4 + $0x14] sm:$0x1]  ;;  %v6378_v49 = vrot.slane %v6279_v60, 5  ;;  %v6382_v14 = vrot.slane %v6281_v61, 5 }
 0x1ae   : > { %v6375_v38 = vrot.slane %v6278_v26, 5  ;;  %v5273_v55 = vld [vmem:[#allocation4 + $0x10] sm:$0xf]  ;;  %v3891_v56 = vmul.f32 %v11559_v59, %v3776_v48  ;;  %v3779_v57 = vadd.f32 %v9999_v24, %v9767_v43  ;;  %v5377_v21 = vrot.slane %v5274_v46, 5  ;;  %v4728_v17 = vld [vmem:[#allocation4 + $0xc] sm:$0xf] }
 0x1af   : > { %v3960_v54 = vmax.f32 %v3928_v35, 0.0  ;;  %v3929_v31 = vadd.f32 %v11564_v22, %v3890_v16  ;;  %v5374_v0 = vrot.slane %v5273_v55, 5  ;;  %v6383_v19 = vsel %vm10288_vm2, %v9514_v45, %v6382_v14  ;;  %v4483_v41 = vld [vmem:[#allocation4 + $0x24] sm:$0xf]  ;;  %v10144_v6 = vld [vmem:[#allocation4 + $0x18] sm:$0xff]  }
 0x1b0   : > { %v6376_v40 = vsel %vm10288_vm2, %v9513_v53, %v6375_v38  ;;  %v6377_v47 = vrot.slane %v6375_v38, 4  ;;  %v3930_v29 = vadd.f32 %v11564_v22, %v3891_v56  ;;  %v3892_v23 = vmul.f32 %v11559_v59, %v3779_v57  ;;  %v4487_v33 = vld [vmem:[#allocation4 + $0x2c] sm:$0x1]  ;;  %v4490_v36 = vld [vmem:[#allocation4 + $0x30] sm:$0xf]  ;;  %v10145_v38 = vld [vmem:[#allocation4 + $0x18] sm:$0xff]  }
 0x1b1   : > { %v9700_v1 = vpack.c.bf16 %v3960_v54, %v3960_v54  ;;  %v3961_v3 = vmax.f32 %v3929_v31, 0.0  ;;  %v5375_v52 = vsel %vm10288_vm2, %v9450_v50, %v5374_v0  ;;  %v5376_v10 = vrot.slane %v5374_v0, 4  ;;  %v5275_v56 = vld [vmem:[#allocation4 + $0x18] sm:$0xe] }
 0x1b2   : > { %v6379_v62 = vsel %vm10288_vm2, %v6377_v47, %v6378_v49  ;;  %v3962_v15 = vmax.f32 %v3930_v29, 0.0  ;;  %v3931_v44 = vadd.f32 %v11564_v22, %v3892_v23  ;;  %v6384_v11 = vrot.slane %v6382_v14, 4  ;;  %v4730_v47 = vld [vmem:[#allocation4 + $0x14] sm:$0x1] }
 0x1b3   : > { %v9529_v39 = vcombine.low %v6376_v40, %v6379_v62  ;;  %v4178_v5 = vshrl.u32 %v9700_v1, 16  ;;  %v4181_v42 = vshll.u32 %v9700_v1, 16  ;;  %v9701_v13 = vpack.c.bf16 %v3961_v3, %v3961_v3  ;;  %v4729_v40 = vld [vmem:[#allocation4 + $0x10] sm:$0xf]  ;;  %v5276_v1 = vld [vmem:[#allocation4 + $0x1c] sm:$0xf] }
 0x1b4   : > { %v5378_v8 = vsel %vm10288_vm2, %v5376_v10, %v5377_v21  ;;  %v9702_v24 = vpack.c.bf16 %v3962_v15, %v3962_v15  ;;  %v3963_v37 = vmax.f32 %v3931_v44, 0.0  ;;  %v6385_v53 = vrot.slane %v6282_v12, 5  ;;  %v4494_v21 = vld [vmem:[#allocation4 + $0x38] sm:$0x1]  ;;  %v5277_v3 = vld [vmem:[#allocation4 + $0x20] sm:$0x1] }
 0x1b5   : > { %6533 = vrot.lane.b32.xlu0 %v9529_v39, %s10229_s15  ;;  %v4180_v18 = vrot.slane %v4178_v5, 7  ;;  %v4186_v20 = vshrl.u32 %v9701_v13, 16  ;;  %v4189_v7 = vshll.u32 %v9701_v13, 16  ;;  %v9466_v27 = vcombine.low %v5375_v52, %v5378_v8  ;;  %v7318_v12 = vld [vmem:[#allocation4 + $0x18] sm:$0xe] }
 0x1b6   : > { %v4798_v25 = vshrl.u32 %v4728_v17, 16  ;;  %v4195_v34 = vshrl.u32 %v9702_v24, 16  ;;  %v4198_v26 = vshll.u32 %v9702_v24, 16  ;;  %v9703_v60 = vpack.c.bf16 %v3963_v37, %v3963_v37  ;;  %v7320_v44 = vld [vmem:[#allocation4 + $0x20] sm:$0x1] }
 0x1b7   : > { %v4183_v28 = vor.u32 %v4181_v42, %v4180_v18  ;;  %v4184_v30 = vrot.slane %v4180_v18, 4  ;;  %v4188_v32 = vrot.slane %v4186_v20, 7  ;;  %5527 = vrot.lane.b32.xlu1 %v9466_v27, %s10227_s13  ;;  %v6386_v55 = vsel %vm10288_vm2, %v6384_v11, %v6385_v53  ;;  %v6774_v8 = vld [vmem:[#allocation4 + $0x18] sm:$0xf] }
 0x1b8   : > { %v4800_v35 = vrot.slane %v4798_v25, 4  ;;  %v4197_v46 = vrot.slane %v4195_v34, 7  ;;  %v4203_v49 = vshrl.u32 %v9703_v60, 16  ;;  %v4206_v50 = vshll.u32 %v9703_v60, 16 }
 0x1b9   : > { %6710 = vrot.lane.b32.xlu0 %v10144_v6, %s10227_s13  ;;  %v4484_v16 = vsel %vm11575_vm15, %v4183_v28, %v4483_v41  ;;  %v4191_v48 = vor.u32 %v4189_v7, %v4188_v32  ;;  %v4193_v43 = vrot.slane %v4188_v32, 4  ;;  %v9530_v54 = vcombine.low %v6383_v19, %v6386_v55  ;;  %v6775_v28 = vld [vmem:[#allocation4 + $0x1c] sm:$0xf] }
 0x1ba   : > { %4485 = vst [vmem:[#allocation4 + $0x24] sm:$0xf] %v4484_v16  ;;  %v9768_v51 = vpop.f32.mrb[16].mxu0  ;;  %v4801_v31 = vshll.u32 %v4728_v17, 16  ;;  %v4200_v62 = vor.u32 %v4198_v26, %v4197_v46  ;;  %v4201_v0 = vrot.slane %v4197_v46, 4  ;;  %v4205_v29 = vrot.slane %v4203_v49, 7 }
 0x1bb   : > { %v4192_v57 = vsel %vm11587_vm1, %v4184_v30, %v4191_v48  ;;  %v4488_v61 = vsel %vm11581_vm0, %v4193_v43, %v4487_v33  ;;  %v9769_v45 = vpop.f32.mrb[17].mxu0  ;;  %5703 = vrot.lane.b32.xlu1 %v10145_v38, %s10228_s14  ;;  %v4807_v10 = vshll.u32 %v4729_v40, 16  ;;  %v4811_v42 = vshrl.u32 %v4729_v40, 16  ;;  %v7319_v17 = vld [vmem:[#allocation4 + $0x1c] sm:$0xf] }
 0x1bc   : > { %4486 = vst.msk [vmem:[#allocation4 + $0x28] sm:$0xf] %vm3988_vm10, %v4192_v57  ;;  %4489 = vst [vmem:[#allocation4 + $0x2c] sm:$0x1] %v4488_v61  ;;  %v11636_v23 = vadd.f32 %v9769_v45, %v9768_v51  ;;  %v9771_v39 = vpop.f32.mrb[18].mxu0  ;;  %v4803_v52 = vrot.slane %v4801_v31, 5  ;;  %v4491_v14 = vsel %vm11575_vm15, %v4200_v62, %v4490_v36  ;;  %v4208_v19 = vor.u32 %v4206_v50, %v4205_v29 }
 0x1bd   : > { %6535 = vrot.lane.b32.xlu0 %v9530_v54, %s10229_s15  ;;  %v9772_v5 = vpop.f32.mrb[19].mxu0  ;;  %v4817_v13 = vshll.u32 %v4730_v47, 16  ;;  %v9451_v15 = vrot.slane %v5275_v56, 9  ;;  %4492 = vst [vmem:[#allocation4 + $0x30] sm:$0xf] %v4491_v14  ;;  %v4210_v11 = vrot.slane %v4205_v29, 4 }
 0x1be   : > { %v11642_v18 = vadd.f32 %v9772_v5, %v9771_v39  ;;  %v4804_v20 = vor.u32 %v4803_v52, %v4800_v35  ;;  %v4809_v7 = vrot.slane %v4807_v10, 5  ;;  %v4813_v24 = vrot.slane %v4811_v42, 4  ;;  %v6776_v26 = vld [vmem:[#allocation4 + $0x20] sm:$0x1]  ;;  %v4731_v54 = vld [vmem:[#allocation4 + $0x18] sm:$0xf] }
 0x1bf   : > { %v4819_v41 = vrot.slane %v4817_v13, 5  ;;  %v5381_v37 = vrot.slane %v5276_v1, 5  ;;  %v4209_v27 = vsel %vm11587_vm1, %v4201_v0, %v4208_v19  ;;  %v4495_v6 = vsel %vm11581_vm0, %v4210_v11, %v4494_v21  ;;  %v4733_v14 = vld [vmem:[#allocation4 + $0x20] sm:$0x1] }
 0x1c0   : > { %v4805_v53 = vrot.slane %v4804_v20, 4  ;;  %v5384_v25 = vrot.slane %v5277_v3, 5  ;;  %4493 = vst.msk [vmem:[#allocation4 + $0x34] sm:$0xf] %vm3988_vm10, %v4209_v27  ;;  %4496 = vst [vmem:[#allocation4 + $0x38] sm:$0x1] %v4495_v6  ;;  %v4814_v30 = vor.u32 %v4813_v24, %v4809_v7 }
 0x1c1   : > { %v5382_v32 = vsel %vm10288_vm2, %v9451_v15, %v5381_v37  ;;  %v5383_v33 = vrot.slane %v5381_v37, 4  ;;  %v9577_v34 = vrot.slane %v7318_v12, 9  ;;  %v7416_v60 = vrot.slane %v7319_v17, 5  ;;  %v6283_v35 = vld [vmem:[#allocation4 + $0x24] sm:$0xe] }
 0x1c2   : > { %v4810_v36 = vsel %vm10348_vm5, %v4805_v53, %v4809_v7  ;;  %v7419_v38 = vrot.slane %v7320_v44, 5  ;;  %v6823_v55 = vshrl.u32 %v6774_v8, 16  ;;  %v4815_v16 = vrot.slane %v4814_v30, 4  ;;  %v4732_v12 = vld [vmem:[#allocation4 + $0x1c] sm:$0xf] }
 0x1c3   : > { %v10146_v48 = vld [vmem:[#allocation4 + $0x24] sm:$0xff]   ;;  %v5385_v43 = vsel %vm10288_vm2, %v5383_v33, %v5384_v25  ;;  %v6826_v46 = vshll.u32 %v6774_v8, 16  ;;  %v6832_v40 = vshll.u32 %v6775_v28, 16  ;;  %v7417_v49 = vsel %vm10288_vm2, %v9577_v34, %v7416_v60  ;;  %v6285_v1 = vld [vmem:[#allocation4 + $0x2c] sm:$0x1] }
 0x1c4   : > { %v9467_v47 = vcombine.low %v5382_v32, %v5385_v43  ;;  %v7418_v50 = vrot.slane %v7416_v60, 4  ;;  %v6825_v51 = vrot.slane %v6823_v55, 4  ;;  %v4820_v31 = vsel %vm10348_vm5, %v4815_v16, %v4819_v41  ;;  %6712 = vrot.lane.b32.xlu0 %v10146_v48, %s10227_s13  ;;  %v6284_v62 = vld [vmem:[#allocation4 + $0x28] sm:$0xf]  ;;  %v7321_v41 = vld [vmem:[#allocation4 + $0x24] sm:$0xe] }
 0x1c5   : > { %v6828_v56 = vrot.slane %v6826_v46, 5  ;;  %v6834_v57 = vrot.slane %v6832_v40, 5  ;;  %v6836_v61 = vshrl.u32 %v6775_v28, 16  ;;  %v9434_v0 = vcombine.low %v4810_v36, %v4820_v31  ;;  %v7322_v28 = vld [vmem:[#allocation4 + $0x28] sm:$0xf] }
 0x1c6   : > { %v7420_v21 = vsel %vm10288_vm2, %v7418_v50, %v7419_v38  ;;  %v6842_v45 = vshll.u32 %v6776_v26, 16  ;;  %v9515_v3 = vrot.slane %v6283_v35, 9  ;;  %v6389_v10 = vrot.slane %v6284_v62, 5  ;;  %v7323_v36 = vld [vmem:[#allocation4 + $0x2c] sm:$0x1]  ;;  %v10148_v16 = vld [vmem:[#allocation4 + $0x24] sm:$0xff]  }
 0x1c7   : > { %v9593_v29 = vcombine.low %v7417_v49, %v7420_v21  ;;  %v6829_v39 = vor.u32 %v6828_v56, %v6825_v51  ;;  %v6838_v52 = vrot.slane %v6836_v61, 4  ;;  %5207 = vrot.lane.b32.xlu1 %v9434_v0, %s10229_s15  ;;  %v6392_v42 = vrot.slane %v6285_v1, 5  ;;  %v5279_v62 = vld [vmem:[#allocation4 + $0x28] sm:$0xf] }
 0x1c8   : > { %v6844_v5 = vrot.slane %v6842_v45, 5  ;;  %v4822_v13 = vshrl.u32 %v4731_v54, 16  ;;  %v4825_v15 = vshll.u32 %v4731_v54, 16  ;;  %v11666_v8 = vsel %vm10288_vm2, %v9515_v3, %v6389_v10  ;;  %v5278_v54 = vld [vmem:[#allocation4 + $0x24] sm:$0xe] }
 0x1c9   : > { %7590 = vst.msk [vmem:[#allocation3 + $0x10] sm:$0xff] %vm408_vm6, %v9593_v29  ;;  %v6830_v17 = vrot.slane %v6829_v39, 4  ;;  %v6839_v44 = vor.u32 %v6838_v52, %v6834_v57  ;;  %v6391_v19 = vrot.slane %v6389_v10, 4  ;;  %v4831_v7 = vshll.u32 %v4732_v12, 16 }
 0x1ca   : > { %v4824_v11 = vrot.slane %v4822_v13, 4  ;;  %v4827_v20 = vrot.slane %v4825_v15, 5  ;;  %v4835_v24 = vshrl.u32 %v4732_v12, 16  ;;  %v4841_v25 = vshll.u32 %v4733_v14, 16 }
 0x1cb   : > { %v6835_v27 = vsel %vm10348_vm5, %v6830_v17, %v6834_v57  ;;  %v6840_v6 = vrot.slane %v6839_v44, 4  ;;  %v6393_v53 = vsel %vm10288_vm2, %v6391_v19, %v6392_v42  ;;  %5529 = vrot.lane.b32.xlu1 %v9467_v47, %s10227_s13  ;;  %v4833_v34 = vrot.slane %v4831_v7, 5  ;;  %v6777_v19 = vld [vmem:[#allocation4 + $0x24] sm:$0xf] }
 0x1cc   : > { %v10002_v37 = vpop.f32.mrb[8].mxu1  ;;  %v9531_v32 = vcombine.low %v11666_v8, %v6393_v53  ;;  %v4828_v33 = vor.u32 %v4827_v20, %v4824_v11  ;;  %v4837_v26 = vrot.slane %v4835_v24, 4  ;;  %v9774_v55 = vpop.f32.mrb[20].mxu0  ;;  %v4843_v48 = vrot.slane %v4841_v25, 5  ;;  %v11694_v11 = vld [vmem:[#allocation4 + $0x28] sm:$0xf] }
 0x1cd   : > { %v3783_v30 = vpop.f32.mrb[9].mxu1  ;;  %v6845_v35 = vsel %vm10348_vm5, %v6840_v6, %v6844_v5  ;;  %v9578_v43 = vrot.slane %v7321_v41, 9  ;;  %v9775_v40 = vpop.f32.mrb[21].mxu0  ;;  %v7423_v51 = vrot.slane %v7322_v28, 5  ;;  %v7426_v61 = vrot.slane %v7323_v36, 5  ;;  %v10150_v25 = vld [vmem:[#allocation4 + $0x30] sm:$0xff]  }
 0x1ce   : > { %v3784_v60 = vadd.f32 %v11636_v23, %v3783_v30  ;;  %v10003_v38 = vpop.f32.mrb[10].mxu1  ;;  %v9561_v49 = vcombine.low %v6835_v27, %v6845_v35  ;;  %v4829_v47 = vrot.slane %v4828_v33, 4  ;;  %v4838_v50 = vor.u32 %v4837_v26, %v4833_v34  ;;  %v9777_v57 = vpop.f32.mrb[22].mxu0  ;;  %v5280_v5 = vld [vmem:[#allocation4 + $0x2c] sm:$0x1] }
 0x1cf   : > { %v3786_v46 = vpop.f32.mrb[11].mxu1  ;;  %v9776_v23 = vadd.f32 %v9775_v40, %v9774_v55  ;;  %5705 = vrot.lane.b32.xlu1 %v10148_v16, %s10228_s14  ;;  %v9778_v21 = vpop.f32.mrb[23].mxu0  ;;  %v7424_v3 = vsel %vm10288_vm2, %v9578_v43, %v7423_v51  ;;  %v7425_v29 = vrot.slane %v7423_v51, 4  ;;  %v9452_v42 = vrot.slane %v5278_v54, 9 }
 0x1d0   : > { %v3893_v31 = vmul.f32 %v11559_v59, %v3784_v60  ;;  %v3787_v56 = vadd.f32 %v11642_v18, %v3786_v46  ;;  %v7608_v0 = vld [vmem:[#allocation3 + $0x10] sm:$0xff]  ;;  %7254 = vrot.lane.b32.xlu0 %v9561_v49, %s10228_s14  ;;  %v4834_v45 = vsel %vm10348_vm5, %v4829_v47, %v4833_v34  ;;  %v4839_v1 = vrot.slane %v4838_v50, 4  ;;  %v4497_v49 = vld [vmem:[#allocation4 + $0x3c] sm:$0xf]  ;;  %v4501_v47 = vld [vmem:[#allocation4 + $0x44] sm:$0x1] }
 0x1d1   : > { %v3792_v52 = vadd.f32 %v10002_v37, %v9776_v23  ;;  %10028 = vmatprep.mubr.msk.bf16.mxu0 %vm408_vm6, %v7608_v0  ;;  %v9779_v10 = vadd.f32 %v9778_v21, %v9777_v57  ;;  %v7427_v14 = vsel %vm10288_vm2, %v7425_v29, %v7426_v61  ;;  %v5388_v13 = vrot.slane %v5279_v62, 5  ;;  %v6779_v62 = vld [vmem:[#allocation4 + $0x2c] sm:$0x1]  ;;  %v4504_v21 = vld [vmem:[#allocation4 + $0x48] sm:$0xf] }
 0x1d2   : > { %v3932_v18 = vadd.f32 %v11564_v22, %v3893_v31  ;;  %v3894_v39 = vmul.f32 %v11559_v59, %v3787_v56  ;;  %v4844_v12 = vsel %vm10348_vm5, %v4839_v1, %v4843_v48  ;;  %v9594_v7 = vcombine.low %v7424_v3, %v7427_v14  ;;  %v6286_v29 = vld [vmem:[#allocation4 + $0x30] sm:$0xe] }
 0x1d3   : > { %v3895_v44 = vmul.f32 %v11559_v59, %v3792_v52  ;;  %v3795_v8 = vadd.f32 %v10003_v38, %v9779_v10  ;;  %v9435_v20 = vcombine.low %v4834_v45, %v4844_v12  ;;  %v5389_v24 = vsel %vm10288_vm2, %v9452_v42, %v5388_v13  ;;  %v6288_v42 = vld [vmem:[#allocation4 + $0x38] sm:$0x1] }
 0x1d4   : > { %v3964_v15 = vmax.f32 %v3932_v18, 0.0  ;;  %v3933_v17 = vadd.f32 %v11564_v22, %v3894_v39  ;;  %6537 = vrot.lane.b32.xlu0 %v9531_v32, %s10229_s15  ;;  %v5390_v41 = vrot.slane %v5388_v13, 4  ;;  %7591 = vst.msk [vmem:[#allocation3 + $0x28] sm:$0xff] %vm408_vm6, %v9594_v7  ;;  %v5391_v28 = vrot.slane %v5280_v5, 5  ;;  %v6287_v18 = vld [vmem:[#allocation4 + $0x34] sm:$0xf] }
 0x1d5   : > { %v3934_v6 = vadd.f32 %v11564_v22, %v3895_v44  ;;  %v3896_v53 = vmul.f32 %v11559_v59, %v3795_v8  ;;  %5209 = vrot.lane.b32.xlu1 %v9435_v20, %s10229_s15  ;;  %v6847_v30 = vshrl.u32 %v6777_v19, 16  ;;  %v6850_v32 = vshll.u32 %v6777_v19, 16  ;;  %v10151_v5 = vld [vmem:[#allocation4 + $0x30] sm:$0xff]   ;;  %v4734_v19 = vld [vmem:[#allocation4 + $0x24] sm:$0xf] }
 0x1d6   : > { %v9704_v37 = vpack.c.bf16 %v3964_v15, %v3964_v15  ;;  %v3965_v27 = vmax.f32 %v3933_v17, 0.0  ;;  %v6856_v33 = vshll.u32 %v11694_v11, 16  ;;  %v5392_v55 = vsel %vm10288_vm2, %v5390_v41, %v5391_v28 }
 0x1d7   : > { %v3966_v60 = vmax.f32 %v3934_v6, 0.0  ;;  %v3935_v38 = vadd.f32 %v11564_v22, %v3896_v53  ;;  %v6849_v35 = vrot.slane %v6847_v30, 4  ;;  %v6852_v16 = vrot.slane %v6850_v32, 5  ;;  %v4508_v30 = vld [vmem:[#allocation4 + $0x50] sm:$0x1] }
 0x1d8   : > { %v4212_v34 = vshrl.u32 %v9704_v37, 16  ;;  %v4215_v26 = vshll.u32 %v9704_v37, 16  ;;  %v9705_v36 = vpack.c.bf16 %v3965_v27, %v3965_v27  ;;  %6714 = vrot.lane.b32.xlu0 %v10150_v25, %s10227_s13  ;;  %v9468_v51 = vcombine.low %v5389_v24, %v5392_v55 }
 0x1d9   : > { %v9706_v40 = vpack.c.bf16 %v3966_v60, %v3966_v60  ;;  %v3967_v50 = vmax.f32 %v3935_v38, 0.0  ;;  %v6853_v54 = vor.u32 %v6852_v16, %v6849_v35  ;;  %v11708_v31 = vrot.slane %v6856_v33, 5  ;;  %v4735_v35 = vld [vmem:[#allocation4 + $0x28] sm:$0xf] }
 0x1da   : > { %v4214_v48 = vrot.slane %v4212_v34, 7  ;;  %v4220_v43 = vshrl.u32 %v9705_v36, 16  ;;  %v4223_v46 = vshll.u32 %v9705_v36, 16  ;;  %5531 = vrot.lane.b32.xlu1 %v9468_v51, %s10227_s13  ;;  %v6860_v3 = vshrl.u32 %v11694_v11, 16 }
 0x1db   : > { %v4229_v61 = vshrl.u32 %v9706_v40, 16  ;;  %v4232_v0 = vshll.u32 %v9706_v40, 16  ;;  %v9707_v45 = vpack.c.bf16 %v3967_v50, %v3967_v50  ;;  %v6854_v1 = vrot.slane %v6853_v54, 4  ;;  %v7611_v14 = vld [vmem:[#allocation3 + $0x28] sm:$0xff] }
 0x1dc   : > { %v4217_v56 = vor.u32 %v4215_v26, %v4214_v48  ;;  %v4218_v23 = vrot.slane %v4214_v48, 4  ;;  %v4222_v57 = vrot.slane %v4220_v43, 7  ;;  %10029 = vmatmul.mubr.msk.bf16.vlgmr.msra.gmra.mrb[64].mxu0 %vm408_vm6, %v7611_v14  ;;  %v6862_v8 = vrot.slane %v6860_v3, 4 }
 0x1dd   : > { %v4231_v12 = vrot.slane %v4229_v61, 7  ;;  %v4237_v13 = vshrl.u32 %v9707_v45, 16  ;;  %v4240_v15 = vshll.u32 %v9707_v45, 16  ;;  %v6859_v44 = vsel %vm10348_vm5, %v6854_v1, %v11708_v31 }
 0x1de   : > { %v4498_v39 = vsel %vm11575_vm15, %v4217_v56, %v4497_v49  ;;  %v4225_v52 = vor.u32 %v4223_v46, %v4222_v57  ;;  %v4227_v10 = vrot.slane %v4222_v57, 4  ;;  %v9780_v17 = vpop.f32.mrb[24].mxu0  ;;  %v6863_v53 = vor.u32 %v6862_v8, %v11708_v31  ;;  %5707 = vrot.lane.b32.xlu1 %v10151_v5, %s10228_s14  ;;  %v4736_v46 = vld [vmem:[#allocation4 + $0x2c] sm:$0x1]  ;;  %v7324_v49 = vld [vmem:[#allocation4 + $0x30] sm:$0xe] }
 0x1df   : > { %4499 = vst [vmem:[#allocation4 + $0x3c] sm:$0xf] %v4498_v39  ;;  %v4234_v7 = vor.u32 %v4232_v0, %v4231_v12  ;;  %v4235_v24 = vrot.slane %v4231_v12, 4  ;;  %v9781_v41 = vpop.f32.mrb[25].mxu0  ;;  %v4239_v37 = vrot.slane %v4237_v13, 7  ;;  %v6866_v25 = vshll.u32 %v6779_v62, 16 }
 0x1e0   : > { %v4226_v11 = vsel %vm11587_vm1, %v4218_v23, %v4225_v52  ;;  %v4502_v20 = vsel %vm11581_vm0, %v4227_v10, %v4501_v47  ;;  %v9782_v27 = vadd.f32 %v9781_v41, %v9780_v17  ;;  %v9783_v6 = vpop.f32.mrb[26].mxu0  ;;  %v9516_v33 = vrot.slane %v6286_v29, 9  ;;  %v7325_v56 = vld [vmem:[#allocation4 + $0x34] sm:$0xf]  ;;  %v7326_v23 = vld [vmem:[#allocation4 + $0x38] sm:$0x1] }
 0x1e1   : > { %4500 = vst.msk [vmem:[#allocation4 + $0x40] sm:$0xf] %vm3988_vm10, %v4226_v11  ;;  %4503 = vst [vmem:[#allocation4 + $0x44] sm:$0x1] %v4502_v20  ;;  %v4505_v28 = vsel %vm11575_vm15, %v4234_v7, %v4504_v21  ;;  %v9784_v32 = vpop.f32.mrb[27].mxu0  ;;  %v6396_v34 = vrot.slane %v6287_v18, 5  ;;  %v4242_v36 = vor.u32 %v4240_v15, %v4239_v37  ;;  %v5206_v15 = vpop.permute.xlu1 %5205 }
 0x1e2   : > { %v6399_v26 = vrot.slane %v6288_v42, 5  ;;  %4506 = vst [vmem:[#allocation4 + $0x48] sm:$0xf] %v4505_v28  ;;  %v4244_v60 = vrot.slane %v4239_v37, 4  ;;  %v6864_v38 = vrot.slane %v6863_v53, 4  ;;  %v6868_v55 = vrot.slane %v6866_v25, 5 }
 0x1e3   : > { %v9785_v16 = vadd.f32 %v9784_v32, %v9783_v6  ;;  %v6397_v48 = vsel %vm10288_vm2, %v9516_v33, %v6396_v34  ;;  %v6398_v43 = vrot.slane %v6396_v34, 4  ;;  %v4846_v40 = vshrl.u32 %v4734_v19, 16  ;;  %v5281_v39 = vld [vmem:[#allocation4 + $0x30] sm:$0xe]  ;;  %v5282_v52 = vld [vmem:[#allocation4 + $0x34] sm:$0xf] }
 0x1e4   : > { %v4243_v47 = vsel %vm11587_vm1, %v4235_v24, %v4242_v36  ;;  %v4509_v50 = vsel %vm11581_vm0, %v4244_v60, %v4508_v30  ;;  %v11733_v51 = vpop.f32.mrb[12].mxu1  ;;  %v6869_v54 = vsel %vm10348_vm5, %v6864_v38, %v6868_v55  ;;  %v4849_v31 = vshll.u32 %v4734_v19, 16  ;;  %v5283_v10 = vld [vmem:[#allocation4 + $0x38] sm:$0x1]  ;;  %v6780_v36 = vld [vmem:[#allocation4 + $0x30] sm:$0xf] }
 0x1e5   : > { %4507 = vst.msk [vmem:[#allocation4 + $0x4c] sm:$0xf] %vm3988_vm10, %v4243_v47  ;;  %4510 = vst [vmem:[#allocation4 + $0x50] sm:$0x1] %v4509_v50  ;;  %v3799_v57 = vpop.f32.mrb[13].mxu1  ;;  %v9562_v61 = vcombine.low %v6859_v44, %v6869_v54  ;;  %v6400_v62 = vsel %vm10288_vm2, %v6398_v43, %v6399_v26  ;;  %v4848_v0 = vrot.slane %v4846_v40, 4 }
 0x1e6   : > { %v4855_v21 = vshll.u32 %v4735_v35, 16  ;;  %v3800_v45 = vadd.f32 %v9782_v27, %v3799_v57  ;;  %v11740_v1 = vpop.f32.mrb[14].mxu1  ;;  %v9532_v3 = vcombine.low %v6397_v48, %v6400_v62  ;;  %v4851_v29 = vrot.slane %v4849_v31, 5  ;;  %v10164_v27 = vld [vmem:[#allocation4] sm:$0xff]   ;;  %v6781_v54 = vld [vmem:[#allocation4 + $0x34] sm:$0xf] }
 0x1e7   : > { %v4859_v18 = vshrl.u32 %v4735_v35, 16  ;;  %7256 = vrot.lane.b32.xlu0 %v9562_v61, %s10228_s14  ;;  %v3802_v12 = vpop.f32.mrb[15].mxu1  ;;  %v4865_v5 = vshll.u32 %v4736_v46, 16  ;;  %v9579_v42 = vrot.slane %v7324_v49, 9  ;;  %v7430_v13 = vrot.slane %v7325_v56, 5  ;;  %4709 = vst.msk [vmem:[#allocation3] sm:$0xff] %vm408_vm6, %v10164_v27 }
 0x1e8   : > { %v4857_v14 = vrot.slane %v4855_v21, 5  ;;  %v3897_v17 = vmul.f32 %v11559_v59, %v3800_v45  ;;  %v3803_v44 = vadd.f32 %v9785_v16, %v3802_v12  ;;  %v4852_v8 = vor.u32 %v4851_v29, %v4848_v0  ;;  %v9786_v11 = vpop.f32.mrb[28].mxu0  ;;  %5253 = vst.msk [vmem:[#allocation3] sm:$0xff] %vm956_vm7, %v5206_v15  ;;  %v5526_v16 = vpop.permute.xlu1 %5525  ;;  %v10152_v43 = vld [vmem:[#allocation4 + $0x3c] sm:$0xff]  }
 0x1e9   : > { %v4861_v19 = vrot.slane %v4859_v18, 4  ;;  %v4867_v20 = vrot.slane %v4865_v5, 5  ;;  %v7431_v7 = vsel %vm10288_vm2, %v9579_v42, %v7430_v13  ;;  %v7432_v24 = vrot.slane %v7430_v13, 4  ;;  %v9787_v37 = vpop.f32.mrb[29].mxu0  ;;  %5573 = vst.msk [vmem:[#allocation3] sm:$0xff] %vm1280_vm8, %v5526_v16  ;;  %v10165_v13 = vld [vmem:[%s13205_s4 + $0x40] sm:$0xff]  }
 0x1ea   : > { %v7433_v41 = vrot.slane %v7326_v23, 5  ;;  %v3936_v6 = vadd.f32 %v11564_v22, %v3897_v17  ;;  %v3898_v53 = vmul.f32 %v11559_v59, %v3803_v44  ;;  %v4853_v25 = vrot.slane %v4852_v8, 4  ;;  %v11748_v30 = vpop.f32.mrb[30].mxu0  ;;  %9858 = vmatprep.subr.bf16.mxu1 %v10165_v13 }
 0x1eb   : > { %v4862_v28 = vor.u32 %v4861_v19, %v4857_v14  ;;  %6539 = vrot.lane.b32.xlu0 %v9532_v3, %s10229_s15  ;;  %v9453_v33 = vrot.slane %v5281_v39, 9  ;;  %v5395_v34 = vrot.slane %v5282_v52, 5  ;;  %v5398_v26 = vrot.slane %v5283_v10, 5  ;;  %v11753_v60 = vpop.f32.mrb[31].mxu0  ;;  %v6782_v3 = vld [vmem:[#allocation4 + $0x38] sm:$0x1] }
 0x1ec   : > { %v7434_v32 = vsel %vm10288_vm2, %v7432_v24, %v7433_v41  ;;  %v3968_v38 = vmax.f32 %v3936_v6, 0.0  ;;  %v3937_v59 = vadd.f32 %v11564_v22, %v3898_v53  ;;  %v4858_v55 = vsel %vm10348_vm5, %v4853_v25, %v4857_v14  ;;  %v4511_v39 = vld [vmem:[#allocation4 + $0x54] sm:$0xf]  ;;  %v11778_v52 = vld [vmem:[%s13203_s2] ss:$0 sm:$0xff] }
 0x1ed   : > { %v4863_v35 = vrot.slane %v4862_v28, 4  ;;  %v9595_v48 = vcombine.low %v7431_v7, %v7434_v32  ;;  %v5396_v46 = vsel %vm10288_vm2, %v9453_v33, %v5395_v34  ;;  %v5397_v40 = vrot.slane %v5395_v34, 4  ;;  %v11795_v7 = vld [vmem:[%s13204_s3] ss:$0 sm:$0xff]  ;;  %v6289_v6 = vld [vmem:[#allocation4 + $0x3c] sm:$0xe] }
 0x1ee   : > { %v9788_v49 = vadd.f32 %v9787_v37, %v9786_v11  ;;  %v9708_v47 = vpack.c.bf16 %v3968_v38, %v3968_v38  ;;  %v3969_v50 = vmax.f32 %v3937_v59, 0.0  ;;  %v6871_v31 = vshrl.u32 %v6780_v36, 16  ;;  %v6290_v53 = vld [vmem:[#allocation4 + $0x40] sm:$0xf] }
 0x1ef   : > { %v4868_v22 = vsel %vm10348_vm5, %v4863_v35, %v4867_v20  ;;  %7592 = vst.msk [vmem:[#allocation3 + $0x40] sm:$0xff] %vm408_vm6, %v9595_v48  ;;  %6716 = vrot.lane.b32.xlu0 %v10152_v43, %s10227_s13  ;;  %v5399_v23 = vsel %vm10288_vm2, %v5397_v40, %v5398_v26  ;;  %v6874_v61 = vshll.u32 %v6780_v36, 16  ;;  %v6880_v14 = vshll.u32 %v6781_v54, 16  ;;  %v4515_v20 = vld [vmem:[#allocation4 + $0x5c] sm:$0x1] }
 0x1f0   : > { %v9436_v56 = vcombine.low %v4858_v55, %v4868_v22  ;;  %v3808_v57 = vadd.f32 %v11733_v51, %v9788_v49  ;;  %v4246_v62 = vshrl.u32 %v9708_v47, 16  ;;  %v4249_v0 = vshll.u32 %v9708_v47, 16  ;;  %v6291_v40 = vld [vmem:[#allocation4 + $0x44] sm:$0x1]  ;;  %v4737_v22 = vld [vmem:[#allocation4 + $0x30] sm:$0xf] }
 0x1f1   : > { %v9709_v21 = vpack.c.bf16 %v3969_v50, %v3969_v50  ;;  %v9469_v45 = vcombine.low %v5396_v46, %v5399_v23  ;;  %v11770_v29 = vpop.f32.mrb[32].mxu0  ;;  %v11772_v18 = vpop.f32.mrb[16].mxu1  ;;  %v6873_v10 = vrot.slane %v6871_v31, 4  ;;  %v6876_v12 = vrot.slane %v6874_v61, 5  ;;  %v10153_v50 = vld [vmem:[#allocation4 + $0x3c] sm:$0xff]  }
 0x1f2   : > { %5211 = vrot.lane.b32.xlu1 %v9436_v56, %s10229_s15  ;;  %v3899_v51 = vmul.f32 %v11778_v52, %v3808_v57  ;;  %v11781_v5 = vpop.f32.mrb[33].mxu0  ;;  %v11783_v42 = vpop.f32.mrb[17].mxu1  ;;  %v4248_v15 = vrot.slane %v4246_v62, 7  ;;  %v6884_v8 = vshrl.u32 %v6781_v54, 16  ;;  %v6882_v37 = vrot.slane %v6880_v14, 5  ;;  %v10167_v54 = vld [vmem:[%s13205_s4] sm:$0xff]  }
 0x1f3   : > { %v4254_v17 = vshrl.u32 %v9709_v21, 16  ;;  %v4257_v44 = vshll.u32 %v9709_v21, 16  ;;  %v11788_v19 = vpop.f32.mrb[34].mxu0  ;;  %v11790_v11 = vpop.f32.mrb[18].mxu1  ;;  %v6877_v41 = vor.u32 %v6876_v12, %v6873_v10  ;;  %v6890_v27 = vshll.u32 %v6782_v3, 16  ;;  %9859 = vmatpush3.bf16.msra.mxu1 %v10167_v54 }
 0x1f4   : > { %v3938_v24 = vadd.f32 %v11795_v7, %v3899_v51  ;;  %v4251_v25 = vor.u32 %v4249_v0, %v4248_v15  ;;  %v4252_v28 = vrot.slane %v4248_v15, 4  ;;  %v6886_v33 = vrot.slane %v6884_v8, 4  ;;  %v11798_v34 = vpop.f32.mrb[35].mxu0  ;;  %v11803_v55 = vpop.f32.mrb[19].mxu1  ;;  %v4738_v21 = vld [vmem:[#allocation4 + $0x34] sm:$0xf] }
 0x1f5   : > { %v4256_v32 = vrot.slane %v4254_v17, 7  ;;  %v6878_v36 = vrot.slane %v6877_v41, 4  ;;  %v6892_v38 = vrot.slane %v6890_v27, 5  ;;  %v9791_v59 = vadd.f32 %v11753_v60, %v11748_v30  ;;  %v4518_v3 = vld [vmem:[#allocation4 + $0x60] sm:$0xf] }
 0x1f6   : > { %5533 = vrot.lane.b32.xlu1 %v9469_v45, %s10227_s13  ;;  %v3970_v26 = vmax.f32 %v3938_v24, 0.0  ;;  %v4512_v35 = vsel %vm11575_vm15, %v4251_v25, %v4511_v39  ;;  %v7614_v43 = vld [vmem:[#allocation3 + $0x40] sm:$0xff]  ;;  %v6887_v46 = vor.u32 %v6886_v33, %v6882_v37  ;;  %v9517_v60 = vrot.slane %v6289_v6, 9  ;;  %v4739_v17 = vld [vmem:[#allocation4 + $0x38] sm:$0x1] }
 0x1f7   : > { %v4259_v16 = vor.u32 %v4257_v44, %v4256_v32  ;;  %v4261_v48 = vrot.slane %v4256_v32, 4  ;;  %4513 = vst [vmem:[#allocation4 + $0x54] sm:$0xf] %v4512_v35  ;;  %10032 = vmatprep.mubr.msk.bf16.mxu0 %vm408_vm6, %v7614_v43  ;;  %v6883_v47 = vsel %vm10348_vm5, %v6878_v36, %v6882_v37  ;;  %v3811_v30 = vadd.f32 %v11740_v1, %v9791_v59  ;;  %v7327_v8 = vld [vmem:[#allocation4 + $0x3c] sm:$0xe] }
 0x1f8   : > { %v9710_v49 = vpack.c.bf16 %v3970_v26, %v3970_v26  ;;  %v6888_v23 = vrot.slane %v6887_v46, 4  ;;  %v6403_v57 = vrot.slane %v6290_v53, 5  ;;  %v6406_v0 = vrot.slane %v6291_v40, 5  ;;  %v7328_v27 = vld [vmem:[#allocation4 + $0x40] sm:$0xf] }
 0x1f9   : > { %v4260_v31 = vsel %vm11587_vm1, %v4252_v28, %v4259_v16  ;;  %v4516_v56 = vsel %vm11581_vm0, %v4261_v48, %v4515_v20  ;;  %v3900_v1 = vmul.f32 %v11778_v52, %v3811_v30  ;;  %v11821_v45 = vpop.f32.mrb[36].mxu0  ;;  %v4870_v12 = vshrl.u32 %v4737_v22, 16  ;;  %v7329_v33 = vld [vmem:[#allocation4 + $0x44] sm:$0x1] }
 0x1fa   : > { %4514 = vst.msk [vmem:[#allocation4 + $0x58] sm:$0xf] %vm3988_vm10, %v4260_v31  ;;  %4517 = vst [vmem:[#allocation4 + $0x5c] sm:$0x1] %v4516_v56  ;;  %v4263_v61 = vshrl.u32 %v9710_v49, 16  ;;  %v4266_v62 = vshll.u32 %v9710_v49, 16  ;;  %5709 = vrot.lane.b32.xlu1 %v10153_v50, %s10228_s14  ;;  %v6893_v39 = vsel %vm10348_vm5, %v6888_v23, %v6892_v38  ;;  %v6404_v51 = vsel %vm10288_vm2, %v9517_v60, %v6403_v57 }
 0x1fb   : > { %v6405_v10 = vrot.slane %v6403_v57, 4  ;;  %v9563_v13 = vcombine.low %v6883_v47, %v6893_v39  ;;  %v3939_v15 = vadd.f32 %v11795_v7, %v3900_v1  ;;  %v4873_v44 = vshll.u32 %v4737_v22, 16  ;;  %v11832_v6 = vpop.f32.mrb[37].mxu0  ;;  %v5284_v49 = vld [vmem:[#allocation4 + $0x3c] sm:$0xe] }
 0x1fc   : > { %v11827_v14 = vrot.slane %v4263_v61, 7  ;;  %v4872_v24 = vrot.slane %v4870_v12, 4  ;;  %v4879_v41 = vshll.u32 %v4738_v21, 16  ;;  %v4883_v37 = vshrl.u32 %v4738_v21, 16  ;;  %v11837_v26 = vpop.f32.mrb[38].mxu0  ;;  %v10154_v61 = vld [vmem:[#allocation4 + $0x48] sm:$0xff]  }
 0x1fd   : > { %v6407_v20 = vsel %vm10288_vm2, %v6405_v10, %v6406_v0  ;;  %7258 = vrot.lane.b32.xlu0 %v9563_v13, %s10228_s14  ;;  %v3971_v28 = vmax.f32 %v3939_v15, 0.0  ;;  %v11839_v36 = vpop.f32.mrb[20].mxu1  ;;  %v4875_v38 = vrot.slane %v4873_v44, 5  ;;  %v4889_v16 = vshll.u32 %v4739_v17, 16  ;;  %v5285_v47 = vld [vmem:[#allocation4 + $0x40] sm:$0xf] }
 0x1fe   : > { %v4268_v53 = vor.u32 %v4266_v62, %v11827_v14  ;;  %v4269_v25 = vrot.slane %v11827_v14, 4  ;;  %v9533_v32 = vcombine.low %v6404_v51, %v6407_v20  ;;  %v4881_v59 = vrot.slane %v4879_v41, 5  ;;  %v5286_v54 = vld [vmem:[#allocation4 + $0x44] sm:$0x1]  ;;  %v11846_v62 = vpop.f32.mrb[39].mxu0 }
 0x1ff   : > { %v4885_v35 = vrot.slane %v4883_v37, 4  ;;  %v9711_v43 = vpack.c.bf16 %v3971_v28, %v3971_v28  ;;  %v9580_v46 = vrot.slane %v7327_v8, 9  ;;  %v7437_v40 = vrot.slane %v7328_v27, 5  ;;  %v6783_v14 = vld [vmem:[#allocation4 + $0x3c] sm:$0xf] }
 0x200   : > { %v4519_v48 = vsel %vm11575_vm15, %v4268_v53, %v4518_v3  ;;  %v4876_v50 = vor.u32 %v4875_v38, %v4872_v24  ;;  %v4891_v60 = vrot.slane %v4889_v16, 5  ;;  %v7440_v22 = vrot.slane %v7329_v33, 5  ;;  %v6784_v13 = vld [vmem:[#allocation4 + $0x40] sm:$0xf]  ;;  %v4522_v15 = vld [vmem:[#allocation4 + $0x68] sm:$0x1] }
 0x201   : > { %4520 = vst [vmem:[#allocation4 + $0x60] sm:$0xf] %v4519_v48  ;;  %v4886_v30 = vor.u32 %v4885_v35, %v4881_v59  ;;  %v4271_v31 = vshrl.u32 %v9711_v43, 16  ;;  %v4274_v56 = vshll.u32 %v9711_v43, 16  ;;  %6541 = vrot.lane.b32.xlu0 %v9533_v32, %s10229_s15  ;;  %v7438_v23 = vsel %vm10288_vm2, %v9580_v46, %v7437_v40  ;;  %v6292_v33 = vld [vmem:[#allocation4 + $0x48] sm:$0xe] }
 0x202   : > { %v7439_v57 = vrot.slane %v7437_v40, 4  ;;  %v4877_v1 = vrot.slane %v4876_v50, 4  ;;  %v9454_v21 = vrot.slane %v5284_v49, 9  ;;  %v5402_v3 = vrot.slane %v5285_v47, 5  ;;  %v11861_v38 = vpop.f32.mrb[40].mxu0 }
 0x203   : > { %v4887_v0 = vrot.slane %v4886_v30, 4  ;;  %v4273_v39 = vrot.slane %v4271_v31, 7  ;;  %v5405_v10 = vrot.slane %v5286_v54, 5  ;;  %v9794_v12 = vadd.f32 %v11781_v5, %v11770_v29  ;;  %v6785_v29 = vld [vmem:[#allocation4 + $0x44] sm:$0x1]  ;;  %v11876_v54 = vpop.f32.mrb[21].mxu1 }
 0x204   : > { %v7441_v51 = vsel %vm10288_vm2, %v7439_v57, %v7440_v22  ;;  %v4882_v17 = vsel %vm10348_vm5, %v4877_v1, %v4881_v59  ;;  %v5403_v20 = vsel %vm10288_vm2, %v9454_v21, %v5402_v3  ;;  %v5404_v27 = vrot.slane %v5402_v3, 4  ;;  %v6293_v43 = vld [vmem:[#allocation4 + $0x4c] sm:$0xf]  ;;  %v6294_v47 = vld [vmem:[#allocation4 + $0x50] sm:$0x1] }
 0x205   : > { %v4892_v44 = vsel %vm10348_vm5, %v4887_v0, %v4891_v60  ;;  %v9596_v8 = vcombine.low %v7438_v23, %v7441_v51  ;;  %v4276_v24 = vor.u32 %v4274_v56, %v4273_v39  ;;  %v4278_v41 = vrot.slane %v4273_v39, 4  ;;  %6718 = vrot.lane.b32.xlu0 %v10154_v61, %s10227_s13  ;;  %v4740_v61 = vld [vmem:[#allocation4 + $0x3c] sm:$0xf]  ;;  %v11881_v0 = vpop.f32.mrb[22].mxu1  ;;  %v10155_v39 = vld [vmem:[#allocation4 + $0x48] sm:$0xff]  }
 0x206   : > { %v9437_v37 = vcombine.low %v4882_v17, %v4892_v44  ;;  %v3816_v5 = vadd.f32 %v9794_v12, %v11783_v42  ;;  %v6895_v53 = vshrl.u32 %v6783_v14, 16  ;;  %v6898_v28 = vshll.u32 %v6783_v14, 16  ;;  %v11870_v42 = vpop.f32.mrb[41].mxu0 }
 0x207   : > { %7593 = vst.msk [vmem:[#allocation3 + $0x58] sm:$0xff] %vm408_vm6, %v9596_v8  ;;  %v6904_v32 = vshll.u32 %v6784_v13, 16  ;;  %v4277_v59 = vsel %vm11587_vm1, %v4269_v25, %v4276_v24  ;;  %v4523_v35 = vsel %vm11581_vm0, %v4278_v41, %v4522_v15  ;;  %v5406_v16 = vsel %vm10288_vm2, %v5404_v27, %v5405_v10  ;;  %v11879_v1 = vpop.f32.mrb[42].mxu0  ;;  %v4742_v15 = vld [vmem:[#allocation4 + $0x44] sm:$0x1] }
 0x208   : > { %5213 = vrot.lane.b32.xlu1 %v9437_v37, %s10229_s15  ;;  %v6908_v48 = vshrl.u32 %v6784_v13, 16  ;;  %4521 = vst.msk [vmem:[#allocation4 + $0x64] sm:$0xf] %vm3988_vm10, %v4277_v59  ;;  %4524 = vst [vmem:[#allocation4 + $0x68] sm:$0x1] %v4523_v35  ;;  %v9470_v46 = vcombine.low %v5403_v20, %v5406_v16  ;;  %v3901_v40 = vmul.f32 %v11778_v52, %v3816_v5  ;;  %v6897_v49 = vrot.slane %v6895_v53, 4 }
 0x209   : > { %v6900_v25 = vrot.slane %v6898_v28, 5  ;;  %v6906_v50 = vrot.slane %v6904_v32, 5  ;;  %v6914_v60 = vshll.u32 %v6785_v29, 16  ;;  %v9797_v22 = vadd.f32 %v11798_v34, %v11788_v19  ;;  %v4741_v34 = vld [vmem:[#allocation4 + $0x40] sm:$0xf]  ;;  %v11887_v17 = vpop.f32.mrb[43].mxu0 }
 0x20a   : > { %v6910_v30 = vrot.slane %v6908_v48, 4  ;;  %v3940_v31 = vadd.f32 %v11795_v7, %v3901_v40  ;;  %v9518_v23 = vrot.slane %v6292_v33, 9  ;;  %v6410_v57 = vrot.slane %v6293_v43, 5  ;;  %v11890_v37 = vpop.f32.mrb[23].mxu1  ;;  %v7330_v28 = vld [vmem:[#allocation4 + $0x48] sm:$0xe] }
 0x20b   : > { %v6901_v56 = vor.u32 %v6900_v25, %v6897_v49  ;;  %v6916_v3 = vrot.slane %v6914_v60, 5  ;;  %v3819_v51 = vadd.f32 %v9797_v22, %v11803_v55  ;;  %v6413_v19 = vrot.slane %v6294_v47, 5  ;;  %v11892_v55 = vpop.f32.mrb[44].mxu0  ;;  %v7331_v32 = vld [vmem:[#allocation4 + $0x4c] sm:$0xf] }
 0x20c   : > { %5535 = vrot.lane.b32.xlu1 %v9470_v46, %s10227_s13  ;;  %v6911_v21 = vor.u32 %v6910_v30, %v6906_v50  ;;  %v3972_v10 = vmax.f32 %v3940_v31, 0.0  ;;  %v6411_v14 = vsel %vm10288_vm2, %v9518_v23, %v6410_v57  ;;  %v6412_v13 = vrot.slane %v6410_v57, 4  ;;  %v11899_v33 = vpop.f32.mrb[45].mxu0  ;;  %v7332_v25 = vld [vmem:[#allocation4 + $0x50] sm:$0x1] }
 0x20d   : > { %v6902_v12 = vrot.slane %v6901_v56, 4  ;;  %v3902_v20 = vmul.f32 %v11778_v52, %v3819_v51  ;;  %v4894_v24 = vshrl.u32 %v4740_v61, 16  ;;  %v4897_v41 = vshll.u32 %v4740_v61, 16  ;;  %v4525_v47 = vld [vmem:[#allocation4 + $0x6c] sm:$0xf] }
 0x20e   : > { %v7617_v44 = vld [vmem:[#allocation3 + $0x58] sm:$0xff]  ;;  %v6912_v8 = vrot.slane %v6911_v21, 4  ;;  %v9712_v27 = vpack.c.bf16 %v3972_v10, %v3972_v10  ;;  %v6414_v5 = vsel %vm10288_vm2, %v6412_v13, %v6413_v19  ;;  %v4903_v53 = vshll.u32 %v4741_v34, 16  ;;  %v5287_v61 = vld [vmem:[#allocation4 + $0x48] sm:$0xe]  ;;  %v11906_v21 = vpop.f32.mrb[46].mxu0 }
 0x20f   : > { %10033 = vmatmul.mubr.msk.bf16.gmra.mrb[68].mxu0 %vm408_vm6, %v7617_v44  ;;  %v6907_v29 = vsel %vm10348_vm5, %v6902_v12, %v6906_v50  ;;  %v3941_v35 = vadd.f32 %v11795_v7, %v3902_v20  ;;  %v9534_v16 = vcombine.low %v6411_v14, %v6414_v5  ;;  %v4896_v48 = vrot.slane %v4894_v24, 4  ;;  %v5288_v10 = vld [vmem:[#allocation4 + $0x4c] sm:$0xf]  ;;  %v11908_v12 = vpop.f32.mrb[47].mxu0  ;;  %v5289_v44 = vld [vmem:[#allocation4 + $0x50] sm:$0x1] }
 0x210   : > { %v6917_v59 = vsel %vm10348_vm5, %v6912_v8, %v6916_v3  ;;  %5711 = vrot.lane.b32.xlu1 %v10155_v39, %s10228_s14  ;;  %v4280_v43 = vshrl.u32 %v9712_v27, 16  ;;  %v4283_v46 = vshll.u32 %v9712_v27, 16  ;;  %v4899_v49 = vrot.slane %v4897_v41, 5  ;;  %v11912_v27 = vpop.f32.mrb[24].mxu1 }
 0x211   : > { %v9564_v40 = vcombine.low %v6907_v29, %v6917_v59  ;;  %v3973_v50 = vmax.f32 %v3941_v35, 0.0  ;;  %v4905_v30 = vrot.slane %v4903_v53, 5  ;;  %v4907_v60 = vshrl.u32 %v4741_v34, 16 }
 0x212   : > { %v4913_v22 = vshll.u32 %v4742_v15, 16  ;;  %v4282_v31 = vrot.slane %v4280_v43, 7  ;;  %v4900_v56 = vor.u32 %v4899_v49, %v4896_v48  ;;  %v9581_v23 = vrot.slane %v7330_v28, 9 }
 0x213   : > { %7260 = vrot.lane.b32.xlu0 %v9564_v40, %s10228_s14  ;;  %v7444_v57 = vrot.slane %v7331_v32, 5  ;;  %v9713_v3 = vpack.c.bf16 %v3973_v50, %v3973_v50  ;;  %v4909_v39 = vrot.slane %v4907_v60, 4  ;;  %v7447_v19 = vrot.slane %v7332_v25, 5  ;;  %v6786_v32 = vld [vmem:[#allocation4 + $0x48] sm:$0xf]  ;;  %v10156_v25 = vld [vmem:[#allocation4 + $0x54] sm:$0xff]  }
 0x214   : > { %v4915_v51 = vrot.slane %v4913_v22, 5  ;;  %v4285_v14 = vor.u32 %v4283_v46, %v4282_v31  ;;  %v4286_v13 = vrot.slane %v4282_v31, 4  ;;  %v4901_v34 = vrot.slane %v4900_v56, 4  ;;  %v11921_v46 = vpop.f32.mrb[25].mxu1  ;;  %v4529_v40 = vld [vmem:[#allocation4 + $0x74] sm:$0x1] }
 0x215   : > { %v7445_v15 = vsel %vm10288_vm2, %v9581_v23, %v7444_v57  ;;  %v4288_v8 = vshrl.u32 %v9713_v3, 16  ;;  %v4291_v20 = vshll.u32 %v9713_v3, 16  ;;  %v4910_v24 = vor.u32 %v4909_v39, %v4905_v30  ;;  %v6787_v56 = vld [vmem:[#allocation4 + $0x4c] sm:$0xf]  ;;  %v6788_v23 = vld [vmem:[#allocation4 + $0x50] sm:$0x1] }
 0x216   : > { %v7446_v41 = vrot.slane %v7444_v57, 4  ;;  %v4526_v29 = vsel %vm11575_vm15, %v4285_v14, %v4525_v47  ;;  %v4906_v5 = vsel %vm10348_vm5, %v4901_v34, %v4905_v30  ;;  %v9455_v53 = vrot.slane %v5287_v61, 9  ;;  %v11927_v30 = vpop.f32.mrb[26].mxu1  ;;  %v6295_v39 = vld [vmem:[#allocation4 + $0x54] sm:$0xe] }
 0x217   : > { %6543 = vrot.lane.b32.xlu0 %v9534_v16, %s10229_s15  ;;  %v5409_v28 = vrot.slane %v5288_v10, 5  ;;  %4527 = vst [vmem:[#allocation4 + $0x6c] sm:$0xf] %v4526_v29  ;;  %v4290_v59 = vrot.slane %v4288_v8, 7  ;;  %v4911_v35 = vrot.slane %v4910_v24, 4  ;;  %v5412_v43 = vrot.slane %v5289_v44, 5 }
 0x218   : > { %v7448_v48 = vsel %vm10288_vm2, %v7446_v41, %v7447_v19  ;;  %v9800_v50 = vadd.f32 %v11832_v6, %v11821_v45  ;;  %v6919_v57 = vshrl.u32 %v6786_v32, 16  ;;  %v6922_v6 = vshll.u32 %v6786_v32, 16  ;;  %v6296_v19 = vld [vmem:[#allocation4 + $0x58] sm:$0xf]  ;;  %v11936_v10 = vpop.f32.mrb[27].mxu1 }
 0x219   : > { %v9597_v49 = vcombine.low %v7445_v15, %v7448_v48  ;;  %v5410_v16 = vsel %vm10288_vm2, %v9455_v53, %v5409_v28  ;;  %v5411_v47 = vrot.slane %v5409_v28, 4  ;;  %v4293_v60 = vor.u32 %v4291_v20, %v4290_v59  ;;  %v6297_v44 = vld [vmem:[#allocation4 + $0x5c] sm:$0x1]  ;;  %v4743_v29 = vld [vmem:[#allocation4 + $0x48] sm:$0xf] }
 0x21a   : > { %v4295_v22 = vrot.slane %v4290_v59, 4  ;;  %v4916_v31 = vsel %vm10348_vm5, %v4911_v35, %v4915_v51  ;;  %v3824_v45 = vadd.f32 %v11772_v18, %v9800_v50  ;;  %v6921_v15 = vrot.slane %v6919_v57, 4  ;;  %v10170_v53 = vld [vmem:[%s13205_s4 + $0x8] sm:$0xff]  }
 0x21b   : > { %v9438_v61 = vcombine.low %v4906_v5, %v4916_v31  ;;  %7594 = vst.msk [vmem:[#allocation3 + $0x70] sm:$0xff] %vm408_vm6, %v9597_v49  ;;  %6720 = vrot.lane.b32.xlu0 %v10156_v25, %s10227_s13  ;;  %v5413_v3 = vsel %vm10288_vm2, %v5411_v47, %v5412_v43  ;;  %v4294_v51 = vsel %vm11587_vm1, %v4286_v13, %v4293_v60  ;;  %v6924_v20 = vrot.slane %v6922_v6, 5  ;;  %v10168_v5 = vld [vmem:[%s13205_s4 + $0x48] sm:$0xff]  }
 0x21c   : > { %v4530_v14 = vsel %vm11581_vm0, %v4295_v22, %v4529_v40  ;;  %v9471_v34 = vcombine.low %v5410_v16, %v5413_v3  ;;  %4528 = vst.msk [vmem:[#allocation4 + $0x70] sm:$0xf] %vm3988_vm10, %v4294_v51  ;;  %v3903_v18 = vmul.f32 %v11778_v52, %v3824_v45  ;;  %v6928_v24 = vshll.u32 %v6787_v56, 16  ;;  %v4744_v48 = vld [vmem:[#allocation4 + $0x4c] sm:$0xf]  ;;  %9860 = vmatprep.subr.bf16.mxu1 %v10168_v5 }
 0x21d   : > { %4531 = vst [vmem:[#allocation4 + $0x74] sm:$0x1] %v4530_v14  ;;  %5215 = vrot.lane.b32.xlu1 %v9438_v61, %s10229_s15  ;;  %v6932_v41 = vshrl.u32 %v6787_v56, 16  ;;  %v6938_v28 = vshll.u32 %v6788_v23, 16  ;;  %v9803_v32 = vadd.f32 %v11846_v62, %v11837_v26  ;;  %v9519_v59 = vrot.slane %v6295_v39, 9  ;;  %9861 = vmatpush3.bf16.msra.mxu1 %v10170_v53  ;;  %v10157_v23 = vld [vmem:[#allocation4 + $0x54] sm:$0xff]  }
 0x21e   : > { %v6417_v35 = vrot.slane %v6296_v19, 5  ;;  %v3942_v40 = vadd.f32 %v11795_v7, %v3903_v18  ;;  %v6925_v49 = vor.u32 %v6924_v20, %v6921_v15  ;;  %v6930_v25 = vrot.slane %v6928_v24, 5  ;;  %v4745_v45 = vld [vmem:[#allocation4 + $0x50] sm:$0x1]  ;;  %v7334_v18 = vld [vmem:[#allocation4 + $0x58] sm:$0xf] }
 0x21f   : > { %v6934_v16 = vrot.slane %v6932_v41, 4  ;;  %v6940_v47 = vrot.slane %v6938_v28, 5  ;;  %v3827_v50 = vadd.f32 %v11790_v11, %v9803_v32  ;;  %v5702_v26 = vpop.permute.xlu1 %5701  ;;  %v6420_v57 = vrot.slane %v6297_v44, 5  ;;  %v7333_v44 = vld [vmem:[#allocation4 + $0x54] sm:$0xe] }
 0x220   : > { %v11963_v60 = vsel %vm10288_vm2, %v9519_v59, %v6417_v35  ;;  %v6419_v22 = vrot.slane %v6417_v35, 4  ;;  %v3974_v62 = vmax.f32 %v3942_v40, 0.0  ;;  %v6926_v31 = vrot.slane %v6925_v49, 4  ;;  %5749 = vst.msk [vmem:[#allocation3] sm:$0xff] %vm1458_vm9, %v5702_v26  ;;  %v10171_v20 = vld [vmem:[%s13205_s4 + $0x50] sm:$0xff]  }
 0x221   : > { %5537 = vrot.lane.b32.xlu1 %v9471_v34, %s10227_s13  ;;  %v6935_v56 = vor.u32 %v6934_v16, %v6930_v25  ;;  %v3904_v11 = vmul.f32 %v11778_v52, %v3827_v50  ;;  %v4918_v6 = vshrl.u32 %v4743_v29, 16  ;;  %v4921_v39 = vshll.u32 %v4743_v29, 16  ;;  %v7335_v53 = vld [vmem:[#allocation4 + $0x5c] sm:$0x1]  ;;  %9862 = vmatprep.subr.bf16.mxu1 %v10171_v20  ;;  %v10172_v40 = vld [vmem:[%s13205_s4 + $0x10] sm:$0xff]  }
 0x222   : > { %v7620_v3 = vld [vmem:[#allocation3 + $0x70] sm:$0xff]  ;;  %v4927_v19 = vshll.u32 %v4744_v48, 16  ;;  %v9714_v51 = vpack.c.bf16 %v3974_v62, %v3974_v62  ;;  %v6931_v14 = vsel %vm10348_vm5, %v6926_v31, %v6930_v25  ;;  %v6421_v15 = vsel %vm10288_vm2, %v6419_v22, %v6420_v57  ;;  %v4532_v49 = vld [vmem:[#allocation4 + $0x78] sm:$0xf]  ;;  %9863 = vmatpush3.bf16.msra.mxu1 %v10172_v40 }
 0x223   : > { %10036 = vmatprep.mubr.msk.bf16.mxu0 %vm408_vm6, %v7620_v3  ;;  %v6936_v34 = vrot.slane %v6935_v56, 4  ;;  %v3943_v24 = vadd.f32 %v11795_v7, %v3904_v11  ;;  %v9535_v41 = vcombine.low %v11963_v60, %v6421_v15  ;;  %v4920_v29 = vrot.slane %v4918_v6, 4  ;;  %v5290_v56 = vld [vmem:[#allocation4 + $0x54] sm:$0xe]  ;;  %v5291_v11 = vld [vmem:[#allocation4 + $0x58] sm:$0xf] }
 0x224   : > { %v4923_v5 = vrot.slane %v4921_v39, 5  ;;  %v4297_v28 = vshrl.u32 %v9714_v51, 16  ;;  %v4300_v32 = vshll.u32 %v9714_v51, 16  ;;  %v4929_v35 = vrot.slane %v4927_v19, 5  ;;  %v10173_v6 = vld [vmem:[%s13205_s4 + $0x58] sm:$0xff]  }
 0x225   : > { %v6941_v59 = vsel %vm10348_vm5, %v6936_v34, %v6940_v47  ;;  %5713 = vrot.lane.b32.xlu1 %v10157_v23, %s10228_s14  ;;  %v3975_v16 = vmax.f32 %v3943_v24, 0.0  ;;  %v4931_v60 = vshrl.u32 %v4744_v48, 16  ;;  %v4937_v26 = vshll.u32 %v4745_v45, 16  ;;  %v5292_v51 = vld [vmem:[#allocation4 + $0x5c] sm:$0x1]  ;;  %9864 = vmatprep.subr.bf16.mxu1 %v10173_v6 }
 0x226   : > { %v9565_v25 = vcombine.low %v6931_v14, %v6941_v59  ;;  %v4924_v50 = vor.u32 %v4923_v5, %v4920_v29  ;;  %v4299_v22 = vrot.slane %v4297_v28, 7  ;;  %v9582_v62 = vrot.slane %v7333_v44, 9 }
 0x227   : > { %v7451_v31 = vrot.slane %v7334_v18, 5  ;;  %v9715_v47 = vpack.c.bf16 %v3975_v16, %v3975_v16  ;;  %v4933_v57 = vrot.slane %v4931_v60, 4  ;;  %v7454_v3 = vrot.slane %v7335_v53, 5  ;;  %v11994_v18 = vld [vmem:[#allocation4 + $0x54] sm:$0xf]  ;;  %v10175_v53 = vld [vmem:[%s13205_s4 + $0x18] sm:$0xff]  }
 0x228   : > { %7262 = vrot.lane.b32.xlu0 %v9565_v25, %s10228_s14  ;;  %v4925_v23 = vrot.slane %v4924_v50, 4  ;;  %v4302_v39 = vor.u32 %v4300_v32, %v4299_v22  ;;  %v4303_v19 = vrot.slane %v4299_v22, 4  ;;  %v4939_v48 = vrot.slane %v4937_v26, 5  ;;  %v4536_v32 = vld [vmem:[#allocation4 + $0x80] sm:$0x1]  ;;  %9865 = vmatpush3.bf16.msra.mxu1 %v10175_v53 }
 0x229   : > { %v7452_v45 = vsel %vm10288_vm2, %v9582_v62, %v7451_v31  ;;  %v4305_v14 = vshrl.u32 %v9715_v47, 16  ;;  %v4308_v34 = vshll.u32 %v9715_v47, 16  ;;  %v4934_v44 = vor.u32 %v4933_v57, %v4929_v35  ;;  %v6790_v60 = vld [vmem:[#allocation4 + $0x58] sm:$0xf]  ;;  %v6791_v22 = vld [vmem:[#allocation4 + $0x5c] sm:$0x1] }
 0x22a   : > { %v4930_v15 = vsel %vm10348_vm5, %v4925_v23, %v4929_v35  ;;  %v4533_v20 = vsel %vm11575_vm15, %v4302_v39, %v4532_v49  ;;  %v7453_v24 = vrot.slane %v7451_v31, 4  ;;  %v9456_v29 = vrot.slane %v5290_v56, 9  ;;  %v10158_v31 = vld [vmem:[#allocation4 + $0x60] sm:$0xff]   ;;  %v10176_v56 = vld [vmem:[#allocation4 + $0xc] sm:$0xff]  }
 0x22b   : > { %v5416_v5 = vrot.slane %v5291_v11, 5  ;;  %4534 = vst [vmem:[#allocation4 + $0x78] sm:$0xf] %v4533_v20  ;;  %v4307_v28 = vrot.slane %v4305_v14, 7  ;;  %v4935_v59 = vrot.slane %v4934_v44, 4  ;;  %v5419_v35 = vrot.slane %v5292_v51, 5  ;;  %v12023_v14 = vpop.permute.xlu1 %5527 }
 0x22c   : > { %6545 = vrot.lane.b32.xlu0 %v9535_v41, %s10229_s15  ;;  %v9806_v40 = vadd.f32 %v11870_v42, %v11861_v38  ;;  %v7455_v49 = vsel %vm10288_vm2, %v7453_v24, %v7454_v3  ;;  %v6943_v26 = vshrl.u32 %v11994_v18, 16  ;;  %v10177_v23 = vld [vmem:[%s13205_s4 + $0x60] sm:$0xff]   ;;  %v6300_v44 = vld [vmem:[#allocation4 + $0x68] sm:$0x1]  ;;  %v12036_v20 = vld [vmem:[#allocation4 + $0x54] sm:$0xf] }
 0x22d   : > { %v12010_v16 = vsel %vm10288_vm2, %v9456_v29, %v5416_v5  ;;  %v5418_v50 = vrot.slane %v5416_v5, 4  ;;  %v4310_v41 = vor.u32 %v4308_v34, %v4307_v28  ;;  %v4312_v62 = vrot.slane %v4307_v28, 4  ;;  %v6298_v39 = vld [vmem:[#allocation4 + $0x60] sm:$0xe]  ;;  %v6299_v51 = vld [vmem:[#allocation4 + $0x64] sm:$0xf]  ;;  %9866 = vmatprep.subr.bf16.mxu1 %v10177_v23 }
 0x22e   : > { %v12004_v25 = vpop.f32.mrb[28].mxu1  ;;  %v4940_v38 = vsel %vm10348_vm5, %v4935_v59, %v4939_v48  ;;  %v9598_v42 = vcombine.low %v7452_v45, %v7455_v49  ;;  %v3832_v11 = vadd.f32 %v9806_v40, %v11876_v54  ;;  %v6945_v6 = vrot.slane %v6943_v26, 4  ;;  %v10179_v48 = vld [vmem:[%s13205_s4 + $0x20] sm:$0xff]   ;;  %4710 = vst.msk [vmem:[#allocation3 + $0x18] sm:$0xff] %vm408_vm6, %v10176_v56  ;;  %v10181_v40 = vld [vmem:[%s13205_s4 + $0x28] sm:$0xff]  }
 0x22f   : > { %v12015_v47 = vpop.f32.mrb[29].mxu1  ;;  %v9439_v57 = vcombine.low %v4930_v15, %v4940_v38  ;;  %v5420_v3 = vsel %vm10288_vm2, %v5418_v50, %v5419_v35  ;;  %v4311_v45 = vsel %vm11587_vm1, %v4303_v19, %v4310_v41  ;;  %v4537_v34 = vsel %vm11581_vm0, %v4312_v62, %v4536_v32  ;;  %v10180_v19 = vld [vmem:[%s13205_s4 + $0x68] sm:$0xff]   ;;  %v12049_v32 = vld [vmem:[#allocation4 + $0x58] sm:$0xf]  ;;  %9867 = vmatpush3.bf16.msra.mxu1 %v10179_v48  ;;  %v12075_v48 = vpop.permute.xlu1 %5703 }
 0x230   : > { %v11942_v8 = vpop.f32.mrb[48].mxu0  ;;  %7595 = vst.msk [vmem:[#allocation3 + $0x88] sm:$0xff] %vm408_vm6, %v9598_v42  ;;  %6722 = vrot.lane.b32.xlu0 %v10158_v31, %s10227_s13  ;;  %v9472_v54 = vcombine.low %v12010_v16, %v5420_v3  ;;  %v6946_v15 = vshll.u32 %v11994_v18, 16  ;;  %v12041_v29 = vpop.f32.mrb[30].mxu1  ;;  %4538 = vst [vmem:[#allocation4 + $0x80] sm:$0x1] %v4537_v34  ;;  %v3905_v18 = vmul.f32 %v11778_v52, %v3832_v11  ;;  %9868 = vmatprep.subr.bf16.mxu1 %v10180_v19 }
 0x231   : > { %v11947_v13 = vpop.f32.mrb[49].mxu0  ;;  %4535 = vst.msk [vmem:[#allocation4 + $0x7c] sm:$0xf] %vm3988_vm10, %v4311_v45  ;;  %5217 = vrot.lane.b32.xlu1 %v9439_v57, %s10229_s15  ;;  %v6952_v5 = vshll.u32 %v6790_v60, 16  ;;  %v6956_v53 = vshrl.u32 %v6790_v60, 16  ;;  %v6962_v28 = vshll.u32 %v6791_v22, 16  ;;  %v9809_v16 = vadd.f32 %v11887_v17, %v11879_v1 }
 0x232   : > { %v11957_v43 = vpop.f32.mrb[50].mxu0  ;;  %v12053_v35 = vpop.f32.mrb[31].mxu1  ;;  %v6948_v49 = vrot.slane %v6946_v15, 5  ;;  %v9520_v50 = vrot.slane %v6298_v39, 9  ;;  %v6424_v26 = vrot.slane %v6299_v51, 5  ;;  %v10182_v60 = vld [vmem:[%s13205_s4 + $0x70] sm:$0xff]   ;;  %v3944_v22 = vadd.f32 %v11795_v7, %v3905_v18 }
 0x233   : > { %v11966_v61 = vpop.f32.mrb[51].mxu0  ;;  %v6954_v62 = vrot.slane %v6952_v5, 5  ;;  %v6958_v38 = vrot.slane %v6956_v53, 4  ;;  %v6964_v42 = vrot.slane %v6962_v28, 5  ;;  %v3835_v23 = vadd.f32 %v9809_v16, %v11890_v37  ;;  %v10185_v57 = vld [vmem:[#allocation4 + $0x18] sm:$0xff]   ;;  %9869 = vmatpush3.bf16.msra.mxu1 %v10181_v40  ;;  %v10184_v37 = vld [vmem:[%s13205_s4 + $0x30] sm:$0xff]  }
 0x234   : > { %v6949_v56 = vor.u32 %v6948_v49, %v6945_v6  ;;  %v12071_v1 = vsel %vm10288_vm2, %v9520_v50, %v6424_v26  ;;  %v6426_v17 = vrot.slane %v6424_v26, 4  ;;  %v3976_v3 = vmax.f32 %v3944_v22, 0.0  ;;  %v4748_v34 = vld [vmem:[#allocation4 + $0x5c] sm:$0x1]  ;;  %v7336_v19 = vld [vmem:[#allocation4 + $0x60] sm:$0xe]  ;;  %9870 = vmatprep.subr.bf16.mxu1 %v10182_v60 }
 0x235   : > { %5539 = vrot.lane.b32.xlu1 %v9472_v54, %s10227_s13  ;;  %v6959_v11 = vor.u32 %v6958_v38, %v6954_v62  ;;  %v6427_v39 = vrot.slane %v6300_v44, 5  ;;  %v4942_v51 = vshrl.u32 %v12036_v20, 16  ;;  %v3906_v45 = vmul.f32 %v11778_v52, %v3835_v23  ;;  %4711 = vst.msk [vmem:[#allocation3 + $0x30] sm:$0xff] %vm408_vm6, %v10185_v57  ;;  %v10186_v44 = vld [vmem:[%s13205_s4 + $0x78] sm:$0xff]   ;;  %v10159_v28 = vld [vmem:[#allocation4 + $0x60] sm:$0xff]  }
 0x236   : > { %v6950_v6 = vrot.slane %v6949_v56, 4  ;;  %v4945_v15 = vshll.u32 %v12036_v20, 16  ;;  %v4951_v54 = vshll.u32 %v12049_v32, 16  ;;  %v9716_v5 = vpack.c.bf16 %v3976_v3, %v3976_v3  ;;  %v7337_v49 = vld [vmem:[#allocation4 + $0x64] sm:$0xf] }
 0x237   : > { %v7623_v18 = vld [vmem:[#allocation3 + $0x88] sm:$0xff]  ;;  %v6960_v53 = vrot.slane %v6959_v11, 4  ;;  %v6428_v52 = vsel %vm10288_vm2, %v6426_v17, %v6427_v39  ;;  %v4944_v40 = vrot.slane %v4942_v51, 4  ;;  %v3945_v16 = vadd.f32 %v11795_v7, %v3906_v45  ;;  %9871 = vmatpush3.bf16.msra.mxu1 %v10184_v37  ;;  %v4539_v17 = vld [vmem:[#allocation4 + $0x84] sm:$0xf] }
 0x238   : > { %v12038_v24 = vpop.f32.mrb[52].mxu0  ;;  %10037 = vmatmul.mubr.msk.bf16.gmra.mrb[72].mxu0 %vm408_vm6, %v7623_v18  ;;  %v6955_v20 = vsel %vm10348_vm5, %v6950_v6, %v6954_v62  ;;  %v9536_v50 = vcombine.low %v12071_v1, %v6428_v52  ;;  %v4947_v26 = vrot.slane %v4945_v15, 5  ;;  %v4314_v60 = vshrl.u32 %v9716_v5, 16  ;;  %v7338_v23 = vld [vmem:[#allocation4 + $0x68] sm:$0x1]  ;;  %v10188_v62 = vld [vmem:[%s13205_s4 + $0x38] sm:$0xff]   ;;  %9872 = vmatprep.subr.bf16.mxu1 %v10186_v44 }
 0x239   : > { %v12051_v59 = vpop.f32.mrb[53].mxu0  ;;  %v4317_v22 = vshll.u32 %v9716_v5, 16  ;;  %v6965_v38 = vsel %vm10348_vm5, %v6960_v53, %v6964_v42  ;;  %5715 = vrot.lane.b32.xlu1 %v10159_v28, %s10228_s14  ;;  %v12097_v56 = vrot.slane %v4951_v54, 5  ;;  %v3977_v57 = vmax.f32 %v3945_v16, 0.0  ;;  %v5293_v6 = vld [vmem:[#allocation4 + $0x60] sm:$0xe]  ;;  %v5208_v45 = vpop.permute.xlu1 %5207 }
 0x23a   : > { %v12060_v41 = vpop.f32.mrb[54].mxu0  ;;  %v9566_v7 = vcombine.low %v6955_v20, %v6965_v38  ;;  %v4948_v1 = vor.u32 %v4947_v26, %v4944_v40  ;;  %v4955_v3 = vshrl.u32 %v12049_v32, 16  ;;  %v12103_v11 = vrot.slane %v4314_v60, 7  ;;  %v5294_v5 = vld [vmem:[#allocation4 + $0x64] sm:$0xf]  ;;  %5254 = vst.msk [vmem:[#allocation3 + $0x18] sm:$0xff] %vm956_vm7, %v5208_v45 }
 0x23b   : > { %v12066_v31 = vpop.f32.mrb[55].mxu0  ;;  %v4961_v42 = vshll.u32 %v4748_v34, 16  ;;  %v9583_v39 = vrot.slane %v7336_v19, 9  ;;  %v7458_v51 = vrot.slane %v7337_v49, 5  ;;  %v9717_v37 = vpack.c.bf16 %v3977_v57, %v3977_v57  ;;  %v10190_v53 = vld [vmem:[#allocation4 + $0x24] sm:$0xff]   ;;  %5574 = vst.msk [vmem:[#allocation3 + $0x18] sm:$0xff] %vm1280_vm8, %v12023_v14  ;;  %9873 = vmatpush3.bf16.msra.mxu1 %v10188_v62 }
 0x23c   : > { %7264 = vrot.lane.b32.xlu0 %v9566_v7, %s10228_s14  ;;  %v4949_v15 = vrot.slane %v4948_v1, 4  ;;  %v4957_v54 = vrot.slane %v4955_v3, 4  ;;  %v7461_v18 = vrot.slane %v7338_v23, 5  ;;  %v4319_v32 = vor.u32 %v4317_v22, %v12103_v11  ;;  %v5295_v19 = vld [vmem:[#allocation4 + $0x68] sm:$0x1]  ;;  %5750 = vst.msk [vmem:[#allocation3 + $0x18] sm:$0xff] %vm1458_vm9, %v12075_v48 }
 0x23d   : > { %v4320_v44 = vrot.slane %v12103_v11, 4  ;;  %v4963_v28 = vrot.slane %v4961_v42, 5  ;;  %v7459_v34 = vsel %vm10288_vm2, %v9583_v39, %v7458_v51  ;;  %v4322_v52 = vshrl.u32 %v9717_v37, 16  ;;  %v6792_v16 = vld [vmem:[#allocation4 + $0x60] sm:$0xf]  ;;  %4712 = vst.msk [vmem:[#allocation3 + $0x48] sm:$0xff] %vm408_vm6, %v10190_v53 }
 0x23e   : > { %v4325_v40 = vshll.u32 %v9717_v37, 16  ;;  %v4954_v49 = vsel %vm10348_vm5, %v4949_v15, %v12097_v56  ;;  %v4958_v20 = vor.u32 %v4957_v54, %v12097_v56  ;;  %v12123_v26 = vld [vmem:[%s13205_s4 + $0x80] sm:$0xff]   ;;  %v4540_v14 = vsel %vm11575_vm15, %v4319_v32, %v4539_v17  ;;  %v12128_v56 = vpop.permute.xlu1 %5529  ;;  %v10193_v23 = vld [vmem:[#allocation4 + $0x30] sm:$0xff]   ;;  %v4543_v62 = vld [vmem:[#allocation4 + $0x8c] sm:$0x1] }
 0x23f   : > { %10060 = vmatprep.subr.bf16.mxu1 %v12123_v26  ;;  %v7460_v60 = vrot.slane %v7458_v51, 4  ;;  %v9457_v22 = vrot.slane %v5293_v6, 9  ;;  %v5423_v38 = vrot.slane %v5294_v5, 5  ;;  %4541 = vst [vmem:[#allocation4 + $0x84] sm:$0xf] %v4540_v14  ;;  %v4324_v48 = vrot.slane %v4322_v52, 7 }
 0x240   : > { %6547 = vrot.lane.b32.xlu0 %v9536_v50, %s10229_s15  ;;  %v4959_v7 = vrot.slane %v4958_v20, 4  ;;  %v5426_v57 = vrot.slane %v5295_v19, 5  ;;  %v9812_v1 = vadd.f32 %v11899_v33, %v11892_v55  ;;  %v12133_v3 = vpop.f32.mrb[56].mxu0  ;;  %v6793_v39 = vld [vmem:[#allocation4 + $0x64] sm:$0xf]  ;;  %v6967_v51 = vshrl.u32 %v6792_v16, 16 }
 0x241   : > { %v7462_v17 = vsel %vm10288_vm2, %v7460_v60, %v7461_v18  ;;  %v5424_v11 = vsel %vm10288_vm2, %v9457_v22, %v5423_v38  ;;  %v5425_v42 = vrot.slane %v5423_v38, 4  ;;  %v12139_v6 = vpop.f32.mrb[57].mxu0  ;;  %4713 = vst.msk [vmem:[#allocation3 + $0x60] sm:$0xff] %vm408_vm6, %v10193_v23  ;;  %v4327_v50 = vor.u32 %v4325_v40, %v4324_v48  ;;  %v10160_v37 = vld [vmem:[#allocation4 + $0x6c] sm:$0xff]   ;;  %v6794_v15 = vld [vmem:[#allocation4 + $0x68] sm:$0x1] }
 0x242   : > { %v4329_v45 = vrot.slane %v4324_v48, 4  ;;  %v4964_v55 = vsel %vm10348_vm5, %v4959_v7, %v4963_v28  ;;  %v9599_v33 = vcombine.low %v7459_v34, %v7462_v17  ;;  %v12144_v54 = vpop.f32.mrb[58].mxu0  ;;  %v3840_v53 = vadd.f32 %v11839_v36, %v9812_v1  ;;  %v6301_v19 = vld [vmem:[#allocation4 + $0x6c] sm:$0xe]  ;;  %v6302_v52 = vld [vmem:[#allocation4 + $0x70] sm:$0xf]  ;;  %v5706_v60 = vpop.permute.xlu1 %5705 }
 0x243   : > { %v9440_v18 = vcombine.low %v4954_v49, %v4964_v55  ;;  %v5427_v5 = vsel %vm10288_vm2, %v5425_v42, %v5426_v57  ;;  %v6969_v32 = vrot.slane %v6967_v51, 4  ;;  %v12149_v20 = vpop.f32.mrb[59].mxu0  ;;  %v4328_v40 = vsel %vm11587_vm1, %v4320_v44, %v4327_v50  ;;  %v4749_v14 = vld [vmem:[#allocation4 + $0x60] sm:$0xf]  ;;  %v4750_v48 = vld [vmem:[#allocation4 + $0x64] sm:$0xf] }
 0x244   : > { %v4544_v28 = vsel %vm11581_vm0, %v4329_v45, %v4543_v62  ;;  %7596 = vst.msk [vmem:[#allocation3 + $0xa0] sm:$0xff] %vm408_vm6, %v9599_v33  ;;  %6724 = vrot.lane.b32.xlu0 %v10160_v37, %s10227_s13  ;;  %v9473_v34 = vcombine.low %v5424_v11, %v5427_v5  ;;  %v6970_v49 = vshll.u32 %v6792_v16, 16  ;;  %v12162_v36 = vld [vmem:[%s13203_s2] ss:$0 sm:$0xff]  ;;  %v6976_v22 = vshll.u32 %v6793_v39, 16 }
 0x245   : > { %4542 = vst.msk [vmem:[#allocation4 + $0x88] sm:$0xf] %vm3988_vm10, %v4328_v40  ;;  %4545 = vst [vmem:[#allocation4 + $0x8c] sm:$0x1] %v4544_v28  ;;  %5219 = vrot.lane.b32.xlu1 %v9440_v18, %s10229_s15  ;;  %v3907_v44 = vmul.f32 %v12162_v36, %v3840_v53  ;;  %v6980_v38 = vshrl.u32 %v6793_v39, 16  ;;  %v6986_v23 = vshll.u32 %v6794_v15, 16  ;;  %v9815_v16 = vadd.f32 %v11908_v12, %v11906_v21 }
 0x246   : > { %v6972_v62 = vrot.slane %v6970_v49, 5  ;;  %v6303_v7 = vld [vmem:[#allocation4 + $0x74] sm:$0x1]  ;;  %v9521_v57 = vrot.slane %v6301_v19, 9  ;;  %v6431_v1 = vrot.slane %v6302_v52, 5  ;;  %v6978_v42 = vrot.slane %v6976_v22, 5 }
 0x247   : > { %v12170_v17 = vld [vmem:[%s13204_s3] ss:$0 sm:$0xff]  ;;  %v6982_v51 = vrot.slane %v6980_v38, 4  ;;  %v6988_v50 = vrot.slane %v6986_v23, 5  ;;  %v3843_v45 = vadd.f32 %v11881_v0, %v9815_v16  ;;  %v6434_v37 = vrot.slane %v6303_v7, 5  ;;  %v5210_v18 = vpop.permute.xlu1 %5209  ;;  %v12183_v23 = vpop.permute.xlu0 %6533 }
 0x248   : > { %v3946_v11 = vadd.f32 %v12170_v17, %v3907_v44  ;;  %v6973_v39 = vor.u32 %v6972_v62, %v6969_v32  ;;  %v12176_v55 = vsel %vm10288_vm2, %v9521_v57, %v6431_v1  ;;  %v6433_v21 = vrot.slane %v6431_v1, 4  ;;  %v4751_v19 = vld [vmem:[#allocation4 + $0x68] sm:$0x1]  ;;  %v7339_v40 = vld [vmem:[#allocation4 + $0x6c] sm:$0xe]  ;;  %5255 = vst.msk [vmem:[#allocation3 + $0x30] sm:$0xff] %vm956_vm7, %v5210_v18 }
 0x249   : > { %5541 = vrot.lane.b32.xlu1 %v9473_v34, %s10227_s13  ;;  %v6983_v33 = vor.u32 %v6982_v51, %v6978_v42  ;;  %v4966_v15 = vshrl.u32 %v4749_v14, 16  ;;  %v3908_v53 = vmul.f32 %v12162_v36, %v3843_v45  ;;  %v4969_v52 = vshll.u32 %v4749_v14, 16  ;;  %v10161_v44 = vld [vmem:[#allocation4 + $0x6c] sm:$0xff]   ;;  %5575 = vst.msk [vmem:[#allocation3 + $0x30] sm:$0xff] %vm1280_vm8, %v12128_v56  ;;  %v7341_v51 = vld [vmem:[#allocation4 + $0x74] sm:$0x1] }
 0x24a   : > { %v3978_v12 = vmax.f32 %v3946_v11, 0.0  ;;  %v6974_v5 = vrot.slane %v6973_v39, 4  ;;  %v4975_v32 = vshll.u32 %v4750_v48, 16  ;;  %v6435_v34 = vsel %vm10288_vm2, %v6433_v21, %v6434_v37  ;;  %v7340_v38 = vld [vmem:[#allocation4 + $0x70] sm:$0xf]  ;;  %5751 = vst.msk [vmem:[#allocation3 + $0x30] sm:$0xff] %vm1458_vm9, %v5706_v60 }
 0x24b   : > { %v7626_v0 = vld [vmem:[#allocation3 + $0xa0] sm:$0xff]  ;;  %v6984_v49 = vrot.slane %v6983_v33, 4  ;;  %v4968_v22 = vrot.slane %v4966_v15, 4  ;;  %v3947_v62 = vadd.f32 %v12170_v17, %v3908_v53  ;;  %v9537_v16 = vcombine.low %v12176_v55, %v6435_v34  ;;  %v4546_v39 = vld [vmem:[#allocation4 + $0x90] sm:$0xf]  ;;  %v12199_v34 = vpop.permute.xlu0 %6710 }
 0x24c   : > { %v9718_v28 = vpack.c.bf16 %v3978_v12, %v3978_v12  ;;  %10040 = vmatprep.mubr.msk.bf16.mxu0 %vm408_vm6, %v7626_v0  ;;  %v6979_v14 = vsel %vm10348_vm5, %v6974_v5, %v6978_v42  ;;  %v4971_v7 = vrot.slane %v4969_v52, 5  ;;  %v4977_v56 = vrot.slane %v4975_v32, 5  ;;  %v5296_v18 = vld [vmem:[#allocation4 + $0x6c] sm:$0xe]  ;;  %v5297_v52 = vld [vmem:[#allocation4 + $0x70] sm:$0xf] }
 0x24d   : > { %v6989_v11 = vsel %vm10348_vm5, %v6984_v49, %v6988_v50  ;;  %5717 = vrot.lane.b32.xlu1 %v10161_v44, %s10228_s14  ;;  %v3979_v21 = vmax.f32 %v3947_v62, 0.0  ;;  %v4979_v12 = vshrl.u32 %v4750_v48, 16  ;;  %v4985_v37 = vshll.u32 %v4751_v19, 16  ;;  %v10196_v0 = vld [vmem:[#allocation4 + $0x3c] sm:$0xff]   ;;  %v5298_v48 = vld [vmem:[#allocation4 + $0x74] sm:$0x1] }
 0x24e   : > { %v4331_v57 = vshrl.u32 %v9718_v28, 16  ;;  %v4334_v1 = vshll.u32 %v9718_v28, 16  ;;  %v9567_v45 = vcombine.low %v6979_v14, %v6989_v11  ;;  %v4972_v42 = vor.u32 %v4971_v7, %v4968_v22  ;;  %v6795_v14 = vld [vmem:[#allocation4 + $0x6c] sm:$0xf]  ;;  %4714 = vst.msk [vmem:[#allocation3 + $0x78] sm:$0xff] %vm408_vm6, %v10196_v0 }
 0x24f   : > { %v9584_v55 = vrot.slane %v7339_v40, 9  ;;  %v7465_v15 = vrot.slane %v7340_v38, 5  ;;  %v9719_v60 = vpack.c.bf16 %v3979_v21, %v3979_v21  ;;  %v4981_v53 = vrot.slane %v4979_v12, 4  ;;  %v4550_v7 = vld [vmem:[#allocation4 + $0x98] sm:$0x1] }
 0x250   : > { %v4333_v33 = vrot.slane %v4331_v57, 7  ;;  %7266 = vrot.lane.b32.xlu0 %v9567_v45, %s10228_s14  ;;  %v4973_v5 = vrot.slane %v4972_v42, 4  ;;  %v7468_v50 = vrot.slane %v7341_v51, 5  ;;  %v4987_v49 = vrot.slane %v4985_v37, 5 }
 0x251   : > { %v7466_v44 = vsel %vm10288_vm2, %v9584_v55, %v7465_v15  ;;  %v4339_v19 = vshrl.u32 %v9719_v60, 16  ;;  %v4342_v40 = vshll.u32 %v9719_v60, 16  ;;  %v4982_v38 = vor.u32 %v4981_v53, %v4977_v56  ;;  %v6797_v55 = vld [vmem:[#allocation4 + $0x74] sm:$0x1]  ;;  %v6304_v53 = vld [vmem:[#allocation4 + $0x78] sm:$0xe] }
 0x252   : > { %v4336_v32 = vor.u32 %v4334_v1, %v4333_v33  ;;  %v4337_v28 = vrot.slane %v4333_v33, 4  ;;  %v4978_v22 = vsel %vm10348_vm5, %v4973_v5, %v4977_v56  ;;  %v7467_v57 = vrot.slane %v7465_v15, 4  ;;  %v6796_v56 = vld [vmem:[#allocation4 + $0x70] sm:$0xf]  ;;  %v12209_v12 = vpop.f32.mrb[60].mxu0 }
 0x253   : > { %v9458_v1 = vrot.slane %v5296_v18, 9  ;;  %v5430_v11 = vrot.slane %v5297_v52, 5  ;;  %v4341_v51 = vrot.slane %v4339_v19, 7  ;;  %v4983_v45 = vrot.slane %v4982_v38, 4  ;;  %v12215_v18 = vpop.f32.mrb[61].mxu0  ;;  %v12224_v38 = vpop.permute.xlu0 %6535 }
 0x254   : > { %v4547_v62 = vsel %vm11575_vm15, %v4336_v32, %v4546_v39  ;;  %6549 = vrot.lane.b32.xlu0 %v9537_v16, %s10229_s15  ;;  %v5433_v21 = vrot.slane %v5298_v48, 5  ;;  %v9818_v42 = vadd.f32 %v11947_v13, %v11942_v8  ;;  %v7469_v33 = vsel %vm10288_vm2, %v7467_v57, %v7468_v50  ;;  %v10162_v13 = vld [vmem:[#allocation4 + $0x78] sm:$0xff]   ;;  %v12219_v52 = vpop.f32.mrb[62].mxu0  ;;  %v6306_v57 = vld [vmem:[#allocation4 + $0x80] sm:$0x1] }
 0x255   : > { %4548 = vst [vmem:[#allocation4 + $0x90] sm:$0xf] %v4547_v62  ;;  %v5431_v39 = vsel %vm10288_vm2, %v9458_v1, %v5430_v11  ;;  %v5432_v37 = vrot.slane %v5430_v11, 4  ;;  %v6991_v15 = vshrl.u32 %v6795_v14, 16  ;;  %v4344_v16 = vor.u32 %v4342_v40, %v4341_v51  ;;  %v6305_v19 = vld [vmem:[#allocation4 + $0x7c] sm:$0xf]  ;;  %v12234_v1 = vpop.permute.xlu1 %5531 }
 0x256   : > { %v4346_v60 = vrot.slane %v4341_v51, 4  ;;  %v4988_v5 = vsel %vm10348_vm5, %v4983_v45, %v4987_v49  ;;  %v9600_v8 = vcombine.low %v7466_v44, %v7469_v33  ;;  %v3848_v32 = vadd.f32 %v9818_v42, %v11921_v46  ;;  %v12226_v40 = vpop.f32.mrb[63].mxu0  ;;  %v4752_v46 = vld [vmem:[#allocation4 + $0x6c] sm:$0xf]  ;;  %v4753_v45 = vld [vmem:[#allocation4 + $0x70] sm:$0xf] }
 0x257   : > { %v9441_v0 = vcombine.low %v4978_v22, %v4988_v5  ;;  %v5434_v50 = vsel %vm10288_vm2, %v5432_v37, %v5433_v21  ;;  %v6993_v48 = vrot.slane %v6991_v15, 4  ;;  %v4345_v49 = vsel %vm11587_vm1, %v4337_v28, %v4344_v16 }
 0x258   : > { %v4551_v44 = vsel %vm11581_vm0, %v4346_v60, %v4550_v7  ;;  %7597 = vst.msk [vmem:[#allocation3 + $0xb8] sm:$0xff] %vm408_vm6, %v9600_v8  ;;  %6726 = vrot.lane.b32.xlu0 %v10162_v13, %s10227_s13  ;;  %v9474_v22 = vcombine.low %v5431_v39, %v5434_v50  ;;  %v6994_v62 = vshll.u32 %v6795_v14, 16  ;;  %v3909_v28 = vmul.f32 %v12162_v36, %v3848_v32  ;;  %v4754_v32 = vld [vmem:[#allocation4 + $0x74] sm:$0x1] }
 0x259   : > { %4549 = vst.msk [vmem:[#allocation4 + $0x94] sm:$0xf] %vm3988_vm10, %v4345_v49  ;;  %4552 = vst [vmem:[#allocation4 + $0x98] sm:$0x1] %v4551_v44  ;;  %5221 = vrot.lane.b32.xlu1 %v9441_v0, %s10229_s15  ;;  %v7000_v11 = vshll.u32 %v6796_v56, 16  ;;  %v7004_v51 = vshrl.u32 %v6796_v56, 16  ;;  %v9821_v42 = vadd.f32 %v11966_v61, %v11957_v43  ;;  %v5708_v49 = vpop.permute.xlu1 %5707 }
 0x25a   : > { %v7010_v7 = vshll.u32 %v6797_v55, 16  ;;  %v6996_v21 = vrot.slane %v6994_v62, 5  ;;  %v9522_v14 = vrot.slane %v6304_v53, 9  ;;  %v6438_v33 = vrot.slane %v6305_v19, 5  ;;  %v12248_v53 = vpop.permute.xlu0 %6712  ;;  %v10198_v44 = vld [vmem:[#allocation4 + $0x48] sm:$0xff]  }
 0x25b   : > { %v3948_v39 = vadd.f32 %v12170_v17, %v3909_v28  ;;  %v7002_v37 = vrot.slane %v7000_v11, 5  ;;  %v7006_v15 = vrot.slane %v7004_v51, 4  ;;  %v3851_v5 = vadd.f32 %v9821_v42, %v11936_v10  ;;  %v7342_v10 = vld [vmem:[#allocation4 + $0x78] sm:$0xe]  ;;  %4715 = vst.msk [vmem:[#allocation3 + $0x90] sm:$0xff] %vm408_vm6, %v10198_v44 }
 0x25c   : > { %v7012_v16 = vrot.slane %v7010_v7, 5  ;;  %v6997_v60 = vor.u32 %v6996_v21, %v6993_v48  ;;  %v12245_v8 = vsel %vm10288_vm2, %v9522_v14, %v6438_v33  ;;  %v6440_v56 = vrot.slane %v6438_v33, 4  ;;  %v10163_v51 = vld [vmem:[#allocation4 + $0x78] sm:$0xff]  }
 0x25d   : > { %5543 = vrot.lane.b32.xlu1 %v9474_v22, %s10227_s13  ;;  %v3980_v55 = vmax.f32 %v3948_v39, 0.0  ;;  %v7007_v13 = vor.u32 %v7006_v15, %v7002_v37  ;;  %v6441_v43 = vrot.slane %v6306_v57, 5  ;;  %v4990_v61 = vshrl.u32 %v4752_v46, 16  ;;  %v7343_v7 = vld [vmem:[#allocation4 + $0x7c] sm:$0xf] }
 0x25e   : > { %v6998_v0 = vrot.slane %v6997_v60, 4  ;;  %v3910_v50 = vmul.f32 %v12162_v36, %v3851_v5  ;;  %v4993_v48 = vshll.u32 %v4752_v46, 16  ;;  %v4999_v19 = vshll.u32 %v4753_v45, 16  ;;  %v7344_v5 = vld [vmem:[#allocation4 + $0x80] sm:$0x1]  ;;  %v12262_v44 = vpop.permute.xlu0 %7254 }
 0x25f   : > { %v7629_v62 = vld [vmem:[#allocation3 + $0xb8] sm:$0xff]  ;;  %v9720_v28 = vpack.c.bf16 %v3980_v55, %v3980_v55  ;;  %v7008_v11 = vrot.slane %v7007_v13, 4  ;;  %v6442_v22 = vsel %vm10288_vm2, %v6440_v56, %v6441_v43  ;;  %v4992_v57 = vrot.slane %v4990_v61, 4 }
 0x260   : > { %10041 = vmatmul.mubr.msk.bf16.gmra.mrb[76].mxu0 %vm408_vm6, %v7629_v62  ;;  %v7003_v21 = vsel %vm10348_vm5, %v6998_v0, %v7002_v37  ;;  %v3949_v46 = vadd.f32 %v12170_v17, %v3910_v50  ;;  %v9538_v42 = vcombine.low %v12245_v8, %v6442_v22  ;;  %v4995_v14 = vrot.slane %v4993_v48, 5  ;;  %v4553_v56 = vld [vmem:[#allocation4 + $0x9c] sm:$0xf]  ;;  %v5299_v48 = vld [vmem:[#allocation4 + $0x78] sm:$0xe] }
 0x261   : > { %v4348_v33 = vshrl.u32 %v9720_v28, 16  ;;  %v4351_v39 = vshll.u32 %v9720_v28, 16  ;;  %v7013_v15 = vsel %vm10348_vm5, %v7008_v11, %v7012_v16  ;;  %5719 = vrot.lane.b32.xlu1 %v10163_v51, %s10228_s14  ;;  %v5001_v60 = vrot.slane %v4999_v19, 5  ;;  %v5300_v19 = vld [vmem:[#allocation4 + $0x7c] sm:$0xf] }
 0x262   : > { %v9568_v55 = vcombine.low %v7003_v21, %v7013_v15  ;;  %v3981_v13 = vmax.f32 %v3949_v46, 0.0  ;;  %v4996_v37 = vor.u32 %v4995_v14, %v4992_v57  ;;  %v5003_v43 = vshrl.u32 %v4753_v45, 16 }
 0x263   : > { %v4350_v61 = vrot.slane %v4348_v33, 7  ;;  %v5009_v0 = vshll.u32 %v4754_v32, 16  ;;  %v9585_v8 = vrot.slane %v7342_v10, 9  ;;  %v7472_v50 = vrot.slane %v7343_v7, 5  ;;  %v5301_v32 = vld [vmem:[#allocation4 + $0x80] sm:$0x1] }
 0x264   : > { %7268 = vrot.lane.b32.xlu0 %v9568_v55, %s10228_s14  ;;  %v9721_v62 = vpack.c.bf16 %v3981_v13, %v3981_v13  ;;  %v4997_v16 = vrot.slane %v4996_v37, 4  ;;  %v5005_v28 = vrot.slane %v5003_v43, 4  ;;  %v7475_v11 = vrot.slane %v7344_v5, 5  ;;  %v5212_v51 = vpop.permute.xlu1 %5211  ;;  %v6798_v33 = vld [vmem:[#allocation4 + $0x78] sm:$0xf] }
 0x265   : > { %v4353_v22 = vor.u32 %v4351_v39, %v4350_v61  ;;  %v4354_v21 = vrot.slane %v4350_v61, 4  ;;  %v5011_v46 = vrot.slane %v5009_v0, 5  ;;  %v7473_v45 = vsel %vm10288_vm2, %v9585_v8, %v7472_v50  ;;  %5256 = vst.msk [vmem:[#allocation3 + $0x48] sm:$0xff] %vm956_vm7, %v5212_v51  ;;  %v4557_v37 = vld [vmem:[#allocation4 + $0xa4] sm:$0x1] }
 0x266   : > { %v4356_v10 = vshrl.u32 %v9721_v62, 16  ;;  %v4359_v57 = vshll.u32 %v9721_v62, 16  ;;  %v5002_v7 = vsel %vm10348_vm5, %v4997_v16, %v5001_v60  ;;  %v5006_v14 = vor.u32 %v5005_v28, %v5001_v60  ;;  %5576 = vst.msk [vmem:[#allocation3 + $0x48] sm:$0xff] %vm1280_vm8, %v12234_v1  ;;  %v6799_v8 = vld [vmem:[#allocation4 + $0x7c] sm:$0xf]  ;;  %v12282_v62 = vpop.permute.xlu0 %6537 }
 0x267   : > { %v4554_v39 = vsel %vm11575_vm15, %v4353_v22, %v4553_v56  ;;  %v7474_v15 = vrot.slane %v7472_v50, 4  ;;  %v9459_v5 = vrot.slane %v5299_v48, 9  ;;  %v5437_v55 = vrot.slane %v5300_v19, 5  ;;  %5752 = vst.msk [vmem:[#allocation3 + $0x48] sm:$0xff] %vm1458_vm9, %v5708_v49  ;;  %v6800_v50 = vld [vmem:[#allocation4 + $0x80] sm:$0x1] }
 0x268   : > { %4555 = vst [vmem:[#allocation4 + $0x9c] sm:$0xf] %v4554_v39  ;;  %v4358_v13 = vrot.slane %v4356_v10, 7  ;;  %6551 = vrot.lane.b32.xlu0 %v9538_v42, %s10229_s15  ;;  %v5007_v43 = vrot.slane %v5006_v14, 4  ;;  %v5440_v61 = vrot.slane %v5301_v32, 5  ;;  %v9824_v60 = vadd.f32 %v12051_v59, %v12038_v24  ;;  %v10166_v24 = vld [vmem:[#allocation4 + $0x84] sm:$0xff]  }
 0x269   : > { %v7476_v1 = vsel %vm10288_vm2, %v7474_v15, %v7475_v11  ;;  %v5438_v56 = vsel %vm10288_vm2, %v9459_v5, %v5437_v55  ;;  %v5439_v0 = vrot.slane %v5437_v55, 4  ;;  %v7015_v49 = vshrl.u32 %v6798_v33, 16  ;;  %v5766_v48 = vld [vmem:[#allocation4 + $0x10] sm:$0xf]  ;;  %v10200_v59 = vld [vmem:[#allocation4 + $0x54] sm:$0xff]  }
 0x26a   : > { %v4361_v16 = vor.u32 %v4359_v57, %v4358_v13  ;;  %v4363_v42 = vrot.slane %v4358_v13, 4  ;;  %v5012_v28 = vsel %vm10348_vm5, %v5007_v43, %v5011_v46  ;;  %v9601_v19 = vcombine.low %v7473_v45, %v7476_v1  ;;  %v5767_v14 = vld [vmem:[#allocation4 + $0x14] sm:$0x1]  ;;  %4716 = vst.msk [vmem:[#allocation3 + $0xa8] sm:$0xff] %vm408_vm6, %v10200_v59 }
 0x26b   : > { %v9442_v51 = vcombine.low %v5002_v7, %v5012_v28  ;;  %v5441_v11 = vsel %vm10288_vm2, %v5439_v0, %v5440_v61  ;;  %v3856_v22 = vadd.f32 %v11912_v27, %v9824_v60  ;;  %v7017_v32 = vrot.slane %v7015_v49, 4  ;;  %v5765_v7 = vld [vmem:[#allocation4 + $0xc] sm:$0xf]  ;;  %v10169_v28 = vld [vmem:[#allocation4 + $0x84] sm:$0xff]  }
 0x26c   : > { %v4362_v10 = vsel %vm11587_vm1, %v4354_v21, %v4361_v16  ;;  %v4558_v57 = vsel %vm11581_vm0, %v4363_v42, %v4557_v37  ;;  %7598 = vst.msk [vmem:[#allocation3 + $0xd0] sm:$0xff] %vm408_vm6, %v9601_v19  ;;  %6728 = vrot.lane.b32.xlu0 %v10166_v24, %s10227_s13  ;;  %v9475_v46 = vcombine.low %v5438_v56, %v5441_v11  ;;  %v7018_v45 = vshll.u32 %v6798_v33, 16  ;;  %v12301_v37 = vpop.permute.xlu1 %5533  ;;  %v12304_v56 = vpop.permute.xlu0 %6714  ;;  %v4755_v11 = vld [vmem:[#allocation4 + $0x78] sm:$0xf] }
 0x26d   : > { %4556 = vst.msk [vmem:[#allocation4 + $0xa0] sm:$0xf] %vm3988_vm10, %v4362_v10  ;;  %4559 = vst [vmem:[#allocation4 + $0xa4] sm:$0x1] %v4558_v57  ;;  %5223 = vrot.lane.b32.xlu1 %v9442_v51, %s10229_s15  ;;  %v3911_v27 = vmul.f32 %v12162_v36, %v3856_v22  ;;  %v7024_v21 = vshll.u32 %v6799_v8, 16  ;;  %v7028_v39 = vshrl.u32 %v6799_v8, 16  ;;  %v9827_v55 = vadd.f32 %v12066_v31, %v12060_v41 }
 0x26e   : > { %v7034_v15 = vshll.u32 %v6800_v50, 16  ;;  %v7020_v5 = vrot.slane %v7018_v45, 5  ;;  %v5823_v13 = vshll.u32 %v5766_v48, 16  ;;  %v5827_v33 = vshrl.u32 %v5766_v48, 16  ;;  %v6307_v51 = vld [vmem:[#allocation4 + $0x84] sm:$0xe] }
 0x26f   : > { %v3950_v43 = vadd.f32 %v12170_v17, %v3911_v27  ;;  %v7026_v61 = vrot.slane %v7024_v21, 5  ;;  %v7030_v60 = vrot.slane %v7028_v39, 4  ;;  %v3859_v49 = vadd.f32 %v11927_v30, %v9827_v55  ;;  %v6308_v45 = vld [vmem:[#allocation4 + $0x88] sm:$0xf] }
 0x270   : > { %v7036_v1 = vrot.slane %v7034_v15, 5  ;;  %v7021_v0 = vor.u32 %v7020_v5, %v7017_v32  ;;  %v12307_v8 = vrot.slane %v5823_v13, 5  ;;  %v5829_v50 = vrot.slane %v5827_v33, 4  ;;  %v5710_v15 = vpop.permute.xlu1 %5709 }
 0x271   : > { %5545 = vrot.lane.b32.xlu1 %v9475_v46, %s10227_s13  ;;  %v3982_v41 = vmax.f32 %v3950_v43, 0.0  ;;  %v7031_v31 = vor.u32 %v7030_v60, %v7026_v61  ;;  %v5833_v48 = vshll.u32 %v5767_v14, 16  ;;  %v5814_v16 = vshrl.u32 %v5765_v7, 16  ;;  %v12312_v46 = vld [vmem:[#allocation4 + $0x7c] sm:$0xf]  ;;  %v12321_v43 = vpop.permute.xlu0 %7256 }
 0x272   : > { %v7022_v42 = vrot.slane %v7021_v0, 4  ;;  %v3912_v19 = vmul.f32 %v12162_v36, %v3859_v49  ;;  %v5830_v24 = vor.u32 %v5829_v50, %v12307_v8  ;;  %v5817_v59 = vshll.u32 %v5765_v7, 16  ;;  %v6309_v7 = vld [vmem:[#allocation4 + $0x8c] sm:$0x1] }
 0x273   : > { %v7632_v22 = vld [vmem:[#allocation3 + $0xd0] sm:$0xff]  ;;  %v9722_v30 = vpack.c.bf16 %v3982_v41, %v3982_v41  ;;  %v7032_v32 = vrot.slane %v7031_v31, 4  ;;  %v5835_v10 = vrot.slane %v5833_v48, 5  ;;  %v5816_v57 = vrot.slane %v5814_v16, 4  ;;  %v4560_v16 = vld [vmem:[#allocation4 + $0xa8] sm:$0xf] }
 0x274   : > { %10044 = vmatprep.mubr.msk.bf16.mxu0 %vm408_vm6, %v7632_v22  ;;  %v7027_v14 = vsel %vm10348_vm5, %v7022_v42, %v7026_v61  ;;  %v3951_v27 = vadd.f32 %v12170_v17, %v3912_v19  ;;  %v5831_v21 = vrot.slane %v5830_v24, 4  ;;  %v5819_v39 = vrot.slane %v5817_v59, 5  ;;  %v10201_v24 = vld [vmem:[#allocation4 + $0x60] sm:$0xff]  }
 0x275   : > { %v4365_v5 = vshrl.u32 %v9722_v30, 16  ;;  %v4368_v55 = vshll.u32 %v9722_v30, 16  ;;  %v7037_v13 = vsel %vm10348_vm5, %v7032_v32, %v7036_v1  ;;  %5721 = vrot.lane.b32.xlu1 %v10169_v28, %s10228_s14  ;;  %v9523_v33 = vrot.slane %v6307_v51, 9  ;;  %v4757_v32 = vld [vmem:[#allocation4 + $0x80] sm:$0x1]  ;;  %4717 = vst.msk [vmem:[#allocation3 + $0xc0] sm:$0xff] %vm408_vm6, %v10201_v24 }
 0x276   : > { %v9569_v60 = vcombine.low %v7027_v14, %v7037_v13  ;;  %v3983_v0 = vmax.f32 %v3951_v27, 0.0  ;;  %v5836_v61 = vsel %vm10348_vm5, %v5831_v21, %v5835_v10  ;;  %v5820_v49 = vor.u32 %v5819_v39, %v5816_v57  ;;  %v7345_v10 = vld [vmem:[#allocation4 + $0x84] sm:$0xe]  ;;  %v7346_v21 = vld [vmem:[#allocation4 + $0x88] sm:$0xf] }
 0x277   : > { %v4367_v50 = vrot.slane %v4365_v5, 7  ;;  %v6445_v41 = vrot.slane %v6308_v45, 5  ;;  %v6448_v31 = vrot.slane %v6309_v7, 5  ;;  %v5014_v48 = vshrl.u32 %v4755_v11, 16  ;;  %v4564_v7 = vld [vmem:[#allocation4 + $0xb0] sm:$0x1] }
 0x278   : > { %7270 = vrot.lane.b32.xlu0 %v9569_v60, %s10228_s14  ;;  %v9723_v42 = vpack.c.bf16 %v3983_v0, %v3983_v0  ;;  %v5821_v1 = vrot.slane %v5820_v49, 4  ;;  %v5017_v19 = vshll.u32 %v4755_v11, 16  ;;  %v5023_v28 = vshll.u32 %v12312_v46, 16  ;;  %v12337_v60 = vpop.permute.xlu0 %6539  ;;  %v5304_v24 = vld [vmem:[#allocation4 + $0x8c] sm:$0x1] }
 0x279   : > { %v4370_v59 = vor.u32 %v4368_v55, %v4367_v50  ;;  %v4371_v51 = vrot.slane %v4367_v50, 4  ;;  %v6446_v22 = vsel %vm10288_vm2, %v9523_v33, %v6445_v41  ;;  %v6447_v30 = vrot.slane %v6445_v41, 4  ;;  %v7347_v33 = vld [vmem:[#allocation4 + $0x8c] sm:$0x1]  ;;  %v5302_v41 = vld [vmem:[#allocation4 + $0x84] sm:$0xe] }
 0x27a   : > { %v4373_v57 = vshrl.u32 %v9723_v42, 16  ;;  %v4376_v45 = vshll.u32 %v9723_v42, 16  ;;  %v5826_v14 = vsel %vm10348_vm5, %v5821_v1, %v12307_v8  ;;  %v5016_v27 = vrot.slane %v5014_v48, 4  ;;  %v5214_v11 = vpop.permute.xlu1 %5213  ;;  %v5303_v42 = vld [vmem:[#allocation4 + $0x88] sm:$0xf] }
 0x27b   : > { %v4561_v39 = vsel %vm11575_vm15, %v4370_v59, %v4560_v16  ;;  %v9497_v5 = vcombine.low %v5826_v14, %v5836_v61  ;;  %v6449_v55 = vsel %vm10288_vm2, %v6447_v30, %v6448_v31  ;;  %v5019_v13 = vrot.slane %v5017_v19, 5  ;;  %5257 = vst.msk [vmem:[#allocation3 + $0x60] sm:$0xff] %vm956_vm7, %v5214_v11  ;;  %v5769_v14 = vld [vmem:[#allocation4 + $0x1c] sm:$0xf]  ;;  %v5770_v11 = vld [vmem:[#allocation4 + $0x20] sm:$0x1] }
 0x27c   : > { %4562 = vst [vmem:[#allocation4 + $0xa8] sm:$0xf] %v4561_v39  ;;  %v4375_v8 = vrot.slane %v4373_v57, 7  ;;  %v9539_v0 = vcombine.low %v6446_v22, %v6449_v55  ;;  %v5025_v49 = vrot.slane %v5023_v28, 5  ;;  %v5027_v50 = vshrl.u32 %v12312_v46, 16  ;;  %5577 = vst.msk [vmem:[#allocation3 + $0x60] sm:$0xff] %vm1280_vm8, %v12301_v37  ;;  %v12363_v39 = vpop.permute.xlu0 %6716 }
 0x27d   : > { %6261 = vst.msk [vmem:[#allocation3 + $0x8] sm:$0xff] %vm408_vm6, %v9497_v5  ;;  %v5020_v61 = vor.u32 %v5019_v13, %v5016_v27  ;;  %v5033_v31 = vshll.u32 %v4757_v32, 16  ;;  %v9586_v48 = vrot.slane %v7345_v10, 9  ;;  %v7479_v16 = vrot.slane %v7346_v21, 5  ;;  %v10174_v57 = vld [vmem:[#allocation4 + $0x90] sm:$0xff]  }
 0x27e   : > { %5753 = vst.msk [vmem:[#allocation3 + $0x60] sm:$0xff] %vm1458_vm9, %v5710_v15  ;;  %v4378_v1 = vor.u32 %v4376_v45, %v4375_v8  ;;  %v4380_v19 = vrot.slane %v4375_v8, 4  ;;  %6553 = vrot.lane.b32.xlu0 %v9539_v0, %s10229_s15  ;;  %v5029_v46 = vrot.slane %v5027_v50, 4  ;;  %v7482_v28 = vrot.slane %v7347_v33, 5  ;;  %v5768_v15 = vld [vmem:[#allocation4 + $0x18] sm:$0xf] }
 0x27f   : > { %6581 = vst.msk [vmem:[#allocation3 + $0x8] sm:$0xff] %vm956_vm7, %v12183_v23  ;;  %v5021_v37 = vrot.slane %v5020_v61, 4  ;;  %v5035_v59 = vrot.slane %v5033_v31, 5  ;;  %v7480_v22 = vsel %vm10288_vm2, %v9586_v48, %v7479_v16  ;;  %v7481_v30 = vrot.slane %v7479_v16, 4  ;;  %v6801_v13 = vld [vmem:[#allocation4 + $0x84] sm:$0xf]  ;;  %v12368_v61 = vpop.permute.xlu1 %5535 }
 0x280   : > { %6758 = vst.msk [vmem:[#allocation3 + $0x8] sm:$0xff] %vm1280_vm8, %v12199_v34  ;;  %v4379_v32 = vsel %vm11587_vm1, %v4371_v51, %v4378_v1  ;;  %v4565_v23 = vsel %vm11581_vm0, %v4380_v19, %v4564_v7  ;;  %v5030_v10 = vor.u32 %v5029_v46, %v5025_v49  ;;  %v9460_v45 = vrot.slane %v5302_v41, 9  ;;  %v6802_v33 = vld [vmem:[#allocation4 + $0x88] sm:$0xf]  ;;  %v10202_v8 = vld [vmem:[#allocation4 + $0x6c] sm:$0xff]  }
 0x281   : > { %7302 = vst.msk [vmem:[#allocation3 + $0x8] sm:$0xff] %vm1458_vm9, %v12262_v44  ;;  %4566 = vst [vmem:[#allocation4 + $0xb0] sm:$0x1] %v4565_v23  ;;  %v5026_v34 = vsel %vm10348_vm5, %v5021_v37, %v5025_v49  ;;  %v7483_v27 = vsel %vm10288_vm2, %v7481_v30, %v7482_v28  ;;  %v5444_v51 = vrot.slane %v5303_v42, 5  ;;  %v5447_v21 = vrot.slane %v5304_v24, 5 }
 0x282   : > { %4563 = vst.msk [vmem:[#allocation4 + $0xac] sm:$0xf] %vm3988_vm10, %v4379_v32  ;;  %v5031_v7 = vrot.slane %v5030_v10, 4  ;;  %v9602_v5 = vcombine.low %v7480_v22, %v7483_v27  ;;  %6730 = vrot.lane.b32.xlu0 %v10174_v57, %s10227_s13  ;;  %v5838_v55 = vshrl.u32 %v5768_v15, 16  ;;  %v5841_v44 = vshll.u32 %v5768_v15, 16 }
 0x283   : > { %v5445_v0 = vsel %vm10288_vm2, %v9460_v45, %v5444_v51  ;;  %v5446_v49 = vrot.slane %v5444_v51, 4  ;;  %v5847_v50 = vshll.u32 %v5769_v14, 16  ;;  %v5851_v41 = vshrl.u32 %v5769_v14, 16  ;;  %4718 = vst.msk [vmem:[#allocation3 + $0xd8] sm:$0xff] %vm408_vm6, %v10202_v8  ;;  %v6803_v24 = vld [vmem:[#allocation4 + $0x8c] sm:$0x1] }
 0x284   : > { %v5036_v31 = vsel %vm10348_vm5, %v5031_v7, %v5035_v59  ;;  %7599 = vst.msk [vmem:[#allocation3 + $0xe8] sm:$0xff] %vm408_vm6, %v9602_v5  ;;  %v5840_v48 = vrot.slane %v5838_v55, 4  ;;  %v5843_v16 = vrot.slane %v5841_v44, 5  ;;  %v5857_v42 = vshll.u32 %v5770_v11, 16  ;;  %v6310_v15 = vld [vmem:[#allocation4 + $0x90] sm:$0xe]  ;;  %v12382_v44 = vpop.permute.xlu1 %5711 }
 0x285   : > { %v9443_v1 = vcombine.low %v5026_v34, %v5036_v31  ;;  %v5448_v19 = vsel %vm10288_vm2, %v5446_v49, %v5447_v21  ;;  %v5849_v46 = vrot.slane %v5847_v50, 5  ;;  %v5853_v28 = vrot.slane %v5851_v41, 4  ;;  %v6311_v45 = vld [vmem:[#allocation4 + $0x94] sm:$0xf]  ;;  %v12379_v34 = vpop.permute.xlu0 %7258  ;;  %v7606_v7 = vld [vmem:[#allocation3] sm:$0xff] }
 0x286   : > { %v9476_v37 = vcombine.low %v5445_v0, %v5448_v19  ;;  %v5844_v22 = vor.u32 %v5843_v16, %v5840_v48  ;;  %v5859_v30 = vrot.slane %v5857_v42, 5  ;;  %v9830_v59 = vadd.f32 %v12139_v6, %v12133_v3  ;;  %v6312_v50 = vld [vmem:[#allocation4 + $0x98] sm:$0x1]  ;;  %v10214_v42 = vld [vmem:[%s13205_s4 + $0x88] sm:$0xff]  }
 0x287   : > { %5225 = vrot.lane.b32.xlu1 %v9443_v1, %s10229_s15  ;;  %v5854_v32 = vor.u32 %v5853_v28, %v5849_v46  ;;  %v7039_v23 = vshrl.u32 %v6801_v13, 16  ;;  %v7042_v10 = vshll.u32 %v6801_v13, 16  ;;  %v7048_v57 = vshll.u32 %v6802_v33, 16  ;;  %v10203_v28 = vld [vmem:[#allocation4 + $0x78] sm:$0xff]  }
 0x288   : > { %v7607_v14 = vld [vmem:[#allocation3 + $0x8] sm:$0xff]  ;;  %v5845_v27 = vrot.slane %v5844_v22, 4  ;;  %v3864_v51 = vadd.f32 %v9830_v59, %v12015_v47  ;;  %v7052_v21 = vshrl.u32 %v6802_v33, 16  ;;  %v7058_v11 = vshll.u32 %v6803_v24, 16  ;;  %v4758_v47 = vld [vmem:[#allocation4 + $0x84] sm:$0xf] }
 0x289   : > { %7878 = vmatprep.mubr.bf16.mxu1 %v7607_v14  ;;  %v5855_v5 = vrot.slane %v5854_v32, 4  ;;  %v7041_v3 = vrot.slane %v7039_v23, 4  ;;  %v7044_v6 = vrot.slane %v7042_v10, 5  ;;  %v7050_v55 = vrot.slane %v7048_v57, 5  ;;  %v12399_v59 = vpop.permute.xlu0 %6541  ;;  %4719 = vst.msk [vmem:[#allocation3 + $0xf0] sm:$0xff] %vm408_vm6, %v10203_v28 }
 0x28a   : > { %7879 = vmatmul.mubr.bf16.vlgmr.msra.gmra.mrb[32].mxu1 %v7606_v7  ;;  %v5850_v13 = vsel %vm10348_vm5, %v5845_v27, %v5849_v46  ;;  %v3913_v8 = vmul.f32 %v12162_v36, %v3864_v51  ;;  %v7054_v0 = vrot.slane %v7052_v21, 4  ;;  %v7060_v49 = vrot.slane %v7058_v11, 5  ;;  %v4760_v11 = vld [vmem:[#allocation4 + $0x8c] sm:$0x1] }
 0x28b   : > { %10062 = vmatpush3.bf16.msra.mxu1 %v12123_v26  ;;  %v7635_v33 = vld [vmem:[#allocation3 + $0xe8] sm:$0xff]  ;;  %5547 = vrot.lane.b32.xlu1 %v9476_v37, %s10227_s13  ;;  %v5860_v41 = vsel %vm10348_vm5, %v5855_v5, %v5859_v30  ;;  %v7045_v31 = vor.u32 %v7044_v6, %v7041_v3  ;;  %v9833_v48 = vadd.f32 %v12149_v20, %v12144_v54  ;;  %v9524_v16 = vrot.slane %v6310_v15, 9  ;;  %v10178_v37 = vld [vmem:[#allocation4 + $0x90] sm:$0xff]  }
 0x28c   : > { %10061 = vmatprep.subr.bf16.mxu1 %v10214_v42  ;;  %10045 = vmatmul.mubr.msk.bf16.gmra.mrb[80].mxu0 %vm408_vm6, %v7635_v33  ;;  %v9498_v1 = vcombine.low %v5850_v13, %v5860_v41  ;;  %v3952_v26 = vadd.f32 %v12170_v17, %v3913_v8  ;;  %v7055_v19 = vor.u32 %v7054_v0, %v7050_v55  ;;  %v6452_v46 = vrot.slane %v6311_v45, 5  ;;  %v4759_v54 = vld [vmem:[#allocation4 + $0x88] sm:$0xf]  ;;  %v7348_v5 = vld [vmem:[#allocation4 + $0x90] sm:$0xe] }
 0x28d   : > { %v7046_v24 = vrot.slane %v7045_v31, 4  ;;  %v3867_v22 = vadd.f32 %v9833_v48, %v12053_v35  ;;  %v6455_v30 = vrot.slane %v6312_v50, 5  ;;  %v5038_v20 = vshrl.u32 %v4758_v47, 16  ;;  %v7349_v13 = vld [vmem:[#allocation4 + $0x94] sm:$0xf] }
 0x28e   : > { %6262 = vst.msk [vmem:[#allocation3 + $0x20] sm:$0xff] %vm408_vm6, %v9498_v1  ;;  %v3984_v15 = vmax.f32 %v3952_v26, 0.0  ;;  %v7056_v32 = vrot.slane %v7055_v19, 4  ;;  %v6453_v23 = vsel %vm10288_vm2, %v9524_v16, %v6452_v46  ;;  %v6454_v10 = vrot.slane %v6452_v46, 4  ;;  %v7350_v8 = vld [vmem:[#allocation4 + $0x98] sm:$0x1]  ;;  %v12426_v16 = vpop.permute.xlu0 %6718 }
 0x28f   : > { %10063 = vmatpush3.bf16.msra.mxu1 %v10214_v42  ;;  %6582 = vst.msk [vmem:[#allocation3 + $0x20] sm:$0xff] %vm956_vm7, %v12224_v38  ;;  %v7051_v35 = vsel %vm10348_vm5, %v7046_v24, %v7050_v55  ;;  %5723 = vrot.lane.b32.xlu1 %v10178_v37, %s10228_s14  ;;  %v3914_v57 = vmul.f32 %v12162_v36, %v3867_v22  ;;  %v5040_v45 = vrot.slane %v5038_v20, 4  ;;  %v5041_v14 = vshll.u32 %v4758_v47, 16  ;;  %v5216_v27 = vpop.permute.xlu1 %5215  ;;  %v5305_v47 = vld [vmem:[#allocation4 + $0x90] sm:$0xe] }
 0x290   : > { %v9724_v51 = vpack.c.bf16 %v3984_v15, %v3984_v15  ;;  %v7061_v21 = vsel %vm10348_vm5, %v7056_v32, %v7060_v49  ;;  %6759 = vst.msk [vmem:[#allocation3 + $0x20] sm:$0xff] %vm1280_vm8, %v12248_v53  ;;  %v6456_v38 = vsel %vm10288_vm2, %v6454_v10, %v6455_v30  ;;  %v5047_v7 = vshll.u32 %v4759_v54, 16  ;;  %v4567_v33 = vld [vmem:[#allocation4 + $0xb4] sm:$0xf]  ;;  %v5307_v37 = vld [vmem:[#allocation4 + $0x98] sm:$0x1] }
 0x291   : > { %5258 = vst.msk [vmem:[#allocation3 + $0x78] sm:$0xff] %vm956_vm7, %v5216_v27  ;;  %v9570_v3 = vcombine.low %v7051_v35, %v7061_v21  ;;  %v3953_v36 = vadd.f32 %v12170_v17, %v3914_v57  ;;  %v9540_v6 = vcombine.low %v6453_v23, %v6456_v38  ;;  %v5043_v55 = vrot.slane %v5041_v14, 5  ;;  %v5306_v19 = vld [vmem:[#allocation4 + $0x94] sm:$0xf]  ;;  %v5771_v15 = vld [vmem:[#allocation4 + $0x24] sm:$0xf] }
 0x292   : > { %7303 = vst.msk [vmem:[#allocation3 + $0x20] sm:$0xff] %vm1458_vm9, %v12321_v43  ;;  %v4382_v53 = vshrl.u32 %v9724_v51, 16  ;;  %v4385_v0 = vshll.u32 %v9724_v51, 16  ;;  %v5049_v49 = vrot.slane %v5047_v7, 5  ;;  %v5051_v50 = vshrl.u32 %v4759_v54, 16  ;;  %v10204_v43 = vld [vmem:[#allocation4 + $0x84] sm:$0xff]  }
 0x293   : > { %5578 = vst.msk [vmem:[#allocation3 + $0x78] sm:$0xff] %vm1280_vm8, %v12368_v61  ;;  %7272 = vrot.lane.b32.xlu0 %v9570_v3, %s10228_s14  ;;  %v3985_v17 = vmax.f32 %v3953_v36, 0.0  ;;  %v5044_v41 = vor.u32 %v5043_v55, %v5040_v45  ;;  %v5057_v31 = vshll.u32 %v4760_v11, 16  ;;  %v9587_v48 = vrot.slane %v7348_v5, 9  ;;  %v5772_v57 = vld [vmem:[#allocation4 + $0x28] sm:$0xf]  ;;  %v12434_v14 = vpop.permute.xlu1 %5537 }
 0x294   : > { %5754 = vst.msk [vmem:[#allocation3 + $0x78] sm:$0xff] %vm1458_vm9, %v12382_v44  ;;  %v4384_v42 = vrot.slane %v4382_v53, 7  ;;  %v5053_v61 = vrot.slane %v5051_v50, 4  ;;  %v7486_v1 = vrot.slane %v7349_v13, 5  ;;  %v7489_v26 = vrot.slane %v7350_v8, 5  ;;  %v7609_v45 = vld [vmem:[#allocation3 + $0x18] sm:$0xff]  ;;  %v12440_v8 = vpop.permute.xlu0 %7260 }
 0x295   : > { %v9725_v46 = vpack.c.bf16 %v3985_v17, %v3985_v17  ;;  %v5045_v28 = vrot.slane %v5044_v41, 4  ;;  %v5059_v24 = vrot.slane %v5057_v31, 5  ;;  %v9461_v44 = vrot.slane %v5305_v47, 9  ;;  %4720 = vst.msk [vmem:[#allocation3 + $0x108] sm:$0xff] %vm408_vm6, %v10204_v43  ;;  %v4571_v51 = vld [vmem:[#allocation4 + $0xbc] sm:$0x1] }
 0x296   : > { %v4387_v22 = vor.u32 %v4385_v0, %v4384_v42  ;;  %v4388_v30 = vrot.slane %v4384_v42, 4  ;;  %v5054_v54 = vor.u32 %v5053_v61, %v5049_v49  ;;  %v7487_v20 = vsel %vm10288_vm2, %v9587_v48, %v7486_v1  ;;  %v5773_v7 = vld [vmem:[#allocation4 + $0x2c] sm:$0x1]  ;;  %v6804_v47 = vld [vmem:[#allocation4 + $0x90] sm:$0xf] }
 0x297   : > { %v4390_v32 = vshrl.u32 %v9725_v46, 16  ;;  %v4393_v23 = vshll.u32 %v9725_v46, 16  ;;  %6555 = vrot.lane.b32.xlu0 %v9540_v6, %s10229_s15  ;;  %v5050_v10 = vsel %vm10348_vm5, %v5045_v28, %v5049_v49  ;;  %v7488_v35 = vrot.slane %v7486_v1, 4  ;;  %v10183_v6 = vld [vmem:[#allocation4 + $0x9c] sm:$0xff]   ;;  %v6317_v4 = vld [vmem:[#allocation4 + $0xac] sm:$0xf] }
 0x298   : > { %v4568_v27 = vsel %vm11575_vm15, %v4387_v22, %v4567_v33  ;;  %v5055_v21 = vrot.slane %v5054_v54, 4  ;;  %v5451_v38 = vrot.slane %v5306_v19, 5  ;;  %v5454_v11 = vrot.slane %v5307_v37, 5  ;;  %v6805_v33 = vld [vmem:[#allocation4 + $0x94] sm:$0xf] }
 0x299   : > { %v7610_v5 = vld [vmem:[#allocation3 + $0x20] sm:$0xff]  ;;  %4569 = vst [vmem:[#allocation4 + $0xb4] sm:$0xf] %v4568_v27  ;;  %v4392_v3 = vrot.slane %v4390_v32, 7  ;;  %v7490_v36 = vsel %vm10288_vm2, %v7488_v35, %v7489_v26  ;;  %v5862_v55 = vshrl.u32 %v5771_v15, 16  ;;  %v5865_v13 = vshll.u32 %v5771_v15, 16  ;;  %v12458_v35 = vpop.permute.xlu0 %6543 }
 0x29a   : > { %7886 = vmatprep.mubr.bf16.mxu1 %v7610_v5  ;;  %v5060_v53 = vsel %vm10348_vm5, %v5055_v21, %v5059_v24  ;;  %v9603_v0 = vcombine.low %v7487_v20, %v7490_v36  ;;  %v5452_v49 = vsel %vm10288_vm2, %v9461_v44, %v5451_v38  ;;  %v5453_v50 = vrot.slane %v5451_v38, 4  ;;  %v5714_v24 = vpop.permute.xlu1 %5713  ;;  %v6806_v20 = vld [vmem:[#allocation4 + $0x98] sm:$0x1] }
 0x29b   : > { %7887 = vmatmul.mubr.bf16.gmra.mrb[36].mxu1 %v7609_v45  ;;  %v4395_v17 = vor.u32 %v4393_v23, %v4392_v3  ;;  %v4397_v41 = vrot.slane %v4392_v3, 4  ;;  %v9444_v31 = vcombine.low %v5050_v10, %v5060_v53  ;;  %6732 = vrot.lane.b32.xlu0 %v10183_v6, %s10227_s13  ;;  %v5864_v48 = vrot.slane %v5862_v55, 4  ;;  %v6313_v10 = vld [vmem:[#allocation4 + $0x9c] sm:$0xe]  ;;  %v10215_v3 = vld [vmem:[%s13203_s2] ss:$0 sm:$0xff] }
 0x29c   : > { %7600 = vst.msk [vmem:[#allocation3 + $0x100] sm:$0xff] %vm408_vm6, %v9603_v0  ;;  %v5455_v43 = vsel %vm10288_vm2, %v5453_v50, %v5454_v11  ;;  %v5867_v42 = vrot.slane %v5865_v13, 5  ;;  %v5871_v61 = vshll.u32 %v5772_v57, 16  ;;  %v5875_v1 = vshrl.u32 %v5772_v57, 16  ;;  %v6315_v55 = vld [vmem:[#allocation4 + $0xa4] sm:$0x1] }
 0x29d   : > { %v4396_v26 = vsel %vm11587_vm1, %v4388_v30, %v4395_v17  ;;  %v4572_v19 = vsel %vm11581_vm0, %v4397_v41, %v4571_v51  ;;  %5227 = vrot.lane.b32.xlu1 %v9444_v31, %s10229_s15  ;;  %v9477_v46 = vcombine.low %v5452_v49, %v5455_v43  ;;  %v5881_v28 = vshll.u32 %v5773_v7, 16  ;;  %v10187_v0 = vld [vmem:[#allocation4 + $0x9c] sm:$0xff]  }
 0x29e   : > { %4570 = vst.msk [vmem:[#allocation4 + $0xb8] sm:$0xf] %vm3988_vm10, %v4396_v26  ;;  %4573 = vst [vmem:[#allocation4 + $0xbc] sm:$0x1] %v4572_v19  ;;  %v5868_v37 = vor.u32 %v5867_v42, %v5864_v48  ;;  %v5873_v44 = vrot.slane %v5871_v61, 5  ;;  %v5877_v22 = vrot.slane %v5875_v1, 4  ;;  %v9836_v54 = vadd.f32 %v12215_v18, %v12209_v12  ;;  %v12478_v19 = vpop.permute.xlu0 %6720 }
 0x29f   : > { %v5883_v15 = vrot.slane %v5881_v28, 5  ;;  %v7063_v30 = vshrl.u32 %v6804_v47, 16  ;;  %v7066_v32 = vshll.u32 %v6804_v47, 16  ;;  %v7072_v23 = vshll.u32 %v6805_v33, 16  ;;  %v6314_v12 = vld [vmem:[#allocation4 + $0xa0] sm:$0xf] }
 0x2a0   : > { %v5869_v57 = vrot.slane %v5868_v37, 4  ;;  %v5878_v45 = vor.u32 %v5877_v22, %v5873_v44  ;;  %v3872_v27 = vadd.f32 %v12004_v25, %v9836_v54  ;;  %v7076_v51 = vshrl.u32 %v6805_v33, 16  ;;  %v10205_v33 = vld [vmem:[#allocation4 + $0x90] sm:$0xff]   ;;  %v10216_v41 = vld [vmem:[%s13204_s3] ss:$0 sm:$0xff] }
 0x2a1   : > { %5549 = vrot.lane.b32.xlu1 %v9477_v46, %s10227_s13  ;;  %v7065_v21 = vrot.slane %v7063_v30, 4  ;;  %v7068_v38 = vrot.slane %v7066_v32, 5  ;;  %v7074_v11 = vrot.slane %v7072_v23, 5  ;;  %v7082_v7 = vshll.u32 %v6806_v20, 16  ;;  %v4761_v42 = vld [vmem:[#allocation4 + $0x90] sm:$0xf] }
 0x2a2   : > { %v5874_v18 = vsel %vm10348_vm5, %v5869_v57, %v5873_v44  ;;  %v5879_v5 = vrot.slane %v5878_v45, 4  ;;  %v3915_v36 = vmul.f32 %v10215_v3, %v3872_v27  ;;  %v7078_v6 = vrot.slane %v7076_v51, 4  ;;  %v4762_v26 = vld [vmem:[#allocation4 + $0x94] sm:$0xf]  ;;  %4721 = vst.msk [vmem:[#allocation3 + $0x120] sm:$0xff] %vm408_vm6, %v10205_v33 }
 0x2a3   : > { %v7638_v25 = vld [vmem:[#allocation3 + $0x100] sm:$0xff]  ;;  %v7069_v13 = vor.u32 %v7068_v38, %v7065_v21  ;;  %v7084_v53 = vrot.slane %v7082_v7, 5  ;;  %v9839_v49 = vadd.f32 %v12226_v40, %v12219_v52  ;;  %v9525_v50 = vrot.slane %v6313_v10, 9  ;;  %v5218_v47 = vpop.permute.xlu1 %5217  ;;  %v4763_v32 = vld [vmem:[#allocation4 + $0x98] sm:$0x1] }
 0x2a4   : > { %10048 = vmatprep.mubr.msk.bf16.mxu0 %vm408_vm6, %v7638_v25  ;;  %v5884_v17 = vsel %vm10348_vm5, %v5879_v5, %v5883_v15  ;;  %v3954_v31 = vadd.f32 %v10216_v41, %v3915_v36  ;;  %v7079_v48 = vor.u32 %v7078_v6, %v7074_v11  ;;  %v6459_v43 = vrot.slane %v6314_v12, 5  ;;  %5259 = vst.msk [vmem:[#allocation3 + $0x90] sm:$0xff] %vm956_vm7, %v5218_v47  ;;  %v7351_v23 = vld [vmem:[#allocation4 + $0x9c] sm:$0xe]  ;;  %v7352_v51 = vld [vmem:[#allocation4 + $0xa0] sm:$0xf]  ;;  %v12502_v6 = vpop.permute.xlu0 %7262 }
 0x2a5   : > { %v9499_v61 = vcombine.low %v5874_v18, %v5884_v17  ;;  %v7070_v52 = vrot.slane %v7069_v13, 4  ;;  %5725 = vrot.lane.b32.xlu1 %v10187_v0, %s10228_s14  ;;  %v3875_v40 = vadd.f32 %v12041_v29, %v9839_v49  ;;  %v6462_v1 = vrot.slane %v6315_v55, 5  ;;  %5579 = vst.msk [vmem:[#allocation3 + $0x90] sm:$0xff] %vm1280_vm8, %v12434_v14  ;;  %v7353_v21 = vld [vmem:[#allocation4 + $0xa4] sm:$0x1] }
 0x2a6   : > { %v3986_v46 = vmax.f32 %v3954_v31, 0.0  ;;  %v7080_v28 = vrot.slane %v7079_v48, 4  ;;  %v6460_v37 = vsel %vm10288_vm2, %v9525_v50, %v6459_v43  ;;  %v6461_v44 = vrot.slane %v6459_v43, 4  ;;  %5755 = vst.msk [vmem:[#allocation3 + $0x90] sm:$0xff] %vm1458_vm9, %v5714_v24  ;;  %v5308_v12 = vld [vmem:[#allocation4 + $0x9c] sm:$0xe] }
 0x2a7   : > { %6263 = vst.msk [vmem:[#allocation3 + $0x38] sm:$0xff] %vm408_vm6, %v9499_v61  ;;  %v7075_v29 = vsel %vm10348_vm5, %v7070_v52, %v7074_v11  ;;  %v3916_v22 = vmul.f32 %v10215_v3, %v3875_v40  ;;  %v5062_v54 = vshrl.u32 %v4761_v42, 16  ;;  %v5065_v20 = vshll.u32 %v4761_v42, 16  ;;  %v4574_v18 = vld [vmem:[#allocation4 + $0xc0] sm:$0xf]  ;;  %v12504_v55 = vpop.permute.xlu1 %5539 }
 0x2a8   : > { %6583 = vst.msk [vmem:[#allocation3 + $0x38] sm:$0xff] %vm956_vm7, %v12282_v62  ;;  %v9726_v14 = vpack.c.bf16 %v3986_v46, %v3986_v46  ;;  %v7085_v15 = vsel %vm10348_vm5, %v7080_v28, %v7084_v53  ;;  %v6463_v30 = vsel %vm10288_vm2, %v6461_v44, %v6462_v1  ;;  %v5071_v24 = vshll.u32 %v4762_v26, 16  ;;  %v5309_v49 = vld [vmem:[#allocation4 + $0xa0] sm:$0xf]  ;;  %v5774_v42 = vld [vmem:[#allocation4 + $0x30] sm:$0xf]  ;;  %v12517_v63 = vpop.permute.xlu0 %6545 }
 0x2a9   : > { %v9571_v10 = vcombine.low %v7075_v29, %v7085_v15  ;;  %v3955_v57 = vadd.f32 %v10216_v41, %v3916_v22  ;;  %6760 = vst.msk [vmem:[#allocation3 + $0x38] sm:$0xff] %vm1280_vm8, %v12304_v56  ;;  %v9541_v45 = vcombine.low %v6460_v37, %v6463_v30  ;;  %v5064_v27 = vrot.slane %v5062_v54, 4  ;;  %v4578_v46 = vld [vmem:[#allocation4 + $0xc8] sm:$0x1]  ;;  %v5775_v29 = vld [vmem:[#allocation4 + $0x34] sm:$0xf] }
 0x2aa   : > { %v4399_v62 = vshrl.u32 %v9726_v14, 16  ;;  %v4402_v38 = vshll.u32 %v9726_v14, 16  ;;  %v5067_v11 = vrot.slane %v5065_v20, 5  ;;  %v12497_v7 = vrot.slane %v5071_v24, 5  ;;  %7304 = vst.msk [vmem:[#allocation3 + $0x38] sm:$0xff] %vm1458_vm9, %v12379_v34  ;;  %v10189_v14 = vld [vmem:[#allocation4 + $0xa8] sm:$0xff]  }
 0x2ab   : > { %7274 = vrot.lane.b32.xlu0 %v9571_v10, %s10228_s14  ;;  %v3987_v5 = vmax.f32 %v3955_v57, 0.0  ;;  %v5075_v3 = vshrl.u32 %v4762_v26, 16  ;;  %v5081_v36 = vshll.u32 %v4763_v32, 16  ;;  %v9588_v56 = vrot.slane %v7351_v23, 9  ;;  %v5310_v34 = vld [vmem:[#allocation4 + $0xa4] sm:$0x1]  ;;  %v12519_v24 = vpop.permute.xlu1 %5715 }
 0x2ac   : > { %v4401_v25 = vrot.slane %v4399_v62, 7  ;;  %v5068_v13 = vor.u32 %v5067_v11, %v5064_v27  ;;  %v7493_v53 = vrot.slane %v7352_v51, 5  ;;  %v7496_v0 = vrot.slane %v7353_v21, 5  ;;  %v5776_v15 = vld [vmem:[#allocation4 + $0x38] sm:$0x1]  ;;  %v7612_v27 = vld [vmem:[#allocation3 + $0x30] sm:$0xff] }
 0x2ad   : > { %v9727_v50 = vpack.c.bf16 %v3987_v5, %v3987_v5  ;;  %v5077_v47 = vrot.slane %v5075_v3, 4  ;;  %v5083_v33 = vrot.slane %v5081_v36, 5  ;;  %v9462_v17 = vrot.slane %v5308_v12, 9  ;;  %v10206_v21 = vld [vmem:[#allocation4 + $0x9c] sm:$0xff]  }
 0x2ae   : > { %v4404_v41 = vor.u32 %v4402_v38, %v4401_v25  ;;  %v4405_v31 = vrot.slane %v4401_v25, 4  ;;  %v5069_v48 = vrot.slane %v5068_v13, 4  ;;  %v7494_v43 = vsel %vm10288_vm2, %v9588_v56, %v7493_v53  ;;  %v6807_v12 = vld [vmem:[#allocation4 + $0x9c] sm:$0xf]  ;;  %v6808_v25 = vld [vmem:[#allocation4 + $0xa0] sm:$0xf] }
 0x2af   : > { %v4407_v61 = vshrl.u32 %v9727_v50, 16  ;;  %v4410_v52 = vshll.u32 %v9727_v50, 16  ;;  %6557 = vrot.lane.b32.xlu0 %v9541_v45, %s10229_s15  ;;  %v5078_v40 = vor.u32 %v5077_v47, %v12497_v7  ;;  %v7495_v1 = vrot.slane %v7493_v53, 4  ;;  %v12523_v51 = vpop.f32.mrb[64].mxu0  ;;  %4722 = vst.msk [vmem:[#allocation3 + $0x138] sm:$0xff] %vm408_vm6, %v10206_v21 }
 0x2b0   : > { %v4575_v26 = vsel %vm11575_vm15, %v4404_v41, %v4574_v18  ;;  %v5074_v28 = vsel %vm10348_vm5, %v5069_v48, %v12497_v7  ;;  %v5458_v37 = vrot.slane %v5309_v49, 5  ;;  %v5461_v44 = vrot.slane %v5310_v34, 5  ;;  %v12528_v18 = vpop.f32.mrb[65].mxu0  ;;  %v6809_v47 = vld [vmem:[#allocation4 + $0xa4] sm:$0x1] }
 0x2b1   : > { %4576 = vst [vmem:[#allocation4 + $0xc0] sm:$0xf] %v4575_v26  ;;  %v4409_v22 = vrot.slane %v4407_v61, 7  ;;  %v5079_v54 = vrot.slane %v5078_v40, 4  ;;  %v7497_v20 = vsel %vm10288_vm2, %v7495_v1, %v7496_v0  ;;  %v5886_v30 = vshrl.u32 %v5774_v42, 16  ;;  %v7613_v32 = vld [vmem:[#allocation3 + $0x38] sm:$0xff]  ;;  %v12544_v1 = vpop.permute.xlu0 %6722 }
 0x2b2   : > { %v9604_v23 = vcombine.low %v7494_v43, %v7497_v20  ;;  %v5459_v10 = vsel %vm10288_vm2, %v9462_v17, %v5458_v37  ;;  %v5460_v57 = vrot.slane %v5458_v37, 4  ;;  %v5889_v45 = vshll.u32 %v5774_v42, 16  ;;  %7894 = vmatprep.mubr.bf16.mxu1 %v7613_v32  ;;  %v12533_v13 = vpop.f32.mrb[66].mxu0  ;;  %v4764_v40 = vld [vmem:[#allocation4 + $0x9c] sm:$0xf] }
 0x2b3   : > { %v4412_v62 = vor.u32 %v4410_v52, %v4409_v22  ;;  %v4414_v38 = vrot.slane %v4409_v22, 4  ;;  %v5084_v11 = vsel %vm10348_vm5, %v5079_v54, %v5083_v33  ;;  %6734 = vrot.lane.b32.xlu0 %v10189_v14, %s10227_s13  ;;  %v5888_v7 = vrot.slane %v5886_v30, 4  ;;  %7895 = vmatmul.mubr.bf16.gmra.mrb[40].mxu1 %v7612_v27  ;;  %v6316_v33 = vld [vmem:[#allocation4 + $0xa8] sm:$0xe]  ;;  %v12540_v34 = vpop.f32.mrb[67].mxu0 }
 0x2b4   : > { %v9445_v5 = vcombine.low %v5074_v28, %v5084_v11  ;;  %7601 = vst.msk [vmem:[#allocation3 + $0x118] sm:$0xff] %vm408_vm6, %v9604_v23  ;;  %v5462_v3 = vsel %vm10288_vm2, %v5460_v57, %v5461_v44  ;;  %v5891_v36 = vrot.slane %v5889_v45, 5  ;;  %v5895_v56 = vshll.u32 %v5775_v29, 16  ;;  %v6318_v52 = vld [vmem:[#allocation4 + $0xb0] sm:$0x1] }
 0x2b5   : > { %v4413_v53 = vsel %vm11587_vm1, %v4405_v31, %v4412_v62  ;;  %v4579_v0 = vsel %vm11581_vm0, %v4414_v38, %v4578_v46  ;;  %v9478_v49 = vcombine.low %v5459_v10, %v5462_v3  ;;  %v5899_v50 = vshrl.u32 %v5775_v29, 16  ;;  %v4765_v14 = vld [vmem:[#allocation4 + $0xa0] sm:$0xf]  ;;  %v4766_v62 = vld [vmem:[#allocation4 + $0xa4] sm:$0x1] }
 0x2b6   : > { %4577 = vst.msk [vmem:[#allocation4 + $0xc4] sm:$0xf] %vm3988_vm10, %v4413_v53  ;;  %4580 = vst [vmem:[#allocation4 + $0xc8] sm:$0x1] %v4579_v0  ;;  %5229 = vrot.lane.b32.xlu1 %v9445_v5, %s10229_s15  ;;  %v5892_v17 = vor.u32 %v5891_v36, %v5888_v7  ;;  %v5897_v41 = vrot.slane %v5895_v56, 5  ;;  %v5905_v48 = vshll.u32 %v5776_v15, 16  ;;  %v12559_v53 = vpop.permute.xlu0 %7264 }
 0x2b7   : > { %v7087_v43 = vshrl.u32 %v6807_v12, 16  ;;  %v5901_v31 = vrot.slane %v5899_v50, 4  ;;  %v7090_v42 = vshll.u32 %v6807_v12, 16  ;;  %v7096_v58 = vshll.u32 %v6808_v25, 16  ;;  %v5220_v26 = vpop.permute.xlu1 %5219  ;;  %v7354_v5 = vld [vmem:[#allocation4 + $0xa8] sm:$0xe] }
 0x2b8   : > { %v7100_v61 = vshrl.u32 %v6808_v25, 16  ;;  %v5893_v46 = vrot.slane %v5892_v17, 4  ;;  %v5907_v28 = vrot.slane %v5905_v48, 5  ;;  %v7106_v44 = vshll.u32 %v6809_v47, 16  ;;  %5260 = vst.msk [vmem:[#allocation3 + $0xa8] sm:$0xff] %vm956_vm7, %v5220_v26 }
 0x2b9   : > { %v7089_v37 = vrot.slane %v7087_v43, 4  ;;  %v5902_v29 = vor.u32 %v5901_v31, %v5897_v41  ;;  %v7092_v22 = vrot.slane %v7090_v42, 5  ;;  %v7098_v54 = vrot.slane %v7096_v58, 5  ;;  %5580 = vst.msk [vmem:[#allocation3 + $0xa8] sm:$0xff] %vm1280_vm8, %v12504_v55  ;;  %v10191_v55 = vld [vmem:[#allocation4 + $0xa8] sm:$0xff]  }
 0x2ba   : > { %v7102_v20 = vrot.slane %v7100_v61, 4  ;;  %5551 = vrot.lane.b32.xlu1 %v9478_v49, %s10227_s13  ;;  %v5898_v15 = vsel %vm10348_vm5, %v5893_v46, %v5897_v41  ;;  %v7108_v30 = vrot.slane %v7106_v44, 5  ;;  %v9526_v32 = vrot.slane %v6316_v33, 9  ;;  %5756 = vst.msk [vmem:[#allocation3 + $0xa8] sm:$0xff] %vm1458_vm9, %v12519_v24  ;;  %v5311_v3 = vld [vmem:[#allocation4 + $0xa8] sm:$0xe] }
 0x2bb   : > { %v6466_v23 = vrot.slane %v6317_v4, 5  ;;  %v7641_v10 = vld [vmem:[#allocation3 + $0x118] sm:$0xff]  ;;  %v5903_v57 = vrot.slane %v5902_v29, 4  ;;  %v7093_v45 = vor.u32 %v7092_v22, %v7089_v37  ;;  %v6469_v21 = vrot.slane %v6318_v52, 5  ;;  %v7355_v33 = vld [vmem:[#allocation4 + $0xac] sm:$0xf]  ;;  %v12568_v58 = vpop.permute.xlu1 %5541 }
 0x2bc   : > { %v7103_v27 = vor.u32 %v7102_v20, %v7098_v54  ;;  %10049 = vmatmul.mubr.msk.bf16.gmra.mrb[84].mxu0 %vm408_vm6, %v7641_v10  ;;  %v5086_v7 = vshrl.u32 %v4764_v40, 16  ;;  %v5089_v12 = vshll.u32 %v4764_v40, 16  ;;  %v5095_v25 = vshll.u32 %v4765_v14, 16  ;;  %v7356_v17 = vld [vmem:[#allocation4 + $0xb0] sm:$0x1] }
 0x2bd   : > { %v6467_v38 = vsel %vm10288_vm2, %v9526_v32, %v6466_v23  ;;  %v6468_v11 = vrot.slane %v6466_v23, 4  ;;  %v5908_v24 = vsel %vm10348_vm5, %v5903_v57, %v5907_v28  ;;  %v7094_v36 = vrot.slane %v7093_v45, 4  ;;  %v5777_v41 = vld [vmem:[#allocation4 + $0x3c] sm:$0xf]  ;;  %v5312_v42 = vld [vmem:[#allocation4 + $0xac] sm:$0xf]  ;;  %v12581_v57 = vpop.permute.xlu0 %6547 }
 0x2be   : > { %v7104_v56 = vrot.slane %v7103_v27, 4  ;;  %v9500_v0 = vcombine.low %v5898_v15, %v5908_v24  ;;  %5727 = vrot.lane.b32.xlu1 %v10191_v55, %s10228_s14  ;;  %v5088_v50 = vrot.slane %v5086_v7, 4  ;;  %v5091_v47 = vrot.slane %v5089_v12, 5  ;;  %v5313_v46 = vld [vmem:[#allocation4 + $0xb0] sm:$0x1]  ;;  %v10207_v28 = vld [vmem:[#allocation4 + $0xa8] sm:$0xff]  }
 0x2bf   : > { %v6470_v49 = vsel %vm10288_vm2, %v6468_v11, %v6469_v21  ;;  %v7099_v48 = vsel %vm10348_vm5, %v7094_v36, %v7098_v54  ;;  %v5097_v31 = vrot.slane %v5095_v25, 5  ;;  %v5099_v40 = vshrl.u32 %v4765_v14, 16  ;;  %v5778_v14 = vld [vmem:[#allocation4 + $0x40] sm:$0xf]  ;;  %4723 = vst.msk [vmem:[#allocation3 + $0x150] sm:$0xff] %vm408_vm6, %v10207_v28 }
 0x2c0   : > { %v7109_v43 = vsel %vm10348_vm5, %v7104_v56, %v7108_v30  ;;  %v9542_v4 = vcombine.low %v6467_v38, %v6470_v49  ;;  %6264 = vst.msk [vmem:[#allocation3 + $0x50] sm:$0xff] %vm408_vm6, %v9500_v0  ;;  %v5092_v52 = vor.u32 %v5091_v47, %v5088_v50  ;;  %v5105_v26 = vshll.u32 %v4766_v62, 16  ;;  %v5779_v62 = vld [vmem:[#allocation4 + $0x44] sm:$0x1]  ;;  %v6810_v12 = vld [vmem:[#allocation4 + $0xa8] sm:$0xf] }
 0x2c1   : > { %v9572_v61 = vcombine.low %v7099_v48, %v7109_v43  ;;  %6584 = vst.msk [vmem:[#allocation3 + $0x50] sm:$0xff] %vm956_vm7, %v12337_v60  ;;  %v9589_v37 = vrot.slane %v7354_v5, 9  ;;  %v7500_v44 = vrot.slane %v7355_v33, 5  ;;  %v7503_v29 = vrot.slane %v7356_v17, 5  ;;  %v6811_v56 = vld [vmem:[#allocation4 + $0xac] sm:$0xf]  ;;  %v12598_v28 = vpop.permute.xlu0 %6724 }
 0x2c2   : > { %v9463_v22 = vrot.slane %v5311_v3, 9  ;;  %6761 = vst.msk [vmem:[#allocation3 + $0x50] sm:$0xff] %vm1280_vm8, %v12363_v39  ;;  %v5093_v54 = vrot.slane %v5092_v52, 4  ;;  %v5101_v20 = vrot.slane %v5099_v40, 4  ;;  %v5107_v15 = vrot.slane %v5105_v26, 5  ;;  %v10192_v17 = vld [vmem:[#allocation4 + $0xb4] sm:$0xff]  }
 0x2c3   : > { %7276 = vrot.lane.b32.xlu0 %v9572_v61, %s10228_s14  ;;  %v5465_v30 = vrot.slane %v5312_v42, 5  ;;  %v7501_v32 = vsel %vm10288_vm2, %v9589_v37, %v7500_v44  ;;  %v7502_v60 = vrot.slane %v7500_v44, 4  ;;  %v5468_v23 = vrot.slane %v5313_v46, 5  ;;  %7305 = vst.msk [vmem:[#allocation3 + $0x50] sm:$0xff] %vm1458_vm9, %v12440_v8  ;;  %v5718_v8 = vpop.permute.xlu1 %5717  ;;  %v6812_v47 = vld [vmem:[#allocation4 + $0xb0] sm:$0x1] }
 0x2c4   : > { %v5910_v10 = vshrl.u32 %v5777_v41, 16  ;;  %v5098_v39 = vsel %vm10348_vm5, %v5093_v54, %v5097_v31  ;;  %v5102_v45 = vor.u32 %v5101_v20, %v5097_v31  ;;  %v5913_v11 = vshll.u32 %v5777_v41, 16  ;;  %v4767_v31 = vld [vmem:[#allocation4 + $0xa8] sm:$0xf]  ;;  %v6320_v26 = vld [vmem:[#allocation4 + $0xb8] sm:$0xf] }
 0x2c5   : > { %v12587_v27 = vsel %vm10288_vm2, %v9463_v22, %v5465_v30  ;;  %v5467_v21 = vrot.slane %v5465_v30, 4  ;;  %v7504_v55 = vsel %vm10288_vm2, %v7502_v60, %v7503_v29  ;;  %v5919_v7 = vshll.u32 %v5778_v14, 16  ;;  %v6321_v46 = vld [vmem:[#allocation4 + $0xbc] sm:$0x1]  ;;  %v10208_v20 = vld [vmem:[#allocation4 + $0xb4] sm:$0xff]   ;;  %v7615_v60 = vld [vmem:[#allocation3 + $0x48] sm:$0xff] }
 0x2c6   : > { %v5912_v38 = vrot.slane %v5910_v10, 4  ;;  %v5103_v5 = vrot.slane %v5102_v45, 4  ;;  %v9605_v3 = vcombine.low %v7501_v32, %v7504_v55  ;;  %v5923_v36 = vshrl.u32 %v5778_v14, 16  ;;  %4724 = vst.msk [vmem:[#allocation3 + $0x168] sm:$0xff] %vm408_vm6, %v10208_v20 }
 0x2c7   : > { %6559 = vrot.lane.b32.xlu0 %v9542_v4, %s10229_s15  ;;  %v5469_v24 = vsel %vm10288_vm2, %v5467_v21, %v5468_v23  ;;  %v5915_v0 = vrot.slane %v5913_v11, 5  ;;  %v5921_v49 = vrot.slane %v5919_v7, 5  ;;  %v5929_v50 = vshll.u32 %v5779_v62, 16  ;;  %v6319_v4 = vld [vmem:[#allocation4 + $0xb4] sm:$0xe] }
 0x2c8   : > { %v9479_v25 = vcombine.low %v12587_v27, %v5469_v24  ;;  %v5108_v33 = vsel %vm10348_vm5, %v5103_v5, %v5107_v15  ;;  %7602 = vst.msk [vmem:[#allocation3 + $0x130] sm:$0xff] %vm408_vm6, %v9605_v3  ;;  %v5925_v41 = vrot.slane %v5923_v36, 4  ;;  %v7111_v48 = vshrl.u32 %v6810_v12, 16  ;;  %v4769_v24 = vld [vmem:[#allocation4 + $0xb0] sm:$0x1] }
 0x2c9   : > { %v7114_v43 = vshll.u32 %v6810_v12, 16  ;;  %v9446_v42 = vcombine.low %v5098_v39, %v5108_v33  ;;  %v5916_v61 = vor.u32 %v5915_v0, %v5912_v38  ;;  %v5931_v52 = vrot.slane %v5929_v50, 5  ;;  %v4768_v38 = vld [vmem:[#allocation4 + $0xac] sm:$0xf]  ;;  %v7357_v36 = vld [vmem:[#allocation4 + $0xb4] sm:$0xe]  ;;  %v12616_v33 = vpop.permute.xlu0 %7266 }
 0x2ca   : > { %v7120_v40 = vshll.u32 %v6811_v56, 16  ;;  %v5926_v37 = vor.u32 %v5925_v41, %v5921_v49  ;;  %v7113_v44 = vrot.slane %v7111_v48, 4  ;;  %v7124_v22 = vshrl.u32 %v6811_v56, 16  ;;  %v7616_v54 = vld [vmem:[#allocation3 + $0x50] sm:$0xff] }
 0x2cb   : > { %6736 = vrot.lane.b32.xlu0 %v10192_v17, %s10227_s13  ;;  %v7116_v29 = vrot.slane %v7114_v43, 5  ;;  %5231 = vrot.lane.b32.xlu1 %v9446_v42, %s10229_s15  ;;  %v5917_v15 = vrot.slane %v5916_v61, 4  ;;  %v7130_v14 = vshll.u32 %v6812_v47, 16  ;;  %v9527_v32 = vrot.slane %v6319_v4, 9  ;;  %v5222_v23 = vpop.permute.xlu1 %5221  ;;  %v4770_v47 = vld [vmem:[#allocation4 + $0xb4] sm:$0xf] }
 0x2cc   : > { %v7122_v30 = vrot.slane %v7120_v40, 5  ;;  %7902 = vmatprep.mubr.bf16.mxu1 %v7616_v54  ;;  %v5927_v10 = vrot.slane %v5926_v37, 4  ;;  %v7126_v45 = vrot.slane %v7124_v22, 4  ;;  %v6473_v27 = vrot.slane %v6320_v26, 5  ;;  %5261 = vst.msk [vmem:[#allocation3 + $0xc0] sm:$0xff] %vm956_vm7, %v5222_v23 }
 0x2cd   : > { %v7117_v39 = vor.u32 %v7116_v29, %v7113_v44  ;;  %7903 = vmatmul.mubr.bf16.gmra.mrb[44].mxu1 %v7615_v60  ;;  %v5922_v21 = vsel %vm10348_vm5, %v5917_v15, %v5921_v49  ;;  %v7132_v62 = vrot.slane %v7130_v14, 5  ;;  %v6476_v55 = vrot.slane %v6321_v46, 5  ;;  %5581 = vst.msk [vmem:[#allocation3 + $0xc0] sm:$0xff] %vm1280_vm8, %v12568_v58  ;;  %v7358_v4 = vld [vmem:[#allocation4 + $0xb8] sm:$0xf] }
 0x2ce   : > { %v5110_v11 = vshrl.u32 %v4767_v31, 16  ;;  %v5932_v7 = vsel %vm10348_vm5, %v5927_v10, %v5931_v52  ;;  %v7127_v5 = vor.u32 %v7126_v45, %v7122_v30  ;;  %v12612_v3 = vsel %vm10288_vm2, %v9527_v32, %v6473_v27  ;;  %5757 = vst.msk [vmem:[#allocation3 + $0xc0] sm:$0xff] %vm1458_vm9, %v5718_v8  ;;  %v10194_v8 = vld [vmem:[#allocation4 + $0xb4] sm:$0xff]   ;;  %v7359_v61 = vld [vmem:[#allocation4 + $0xbc] sm:$0x1]  ;;  %v12639_v45 = vpop.permute.xlu0 %6549 }
 0x2cf   : > { %v7118_v12 = vrot.slane %v7117_v39, 4  ;;  %v7644_v56 = vld [vmem:[#allocation3 + $0x130] sm:$0xff]  ;;  %5553 = vrot.lane.b32.xlu1 %v9479_v25, %s10227_s13  ;;  %v9501_v0 = vcombine.low %v5922_v21, %v5932_v7  ;;  %v6475_v49 = vrot.slane %v6473_v27, 4  ;;  %v5113_v58 = vshll.u32 %v4767_v31, 16  ;;  %v4771_v44 = vld [vmem:[#allocation4 + $0xb8] sm:$0xf]  ;;  %v12632_v15 = vpop.permute.xlu1 %5543 }
 0x2d0   : > { %v5112_v50 = vrot.slane %v5110_v11, 4  ;;  %10052 = vmatprep.mubr.msk.bf16.mxu0 %vm408_vm6, %v7644_v56  ;;  %v7128_v41 = vrot.slane %v7127_v5, 4  ;;  %v5119_v48 = vshll.u32 %v4768_v38, 16  ;;  %v5123_v43 = vshrl.u32 %v4768_v38, 16  ;;  %v4772_v14 = vld [vmem:[#allocation4 + $0xbc] sm:$0x1] }
 0x2d1   : > { %v7123_v17 = vsel %vm10348_vm5, %v7118_v12, %v7122_v30  ;;  %6265 = vst.msk [vmem:[#allocation3 + $0x68] sm:$0xff] %vm408_vm6, %v9501_v0  ;;  %v6477_v25 = vsel %vm10288_vm2, %v6475_v49, %v6476_v55  ;;  %v5115_v42 = vrot.slane %v5113_v58, 5  ;;  %v5129_v31 = vshll.u32 %v4769_v24, 16  ;;  %v5780_v38 = vld [vmem:[#allocation4 + $0x48] sm:$0xf] }
 0x2d2   : > { %v9590_v52 = vrot.slane %v7357_v36, 9  ;;  %6585 = vst.msk [vmem:[#allocation3 + $0x68] sm:$0xff] %vm956_vm7, %v12399_v59  ;;  %v7133_v40 = vsel %vm10348_vm5, %v7128_v41, %v7132_v62  ;;  %v9543_v26 = vcombine.low %v12612_v3, %v6477_v25  ;;  %v5121_v46 = vrot.slane %v5119_v48, 5  ;;  %v5781_v5 = vld [vmem:[#allocation4 + $0x4c] sm:$0xf] }
 0x2d3   : > { %v5125_v37 = vrot.slane %v5123_v43, 4  ;;  %v9573_v29 = vcombine.low %v7123_v17, %v7133_v40  ;;  %5729 = vrot.lane.b32.xlu1 %v10194_v8, %s10228_s14  ;;  %6762 = vst.msk [vmem:[#allocation3 + $0x68] sm:$0xff] %vm1280_vm8, %v12426_v16  ;;  %v5116_v22 = vor.u32 %v5115_v42, %v5112_v50  ;;  %v5131_v54 = vrot.slane %v5129_v31, 5  ;;  %v5782_v0 = vld [vmem:[#allocation4 + $0x50] sm:$0x1]  ;;  %v12648_v41 = vpop.permute.xlu1 %5719  ;;  %v10195_v42 = vld [vmem:[#allocation4 + $0xc0] sm:$0xff]  }
 0x2d4   : > { %v7507_v20 = vrot.slane %v7358_v4, 5  ;;  %v7510_v30 = vrot.slane %v7359_v61, 5  ;;  %v5134_v32 = vshrl.u32 %v4770_v47, 16  ;;  %v5137_v60 = vshll.u32 %v4770_v47, 16  ;;  %7306 = vst.msk [vmem:[#allocation3 + $0x68] sm:$0xff] %vm1458_vm9, %v12502_v6 }
 0x2d5   : > { %v5126_v59 = vor.u32 %v5125_v37, %v5121_v46  ;;  %7278 = vrot.lane.b32.xlu0 %v9573_v29, %s10228_s14  ;;  %v5117_v23 = vrot.slane %v5116_v22, 4  ;;  %v5143_v39 = vshll.u32 %v4771_v44, 16  ;;  %v5147_v55 = vshrl.u32 %v4771_v44, 16  ;;  %v6813_v49 = vld [vmem:[#allocation4 + $0xb4] sm:$0xf]  ;;  %v12652_v37 = vpop.permute.xlu0 %6726 }
 0x2d6   : > { %v7508_v10 = vsel %vm10288_vm2, %v9590_v52, %v7507_v20  ;;  %v7509_v16 = vrot.slane %v7507_v20, 4  ;;  %v5136_v21 = vrot.slane %v5134_v32, 4  ;;  %v5139_v62 = vrot.slane %v5137_v60, 5  ;;  %v6814_v25 = vld [vmem:[#allocation4 + $0xb8] sm:$0xf] }
 0x2d7   : > { %v5127_v27 = vrot.slane %v5126_v59, 4  ;;  %v5122_v11 = vsel %vm10348_vm5, %v5117_v23, %v5121_v46  ;;  %v5145_v7 = vrot.slane %v5143_v39, 5  ;;  %v5153_v12 = vshll.u32 %v4772_v14, 16  ;;  %v6815_v20 = vld [vmem:[#allocation4 + $0xbc] sm:$0x1]  ;;  %v7618_v59 = vld [vmem:[#allocation3 + $0x60] sm:$0xff] }
 0x2d8   : > { %v7511_v6 = vsel %vm10288_vm2, %v7509_v16, %v7510_v30  ;;  %v5140_v36 = vor.u32 %v5139_v62, %v5136_v21  ;;  %v5149_v56 = vrot.slane %v5147_v55, 4  ;;  %v5934_v47 = vshrl.u32 %v5780_v38, 16  ;;  %v5315_v23 = vld [vmem:[#allocation4 + $0xb8] sm:$0xf]  ;;  %v5316_v21 = vld [vmem:[#allocation4 + $0xbc] sm:$0x1] }
 0x2d9   : > { %v5132_v3 = vsel %vm10348_vm5, %v5127_v27, %v5131_v54  ;;  %v9606_v24 = vcombine.low %v7508_v10, %v7511_v6  ;;  %6561 = vrot.lane.b32.xlu0 %v9543_v26, %s10229_s15  ;;  %v5155_v58 = vrot.slane %v5153_v12, 5  ;;  %v5937_v17 = vshll.u32 %v5780_v38, 16  ;;  %v5314_v26 = vld [vmem:[#allocation4 + $0xb4] sm:$0xe]  ;;  %v6322_v62 = vld [vmem:[#allocation4 + $0xc0] sm:$0xe] }
 0x2da   : > { %v9447_v50 = vcombine.low %v5122_v11, %v5132_v3  ;;  %v5141_v48 = vrot.slane %v5140_v36, 4  ;;  %v5150_v43 = vor.u32 %v5149_v56, %v5145_v7  ;;  %v5943_v4 = vshll.u32 %v5781_v5, 16  ;;  %v6323_v56 = vld [vmem:[#allocation4 + $0xc4] sm:$0xf] }
 0x2db   : > { %7603 = vst.msk [vmem:[#allocation3 + $0x148] sm:$0xff] %vm408_vm6, %v9606_v24  ;;  %v5947_v8 = vshrl.u32 %v5781_v5, 16  ;;  %v5936_v31 = vrot.slane %v5934_v47, 4  ;;  %v5939_v61 = vrot.slane %v5937_v17, 5  ;;  %v5953_v52 = vshll.u32 %v5782_v0, 16  ;;  %v7619_v46 = vld [vmem:[#allocation3 + $0x68] sm:$0xff] }
 0x2dc   : > { %5233 = vrot.lane.b32.xlu1 %v9447_v50, %s10229_s15  ;;  %v7135_v40 = vshrl.u32 %v6813_v49, 16  ;;  %v5146_v44 = vsel %vm10348_vm5, %v5141_v48, %v5145_v7  ;;  %v5151_v29 = vrot.slane %v5150_v43, 4  ;;  %v5945_v22 = vrot.slane %v5943_v4, 5  ;;  %7910 = vmatprep.mubr.bf16.mxu1 %v7619_v46  ;;  %v6816_v7 = vld [vmem:[#allocation4 + $0xc0] sm:$0xf]  ;;  %v12663_v48 = vpop.permute.xlu0 %7268 }
 0x2dd   : > { %v5949_v54 = vrot.slane %v5947_v8, 4  ;;  %6738 = vrot.lane.b32.xlu0 %v10195_v42, %s10227_s13  ;;  %v5940_v30 = vor.u32 %v5939_v61, %v5936_v31  ;;  %v5955_v14 = vrot.slane %v5953_v52, 5  ;;  %v7138_v60 = vshll.u32 %v6813_v49, 16  ;;  %7911 = vmatmul.mubr.bf16.gmra.mrb[48].mxu1 %v7618_v59  ;;  %v6324_v17 = vld [vmem:[#allocation4 + $0xc8] sm:$0x1] }
 0x2de   : > { %v7137_v32 = vrot.slane %v7135_v40, 4  ;;  %v5156_v10 = vsel %vm10348_vm5, %v5151_v29, %v5155_v58  ;;  %v7144_v39 = vshll.u32 %v6814_v25, 16  ;;  %v7148_v27 = vshrl.u32 %v6814_v25, 16  ;;  %v6817_v42 = vld [vmem:[#allocation4 + $0xc4] sm:$0xf] }
 0x2df   : > { %v5950_v16 = vor.u32 %v5949_v54, %v5945_v22  ;;  %v9448_v55 = vcombine.low %v5146_v44, %v5156_v10  ;;  %v5941_v38 = vrot.slane %v5940_v30, 4  ;;  %v7140_v11 = vrot.slane %v7138_v60, 5  ;;  %v5224_v12 = vpop.permute.xlu1 %5223  ;;  %v6818_v30 = vld [vmem:[#allocation4 + $0xc8] sm:$0x1] }
 0x2e0   : > { %v7154_v6 = vshll.u32 %v6815_v20, 16  ;;  %v7146_v3 = vrot.slane %v7144_v39, 5  ;;  %v7150_v24 = vrot.slane %v7148_v27, 4  ;;  %v9464_v36 = vrot.slane %v5314_v26, 9  ;;  %5262 = vst.msk [vmem:[#allocation3 + $0xd8] sm:$0xff] %vm956_vm7, %v5224_v12 }
 0x2e1   : > { %v5951_v5 = vrot.slane %v5950_v16, 4  ;;  %5235 = vrot.lane.b32.xlu1 %v9448_v55, %s10229_s15  ;;  %v5946_v49 = vsel %vm10348_vm5, %v5941_v38, %v5945_v22  ;;  %v7141_v50 = vor.u32 %v7140_v11, %v7137_v32  ;;  %v5472_v47 = vrot.slane %v5315_v23, 5  ;;  %5582 = vst.msk [vmem:[#allocation3 + $0xd8] sm:$0xff] %vm1280_vm8, %v12632_v15  ;;  %v5783_v26 = vld [vmem:[#allocation4 + $0x54] sm:$0xf]  ;;  %v12695_v11 = vpop.permute.xlu0 %6551 }
 0x2e2   : > { %v7647_v0 = vld [vmem:[#allocation3 + $0x148] sm:$0xff]  ;;  %v7156_v58 = vrot.slane %v7154_v6, 5  ;;  %v7151_v4 = vor.u32 %v7150_v24, %v7146_v3  ;;  %v5475_v8 = vrot.slane %v5316_v21, 5  ;;  %v9528_v25 = vrot.slane %v6322_v62, 9  ;;  %5758 = vst.msk [vmem:[#allocation3 + $0xd8] sm:$0xff] %vm1458_vm9, %v12648_v41  ;;  %v12672_v31 = vpop.f32.mrb[68].mxu0 }
 0x2e3   : > { %10053 = vmatmul.mubr.msk.bf16.gmra.mrb[88].mxu0 %vm408_vm6, %v7647_v0  ;;  %v5956_v43 = vsel %vm10348_vm5, %v5951_v5, %v5955_v14  ;;  %v7142_v52 = vrot.slane %v7141_v50, 4  ;;  %v5473_v40 = vsel %vm10288_vm2, %v9464_v36, %v5472_v47  ;;  %v5474_v15 = vrot.slane %v5472_v47, 4  ;;  %v12676_v46 = vpop.f32.mrb[69].mxu0  ;;  %v5784_v27 = vld [vmem:[#allocation4 + $0x58] sm:$0xf] }
 0x2e4   : > { %v9502_v61 = vcombine.low %v5946_v49, %v5956_v43  ;;  %v7152_v44 = vrot.slane %v7151_v4, 4  ;;  %v6480_v29 = vrot.slane %v6323_v56, 5  ;;  %v6483_v22 = vrot.slane %v6324_v17, 5  ;;  %v12678_v20 = vpop.f32.mrb[70].mxu0  ;;  %v5785_v12 = vld [vmem:[#allocation4 + $0x5c] sm:$0x1] }
 0x2e5   : > { %v7159_v54 = vshrl.u32 %v6816_v7, 16  ;;  %v7147_v41 = vsel %vm10348_vm5, %v7142_v52, %v7146_v3  ;;  %v5476_v59 = vsel %vm10288_vm2, %v5474_v15, %v5475_v8  ;;  %v7162_v14 = vshll.u32 %v6816_v7, 16  ;;  %v12685_v60 = vpop.f32.mrb[71].mxu0  ;;  %v6819_v56 = vld [vmem:[#allocation4 + $0xcc] sm:$0xf]  ;;  %v10197_v49 = vld [vmem:[#allocation4 + $0xc0] sm:$0xff]  }
 0x2e6   : > { %6266 = vst.msk [vmem:[#allocation3 + $0x80] sm:$0xff] %vm408_vm6, %v9502_v61  ;;  %v7168_v32 = vshll.u32 %v6817_v42, 16  ;;  %v7157_v23 = vsel %vm10348_vm5, %v7152_v44, %v7156_v58  ;;  %v9480_v10 = vcombine.low %v5473_v40, %v5476_v59  ;;  %v6481_v16 = vsel %vm10288_vm2, %v9528_v25, %v6480_v29  ;;  %v6820_v0 = vld [vmem:[#allocation4 + $0xd0] sm:$0xf]  ;;  %v6821_v61 = vld [vmem:[#allocation4 + $0xd4] sm:$0x1] }
 0x2e7   : > { %6586 = vst.msk [vmem:[#allocation3 + $0x80] sm:$0xff] %vm956_vm7, %v12458_v35  ;;  %v6482_v39 = vrot.slane %v6480_v29, 4  ;;  %v9574_v21 = vcombine.low %v7147_v41, %v7157_v23  ;;  %v7161_v62 = vrot.slane %v7159_v54, 4  ;;  %v7164_v55 = vrot.slane %v7162_v14, 5  ;;  %v12707_v54 = vpop.permute.xlu0 %6728  ;;  %v12709_v41 = vpop.permute.xlu1 %5545 }
 0x2e8   : > { %6763 = vst.msk [vmem:[#allocation3 + $0x80] sm:$0xff] %vm1280_vm8, %v12478_v19  ;;  %v7170_v38 = vrot.slane %v7168_v32, 5  ;;  %5555 = vrot.lane.b32.xlu1 %v9480_v10, %s10227_s13  ;;  %v7172_v6 = vshrl.u32 %v6817_v42, 16  ;;  %v7178_v7 = vshll.u32 %v6818_v30, 16  ;;  %v5958_v5 = vshrl.u32 %v5783_v26, 16 }
 0x2e9   : > { %v6484_v35 = vsel %vm10288_vm2, %v6482_v39, %v6483_v22  ;;  %7307 = vst.msk [vmem:[#allocation3 + $0x80] sm:$0xff] %vm1458_vm9, %v12559_v53  ;;  %7280 = vrot.lane.b32.xlu0 %v9574_v21, %s10228_s14  ;;  %v7165_v3 = vor.u32 %v7164_v55, %v7161_v62  ;;  %v5961_v24 = vshll.u32 %v5783_v26, 16  ;;  %v5967_v36 = vshll.u32 %v5784_v27, 16  ;;  %v5786_v22 = vld [vmem:[#allocation4 + $0x60] sm:$0xf] }
 0x2ea   : > { %v9544_v19 = vcombine.low %v6481_v16, %v6484_v35  ;;  %v7174_v50 = vrot.slane %v7172_v6, 4  ;;  %v7180_v58 = vrot.slane %v7178_v7, 5  ;;  %v5960_v47 = vrot.slane %v5958_v5, 4  ;;  %v7621_v6 = vld [vmem:[#allocation3 + $0x78] sm:$0xff] }
 0x2eb   : > { %v5971_v17 = vshrl.u32 %v5784_v27, 16  ;;  %v7166_v43 = vrot.slane %v7165_v3, 4  ;;  %v5963_v4 = vrot.slane %v5961_v24, 5  ;;  %v5969_v8 = vrot.slane %v5967_v36, 5  ;;  %v5788_v3 = vld [vmem:[#allocation4 + $0x68] sm:$0x1] }
 0x2ec   : > { %v5977_v25 = vshll.u32 %v5785_v12, 16  ;;  %5731 = vrot.lane.b32.xlu1 %v10197_v49, %s10228_s14  ;;  %v7175_v53 = vor.u32 %v7174_v50, %v7170_v38  ;;  %v7183_v52 = vshrl.u32 %v6819_v56, 16  ;;  %v7186_v40 = vshll.u32 %v6819_v56, 16  ;;  %v5789_v24 = vld [vmem:[#allocation4 + $0x6c] sm:$0xf] }
 0x2ed   : > { %v5973_v42 = vrot.slane %v5971_v17, 4  ;;  %6563 = vrot.lane.b32.xlu0 %v9544_v19, %s10229_s15  ;;  %v7171_v15 = vsel %vm10348_vm5, %v7166_v43, %v7170_v38  ;;  %v5964_v26 = vor.u32 %v5963_v4, %v5960_v47  ;;  %v7192_v29 = vshll.u32 %v6820_v0, 16  ;;  %v5787_v38 = vld [vmem:[#allocation4 + $0x64] sm:$0xf]  ;;  %v5790_v4 = vld [vmem:[#allocation4 + $0x70] sm:$0xf] }
 0x2ee   : > { %v5979_v44 = vrot.slane %v5977_v25, 5  ;;  %v7176_v59 = vrot.slane %v7175_v53, 4  ;;  %v7185_v14 = vrot.slane %v7183_v52, 4  ;;  %v7188_v32 = vrot.slane %v7186_v40, 5  ;;  %v5722_v25 = vpop.permute.xlu1 %5721 }
 0x2ef   : > { %v5974_v30 = vor.u32 %v5973_v42, %v5969_v8  ;;  %v5965_v23 = vrot.slane %v5964_v26, 4  ;;  %v7194_v10 = vrot.slane %v7192_v29, 5  ;;  %v7196_v16 = vshrl.u32 %v6820_v0, 16 }
 0x2f0   : > { %v7202_v39 = vshll.u32 %v6821_v61, 16  ;;  %v7622_v27 = vld [vmem:[#allocation3 + $0x80] sm:$0xff]  ;;  %v7181_v21 = vsel %vm10348_vm5, %v7176_v59, %v7180_v58  ;;  %v7189_v55 = vor.u32 %v7188_v32, %v7185_v14  ;;  %v5982_v35 = vshrl.u32 %v5786_v22, 16  ;;  %v10199_v58 = vld [vmem:[#allocation4 + $0xcc] sm:$0xff]   ;;  %v5792_v32 = vld [vmem:[#allocation4 + $0x78] sm:$0xf] }
 0x2f1   : > { %v5975_v62 = vrot.slane %v5974_v30, 4  ;;  %7918 = vmatprep.mubr.bf16.mxu1 %v7622_v27  ;;  %v9575_v7 = vcombine.low %v7171_v15, %v7181_v21  ;;  %v5970_v12 = vsel %vm10348_vm5, %v5965_v23, %v5969_v8  ;;  %v7198_v5 = vrot.slane %v7196_v16, 4  ;;  %v12718_v8 = vpop.permute.xlu0 %7270  ;;  %v5793_v27 = vld [vmem:[#allocation4 + $0x7c] sm:$0xf] }
 0x2f2   : > { %v7204_v19 = vrot.slane %v7202_v39, 5  ;;  %7919 = vmatmul.mubr.bf16.gmra.mrb[52].mxu1 %v7621_v6  ;;  %v7190_v56 = vrot.slane %v7189_v55, 4  ;;  %v5984_v0 = vrot.slane %v5982_v35, 4  ;;  %v5985_v49 = vshll.u32 %v5786_v22, 16 }
 0x2f3   : > { %v5980_v36 = vsel %vm10348_vm5, %v5975_v62, %v5979_v44  ;;  %7282 = vrot.lane.b32.xlu0 %v9575_v7, %s10228_s14  ;;  %v7199_v47 = vor.u32 %v7198_v5, %v7194_v10  ;;  %v5991_v17 = vshll.u32 %v5787_v38, 16  ;;  %v5995_v43 = vshrl.u32 %v5787_v38, 16  ;;  %v5791_v44 = vld [vmem:[#allocation4 + $0x74] sm:$0x1]  ;;  %v5794_v7 = vld [vmem:[#allocation4 + $0x80] sm:$0x1] }
 0x2f4   : > { %v9503_v50 = vcombine.low %v5970_v12, %v5980_v36  ;;  %v7195_v53 = vsel %vm10348_vm5, %v7190_v56, %v7194_v10  ;;  %v5987_v42 = vrot.slane %v5985_v49, 5  ;;  %v6001_v61 = vshll.u32 %v5788_v3, 16  ;;  %v5795_v56 = vld [vmem:[#allocation4 + $0x84] sm:$0xf] }
 0x2f5   : > { %v6006_v52 = vshrl.u32 %v5789_v24, 16  ;;  %v7200_v40 = vrot.slane %v7199_v47, 4  ;;  %v5993_v15 = vrot.slane %v5991_v17, 5  ;;  %v5997_v26 = vrot.slane %v5995_v43, 4 }
 0x2f6   : > { %6267 = vst.msk [vmem:[#allocation3 + $0x98] sm:$0xff] %vm408_vm6, %v9503_v50  ;;  %v6009_v29 = vshll.u32 %v5789_v24, 16  ;;  %v5988_v22 = vor.u32 %v5987_v42, %v5984_v0  ;;  %v6003_v59 = vrot.slane %v6001_v61, 5  ;;  %v6015_v14 = vshll.u32 %v5790_v4, 16 }
 0x2f7   : > { %6587 = vst.msk [vmem:[#allocation3 + $0x98] sm:$0xff] %vm956_vm7, %v12517_v63  ;;  %v6008_v30 = vrot.slane %v6006_v52, 4  ;;  %6740 = vrot.lane.b32.xlu0 %v10199_v58, %s10227_s13  ;;  %v7205_v23 = vsel %vm10348_vm5, %v7200_v40, %v7204_v19  ;;  %v5998_v10 = vor.u32 %v5997_v26, %v5993_v15  ;;  %v6019_v39 = vshrl.u32 %v5790_v4, 16  ;;  %v5796_v58 = vld [vmem:[#allocation4 + $0x88] sm:$0xf] }
 0x2f8   : > { %6764 = vst.msk [vmem:[#allocation3 + $0x98] sm:$0xff] %vm1280_vm8, %v12544_v1  ;;  %v6011_v16 = vrot.slane %v6009_v29, 5  ;;  %v9576_v21 = vcombine.low %v7195_v53, %v7205_v23  ;;  %v5989_v62 = vrot.slane %v5988_v22, 4  ;;  %v6017_v63 = vrot.slane %v6015_v14, 5  ;;  %v12732_v1 = vpop.permute.xlu0 %6553  ;;  %v5797_v52 = vld [vmem:[#allocation4 + $0x8c] sm:$0x1] }
 0x2f9   : > { %7308 = vst.msk [vmem:[#allocation3 + $0x98] sm:$0xff] %vm1458_vm9, %v12616_v33  ;;  %v6025_v55 = vshll.u32 %v5791_v44, 16  ;;  %v5999_v38 = vrot.slane %v5998_v10, 4  ;;  %v6021_v6 = vrot.slane %v6019_v39, 4  ;;  %v6030_v12 = vshrl.u32 %v5792_v32, 16  ;;  %v5226_v5 = vpop.permute.xlu1 %5225  ;;  %v7624_v10 = vld [vmem:[#allocation3 + $0x90] sm:$0xff] }
 0x2fa   : > { %v6012_v35 = vor.u32 %v6011_v16, %v6008_v30  ;;  %v5994_v19 = vsel %vm10348_vm5, %v5989_v62, %v5993_v15  ;;  %v6033_v24 = vshll.u32 %v5792_v32, 16  ;;  %v6039_v36 = vshll.u32 %v5793_v27, 16  ;;  %5263 = vst.msk [vmem:[#allocation3 + $0xf0] sm:$0xff] %vm956_vm7, %v5226_v5 }
 0x2fb   : > { %v6027_v3 = vrot.slane %v6025_v55, 5  ;;  %7284 = vrot.lane.b32.xlu0 %v9576_v21, %s10228_s14  ;;  %v6004_v33 = vsel %vm10348_vm5, %v5999_v38, %v6003_v59  ;;  %v6022_v49 = vor.u32 %v6021_v6, %v6017_v63  ;;  %v6032_v50 = vrot.slane %v6030_v12, 4  ;;  %5583 = vst.msk [vmem:[#allocation3 + $0xf0] sm:$0xff] %vm1280_vm8, %v12709_v41  ;;  %v5798_v41 = vld [vmem:[#allocation4 + $0x90] sm:$0xf] }
 0x2fc   : > { %v6013_v0 = vrot.slane %v6012_v35, 4  ;;  %v9504_v47 = vcombine.low %v5994_v19, %v6004_v33  ;;  %v6035_v17 = vrot.slane %v6033_v24, 5  ;;  %v6041_v43 = vrot.slane %v6039_v36, 5  ;;  %5759 = vst.msk [vmem:[#allocation3 + $0xf0] sm:$0xff] %vm1458_vm9, %v5722_v25  ;;  %v12750_v32 = vpop.permute.xlu0 %6730  ;;  %v5799_v21 = vld [vmem:[#allocation4 + $0x94] sm:$0xf] }
 0x2fd   : > { %v6043_v4 = vshrl.u32 %v5793_v27, 16  ;;  %v6023_v42 = vrot.slane %v6022_v49, 4  ;;  %v6049_v61 = vshll.u32 %v5794_v7, 16  ;;  %v6054_v40 = vshrl.u32 %v5795_v56, 16  ;;  %v5800_v6 = vld [vmem:[#allocation4 + $0x98] sm:$0x1]  ;;  %v12761_v19 = vpop.permute.xlu1 %5547 }
 0x2fe   : > { %v6018_v53 = vsel %vm10348_vm5, %v6013_v0, %v6017_v63  ;;  %6268 = vst.msk [vmem:[#allocation3 + $0xb0] sm:$0xff] %vm408_vm6, %v9504_v47  ;;  %v6036_v15 = vor.u32 %v6035_v17, %v6032_v50  ;;  %v6057_v44 = vshll.u32 %v5795_v56, 16  ;;  %v6063_v29 = vshll.u32 %v5796_v58, 16  ;;  %v5801_v24 = vld [vmem:[#allocation4 + $0x9c] sm:$0xf] }
 0x2ff   : > { %v6045_v26 = vrot.slane %v6043_v4, 4  ;;  %6588 = vst.msk [vmem:[#allocation3 + $0xb0] sm:$0xff] %vm956_vm7, %v12581_v57  ;;  %v6028_v25 = vsel %vm10348_vm5, %v6023_v42, %v6027_v3  ;;  %v6051_v59 = vrot.slane %v6049_v61, 5  ;;  %v6056_v30 = vrot.slane %v6054_v40, 4  ;;  %v5802_v49 = vld [vmem:[#allocation4 + $0xa0] sm:$0xf] }
 0x300   : > { %v7625_v22 = vld [vmem:[#allocation3 + $0x98] sm:$0xff]  ;;  %v6067_v14 = vshrl.u32 %v5796_v58, 16  ;;  %6765 = vst.msk [vmem:[#allocation3 + $0xb0] sm:$0xff] %vm1280_vm8, %v12598_v28  ;;  %v9505_v23 = vcombine.low %v6018_v53, %v6028_v25  ;;  %v6037_v16 = vrot.slane %v6036_v15, 4  ;;  %v6059_v27 = vrot.slane %v6057_v44, 5 }
 0x301   : > { %7926 = vmatprep.mubr.bf16.mxu1 %v7625_v22  ;;  %v6046_v39 = vor.u32 %v6045_v26, %v6041_v43  ;;  %7309 = vst.msk [vmem:[#allocation3 + $0xb0] sm:$0xff] %vm1458_vm9, %v12663_v48  ;;  %v6065_v57 = vrot.slane %v6063_v29, 5  ;;  %v6073_v63 = vshll.u32 %v5797_v52, 16  ;;  %v6078_v55 = vshrl.u32 %v5798_v41, 16  ;;  %v5803_v61 = vld [vmem:[#allocation4 + $0xa4] sm:$0x1] }
 0x302   : > { %7927 = vmatmul.mubr.bf16.gmra.mrb[56].mxu1 %v7624_v10  ;;  %v6069_v62 = vrot.slane %v6067_v14, 4  ;;  %6269 = vst.msk [vmem:[#allocation3 + $0xc8] sm:$0xff] %vm408_vm6, %v9505_v23  ;;  %v6042_v28 = vsel %vm10348_vm5, %v6037_v16, %v6041_v43  ;;  %v6060_v35 = vor.u32 %v6059_v27, %v6056_v30  ;;  %v6081_v7 = vshll.u32 %v5798_v41, 16  ;;  %v5804_v15 = vld [vmem:[#allocation4 + $0xa8] sm:$0xf] }
 0x303   : > { %v6047_v38 = vrot.slane %v6046_v39, 4  ;;  %6589 = vst.msk [vmem:[#allocation3 + $0xc8] sm:$0xff] %vm956_vm7, %v12639_v45  ;;  %v6075_v5 = vrot.slane %v6073_v63, 5  ;;  %v6080_v48 = vrot.slane %v6078_v55, 4  ;;  %v6087_v3 = vshll.u32 %v5799_v21, 16  ;;  %v7627_v22 = vld [vmem:[#allocation3 + $0xa8] sm:$0xff] }
 0x304   : > { %v6070_v12 = vor.u32 %v6069_v62, %v6065_v57  ;;  %6766 = vst.msk [vmem:[#allocation3 + $0xc8] sm:$0xff] %vm1280_vm8, %v12652_v37  ;;  %v6061_v56 = vrot.slane %v6060_v35, 4  ;;  %v6083_v33 = vrot.slane %v6081_v7, 5  ;;  %v6091_v0 = vshrl.u32 %v5799_v21, 16  ;;  %v5805_v25 = vld [vmem:[#allocation4 + $0xac] sm:$0xf] }
 0x305   : > { %v6052_v36 = vsel %vm10348_vm5, %v6047_v38, %v6051_v59  ;;  %7310 = vst.msk [vmem:[#allocation3 + $0xc8] sm:$0xff] %vm1458_vm9, %v12718_v8  ;;  %v7273_v58 = vpop.permute.xlu0 %7272  ;;  %v6089_v47 = vrot.slane %v6087_v3, 5  ;;  %v6097_v17 = vshll.u32 %v5800_v6, 16  ;;  %v6102_v53 = vshrl.u32 %v5801_v24, 16  ;;  %v12778_v59 = vpop.permute.xlu1 %5723  ;;  %v5808_v38 = vld [vmem:[#allocation4 + $0xb8] sm:$0xf] }
 0x306   : > { %v9506_v50 = vcombine.low %v6042_v28, %v6052_v36  ;;  %v6071_v45 = vrot.slane %v6070_v12, 4  ;;  %v6084_v43 = vor.u32 %v6083_v33, %v6080_v48  ;;  %v6093_v4 = vrot.slane %v6091_v0, 4 }
 0x307   : > { %v6066_v37 = vsel %vm10348_vm5, %v6061_v56, %v6065_v57  ;;  %v6105_v52 = vshll.u32 %v5801_v24, 16  ;;  %v6111_v40 = vshll.u32 %v5802_v49, 16  ;;  %v6104_v41 = vrot.slane %v6102_v53, 4  ;;  %v5807_v57 = vld [vmem:[#allocation4 + $0xb4] sm:$0xf] }
 0x308   : > { %6270 = vst.msk [vmem:[#allocation3 + $0xe0] sm:$0xff] %vm408_vm6, %v9506_v50  ;;  %v6076_v42 = vsel %vm10348_vm5, %v6071_v45, %v6075_v5  ;;  %v7628_v8 = vld [vmem:[#allocation3 + $0xb0] sm:$0xff]  ;;  %v6085_v44 = vrot.slane %v6084_v43, 4  ;;  %v6094_v29 = vor.u32 %v6093_v4, %v6089_v47  ;;  %v6099_v30 = vrot.slane %v6097_v17, 5  ;;  %v5809_v4 = vld [vmem:[#allocation4 + $0xbc] sm:$0x1] }
 0x309   : > { %6590 = vst.msk [vmem:[#allocation3 + $0xe0] sm:$0xff] %vm956_vm7, %v12695_v11  ;;  %v9507_v26 = vcombine.low %v6066_v37, %v6076_v42  ;;  %7934 = vmatprep.mubr.bf16.mxu1 %v7628_v8  ;;  %v6556_v14 = vpop.permute.xlu0 %6555  ;;  %v6107_v23 = vrot.slane %v6105_v52, 5  ;;  %v12780_v10 = vrot.slane %v6111_v40, 5  ;;  %v6115_v16 = vshrl.u32 %v5802_v49, 16  ;;  %v5806_v11 = vld [vmem:[#allocation4 + $0xb0] sm:$0x1] }
 0x30a   : > { %6767 = vst.msk [vmem:[#allocation3 + $0xe0] sm:$0xff] %vm1280_vm8, %v12707_v54  ;;  %7935 = vmatmul.mubr.bf16.gmra.mrb[60].mxu1 %v7627_v22  ;;  %v6095_v39 = vrot.slane %v6094_v29, 4  ;;  %v6121_v27 = vshll.u32 %v5803_v61, 16  ;;  %v6126_v21 = vshrl.u32 %v5804_v15, 16  ;;  %v6129_v54 = vshll.u32 %v5804_v15, 16  ;;  %v7630_v42 = vld [vmem:[#allocation3 + $0xc0] sm:$0xff] }
 0x30b   : > { %6271 = vst.msk [vmem:[#allocation3 + $0xf8] sm:$0xff] %vm408_vm6, %v9507_v26  ;;  %v6090_v62 = vsel %vm10348_vm5, %v6085_v44, %v6089_v47  ;;  %v6108_v63 = vor.u32 %v6107_v23, %v6104_v41  ;;  %v6117_v55 = vrot.slane %v6115_v16, 4  ;;  %v6135_v28 = vshll.u32 %v5805_v25, 16  ;;  %v12788_v35 = vpop.f32.mrb[72].mxu0  ;;  %v5810_v8 = vld [vmem:[#allocation4 + $0xc0] sm:$0xf] }
 0x30c   : > { %7311 = vst.msk [vmem:[#allocation3 + $0xe0] sm:$0xff] %vm1458_vm9, %v7273_v58  ;;  %v7631_v6 = vld [vmem:[#allocation3 + $0xc8] sm:$0xff]  ;;  %v6100_v7 = vsel %vm10348_vm5, %v6095_v39, %v6099_v30  ;;  %v6128_v12 = vrot.slane %v6126_v21, 4  ;;  %v6131_v5 = vrot.slane %v6129_v54, 5  ;;  %v6139_v48 = vshrl.u32 %v5805_v25, 16 }
 0x30d   : > { %6591 = vst.msk [vmem:[#allocation3 + $0xf8] sm:$0xff] %vm956_vm7, %v12732_v1  ;;  %v12794_v1 = vpop.f32.mrb[73].mxu0  ;;  %7942 = vmatprep.mubr.bf16.mxu1 %v7631_v6  ;;  %v9508_v3 = vcombine.low %v6090_v62, %v6100_v7  ;;  %v6109_v24 = vrot.slane %v6108_v63, 4  ;;  %v6118_v36 = vor.u32 %v6117_v55, %v12780_v10  ;;  %v6137_v56 = vrot.slane %v6135_v28, 5  ;;  %v6733_v0 = vpop.permute.xlu0 %6732  ;;  %v5811_v22 = vld [vmem:[#allocation4 + $0xc4] sm:$0xf] }
 0x30e   : > { %6768 = vst.msk [vmem:[#allocation3 + $0xf8] sm:$0xff] %vm1280_vm8, %v12750_v32  ;;  %v12797_v33 = vpop.f32.mrb[74].mxu0  ;;  %v6132_v49 = vor.u32 %v6131_v5, %v6128_v12  ;;  %v6141_v32 = vrot.slane %v6139_v48, 4  ;;  %v6145_v50 = vshll.u32 %v5806_v11, 16  ;;  %v6150_v45 = vshrl.u32 %v5807_v57, 16 }
 0x30f   : > { %v12799_v58 = vpop.f32.mrb[75].mxu0  ;;  %6272 = vst.msk [vmem:[#allocation3 + $0x110] sm:$0xff] %vm408_vm6, %v9508_v3  ;;  %v5228_v47 = vpop.permute.xlu1 %5227  ;;  %v6119_v17 = vrot.slane %v6118_v36, 4  ;;  %v6123_v43 = vrot.slane %v6121_v27, 5  ;;  %v6153_v53 = vshll.u32 %v5807_v57, 16  ;;  %v6159_v37 = vshll.u32 %v5808_v38, 16 }
 0x310   : > { %6592 = vst.msk [vmem:[#allocation3 + $0x110] sm:$0xff] %vm956_vm7, %v6556_v14  ;;  %5264 = vst.msk [vmem:[#allocation3 + $0x108] sm:$0xff] %vm956_vm7, %v5228_v47  ;;  %v6114_v61 = vsel %vm10348_vm5, %v6109_v24, %v12780_v10  ;;  %v6133_v52 = vrot.slane %v6132_v49, 4  ;;  %v6142_v40 = vor.u32 %v6141_v32, %v6137_v56  ;;  %v6152_v15 = vrot.slane %v6150_v45, 4  ;;  %v5812_v11 = vld [vmem:[#allocation4 + $0xc8] sm:$0x1] }
 0x311   : > { %5584 = vst.msk [vmem:[#allocation3 + $0x108] sm:$0xff] %vm1280_vm8, %v12761_v19  ;;  %6769 = vst.msk [vmem:[#allocation3 + $0x110] sm:$0xff] %vm1280_vm8, %v6733_v0  ;;  %v6124_v44 = vsel %vm10348_vm5, %v6119_v17, %v6123_v43  ;;  %v6155_v29 = vrot.slane %v6153_v53, 5  ;;  %v6161_v41 = vrot.slane %v6159_v37, 5  ;;  %v6163_v25 = vshrl.u32 %v5808_v38, 16 }
 0x312   : > { %7943 = vmatmul.mubr.bf16.gmra.mrb[64].mxu1 %v7630_v42  ;;  %5760 = vst.msk [vmem:[#allocation3 + $0x108] sm:$0xff] %vm1458_vm9, %v12778_v59  ;;  %v9509_v30 = vcombine.low %v6114_v61, %v6124_v44  ;;  %v6143_v14 = vrot.slane %v6142_v40, 4  ;;  %v6147_v23 = vrot.slane %v6145_v50, 5  ;;  %v6169_v10 = vshll.u32 %v5809_v4, 16  ;;  %v7361_v62 = vld [vmem:[#allocation4 + $0xc4] sm:$0xf] }
 0x313   : > { %v7634_v26 = vld [vmem:[#allocation3 + $0xe0] sm:$0xff]  ;;  %v6156_v19 = vor.u32 %v6155_v29, %v6152_v15  ;;  %v6165_v16 = vrot.slane %v6163_v25, 4  ;;  %v6174_v39 = vshrl.u32 %v5810_v8, 16  ;;  %v6177_v27 = vshll.u32 %v5810_v8, 16  ;;  %v7362_v7 = vld [vmem:[#allocation4 + $0xc8] sm:$0x1] }
 0x314   : > { %7950 = vmatprep.mubr.bf16.mxu1 %v7634_v26  ;;  %6273 = vst.msk [vmem:[#allocation3 + $0x128] sm:$0xff] %vm408_vm6, %v9509_v30  ;;  %v6138_v21 = vsel %vm10348_vm5, %v6133_v52, %v6137_v56  ;;  %v6148_v54 = vsel %vm10348_vm5, %v6143_v14, %v6147_v23  ;;  %v6183_v57 = vshll.u32 %v5811_v22, 16  ;;  %v6187_v59 = vshrl.u32 %v5811_v22, 16  ;;  %v7360_v6 = vld [vmem:[#allocation4 + $0xc0] sm:$0xe]  ;;  %v7633_v4 = vld [vmem:[#allocation3 + $0xd8] sm:$0xff] }
 0x315   : > { %v9510_v63 = vcombine.low %v6138_v21, %v6148_v54  ;;  %v6157_v55 = vrot.slane %v6156_v19, 4  ;;  %v6166_v28 = vor.u32 %v6165_v16, %v6161_v41  ;;  %v6176_v38 = vrot.slane %v6174_v39, 4  ;;  %v7363_v24 = vld [vmem:[#allocation4 + $0xcc] sm:$0xe]  ;;  %v7364_v32 = vld [vmem:[#allocation4 + $0xd0] sm:$0xf] }
 0x316   : > { %v6179_v12 = vrot.slane %v6177_v27, 5  ;;  %v6185_v5 = vrot.slane %v6183_v57, 5  ;;  %v6189_v48 = vrot.slane %v6187_v59, 4  ;;  %v6193_v3 = vshll.u32 %v5812_v11, 16  ;;  %v7365_v43 = vld [vmem:[#allocation4 + $0xd4] sm:$0x1] }
 0x317   : > { %6274 = vst.msk [vmem:[#allocation3 + $0x140] sm:$0xff] %vm408_vm6, %v9510_v63  ;;  %v6162_v36 = vsel %vm10348_vm5, %v6157_v55, %v6161_v41  ;;  %v6167_v56 = vrot.slane %v6166_v28, 4  ;;  %v6171_v0 = vrot.slane %v6169_v10, 5  ;;  %v7514_v49 = vrot.slane %v7361_v62, 5  ;;  %v5550_v41 = vpop.permute.xlu1 %5549  ;;  %v7636_v57 = vld [vmem:[#allocation3 + $0xf0] sm:$0xff] }
 0x318   : > { %v6180_v50 = vor.u32 %v6179_v12, %v6176_v38  ;;  %v6190_v45 = vor.u32 %v6189_v48, %v6185_v5  ;;  %v6195_v47 = vrot.slane %v6193_v3, 5  ;;  %v9591_v17 = vrot.slane %v7360_v6, 9 }
 0x319   : > { %v6172_v53 = vsel %vm10348_vm5, %v6167_v56, %v6171_v0  ;;  %v7516_v37 = vrot.slane %v7514_v49, 4  ;;  %v7517_v42 = vrot.slane %v7362_v7, 5  ;;  %v9592_v61 = vrot.slane %v7363_v24, 9  ;;  %v7639_v3 = vld [vmem:[#allocation3 + $0x108] sm:$0xff] }
 0x31a   : > { %7951 = vmatmul.mubr.bf16.gmra.mrb[68].mxu1 %v7633_v4  ;;  %v9511_v52 = vcombine.low %v6162_v36, %v6172_v53  ;;  %v6181_v40 = vrot.slane %v6180_v50, 4  ;;  %v6191_v15 = vrot.slane %v6190_v45, 4  ;;  %v7521_v8 = vrot.slane %v7364_v32, 5 }
 0x31b   : > { %v7515_v26 = vsel %vm10288_vm2, %v9591_v17, %v7514_v49  ;;  %v7518_v44 = vsel %vm10288_vm2, %v7516_v37, %v7517_v42  ;;  %v7524_v29 = vrot.slane %v7365_v43, 5  ;;  %v5726_v27 = vpop.permute.xlu1 %5725  ;;  %v9645_v49 = vld [vmem:[%s10298_s12 + $0xc] sm:$0xf] }
 0x31c   : > { %6275 = vst.msk [vmem:[#allocation3 + $0x158] sm:$0xff] %vm408_vm6, %v9511_v52  ;;  %v6186_v25 = vsel %vm10348_vm5, %v6181_v40, %v6185_v5  ;;  %v6196_v22 = vsel %vm10348_vm5, %v6191_v15, %v6195_v47  ;;  %v9607_v30 = vcombine.low %v7515_v26, %v7518_v44  ;;  %v7522_v10 = vsel %vm10288_vm2, %v9592_v61, %v7521_v8  ;;  %v9646_v47 = vld [vmem:[%s10298_s12 + $0x10] sm:$0xf]  ;;  %v9647_v26 = vld [vmem:[%s10298_s12 + $0x14] sm:$0x1] }
 0x31d   : > { %v7275_v14 = vpop.permute.xlu0 %7274  ;;  %v9512_v23 = vcombine.low %v6186_v25, %v6196_v22  ;;  %v7523_v19 = vrot.slane %v7521_v8, 4  ;;  %v8295_v17 = vshrl.u32 %v9645_v49, 16  ;;  %v8298_v43 = vshll.u32 %v9645_v49, 16 }
 0x31e   : > { %7312 = vst.msk [vmem:[#allocation3 + $0xf8] sm:$0xff] %vm1458_vm9, %v7275_v14  ;;  %v8304_v53 = vshll.u32 %v9646_v47, 16  ;;  %v8308_v37 = vshrl.u32 %v9646_v47, 16 }
 0x31f   : > { %7604 = vst.msk [vmem:[#allocation3 + $0x160] sm:$0xff] %vm408_vm6, %v9607_v30  ;;  %6276 = vst.msk [vmem:[#allocation3 + $0x170] sm:$0xff] %vm408_vm6, %v9512_v23  ;;  %v7525_v16 = vsel %vm10288_vm2, %v7523_v19, %v7524_v29  ;;  %v8297_v61 = vrot.slane %v8295_v17, 4  ;;  %v8300_v52 = vrot.slane %v8298_v43, 5  ;;  %v9648_v23 = vld [vmem:[%s10298_s12 + $0x18] sm:$0xf] }
 0x320   : > { %v9608_v11 = vcombine.low %v7522_v10, %v7525_v16  ;;  %v8306_v40 = vrot.slane %v8304_v53, 5  ;;  %v8310_v15 = vrot.slane %v8308_v37, 4 }
 0x321   : > { %v6558_v39 = vpop.permute.xlu0 %6557  ;;  %v8301_v8 = vor.u32 %v8300_v52, %v8297_v61 }
 0x322   : > { %6593 = vst.msk [vmem:[#allocation3 + $0x128] sm:$0xff] %vm956_vm7, %v6558_v39  ;;  %v8311_v29 = vor.u32 %v8310_v15, %v8306_v40 }
 0x323   : > { %7605 = vst.msk [vmem:[#allocation3 + $0x178] sm:$0xff] %vm408_vm6, %v9608_v11  ;;  %v8302_v22 = vrot.slane %v8301_v8, 4 }
 0x324   : > { %v8312_v11 = vrot.slane %v8311_v29, 4 }
 0x325   : > { %v6735_v21 = vpop.permute.xlu0 %6734  ;;  %v7637_v54 = vld [vmem:[#allocation3 + $0xf8] sm:$0xff] }
 0x326   : > { %6770 = vst.msk [vmem:[#allocation3 + $0x128] sm:$0xff] %vm1280_vm8, %v6735_v21  ;;  %7958 = vmatprep.mubr.bf16.mxu1 %v7637_v54 }
 0x327   : > { %7959 = vmatmul.mubr.bf16.gmra.mrb[72].mxu1 %v7636_v57  ;;  %v12880_v57 = vld [vmem:[%s13206_s5] ss:$0 sm:$0xff] }
 0x328   : > { %v5230_v59 = vpop.permute.xlu1 %5229 }
 0x329   : > { %5265 = vst.msk [vmem:[#allocation3 + $0x120] sm:$0xff] %vm956_vm7, %v5230_v59  ;;  %v8307_v59 = vsel %vm10348_vm5, %v8302_v22, %v8306_v40  ;;  %v9650_v40 = vld [vmem:[%s10298_s12 + $0x20] sm:$0x1] }
 0x32a   : > { %5585 = vst.msk [vmem:[#allocation3 + $0x120] sm:$0xff] %vm1280_vm8, %v5550_v41  ;;  %v8314_v41 = vshll.u32 %v9647_v26, 16 }
 0x32b   : > { %5761 = vst.msk [vmem:[#allocation3 + $0x120] sm:$0xff] %vm1458_vm9, %v5726_v27  ;;  %v9649_v27 = vld [vmem:[%s10298_s12 + $0x1c] sm:$0xf] }
 0x32c   : > { %v5552_v2 = vpop.permute.xlu1 %5551  ;;  %v8316_v39 = vrot.slane %v8314_v41, 5  ;;  %v8332_v49 = vshrl.u32 %v9649_v27, 16  ;;  %v8338_v41 = vshll.u32 %v9650_v40, 16 }
 0x32e   : > { %v8334_v52 = vrot.slane %v8332_v49, 4 }
 0x330   : > { %v5728_v6 = vpop.permute.xlu1 %5727 }
 0x332   : > { %v7642_v4 = vld [vmem:[#allocation3 + $0x120] sm:$0xff] }
 0x333   : > { %v12846_v62 = vpop.f32.mrb[76].mxu0 }
 0x334   : > { %v12848_v55 = vpop.f32.mrb[77].mxu0 }
 0x335   : > { %v7277_v63 = vpop.permute.xlu0 %7276  ;;  %v12851_v28 = vpop.f32.mrb[78].mxu0 }
 0x336   : > { %7313 = vst.msk [vmem:[#allocation3 + $0x110] sm:$0xff] %vm1458_vm9, %v7277_v63  ;;  %v12853_v38 = vpop.f32.mrb[79].mxu0 }
 0x339   : > { %v6560_v7 = vpop.permute.xlu0 %6559 }
 0x33a   : > { %6594 = vst.msk [vmem:[#allocation3 + $0x140] sm:$0xff] %vm956_vm7, %v6560_v7  ;;  %v8319_v7 = vshrl.u32 %v9648_v23, 16 }
 0x33c   : > { %v8321_v17 = vrot.slane %v8319_v7, 4 }
 0x33d   : > { %v6737_v12 = vpop.permute.xlu0 %6736  ;;  %v7640_v5 = vld [vmem:[#allocation3 + $0x110] sm:$0xff]  ;;  %v5232_v48 = vpop.permute.xlu1 %5231 }
 0x33e   : > { %6771 = vst.msk [vmem:[#allocation3 + $0x140] sm:$0xff] %vm1280_vm8, %v6737_v12  ;;  %7966 = vmatprep.mubr.bf16.mxu1 %v7640_v5  ;;  %v8322_v12 = vshll.u32 %v9648_v23, 16 }
 0x33f   : > { %5266 = vst.msk [vmem:[#allocation3 + $0x138] sm:$0xff] %vm956_vm7, %v5232_v48  ;;  %7967 = vmatmul.mubr.bf16.gmra.mrb[76].mxu1 %v7639_v3  ;;  %v12893_v48 = vld [vmem:[%s13207_s6] ss:$0 sm:$0xff] }
 0x340   : > { %5586 = vst.msk [vmem:[#allocation3 + $0x138] sm:$0xff] %vm1280_vm8, %v5552_v2  ;;  %v8324_v43 = vrot.slane %v8322_v12, 5 }
 0x341   : > { %5762 = vst.msk [vmem:[#allocation3 + $0x138] sm:$0xff] %vm1458_vm9, %v5728_v6  ;;  %v5554_v24 = vpop.permute.xlu1 %5553 }
 0x342   : > { %v8325_v8 = vor.u32 %v8324_v43, %v8321_v17  ;;  %v9652_v17 = vld [vmem:[%s10298_s12 + $0x28] sm:$0xf] }
 0x344   : > { %v8326_v22 = vrot.slane %v8325_v8, 4 }
 0x345   : > { %v5730_v56 = vpop.permute.xlu1 %5729 }
 0x347   : > { %v7279_v36 = vpop.permute.xlu0 %7278 }
 0x348   : > { %7314 = vst.msk [vmem:[#allocation3 + $0x128] sm:$0xff] %vm1458_vm9, %v7279_v36 }
 0x34b   : > { %v6562_v0 = vpop.permute.xlu0 %6561 }
 0x34c   : > { %6595 = vst.msk [vmem:[#allocation3 + $0x158] sm:$0xff] %vm956_vm7, %v6562_v0  ;;  %v8710_v0 = vunpack.c.l.bf16 %v8307_v59 }
 0x34e   : > { %v5234_v32 = vpop.permute.xlu1 %5233 }
 0x34f   : > { %5267 = vst.msk [vmem:[#allocation3 + $0x150] sm:$0xff] %vm956_vm7, %v5234_v32  ;;  %v6739_v50 = vpop.permute.xlu0 %6738  ;;  %v7643_v45 = vld [vmem:[#allocation3 + $0x128] sm:$0xff] }
 0x350   : > { %5587 = vst.msk [vmem:[#allocation3 + $0x150] sm:$0xff] %vm1280_vm8, %v5554_v24  ;;  %6772 = vst.msk [vmem:[#allocation3 + $0x158] sm:$0xff] %vm1280_vm8, %v6739_v50  ;;  %7974 = vmatprep.mubr.bf16.mxu1 %v7643_v45  ;;  %v8328_v24 = vshll.u32 %v9649_v27, 16  ;;  %v7645_v45 = vld [vmem:[#allocation3 + $0x138] sm:$0xff] }
 0x351   : > { %5763 = vst.msk [vmem:[#allocation3 + $0x150] sm:$0xff] %vm1458_vm9, %v5730_v56  ;;  %7975 = vmatmul.mubr.bf16.gmra.mrb[80].mxu1 %v7642_v4 }
 0x352   : > { %v8330_v61 = vrot.slane %v8328_v24, 5 }
 0x353   : > { %v5236_v42 = vpop.permute.xlu1 %5235 }
 0x354   : > { %5268 = vst.msk [vmem:[#allocation3 + $0x168] sm:$0xff] %vm956_vm7, %v5236_v42  ;;  %v8335_v29 = vor.u32 %v8334_v52, %v8330_v61  ;;  %v7653_v52 = vld [vmem:[#allocation3 + $0x178] sm:$0xff] }
 0x35a   : > { %v5556_v44 = vpop.permute.xlu1 %5555 }
 0x35b   : > { %v7281_v25 = vpop.permute.xlu0 %7280  ;;  %5588 = vst.msk [vmem:[#allocation3 + $0x168] sm:$0xff] %vm1280_vm8, %v5556_v44 }
 0x35c   : > { %7315 = vst.msk [vmem:[#allocation3 + $0x140] sm:$0xff] %vm1458_vm9, %v7281_v25 }
 0x35d   : > { %v9874_v30 = vpop.f32.mrb[32].mxu1 }
 0x35e   : > { %v9875_v14 = vpop.f32.mrb[33].mxu1  ;;  %v5732_v10 = vpop.permute.xlu1 %5731 }
 0x35f   : > { %v9876_v19 = vadd.f32 %v9875_v14, %v9874_v30  ;;  %v9877_v16 = vpop.f32.mrb[34].mxu1  ;;  %v6564_v21 = vpop.permute.xlu0 %6563  ;;  %5764 = vst.msk [vmem:[#allocation3 + $0x168] sm:$0xff] %vm1458_vm9, %v5732_v10  ;;  %v7648_v10 = vld [vmem:[#allocation3 + $0x150] sm:$0xff] }
 0x360   : > { %v12875_v54 = vpop.f32.mrb[80].mxu0  ;;  %6596 = vst.msk [vmem:[#allocation3 + $0x170] sm:$0xff] %vm956_vm7, %v6564_v21  ;;  %v9878_v6 = vpop.f32.mrb[35].mxu1  ;;  %v8331_v21 = vsel %vm10348_vm5, %v8326_v22, %v8330_v61  ;;  %v8356_v61 = vshrl.u32 %v9652_v17, 16 }
 0x361   : > { %v12885_v2 = vpop.f32.mrb[81].mxu0  ;;  %v8042_v63 = vadd.f32 %v9876_v19, %v12528_v18  ;;  %v9879_v3 = vadd.f32 %v9878_v6, %v9877_v16  ;;  %v8317_v18 = vsel %vm10348_vm5, %v8312_v11, %v8316_v39  ;;  %v8336_v16 = vrot.slane %v8335_v29, 4 }
 0x362   : > { %v12888_v5 = vpop.f32.mrb[82].mxu0  ;;  %v8711_v37 = vunpack.c.l.bf16 %v8317_v18  ;;  %v8340_v11 = vrot.slane %v8338_v41, 5  ;;  %v8358_v8 = vrot.slane %v8356_v61, 4  ;;  %v9656_v61 = vld [vmem:[%s10298_s12 + $0x38] sm:$0x1] }
 0x363   : > { %v12895_v36 = vpop.f32.mrb[83].mxu0  ;;  %v8175_v56 = vmul.f32 %v12880_v57, %v8042_v63  ;;  %v7646_v32 = vld [vmem:[#allocation3 + $0x140] sm:$0xff]  ;;  %v8045_v50 = vadd.f32 %v9879_v3, %v12540_v34  ;;  %v8712_v3 = vunpack.c.l.bf16 %v8331_v21 }
 0x364   : > { %7982 = vmatprep.mubr.bf16.mxu1 %v7646_v32  ;;  %v8341_v7 = vsel %vm10348_vm5, %v8336_v16, %v8340_v11 }
 0x365   : > { %v8214_v47 = vadd.f32 %v12893_v48, %v8175_v56  ;;  %v7283_v4 = vpop.permute.xlu0 %7282  ;;  %7983 = vmatmul.mubr.bf16.gmra.mrb[84].mxu1 %v7645_v45  ;;  %v8176_v53 = vmul.f32 %v12880_v57, %v8045_v50  ;;  %v8713_v49 = vunpack.c.l.bf16 %v8341_v7  ;;  %v7650_v50 = vld [vmem:[#allocation3 + $0x160] sm:$0xff] }
 0x366   : > { %7316 = vst.msk [vmem:[#allocation3 + $0x158] sm:$0xff] %vm1458_vm9, %v7283_v4  ;;  %v7651_v32 = vld [vmem:[#allocation3 + $0x168] sm:$0xff] }
 0x367   : > { %v8742_v42 = vadd.f32 %v8710_v0, %v8214_v47  ;;  %v8215_v34 = vadd.f32 %v12893_v48, %v8176_v53 }
 0x369   : > { %v8774_v15 = vmax.f32 %v8742_v42, 0.0  ;;  %v6741_v26 = vpop.permute.xlu0 %6740  ;;  %v8743_v44 = vadd.f32 %v8711_v37, %v8215_v34  ;;  %v8352_v42 = vshll.u32 %v9652_v17, 16 }
 0x36a   : > { %6773 = vst.msk [vmem:[#allocation3 + $0x170] sm:$0xff] %vm1280_vm8, %v6741_v26  ;;  %v9653_v26 = vld [vmem:[%s10298_s12 + $0x2c] sm:$0x1] }
 0x36b   : > { %8806 = vst.msk [vmem:[%s12908_s21] sm:$0xff] %vm408_vm6, %v8774_v15  ;;  %v8775_v25 = vmax.f32 %v8743_v44, 0.0  ;;  %v8354_v15 = vrot.slane %v8352_v42, 5  ;;  %v8362_v41 = vshll.u32 %v9653_v26, 16  ;;  %v9657_v26 = vld [vmem:[%s10298_s12 + $0x3c] sm:$0xf] }
 0x36d   : > { %v7285_v30 = vpop.permute.xlu0 %7284  ;;  %v7649_v14 = vld [vmem:[#allocation3 + $0x158] sm:$0xff]  ;;  %8807 = vst.msk [vmem:[%s12908_s21 + $0x8] sm:$0xff] %vm408_vm6, %v8775_v25  ;;  %v8359_v29 = vor.u32 %v8358_v8, %v8354_v15 }
 0x36e   : > { %v9880_v23 = vpop.f32.mrb[36].mxu1  ;;  %7317 = vst.msk [vmem:[#allocation3 + $0x170] sm:$0xff] %vm1458_vm9, %v7285_v30  ;;  %7990 = vmatprep.mubr.bf16.mxu1 %v7649_v14 }
 0x36f   : > { %v9881_v19 = vpop.f32.mrb[37].mxu1  ;;  %7991 = vmatmul.mubr.bf16.gmra.mrb[88].mxu1 %v7648_v10  ;;  %v8360_v14 = vrot.slane %v8359_v29, 4 }
 0x370   : > { %v9882_v39 = vadd.f32 %v9881_v19, %v9880_v23  ;;  %v9883_v27 = vpop.f32.mrb[38].mxu1  ;;  %v8364_v23 = vrot.slane %v8362_v41, 5 }
 0x371   : > { %v9884_v59 = vpop.f32.mrb[39].mxu1 }
 0x372   : > { %v8050_v63 = vadd.f32 %v12523_v51, %v9882_v39  ;;  %v9885_v6 = vadd.f32 %v9884_v59, %v9883_v27  ;;  %v9651_v51 = vld [vmem:[%s10298_s12 + $0x24] sm:$0xf]  ;;  %v8365_v21 = vsel %vm10348_vm5, %v8360_v14, %v8364_v23 }
 0x373   : > { %v8343_v4 = vshrl.u32 %v9651_v51, 16  ;;  %v8346_v53 = vshll.u32 %v9651_v51, 16 }
 0x374   : > { %v8177_v12 = vmul.f32 %v12880_v57, %v8050_v63  ;;  %v8053_v24 = vadd.f32 %v12533_v13, %v9885_v6 }
 0x375   : > { %v7652_v56 = vld [vmem:[#allocation3 + $0x170] sm:$0xff]  ;;  %v8345_v34 = vrot.slane %v8343_v4, 4  ;;  %v8348_v40 = vrot.slane %v8346_v53, 5 }
 0x376   : > { %v8216_v0 = vadd.f32 %v12893_v48, %v8177_v12  ;;  %v8178_v18 = vmul.f32 %v12880_v57, %v8053_v24  ;;  %7998 = vmatprep.mubr.bf16.mxu1 %v7652_v56  ;;  %v9654_v56 = vld [vmem:[%s10298_s12 + $0x30] sm:$0xf] }
 0x377   : > { %7999 = vmatmul.mubr.bf16.gmra.mrb[92].mxu1 %v7651_v32  ;;  %v8349_v44 = vor.u32 %v8348_v40, %v8345_v34  ;;  %v9655_v32 = vld [vmem:[%s10298_s12 + $0x34] sm:$0xf]  ;;  %v8386_v40 = vshll.u32 %v9656_v61, 16 }
 0x378   : > { %v8744_v45 = vadd.f32 %v8712_v3, %v8216_v0  ;;  %v8217_v47 = vadd.f32 %v12893_v48, %v8178_v18  ;;  %10056 = vmatprep.mubr.msk.bf16.mxu1 %vm408_vm6, %v7650_v50  ;;  %v8715_v3 = vunpack.c.l.bf16 %v8365_v21 }
 0x379   : > { %v8350_v25 = vrot.slane %v8349_v44, 4  ;;  %v8388_v41 = vrot.slane %v8386_v40, 5 }
 0x37a   : > { %v8776_v13 = vmax.f32 %v8744_v45, 0.0  ;;  %v8745_v43 = vadd.f32 %v8713_v49, %v8217_v47  ;;  %v8367_v45 = vshrl.u32 %v9654_v56, 16  ;;  %v8370_v47 = vshll.u32 %v9654_v56, 16 }
 0x37b   : > { %v8355_v16 = vsel %vm10348_vm5, %v8350_v25, %v8354_v15 }
 0x37c   : > { %8808 = vst.msk [vmem:[%s12908_s21 + $0x10] sm:$0xff] %vm408_vm6, %v8776_v13  ;;  %v8777_v37 = vmax.f32 %v8745_v43, 0.0  ;;  %v8714_v63 = vunpack.c.l.bf16 %v8355_v16  ;;  %v8376_v13 = vshll.u32 %v9655_v32, 16  ;;  %v8380_v43 = vshrl.u32 %v9655_v32, 16 }
 0x37d   : > { %v8369_v4 = vrot.slane %v8367_v45, 4  ;;  %v8372_v53 = vrot.slane %v8370_v47, 5  ;;  %v9659_v45 = vld [vmem:[%s10298_s12 + $0x44] sm:$0x1] }
 0x37e   : > { %8809 = vst.msk [vmem:[%s12908_s21 + $0x18] sm:$0xff] %vm408_vm6, %v8777_v37  ;;  %v8378_v37 = vrot.slane %v8376_v13, 5  ;;  %v8382_v42 = vrot.slane %v8380_v43, 4  ;;  %v8410_v43 = vshll.u32 %v9659_v45, 16 }
 0x37f   : > { %10057 = vmatmul.mubr.msk.bf16.vlgmr.msra.gmra.mrb[96].mxu1 %vm408_vm6, %v7653_v52  ;;  %v8373_v52 = vor.u32 %v8372_v53, %v8369_v4 }
 0x380   : > { %v8383_v34 = vor.u32 %v8382_v42, %v8378_v37  ;;  %v8412_v61 = vrot.slane %v8410_v43, 5 }
 0x381   : > { %v8374_v15 = vrot.slane %v8373_v52, 4 }
 0x382   : > { %v8384_v29 = vrot.slane %v8383_v34, 4 }
 0x383   : > { %v8379_v14 = vsel %vm10348_vm5, %v8374_v15, %v8378_v37 }
 0x386   : > { %v9886_v22 = vpop.f32.mrb[40].mxu1 }
 0x387   : > { %v9887_v30 = vpop.f32.mrb[41].mxu1 }
 0x388   : > { %v9888_v10 = vadd.f32 %v9887_v30, %v9886_v22  ;;  %v9889_v19 = vpop.f32.mrb[42].mxu1  ;;  %v9658_v30 = vld [vmem:[%s10298_s12 + $0x40] sm:$0xf] }
 0x389   : > { %v9890_v11 = vpop.f32.mrb[43].mxu1 }
 0x38a   : > { %v8058_v39 = vadd.f32 %v9888_v10, %v12676_v46  ;;  %v9891_v27 = vadd.f32 %v9890_v11, %v9889_v19  ;;  %v8391_v10 = vshrl.u32 %v9657_v26, 16  ;;  %v8394_v19 = vshll.u32 %v9657_v26, 16 }
 0x38c   : > { %v8179_v59 = vmul.f32 %v12880_v57, %v8058_v39  ;;  %v8061_v6 = vadd.f32 %v9891_v27, %v12685_v60  ;;  %v8389_v39 = vsel %vm10348_vm5, %v8384_v29, %v8388_v41  ;;  %v8400_v27 = vshll.u32 %v9658_v30, 16 }
 0x38d   : > { %v8717_v56 = vunpack.c.l.bf16 %v8389_v39 }
 0x38e   : > { %v8218_v7 = vadd.f32 %v12893_v48, %v8179_v59  ;;  %v8180_v12 = vmul.f32 %v12880_v57, %v8061_v6  ;;  %v8716_v59 = vunpack.c.l.bf16 %v8379_v14  ;;  %v8404_v6 = vshrl.u32 %v9658_v30, 16 }
 0x38f   : > { %v12946_v24 = vpop.f32.mrb[84].mxu0  ;;  %v8402_v32 = vrot.slane %v8400_v27, 5 }
 0x390   : > { %v12949_v46 = vpop.f32.mrb[85].mxu0  ;;  %v8746_v0 = vadd.f32 %v8714_v63, %v8218_v7  ;;  %v8219_v18 = vadd.f32 %v12893_v48, %v8180_v12  ;;  %v8393_v7 = vrot.slane %v8391_v10, 4  ;;  %v8396_v12 = vrot.slane %v8394_v19, 5 }
 0x391   : > { %v12952_v49 = vpop.f32.mrb[86].mxu0 }
 0x392   : > { %v12955_v60 = vpop.f32.mrb[87].mxu0  ;;  %v8778_v51 = vmax.f32 %v8746_v0, 0.0  ;;  %v8747_v50 = vadd.f32 %v8715_v3, %v8219_v18 }
 0x394   : > { %8810 = vst.msk [vmem:[%s12908_s21 + $0x20] sm:$0xff] %vm408_vm6, %v8778_v51  ;;  %v8779_v17 = vmax.f32 %v8747_v50, 0.0  ;;  %v8406_v51 = vrot.slane %v8404_v6, 4  ;;  %v8397_v50 = vor.u32 %v8396_v12, %v8393_v7 }
 0x396   : > { %8811 = vst.msk [vmem:[%s12908_s21 + $0x28] sm:$0xff] %vm408_vm6, %v8779_v17  ;;  %v8407_v13 = vor.u32 %v8406_v51, %v8402_v32  ;;  %v8398_v4 = vrot.slane %v8397_v50, 4 }
 0x398   : > { %v8408_v42 = vrot.slane %v8407_v13, 4  ;;  %v8403_v34 = vsel %vm10348_vm5, %v8398_v4, %v8402_v32  ;;  %v9662_v32 = vld [vmem:[%s10298_s12 + $0x50] sm:$0x1] }
 0x399   : > { %v8718_v41 = vunpack.c.l.bf16 %v8403_v34  ;;  %v8434_v50 = vshll.u32 %v9662_v32, 16 }
 0x39b   : > { %v8436_v4 = vrot.slane %v8434_v50, 5 }
 0x3a0   : > { %v9892_v8 = vpop.f32.mrb[44].mxu1 }
 0x3a1   : > { %v9893_v44 = vpop.f32.mrb[45].mxu1 }
 0x3a2   : > { %v9894_v25 = vadd.f32 %v9893_v44, %v9892_v8  ;;  %v9895_v22 = vpop.f32.mrb[46].mxu1  ;;  %v9660_v8 = vld [vmem:[%s10298_s12 + $0x48] sm:$0xf] }
 0x3a3   : > { %v9896_v23 = vpop.f32.mrb[47].mxu1  ;;  %v8415_v10 = vshrl.u32 %v9660_v8, 16  ;;  %v8418_v19 = vshll.u32 %v9660_v8, 16 }
 0x3a4   : > { %v8066_v16 = vadd.f32 %v12672_v31, %v9894_v25  ;;  %v9897_v11 = vadd.f32 %v9896_v23, %v9895_v22  ;;  %v8413_v25 = vsel %vm10348_vm5, %v8408_v42, %v8412_v61  ;;  %v9661_v23 = vld [vmem:[%s10298_s12 + $0x4c] sm:$0xf] }
 0x3a5   : > { %v8719_v27 = vunpack.c.l.bf16 %v8413_v25  ;;  %v8417_v6 = vrot.slane %v8415_v10, 4  ;;  %v8420_v7 = vrot.slane %v8418_v19, 5 }
 0x3a6   : > { %v8181_v21 = vmul.f32 %v12880_v57, %v8066_v16  ;;  %v8069_v63 = vadd.f32 %v12678_v20, %v9897_v11 }
 0x3a8   : > { %v8220_v3 = vadd.f32 %v12893_v48, %v8181_v21  ;;  %v8182_v31 = vmul.f32 %v12880_v57, %v8069_v63  ;;  %v8424_v21 = vshll.u32 %v9661_v23, 16 }
 0x3aa   : > { %v8748_v0 = vadd.f32 %v8716_v59, %v8220_v3  ;;  %v8221_v18 = vadd.f32 %v12893_v48, %v8182_v31  ;;  %v8428_v59 = vshrl.u32 %v9661_v23, 16  ;;  %v8426_v31 = vrot.slane %v8424_v21, 5  ;;  %v9666_v21 = vld [vmem:[%s10298_s12 + $0x60] sm:$0xf] }
 0x3ac   : > { %v8780_v47 = vmax.f32 %v8748_v0, 0.0  ;;  %v8749_v17 = vadd.f32 %v8717_v56, %v8221_v18  ;;  %v8430_v56 = vrot.slane %v8428_v59, 4  ;;  %v8421_v18 = vor.u32 %v8420_v7, %v8417_v6  ;;  %v9667_v59 = vld [vmem:[%s10298_s12 + $0x64] sm:$0xf] }
 0x3ae   : > { %8812 = vst.msk [vmem:[%s12908_s21 + $0x30] sm:$0xff] %vm408_vm6, %v8780_v47  ;;  %v8781_v20 = vmax.f32 %v8749_v17, 0.0  ;;  %v8431_v51 = vor.u32 %v8430_v56, %v8426_v31  ;;  %v8422_v45 = vrot.slane %v8421_v18, 4  ;;  %v9663_v47 = vld [vmem:[%s10298_s12 + $0x54] sm:$0xf]  ;;  %v8476_v56 = vshrl.u32 %v9667_v59, 16 }
 0x3af   : > { %v9664_v17 = vld [vmem:[%s10298_s12 + $0x58] sm:$0xf] }
 0x3b0   : > { %8813 = vst.msk [vmem:[%s12908_s21 + $0x38] sm:$0xff] %vm408_vm6, %v8781_v20  ;;  %v9898_v53 = vpop.f32.mrb[48].mxu1  ;;  %v8432_v43 = vrot.slane %v8431_v51, 4  ;;  %v8427_v61 = vsel %vm10348_vm5, %v8422_v45, %v8426_v31  ;;  %v8448_v34 = vshll.u32 %v9664_v17, 16  ;;  %v8472_v31 = vshll.u32 %v9667_v59, 16 }
 0x3b1   : > { %v9899_v37 = vpop.f32.mrb[49].mxu1 }
 0x3b2   : > { %v9900_v52 = vadd.f32 %v9899_v37, %v9898_v53  ;;  %v9901_v40 = vpop.f32.mrb[50].mxu1  ;;  %v8439_v53 = vshrl.u32 %v9663_v47, 16  ;;  %v8442_v37 = vshll.u32 %v9663_v47, 16  ;;  %v8450_v10 = vrot.slane %v8448_v34, 5  ;;  %v9670_v34 = vld [vmem:[%s10298_s12 + $0x70] sm:$0xf] }
 0x3b3   : > { %v9902_v15 = vpop.f32.mrb[51].mxu1 }
 0x3b4   : > { %v8074_v26 = vadd.f32 %v9900_v52, %v12794_v1  ;;  %v9903_v44 = vadd.f32 %v9902_v15, %v9901_v40  ;;  %v8452_v40 = vshrl.u32 %v9664_v17, 16  ;;  %v8441_v25 = vrot.slane %v8439_v53, 4 }
 0x3b6   : > { %v12983_v29 = vpop.f32.mrb[88].mxu0  ;;  %v8183_v30 = vmul.f32 %v12880_v57, %v8074_v26  ;;  %v8077_v14 = vadd.f32 %v9903_v44, %v12799_v58  ;;  %v8720_v44 = vunpack.c.l.bf16 %v8427_v61  ;;  %v8454_v19 = vrot.slane %v8452_v40, 4 }
 0x3b7   : > { %v12987_v22 = vpop.f32.mrb[89].mxu0 }
 0x3b8   : > { %v12992_v16 = vpop.f32.mrb[90].mxu0  ;;  %v8222_v11 = vadd.f32 %v12893_v48, %v8183_v30  ;;  %v8184_v39 = vmul.f32 %v12880_v57, %v8077_v14  ;;  %v8444_v30 = vrot.slane %v8442_v37, 5  ;;  %v8455_v7 = vor.u32 %v8454_v19, %v8450_v10  ;;  %v9669_v37 = vld [vmem:[%s10298_s12 + $0x6c] sm:$0xf] }
 0x3b9   : > { %v12994_v1 = vpop.f32.mrb[91].mxu0  ;;  %v8500_v19 = vshrl.u32 %v9670_v34, 16 }
 0x3ba   : > { %v8750_v63 = vadd.f32 %v8718_v41, %v8222_v11  ;;  %v8223_v58 = vadd.f32 %v12893_v48, %v8184_v39  ;;  %v8437_v41 = vsel %vm10348_vm5, %v8432_v43, %v8436_v4  ;;  %v9665_v11 = vld [vmem:[%s10298_s12 + $0x5c] sm:$0x1]  ;;  %v8456_v50 = vrot.slane %v8455_v7, 4  ;;  %v9668_v4 = vld [vmem:[%s10298_s12 + $0x68] sm:$0x1] }
 0x3bc   : > { %v8782_v12 = vmax.f32 %v8750_v63, 0.0  ;;  %v8751_v3 = vadd.f32 %v8719_v27, %v8223_v58  ;;  %v8445_v63 = vor.u32 %v8444_v30, %v8441_v25  ;;  %v8487_v30 = vshrl.u32 %v9669_v37, 16 }
 0x3be   : > { %8814 = vst.msk [vmem:[%s12908_s21 + $0x40] sm:$0xff] %vm408_vm6, %v8782_v12  ;;  %v8783_v0 = vmax.f32 %v8751_v3, 0.0  ;;  %v8458_v12 = vshll.u32 %v9665_v11, 16  ;;  %v8463_v3 = vshrl.u32 %v9666_v21, 16  ;;  %v8446_v51 = vrot.slane %v8445_v63, 4 }
 0x3c0   : > { %8815 = vst.msk [vmem:[%s12908_s21 + $0x48] sm:$0xff] %vm408_vm6, %v8783_v0  ;;  %v8460_v45 = vrot.slane %v8458_v12, 5  ;;  %v8465_v47 = vrot.slane %v8463_v3, 4  ;;  %v8451_v61 = vsel %vm10348_vm5, %v8446_v51, %v8450_v10 }
 0x3c1   : > { %v8722_v11 = vunpack.c.l.bf16 %v8451_v61 }
 0x3c5   : > { %v9904_v20 = vpop.f32.mrb[52].mxu1 }
 0x3c6   : > { %v9905_v13 = vpop.f32.mrb[53].mxu1 }
 0x3c7   : > { %v9906_v42 = vadd.f32 %v9905_v13, %v9904_v20  ;;  %v9907_v52 = vpop.f32.mrb[54].mxu1  ;;  %v13021_v20 = vrot.slane %v8472_v31, 5  ;;  %v8478_v13 = vrot.slane %v8476_v56, 4  ;;  %v8502_v31 = vrot.slane %v8500_v19, 4 }
 0x3c8   : > { %v9908_v15 = vpop.f32.mrb[55].mxu1 }
 0x3c9   : > { %v8082_v8 = vadd.f32 %v12788_v35, %v9906_v42  ;;  %v9909_v26 = vadd.f32 %v9908_v15, %v9907_v52  ;;  %v8721_v35 = vunpack.c.l.bf16 %v8437_v41  ;;  %v8461_v15 = vsel %vm10348_vm5, %v8456_v50, %v8460_v45 }
 0x3cb   : > { %v8185_v14 = vmul.f32 %v12880_v57, %v8082_v8  ;;  %v8085_v23 = vadd.f32 %v12797_v33, %v9909_v26  ;;  %v8466_v33 = vshll.u32 %v9666_v21, 16  ;;  %v8479_v26 = vor.u32 %v8478_v13, %v13021_v20 }
 0x3cd   : > { %v8224_v39 = vadd.f32 %v12893_v48, %v8185_v14  ;;  %v8186_v27 = vmul.f32 %v12880_v57, %v8085_v23  ;;  %v8468_v17 = vrot.slane %v8466_v33, 5  ;;  %v8490_v14 = vshll.u32 %v9669_v37, 16  ;;  %v9671_v33 = vld [vmem:[%s10298_s12 + $0x74] sm:$0x1] }
 0x3ce   : > { %v8496_v23 = vshll.u32 %v9670_v34, 16  ;;  %v8480_v59 = vrot.slane %v8479_v26, 4  ;;  %v8506_v37 = vshll.u32 %v9671_v33, 16 }
 0x3cf   : > { %v8752_v58 = vadd.f32 %v8720_v44, %v8224_v39  ;;  %v8225_v6 = vadd.f32 %v12893_v48, %v8186_v27  ;;  %v8469_v8 = vor.u32 %v8468_v17, %v8465_v47  ;;  %v8482_v44 = vshll.u32 %v9668_v4, 16  ;;  %v9672_v27 = vld [vmem:[%s10298_s12 + $0x78] sm:$0xf]  ;;  %v9673_v17 = vld [vmem:[%s10298_s12 + $0x7c] sm:$0xf] }
 0x3d0   : > { %v8492_v7 = vrot.slane %v8490_v14, 5  ;;  %v8498_v3 = vrot.slane %v8496_v23, 5  ;;  %v8511_v56 = vshrl.u32 %v9672_v27, 16  ;;  %v8508_v19 = vrot.slane %v8506_v37, 5 }
 0x3d1   : > { %v8784_v0 = vmax.f32 %v8752_v58, 0.0  ;;  %v8753_v18 = vadd.f32 %v8721_v35, %v8225_v6  ;;  %v8723_v35 = vunpack.c.l.bf16 %v8461_v15  ;;  %v8470_v21 = vrot.slane %v8469_v8, 4 }
 0x3d2   : > { %v8484_v63 = vrot.slane %v8482_v44, 5  ;;  %v8489_v6 = vrot.slane %v8487_v30, 4  ;;  %v8513_v34 = vrot.slane %v8511_v56, 4  ;;  %v8520_v15 = vshll.u32 %v9673_v17, 16  ;;  %v9675_v56 = vld [vmem:[%s10298_s12 + $0x84] sm:$0xf] }
 0x3d3   : > { %8816 = vst.msk [vmem:[%s12908_s21 + $0x50] sm:$0xff] %vm408_vm6, %v8784_v0  ;;  %v8785_v32 = vmax.f32 %v8753_v18, 0.0  ;;  %v8475_v50 = vsel %vm10348_vm5, %v8470_v21, %v13021_v20  ;;  %v8524_v8 = vshrl.u32 %v9673_v17, 16  ;;  %v8535_v17 = vshrl.u32 %v9675_v56, 16 }
 0x3d4   : > { %v8485_v47 = vsel %vm10348_vm5, %v8480_v59, %v8484_v63  ;;  %v8724_v44 = vunpack.c.l.bf16 %v8475_v50 }
 0x3d5   : > { %8817 = vst.msk [vmem:[%s12908_s21 + $0x58] sm:$0xff] %vm408_vm6, %v8785_v32  ;;  %v9910_v43 = vpop.f32.mrb[56].mxu1  ;;  %v8514_v32 = vshll.u32 %v9672_v27, 16  ;;  %v8725_v14 = vunpack.c.l.bf16 %v8485_v47  ;;  %v8522_v27 = vrot.slane %v8520_v15, 5  ;;  %v9676_v47 = vld [vmem:[%s10298_s12 + $0x88] sm:$0xf] }
 0x3d6   : > { %v9911_v53 = vpop.f32.mrb[57].mxu1 }
 0x3d7   : > { %v9912_v42 = vadd.f32 %v9911_v53, %v9910_v43  ;;  %v9913_v52 = vpop.f32.mrb[58].mxu1  ;;  %v8493_v53 = vor.u32 %v8492_v7, %v8489_v6  ;;  %v8516_v20 = vrot.slane %v8514_v32, 5 }
 0x3d8   : > { %v9914_v40 = vpop.f32.mrb[59].mxu1 }
 0x3d9   : > { %v8090_v41 = vadd.f32 %v9912_v42, %v12848_v55  ;;  %v9915_v25 = vadd.f32 %v9914_v40, %v9913_v52  ;;  %v8503_v52 = vor.u32 %v8502_v31, %v8498_v3 }
 0x3db   : > { %v8187_v10 = vmul.f32 %v12880_v57, %v8090_v41  ;;  %v8093_v39 = vadd.f32 %v9915_v25, %v12853_v38  ;;  %v8494_v25 = vrot.slane %v8493_v53, 4 }
 0x3dd   : > { %v8226_v58 = vadd.f32 %v12893_v48, %v8187_v10  ;;  %v8188_v55 = vmul.f32 %v12880_v57, %v8093_v39  ;;  %v9916_v12 = vpop.f32.mrb[60].mxu1  ;;  %v8517_v39 = vor.u32 %v8516_v20, %v8513_v34  ;;  %v8544_v34 = vshll.u32 %v9676_v47, 16 }
 0x3de   : > { %v9917_v18 = vpop.f32.mrb[61].mxu1 }
 0x3df   : > { %v8754_v0 = vadd.f32 %v8722_v11, %v8226_v58  ;;  %v8227_v38 = vadd.f32 %v12893_v48, %v8188_v55  ;;  %v9918_v51 = vadd.f32 %v9917_v18, %v9916_v12  ;;  %v9919_v45 = vpop.f32.mrb[62].mxu1  ;;  %v8504_v11 = vrot.slane %v8503_v52, 4  ;;  %v9674_v58 = vld [vmem:[%s10298_s12 + $0x80] sm:$0x1] }
 0x3e0   : > { %v9920_v4 = vpop.f32.mrb[63].mxu1  ;;  %v8499_v55 = vsel %vm10348_vm5, %v8494_v25, %v8498_v3  ;;  %v8530_v32 = vshll.u32 %v9674_v58, 16 }
 0x3e1   : > { %v8786_v13 = vmax.f32 %v8754_v0, 0.0  ;;  %v8755_v43 = vadd.f32 %v8723_v35, %v8227_v38  ;;  %v8098_v42 = vadd.f32 %v12846_v62, %v9918_v51  ;;  %v9921_v61 = vadd.f32 %v9920_v4, %v9919_v45 }
 0x3e2   : > { %v8526_v35 = vrot.slane %v8524_v8, 4  ;;  %v8509_v0 = vsel %vm10348_vm5, %v8504_v11, %v8508_v19  ;;  %v8518_v38 = vrot.slane %v8517_v39, 4  ;;  %v8726_v50 = vunpack.c.l.bf16 %v8499_v55 }
 0x3e3   : > { %8818 = vst.msk [vmem:[%s12908_s21 + $0x60] sm:$0xff] %vm408_vm6, %v8786_v13  ;;  %v8787_v40 = vmax.f32 %v8755_v43, 0.0  ;;  %v8189_v26 = vmul.f32 %v12880_v57, %v8098_v42  ;;  %v8101_v41 = vadd.f32 %v12851_v28, %v9921_v61  ;;  %v8538_v13 = vshll.u32 %v9675_v56, 16 }
 0x3e4   : > { %v8527_v18 = vor.u32 %v8526_v35, %v8522_v27  ;;  %v8727_v4 = vunpack.c.l.bf16 %v8509_v0  ;;  %v8523_v42 = vsel %vm10348_vm5, %v8518_v38, %v8522_v27  ;;  %v8532_v52 = vrot.slane %v8530_v32, 5 }
 0x3e5   : > { %8819 = vst.msk [vmem:[%s12908_s21 + $0x68] sm:$0xff] %vm408_vm6, %v8787_v40  ;;  %v8228_v62 = vadd.f32 %v12893_v48, %v8189_v26  ;;  %v8190_v30 = vmul.f32 %v12880_v57, %v8101_v41  ;;  %v9922_v23 = vpop.f32.mrb[64].mxu1  ;;  %v8548_v8 = vshrl.u32 %v9676_v47, 16  ;;  %v8540_v41 = vrot.slane %v8538_v13, 5 }
 0x3e6   : > { %v9923_v10 = vpop.f32.mrb[65].mxu1  ;;  %v8528_v61 = vrot.slane %v8527_v18, 4 }
 0x3e7   : > { %v8756_v21 = vadd.f32 %v8724_v44, %v8228_v62  ;;  %v8229_v28 = vadd.f32 %v12893_v48, %v8190_v30  ;;  %v9924_v59 = vadd.f32 %v9923_v10, %v9922_v23  ;;  %v9925_v63 = vpop.f32.mrb[66].mxu1  ;;  %v8537_v44 = vrot.slane %v8535_v17, 4 }
 0x3e8   : > { %v9926_v6 = vpop.f32.mrb[67].mxu1  ;;  %v8728_v23 = vunpack.c.l.bf16 %v8523_v42  ;;  %v8533_v19 = vsel %vm10348_vm5, %v8528_v61, %v8532_v52  ;;  %v8546_v10 = vrot.slane %v8544_v34, 5  ;;  %v8550_v35 = vrot.slane %v8548_v8, 4  ;;  %v9679_v61 = vld [vmem:[%s10298_s12 + $0x94] sm:$0xf] }
 0x3e9   : > { %v8788_v7 = vmax.f32 %v8756_v21, 0.0  ;;  %v8757_v12 = vadd.f32 %v8725_v14, %v8229_v28  ;;  %v8106_v33 = vadd.f32 %v9924_v59, %v12885_v2  ;;  %v9927_v31 = vadd.f32 %v9926_v6, %v9925_v63  ;;  %v9677_v21 = vld [vmem:[%s10298_s12 + $0x8c] sm:$0x1] }
 0x3ea   : > { %v8729_v59 = vunpack.c.l.bf16 %v8533_v19  ;;  %v8541_v63 = vor.u32 %v8540_v41, %v8537_v44  ;;  %v8551_v6 = vor.u32 %v8550_v35, %v8546_v10 }
 0x3eb   : > { %8820 = vst.msk [vmem:[%s12908_s21 + $0x70] sm:$0xff] %vm408_vm6, %v8788_v7  ;;  %v8789_v51 = vmax.f32 %v8757_v12, 0.0  ;;  %v8191_v3 = vmul.f32 %v12880_v57, %v8106_v33  ;;  %v8109_v45 = vadd.f32 %v9927_v31, %v12895_v36  ;;  %v8554_v7 = vshll.u32 %v9677_v21, 16 }
 0x3ec   : > { %v8552_v38 = vrot.slane %v8551_v6, 4 }
 0x3ed   : > { %8821 = vst.msk [vmem:[%s12908_s21 + $0x78] sm:$0xff] %vm408_vm6, %v8789_v51  ;;  %v8230_v2 = vadd.f32 %v12893_v48, %v8191_v3  ;;  %v8192_v43 = vmul.f32 %v12880_v57, %v8109_v45  ;;  %v9928_v53 = vpop.f32.mrb[68].mxu1  ;;  %v8556_v18 = vrot.slane %v8554_v7, 5  ;;  %v9682_v7 = vld [vmem:[%s10298_s12 + $0xa0] sm:$0xf] }
 0x3ee   : > { %v9929_v37 = vpop.f32.mrb[69].mxu1 }
 0x3ef   : > { %v8758_v36 = vadd.f32 %v8726_v50, %v8230_v2  ;;  %v8231_v40 = vadd.f32 %v12893_v48, %v8192_v43  ;;  %v9930_v20 = vadd.f32 %v9929_v37, %v9928_v53  ;;  %v9931_v15 = vpop.f32.mrb[70].mxu1  ;;  %v8557_v17 = vsel %vm10348_vm5, %v8552_v38, %v8556_v18 }
 0x3f0   : > { %v9932_v26 = vpop.f32.mrb[71].mxu1  ;;  %v8731_v42 = vunpack.c.l.bf16 %v8557_v17  ;;  %v8592_v38 = vshll.u32 %v9682_v7, 16  ;;  %v8596_v18 = vshrl.u32 %v9682_v7, 16 }
 0x3f1   : > { %v8790_v25 = vmax.f32 %v8758_v36, 0.0  ;;  %v8759_v62 = vadd.f32 %v8727_v4, %v8231_v40  ;;  %v8114_v30 = vadd.f32 %v12875_v54, %v9930_v20  ;;  %v9933_v14 = vadd.f32 %v9932_v26, %v9931_v15  ;;  %v9678_v4 = vld [vmem:[%s10298_s12 + $0x90] sm:$0xf] }
 0x3f2   : > { %v8562_v52 = vshll.u32 %v9678_v4, 16  ;;  %v8568_v40 = vshll.u32 %v9679_v61, 16  ;;  %v8572_v20 = vshrl.u32 %v9679_v61, 16  ;;  %v8598_v17 = vrot.slane %v8596_v18, 4 }
 0x3f3   : > { %8822 = vst.msk [vmem:[%s12908_s21 + $0x80] sm:$0xff] %vm408_vm6, %v8790_v25  ;;  %v8791_v11 = vmax.f32 %v8759_v62, 0.0  ;;  %v8193_v39 = vmul.f32 %v12880_v57, %v8114_v30  ;;  %v8117_v27 = vadd.f32 %v12888_v5, %v9933_v14  ;;  %v8542_v5 = vrot.slane %v8541_v63, 4  ;;  %v9680_v62 = vld [vmem:[%s10298_s12 + $0x98] sm:$0x1] }
 0x3f4   : > { %v8564_v26 = vrot.slane %v8562_v52, 5  ;;  %v8570_v41 = vrot.slane %v8568_v40, 5  ;;  %v8574_v25 = vrot.slane %v8572_v20, 4 }
 0x3f5   : > { %8823 = vst.msk [vmem:[%s12908_s21 + $0x88] sm:$0xff] %vm408_vm6, %v8791_v11  ;;  %v8232_v54 = vadd.f32 %v12893_v48, %v8193_v39  ;;  %v8194_v28 = vmul.f32 %v12880_v57, %v8117_v27  ;;  %v8547_v3 = vsel %vm10348_vm5, %v8542_v5, %v8546_v10 }
 0x3f6   : > { %v8730_v2 = vunpack.c.l.bf16 %v8547_v3  ;;  %v8575_v14 = vor.u32 %v8574_v25, %v8570_v41 }
 0x3f7   : > { %v8760_v58 = vadd.f32 %v8728_v23, %v8232_v54  ;;  %v8233_v55 = vadd.f32 %v12893_v48, %v8194_v28  ;;  %v8578_v23 = vshll.u32 %v9680_v62, 16  ;;  %v9685_v62 = vld [vmem:[%s10298_s12 + $0xac] sm:$0xf] }
 0x3f8   : > { %v8576_v11 = vrot.slane %v8575_v14, 4 }
 0x3f9   : > { %v8792_v12 = vmax.f32 %v8760_v58, 0.0  ;;  %v8761_v33 = vadd.f32 %v8729_v59, %v8233_v55  ;;  %v8580_v39 = vrot.slane %v8578_v23, 5  ;;  %v9681_v59 = vld [vmem:[%s10298_s12 + $0x9c] sm:$0xf] }
 0x3fa   : > { %v9934_v31 = vpop.f32.mrb[72].mxu1  ;;  %v8583_v5 = vshrl.u32 %v9681_v59, 16 }
 0x3fb   : > { %8824 = vst.msk [vmem:[%s12908_s21 + $0x90] sm:$0xff] %vm408_vm6, %v8792_v12  ;;  %v8793_v56 = vmax.f32 %v8761_v33, 0.0  ;;  %v9935_v0 = vpop.f32.mrb[73].mxu1  ;;  %v8581_v55 = vsel %vm10348_vm5, %v8576_v11, %v8580_v39  ;;  %v8620_v11 = vshrl.u32 %v9685_v62, 16 }
 0x3fc   : > { %v9936_v32 = vadd.f32 %v9935_v0, %v9934_v31  ;;  %v9937_v51 = vpop.f32.mrb[74].mxu1  ;;  %v8586_v31 = vshll.u32 %v9681_v59, 16  ;;  %v8585_v3 = vrot.slane %v8583_v5, 4 }
 0x3fd   : > { %8825 = vst.msk [vmem:[%s12908_s21 + $0x98] sm:$0xff] %vm408_vm6, %v8793_v56  ;;  %v9938_v50 = vpop.f32.mrb[75].mxu1  ;;  %v8733_v56 = vunpack.c.l.bf16 %v8581_v55  ;;  %v8622_v59 = vrot.slane %v8620_v11, 4 }
 0x3fe   : > { %v8122_v45 = vadd.f32 %v9936_v32, %v12949_v46  ;;  %v9939_v47 = vadd.f32 %v9938_v50, %v9937_v51  ;;  %v8559_v46 = vshrl.u32 %v9678_v4, 16  ;;  %v8588_v50 = vrot.slane %v8586_v31, 5 }
 0x400   : > { %v8195_v13 = vmul.f32 %v12880_v57, %v8122_v45  ;;  %v8125_v43 = vadd.f32 %v9939_v47, %v12955_v60  ;;  %v8561_v60 = vrot.slane %v8559_v46, 4 }
 0x402   : > { %v8234_v53 = vadd.f32 %v12893_v48, %v8195_v13  ;;  %v8196_v37 = vmul.f32 %v12880_v57, %v8125_v43  ;;  %v8565_v30 = vor.u32 %v8564_v26, %v8561_v60  ;;  %v9683_v13 = vld [vmem:[%s10298_s12 + $0xa4] sm:$0x1]  ;;  %v8589_v43 = vor.u32 %v8588_v50, %v8585_v3  ;;  %v9684_v60 = vld [vmem:[%s10298_s12 + $0xa8] sm:$0xf] }
 0x403   : > { %v8610_v14 = vshll.u32 %v9684_v60, 16 }
 0x404   : > { %v8762_v34 = vadd.f32 %v8730_v2, %v8234_v53  ;;  %v8235_v36 = vadd.f32 %v12893_v48, %v8196_v37  ;;  %v8566_v19 = vrot.slane %v8565_v30, 4  ;;  %v8602_v53 = vshll.u32 %v9683_v13, 16 }
 0x405   : > { %v8590_v37 = vrot.slane %v8589_v43, 4  ;;  %v8607_v30 = vshrl.u32 %v9684_v60, 16  ;;  %v9691_v43 = vld [vmem:[%s10298_s12 + $0xc4] sm:$0xf] }
 0x406   : > { %v8794_v15 = vmax.f32 %v8762_v34, 0.0  ;;  %v8763_v8 = vadd.f32 %v8731_v42, %v8235_v36  ;;  %v8571_v21 = vsel %vm10348_vm5, %v8566_v19, %v8570_v41  ;;  %v8604_v52 = vrot.slane %v8602_v53, 5 }
 0x407   : > { %v8732_v6 = vunpack.c.l.bf16 %v8571_v21  ;;  %v8668_v60 = vshrl.u32 %v9691_v43, 16 }
 0x408   : > { %8826 = vst.msk [vmem:[%s12908_s21 + $0xa0] sm:$0xff] %vm408_vm6, %v8794_v15  ;;  %v8795_v44 = vmax.f32 %v8763_v8, 0.0 }
 0x40a   : > { %8827 = vst.msk [vmem:[%s12908_s21 + $0xa8] sm:$0xff] %vm408_vm6, %v8795_v44 }
 0x412   : > { %v9940_v10 = vpop.f32.mrb[76].mxu1 }
 0x413   : > { %v9941_v27 = vpop.f32.mrb[77].mxu1 }
 0x414   : > { %v9942_v35 = vadd.f32 %v9941_v27, %v9940_v10  ;;  %v9943_v54 = vpop.f32.mrb[78].mxu1  ;;  %v8609_v27 = vrot.slane %v8607_v30, 4 }
 0x415   : > { %v9944_v28 = vpop.f32.mrb[79].mxu1 }
 0x416   : > { %v8130_v63 = vadd.f32 %v12946_v24, %v9942_v35  ;;  %v9945_v58 = vadd.f32 %v9944_v28, %v9943_v54  ;;  %v8612_v35 = vrot.slane %v8610_v14, 5 }
 0x418   : > { %v8197_v12 = vmul.f32 %v12880_v57, %v8130_v63  ;;  %v8133_v33 = vadd.f32 %v12952_v49, %v9945_v58  ;;  %v8594_v49 = vrot.slane %v8592_v38, 5  ;;  %v9686_v58 = vld [vmem:[%s10298_s12 + $0xb0] sm:$0x1]  ;;  %v8613_v55 = vor.u32 %v8612_v35, %v8609_v27 }
 0x419   : > { %v8626_v7 = vshll.u32 %v9686_v58, 16 }
 0x41a   : > { %v8236_v0 = vadd.f32 %v12893_v48, %v8197_v12  ;;  %v8198_v24 = vmul.f32 %v12880_v57, %v8133_v33  ;;  %v8599_v4 = vor.u32 %v8598_v17, %v8594_v49  ;;  %v8595_v40 = vsel %vm10348_vm5, %v8590_v37, %v8594_v49  ;;  %v9690_v49 = vld [vmem:[%s10298_s12 + $0xc0] sm:$0xf] }
 0x41b   : > { %v8734_v41 = vunpack.c.l.bf16 %v8595_v40  ;;  %v8614_v12 = vrot.slane %v8613_v55, 4 }
 0x41c   : > { %v8764_v32 = vadd.f32 %v8732_v6, %v8236_v0  ;;  %v8237_v51 = vadd.f32 %v12893_v48, %v8198_v24  ;;  %v8600_v46 = vrot.slane %v8599_v4, 4  ;;  %v9687_v4 = vld [vmem:[%s10298_s12 + $0xb4] sm:$0xf] }
 0x41e   : > { %v8796_v45 = vmax.f32 %v8764_v32, 0.0  ;;  %v8765_v47 = vadd.f32 %v8733_v56, %v8237_v51  ;;  %v8605_v26 = vsel %vm10348_vm5, %v8600_v46, %v8604_v52  ;;  %v8628_v56 = vrot.slane %v8626_v7, 5  ;;  %v9688_v46 = vld [vmem:[%s10298_s12 + $0xb8] sm:$0xf] }
 0x41f   : > { %v8735_v10 = vunpack.c.l.bf16 %v8605_v26 }
 0x420   : > { %8828 = vst.msk [vmem:[%s12908_s21 + $0xb0] sm:$0xff] %vm408_vm6, %v8796_v45  ;;  %v8797_v2 = vmax.f32 %v8765_v47, 0.0 }
 0x422   : > { %8829 = vst.msk [vmem:[%s12908_s21 + $0xb8] sm:$0xff] %vm408_vm6, %v8797_v2 }
 0x424   : > { %v9946_v42 = vpop.f32.mrb[80].mxu1 }
 0x425   : > { %v9947_v61 = vpop.f32.mrb[81].mxu1 }
 0x426   : > { %v9948_v34 = vadd.f32 %v9947_v61, %v9946_v42  ;;  %v9949_v36 = vpop.f32.mrb[82].mxu1  ;;  %v8655_v42 = vshrl.u32 %v9690_v49, 16  ;;  %v8658_v61 = vshll.u32 %v9690_v49, 16 }
 0x427   : > { %v9950_v20 = vpop.f32.mrb[83].mxu1 }
 0x428   : > { %v8138_v15 = vadd.f32 %v9948_v34, %v12987_v22  ;;  %v9951_v8 = vadd.f32 %v9950_v20, %v9949_v36  ;;  %v13140_v22 = vld [vmem:[%s13206_s5] ss:$0 sm:$0xff]  ;;  %v8664_v34 = vshll.u32 %v9691_v43, 16  ;;  %v8631_v36 = vshrl.u32 %v9687_v4, 16 }
 0x429   : > { %v8657_v30 = vrot.slane %v8655_v42, 4  ;;  %v8660_v14 = vrot.slane %v8658_v61, 5 }
 0x42a   : > { %v8199_v44 = vmul.f32 %v12880_v57, %v8138_v15  ;;  %v8141_v25 = vadd.f32 %v9951_v8, %v12994_v1  ;;  %v8616_v57 = vshll.u32 %v9685_v62, 16  ;;  %v13146_v1 = vld [vmem:[%s13207_s6] ss:$0 sm:$0xff] }
 0x42b   : > { %v8661_v35 = vor.u32 %v8660_v14, %v8657_v30 }
 0x42c   : > { %v8238_v23 = vadd.f32 %v12893_v48, %v8199_v44  ;;  %v8200_v19 = vmul.f32 %v13140_v22, %v8141_v25  ;;  %v8618_v28 = vrot.slane %v8616_v57, 5  ;;  %v8640_v44 = vshll.u32 %v9688_v46, 16 }
 0x42d   : > { %v8670_v57 = vrot.slane %v8668_v60, 4 }
 0x42e   : > { %v8766_v39 = vadd.f32 %v8734_v41, %v8238_v23  ;;  %v8239_v48 = vadd.f32 %v13146_v1, %v8200_v19  ;;  %v8623_v6 = vor.u32 %v8622_v59, %v8618_v28  ;;  %v8619_v38 = vsel %vm10348_vm5, %v8614_v12, %v8618_v28 }
 0x42f   : > { %v8736_v45 = vunpack.c.l.bf16 %v8619_v38  ;;  %v8644_v41 = vshrl.u32 %v9688_v46, 16  ;;  %v8633_v23 = vrot.slane %v8631_v36, 4  ;;  %v8642_v11 = vrot.slane %v8640_v44, 5 }
 0x430   : > { %v8798_v21 = vmax.f32 %v8766_v39, 0.0  ;;  %v8767_v54 = vadd.f32 %v8735_v10, %v8239_v48  ;;  %v8624_v31 = vrot.slane %v8623_v6, 4  ;;  %v8666_v10 = vrot.slane %v8664_v34, 5  ;;  %v9692_v39 = vld [vmem:[%s10298_s12 + $0xc8] sm:$0x1] }
 0x431   : > { %v8646_v48 = vrot.slane %v8644_v41, 4  ;;  %v8674_v55 = vshll.u32 %v9692_v39, 16 }
 0x432   : > { %8830 = vst.msk [vmem:[%s12908_s21 + $0xc0] sm:$0xff] %vm408_vm6, %v8798_v21  ;;  %v8799_v63 = vmax.f32 %v8767_v54, 0.0  ;;  %v8629_v3 = vsel %vm10348_vm5, %v8624_v31, %v8628_v56  ;;  %v9689_v21 = vld [vmem:[%s10298_s12 + $0xbc] sm:$0x1]  ;;  %v8671_v58 = vor.u32 %v8670_v57, %v8666_v10 }
 0x433   : > { %v8737_v2 = vunpack.c.l.bf16 %v8629_v3  ;;  %v8647_v7 = vor.u32 %v8646_v48, %v8642_v11  ;;  %v8650_v12 = vshll.u32 %v9689_v21, 16 }
 0x434   : > { %8831 = vst.msk [vmem:[%s12908_s21 + $0xc8] sm:$0xff] %vm408_vm6, %v8799_v63  ;;  %v8672_v56 = vrot.slane %v8671_v58, 4 }
 0x435   : > { %v8652_v38 = vrot.slane %v8650_v12, 5 }
 0x438   : > { %v9952_v33 = vpop.f32.mrb[84].mxu1 }
 0x439   : > { %v9953_v5 = vpop.f32.mrb[85].mxu1 }
 0x43a   : > { %v9954_v0 = vadd.f32 %v9953_v5, %v9952_v33  ;;  %v9955_v24 = vpop.f32.mrb[86].mxu1  ;;  %v8662_v5 = vrot.slane %v8661_v35, 4 }
 0x43b   : > { %v9956_v18 = vpop.f32.mrb[87].mxu1 }
 0x43c   : > { %v8146_v32 = vadd.f32 %v12983_v29, %v9954_v0  ;;  %v9957_v51 = vadd.f32 %v9956_v18, %v9955_v24  ;;  %v8676_v0 = vrot.slane %v8674_v55, 5  ;;  %v8648_v24 = vrot.slane %v8647_v7, 4 }
 0x43e   : > { %v8201_v50 = vmul.f32 %v13140_v22, %v8146_v32  ;;  %v8149_v47 = vadd.f32 %v12992_v16, %v9957_v51  ;;  %v8634_v16 = vshll.u32 %v9687_v4, 16  ;;  %v8667_v32 = vsel %vm10348_vm5, %v8662_v5, %v8666_v10 }
 0x43f   : > { %v8677_v49 = vsel %vm10348_vm5, %v8672_v56, %v8676_v0  ;;  %v8653_v4 = vsel %vm10348_vm5, %v8648_v24, %v8652_v38 }
 0x440   : > { %v8240_v17 = vadd.f32 %v13146_v1, %v8201_v50  ;;  %v8202_v13 = vmul.f32 %v13140_v22, %v8149_v47  ;;  %v8636_v19 = vrot.slane %v8634_v16, 5  ;;  %v8741_v46 = vunpack.c.l.bf16 %v8677_v49 }
 0x441   : > { %v8739_v36 = vunpack.c.l.bf16 %v8653_v4 }
 0x442   : > { %v8768_v53 = vadd.f32 %v8736_v45, %v8240_v17  ;;  %v8241_v29 = vadd.f32 %v13146_v1, %v8202_v13  ;;  %v9958_v37 = vpop.f32.mrb[88].mxu1  ;;  %v8637_v28 = vor.u32 %v8636_v19, %v8633_v23  ;;  %v8740_v13 = vunpack.c.l.bf16 %v8667_v32 }
 0x443   : > { %v9959_v52 = vpop.f32.mrb[89].mxu1 }
 0x444   : > { %v8800_v40 = vmax.f32 %v8768_v53, 0.0  ;;  %v8769_v20 = vadd.f32 %v8737_v2, %v8241_v29  ;;  %v9960_v15 = vadd.f32 %v9959_v52, %v9958_v37  ;;  %v9961_v8 = vpop.f32.mrb[90].mxu1  ;;  %v8638_v31 = vrot.slane %v8637_v28, 4 }
 0x445   : > { %v9962_v26 = vpop.f32.mrb[91].mxu1 }
 0x446   : > { %8832 = vst.msk [vmem:[%s12908_s21 + $0xd0] sm:$0xff] %vm408_vm6, %v8800_v40  ;;  %v8801_v25 = vmax.f32 %v8769_v20, 0.0  ;;  %v9963_v62 = vadd.f32 %v9962_v26, %v9961_v8  ;;  %v8643_v50 = vsel %vm10348_vm5, %v8638_v31, %v8642_v11 }
 0x447   : > { %v8738_v29 = vunpack.c.l.bf16 %v8643_v50 }
 0x448   : > { %8833 = vst.msk [vmem:[%s12908_s21 + $0xd8] sm:$0xff] %vm408_vm6, %v8801_v25 }
 0x44a   : > { %v9964_v27 = vpop.f32.mrb[92].mxu1 }
 0x44b   : > { %v9965_v54 = vpop.f32.mrb[93].mxu1 }
 0x44c   : > { %v9966_v59 = vadd.f32 %v9965_v54, %v9964_v27  ;;  %v9967_v63 = vpop.f32.mrb[94].mxu1 }
 0x44d   : > { %v9968_v6 = vpop.f32.mrb[95].mxu1 }
 0x44e   : > { %v9969_v33 = vadd.f32 %v9968_v6, %v9967_v63 }
 0x452   : > { %v10058_v18 = vpop.f32.mrb[96].mxu1 }
 0x453   : > { %v8162_v51 = vadd.f32 %v10058_v18, %v9966_v59  ;;  %v8153_v3 = vpop.f32.mrb[97].mxu1 }
 0x454   : > { %v8154_v45 = vadd.f32 %v9960_v15, %v8153_v3  ;;  %v10059_v47 = vpop.f32.mrb[98].mxu1 }
 0x455   : > { %v8205_v17 = vmul.f32 %v13140_v22, %v8162_v51  ;;  %v8165_v2 = vadd.f32 %v10059_v47, %v9969_v33  ;;  %v8156_v43 = vpop.f32.mrb[99].mxu1 }
 0x456   : > { %v8203_v53 = vmul.f32 %v13140_v22, %v8154_v45  ;;  %v8157_v37 = vadd.f32 %v9963_v62, %v8156_v43 }
 0x457   : > { %v8244_v42 = vadd.f32 %v13146_v1, %v8205_v17  ;;  %v8206_v61 = vmul.f32 %v13140_v22, %v8165_v2 }
 0x458   : > { %v8242_v52 = vadd.f32 %v13146_v1, %v8203_v53  ;;  %v8204_v34 = vmul.f32 %v13140_v22, %v8157_v37 }
 0x459   : > { %v8772_v9 = vadd.f32 %v8740_v13, %v8244_v42  ;;  %v8245_v16 = vadd.f32 %v13146_v1, %v8206_v61 }
 0x45a   : > { %v8770_v40 = vadd.f32 %v8738_v29, %v8242_v52  ;;  %v8243_v20 = vadd.f32 %v13146_v1, %v8204_v34 }
 0x45b   : > { %v8804_v15 = vmax.f32 %v8772_v9, 0.0  ;;  %v8773_v8 = vadd.f32 %v8741_v46, %v8245_v16 }
 0x45c   : > { %v8802_v60 = vmax.f32 %v8770_v40, 0.0  ;;  %v8771_v26 = vadd.f32 %v8739_v36, %v8243_v20 }
 0x45d   : > { %8836 = vst.msk [vmem:[%s12908_s21 + $0xf0] sm:$0xff] %vm408_vm6, %v8804_v15  ;;  %v8805_v44 = vmax.f32 %v8773_v8, 0.0 }
 0x45e   : > { %8834 = vst.msk [vmem:[%s12908_s21 + $0xe0] sm:$0xff] %vm408_vm6, %v8802_v60  ;;  %v8803_v41 = vmax.f32 %v8771_v26, 0.0 }
 0x45f   : > { %8837 = vst.msk [vmem:[%s12908_s21 + $0xf8] sm:$0xff] %vm408_vm6, %v8805_v44 }
 0x460   : > { %8835 = vst.msk [vmem:[%s12908_s21 + $0xe8] sm:$0xff] %vm408_vm6, %v8803_v41 }
 0x461 PF: > { %s17_s24 = sadd.s32 1, %s10225_s24  }
 0x462   : > { %p14_p4 = scmp.ge.s32.totalorder %s17_s24, 4  }
 0x464   :  { %16 = sbr.rel (!%p14_p4) target bundleno = 1 (0x1), region = 82 }

</bundles_post_ra>
